<compile_context>
chip_gen: v6e
topology: v6e:2x2x1
jax: 0.10.0
libtpu: 0.0.40
codegen_flags: <defaults>
</compile_context>

<pallas_src>
import functools

import jax
import jax.numpy as jnp
from jax.experimental import pallas as pl
from jax.experimental.pallas import tpu as pltpu

# LSSIZE is an undefined global in the original snippet; pick a small latent size.
LSSIZE = 10

_VMEM = pl.BlockSpec(memory_space=pltpu.MemorySpace.VMEM)


# --------------------------------------------------------------------------
# Kernels
# --------------------------------------------------------------------------
def _matmul_bias_act_kernel(x_ref, w_ref, b_ref, o_ref, *, activation):
    """y = act(x @ w + b); whole layer resident in VMEM, f32 accumulation."""
    y = jnp.dot(x_ref[...], w_ref[...], preferred_element_type=jnp.float32)
    y = y + b_ref[...]
    if activation == "relu":
        y = jnp.maximum(y, 0.0)
    o_ref[...] = y.astype(o_ref.dtype)


def _conv_pool_relu_kernel(p00_ref, p01_ref, p10_ref, p11_ref, w_ref, b_ref, o_ref):
    """Fused Conv2d(3x3,pad=1) -> MaxPool2d(2,2) -> ReLU.

    The four inputs are the im2col patch matrices of the four pooling-window
    sub-grids; max(conv(x)) over the window == max of the four matmul results
    (bias is constant over the window so it can be added after the max).
    """
    w = w_ref[...]
    y00 = jnp.dot(p00_ref[...], w, preferred_element_type=jnp.float32)
    y01 = jnp.dot(p01_ref[...], w, preferred_element_type=jnp.float32)
    y10 = jnp.dot(p10_ref[...], w, preferred_element_type=jnp.float32)
    y11 = jnp.dot(p11_ref[...], w, preferred_element_type=jnp.float32)
    y = jnp.maximum(jnp.maximum(y00, y01), jnp.maximum(y10, y11)) + b_ref[...]
    o_ref[...] = jnp.maximum(y, 0.0).astype(o_ref.dtype)


def _latent_kernel(x_ref, w1_ref, b1_ref, w2_ref, b2_ref, ls_ref, y_ref):
    """Fused fcn1 -> Softmax(dim=1) -> fcn2 (both tiny; weights stay in VMEM)."""
    h = jnp.dot(x_ref[...], w1_ref[...], preferred_element_type=jnp.float32)
    h = h + b1_ref[...]
    h = h - jnp.max(h, axis=-1, keepdims=True)
    e = jnp.exp(h)
    ls = e / jnp.sum(e, axis=-1, keepdims=True)
    ls_ref[...] = ls.astype(ls_ref.dtype)
    y = jnp.dot(ls, w2_ref[...], preferred_element_type=jnp.float32) + b2_ref[...]
    y_ref[...] = y.astype(y_ref.dtype)


# --------------------------------------------------------------------------
# Pallas wrappers
# --------------------------------------------------------------------------
def _pallas_matmul(x, w, b, activation="none"):
    """act(x @ w + b); x:(M,K), w:(K,N), b:(N,) — single whole-array block."""
    M, K = x.shape
    Kw, N = w.shape
    assert K == Kw
    kernel = functools.partial(_matmul_bias_act_kernel, activation=activation)
    return pl.pallas_call(
        kernel,
        out_shape=jax.ShapeDtypeStruct((M, N), jnp.float32),
        in_specs=[_VMEM] * 3,
        out_specs=_VMEM,
    )(x, w, b.reshape(1, N))


def _im2col_3x3(x_nhwc):
    """3x3 / pad=1 patches, column order (kh, kw, cin) -> (B, H, W, 9*C)."""
    B, H, W, C = x_nhwc.shape
    xp = jnp.pad(x_nhwc, ((0, 0), (1, 1), (1, 1), (0, 0)))
    cols = [xp[:, kh:kh + H, kw:kw + W, :] for kh in range(3) for kw in range(3)]
    return jnp.concatenate(cols, axis=-1)


def conv3x3(x_nhwc, w_mat, b, activation):
    """Conv2d(k=3,s=1,p=1) (+optional ReLU) as one fused matmul kernel."""
    B, H, W, C = x_nhwc.shape
    N = w_mat.shape[1]
    patches = _im2col_3x3(x_nhwc).reshape(B * H * W, 9 * C)
    y = _pallas_matmul(patches, w_mat, b, activation)
    return y.reshape(B, H, W, N)


def conv3x3_pool_relu(x_nhwc, w_mat, b):
    """Conv2d(3x3,pad=1) -> MaxPool2d(2,2) -> ReLU, fused into one kernel."""
    B, H, W, C = x_nhwc.shape
    N = w_mat.shape[1]
    Ho, Wo = H // 2, W // 2
    patches = _im2col_3x3(x_nhwc)  # (B, H, W, 9C)
    ps = [
        patches[:, di::2, dj::2, :].reshape(B * Ho * Wo, 9 * C)
        for di in range(2)
        for dj in range(2)
    ]
    out = pl.pallas_call(
        _conv_pool_relu_kernel,
        out_shape=jax.ShapeDtypeStruct((B * Ho * Wo, N), jnp.float32),
        in_specs=[_VMEM] * 6,
        out_specs=_VMEM,
    )(*ps, w_mat, b.reshape(1, N))
    return out.reshape(B, Ho, Wo, N)


def conv_transpose2x2(x_nhwc, w_mat, b4, activation):
    """ConvTranspose2d(k=2,s=2) (+optional ReLU): one matmul + spatial unfold.

    w_mat:(C_in, C_out*4) with columns ordered (cout, dh, dw);
    b4:(C_out*4,) is the bias repeated 4x (once per (dh, dw)).
    """
    B, H, W, C = x_nhwc.shape
    C_out = w_mat.shape[1] // 4
    y = _pallas_matmul(x_nhwc.reshape(B * H * W, C), w_mat, b4, activation)
    y = y.reshape(B, H, W, C_out, 2, 2).transpose(0, 1, 4, 2, 5, 3)
    return y.reshape(B, 2 * H, 2 * W, C_out)


def latent_block(h, w1, b1, w2, b2):
    """Fused fcn1 -> Softmax -> fcn2; returns (ls, fcn2_out)."""
    M = h.shape[0]
    ls, y = pl.pallas_call(
        _latent_kernel,
        out_shape=(
            jax.ShapeDtypeStruct((M, w1.shape[1]), jnp.float32),
            jax.ShapeDtypeStruct((M, w2.shape[1]), jnp.float32),
        ),
        in_specs=[_VMEM] * 5,
        out_specs=(_VMEM, _VMEM),
    )(h, w1, b1.reshape(1, -1), w2, b2.reshape(1, -1))
    return ls, y


# --------------------------------------------------------------------------
# Parameters (deterministic, torch-like uniform(-1/sqrt(fan_in), 1/sqrt(fan_in)),
# stored directly in matmul (K, N) layout).
# --------------------------------------------------------------------------
def _init_dense(key, fan_in, w_shape, b_shape):
    kw, kb = jax.random.split(key)
    bound = 1.0 / (float(fan_in) ** 0.5)
    w = jax.random.uniform(kw, w_shape, jnp.float32, -bound, bound)
    b = jax.random.uniform(kb, b_shape, jnp.float32, -bound, bound)
    return w, b


def init_params(key):
    ks = jax.random.split(key, 8)
    p = {}
    # encodeBlock(1, 20)   (its BatchNorm2d is declared but never used in forward)
    p["enc_conv1_w"], p["enc_conv1_b"] = _init_dense(ks[0], 1 * 9, (9, 20), (20,))
    p["enc_conv2_w"], p["enc_conv2_b"] = _init_dense(ks[1], 20 * 9, (180, 20), (20,))
    # fcn1 / fcn2
    p["fcn1_w"], p["fcn1_b"] = _init_dense(ks[2], 49, (49, LSSIZE), (LSSIZE,))
    p["fcn2_w"], p["fcn2_b"] = _init_dense(ks[3], LSSIZE, (LSSIZE, 49), (49,))
    # decodeBlock(20, 1, last=True)
    w, b = _init_dense(ks[4], 20 * 4, (20, 20 * 4), (20,))
    p["dec_ct1_w"], p["dec_ct1_b"] = w, jnp.repeat(b, 4)
    p["dec_conv1_w"], p["dec_conv1_b"] = _init_dense(ks[5], 20 * 9, (180, 1), (1,))
    w, b = _init_dense(ks[6], 1 * 4, (1, 1 * 4), (1,))
    p["dec_ct2_w"], p["dec_ct2_b"] = w, jnp.repeat(b, 4)
    p["dec_conv2_w"], p["dec_conv2_b"] = _init_dense(ks[7], 1 * 9, (9, 1), (1,))
    return p


# --------------------------------------------------------------------------
# Forward pass (mirrors autoencoder_minist.forward; returns (ls, recon))
# --------------------------------------------------------------------------
def autoencoder_minist_forward(params, x_nchw):
    B = x_nchw.shape[0]
    x = jnp.transpose(x_nchw, (0, 2, 3, 1))  # NCHW -> NHWC

    # --- encodeBlock(1, 20): conv1 -> pool1 -> relu -> conv2 -> pool2 -> relu
    x = conv3x3_pool_relu(x, params["enc_conv1_w"], params["enc_conv1_b"])  # (B,14,14,20)
    x = conv3x3_pool_relu(x, params["enc_conv2_w"], params["enc_conv2_b"])  # (B, 7, 7,20)

    # --- x.view(-1, 7*7) on the NCHW tensor -> (B*20, 49)
    h = jnp.transpose(x, (0, 3, 1, 2)).reshape(B * 20, 49)

    # --- fcn1 -> Softmax(dim=1) -> fcn2 (fused)
    ls, h = latent_block(h, params["fcn1_w"], params["fcn1_b"],
                         params["fcn2_w"], params["fcn2_b"])

    # --- x.view(-1, 20, 7, 7) -> NHWC
    x = h.reshape(B, 20, 7, 7).transpose(0, 2, 3, 1)  # (B,7,7,20)

    # --- decodeBlock(20, 1, last=True)
    x = conv_transpose2x2(x, params["dec_ct1_w"], params["dec_ct1_b"], "relu")  # (B,14,14,20)
    x = conv3x3(x, params["dec_conv1_w"], params["dec_conv1_b"], "relu")        # (B,14,14, 1)
    x = conv_transpose2x2(x, params["dec_ct2_w"], params["dec_ct2_b"], "relu")  # (B,28,28, 1)
    x = conv3x3(x, params["dec_conv2_w"], params["dec_conv2_b"], "none")        # (B,28,28, 1)

    x = jnp.transpose(x, (0, 3, 1, 2))  # NHWC -> NCHW (B,1,28,28)
    return ls, x


if __name__ == "__main__":
    key = jax.random.PRNGKey(0)
    key, kx = jax.random.split(key)
    B = 2
    x = jax.random.normal(kx, (B, 1, 28, 28), jnp.float32)  # MNIST-shaped input

    params = init_params(key)
    fwd = jax.jit(autoencoder_minist_forward)
    ls, recon = fwd(params, x)
    jax.block_until_ready(ls)
    jax.block_until_ready(recon)

    assert ls.shape == (B * 20, LSSIZE)
    assert recon.shape == (B, 1, 28, 28)
    assert bool(jnp.allclose(jnp.sum(ls, axis=-1), 1.0, atol=1e-4))
    print("KERNEL_OK")
</pallas_src>

<mosaic_0001>
module attributes {stable_mosaic.version = 11 : i64} {
  func.func @_conv_pool_relu_kernel(%arg0: memref<392x9xf32, #tpu.memory_space<vmem>>, %arg1: memref<392x9xf32, #tpu.memory_space<vmem>>, %arg2: memref<392x9xf32, #tpu.memory_space<vmem>>, %arg3: memref<392x9xf32, #tpu.memory_space<vmem>>, %arg4: memref<9x20xf32, #tpu.memory_space<vmem>>, %arg5: memref<1x20xf32, #tpu.memory_space<vmem>>, %arg6: memref<392x20xf32, #tpu.memory_space<vmem>>) attributes {dimension_semantics = [], scalar_prefetch = 0 : i64, scratch_operands = 0 : i64, tpu.core_type = #tpu.core_type<tc>} {
    %c0 = arith.constant 0 : index
    %c0_0 = arith.constant 0 : index
    %0 = vector.load %arg4[%c0, %c0_0] : memref<9x20xf32, #tpu.memory_space<vmem>>, vector<9x20xf32>
    %c0_1 = arith.constant 0 : index
    %c0_2 = arith.constant 0 : index
    %1 = vector.load %arg0[%c0_1, %c0_2] : memref<392x9xf32, #tpu.memory_space<vmem>>, vector<392x9xf32>
    %cst = arith.constant dense<0.000000e+00> : vector<392x20xf32>
    %2 = tpu.matmul %1, %0, %cst {dimension_numbers = #tpu.dot_dimension_numbers<[1], [0], [0], [1], [0, 0, 1, 1], [], []>} : vector<392x9xf32>, vector<9x20xf32>, vector<392x20xf32> -> vector<392x20xf32>
    %c0_3 = arith.constant 0 : index
    %c0_4 = arith.constant 0 : index
    %3 = vector.load %arg1[%c0_3, %c0_4] : memref<392x9xf32, #tpu.memory_space<vmem>>, vector<392x9xf32>
    %cst_5 = arith.constant dense<0.000000e+00> : vector<392x20xf32>
    %4 = tpu.matmul %3, %0, %cst_5 {dimension_numbers = #tpu.dot_dimension_numbers<[1], [0], [0], [1], [0, 0, 1, 1], [], []>} : vector<392x9xf32>, vector<9x20xf32>, vector<392x20xf32> -> vector<392x20xf32>
    %c0_6 = arith.constant 0 : index
    %c0_7 = arith.constant 0 : index
    %5 = vector.load %arg2[%c0_6, %c0_7] : memref<392x9xf32, #tpu.memory_space<vmem>>, vector<392x9xf32>
    %cst_8 = arith.constant dense<0.000000e+00> : vector<392x20xf32>
    %6 = tpu.matmul %5, %0, %cst_8 {dimension_numbers = #tpu.dot_dimension_numbers<[1], [0], [0], [1], [0, 0, 1, 1], [], []>} : vector<392x9xf32>, vector<9x20xf32>, vector<392x20xf32> -> vector<392x20xf32>
    %c0_9 = arith.constant 0 : index
    %c0_10 = arith.constant 0 : index
    %7 = vector.load %arg3[%c0_9, %c0_10] : memref<392x9xf32, #tpu.memory_space<vmem>>, vector<392x9xf32>
    %cst_11 = arith.constant dense<0.000000e+00> : vector<392x20xf32>
    %8 = tpu.matmul %7, %0, %cst_11 {dimension_numbers = #tpu.dot_dimension_numbers<[1], [0], [0], [1], [0, 0, 1, 1], [], []>} : vector<392x9xf32>, vector<9x20xf32>, vector<392x20xf32> -> vector<392x20xf32>
    %9 = arith.maximumf %2, %4 : vector<392x20xf32>
    %10 = arith.maximumf %6, %8 : vector<392x20xf32>
    %11 = arith.maximumf %9, %10 : vector<392x20xf32>
    %c0_12 = arith.constant 0 : index
    %c0_13 = arith.constant 0 : index
    %12 = vector.load %arg5[%c0_12, %c0_13] : memref<1x20xf32, #tpu.memory_space<vmem>>, vector<1x20xf32>
    %13 = vector.broadcast %12 : vector<1x20xf32> to vector<392x20xf32>
    %14 = arith.addf %11, %13 : vector<392x20xf32>
    %cst_14 = arith.constant 0.000000e+00 : f32
    %15 = vector.broadcast %cst_14 : f32 to vector<392x20xf32>
    %16 = arith.maximumf %14, %15 : vector<392x20xf32>
    %c0_15 = arith.constant 0 : index
    %c0_16 = arith.constant 0 : index
    %17 = vector.load %arg6[%c0_15, %c0_16] : memref<392x20xf32, #tpu.memory_space<vmem>>, vector<392x20xf32>
    tpu.vector_store %arg6[%c0_15, %c0_16], %16 {strides = array<i32>} : memref<392x20xf32, #tpu.memory_space<vmem>>, vector<392x20xf32>,
    return
  }
}

module attributes {stable_mosaic.version = 11 : i64} {
  func.func @_conv_pool_relu_kernel(%arg0: memref<98x180xf32, #tpu.memory_space<vmem>>, %arg1: memref<98x180xf32, #tpu.memory_space<vmem>>, %arg2: memref<98x180xf32, #tpu.memory_space<vmem>>, %arg3: memref<98x180xf32, #tpu.memory_space<vmem>>, %arg4: memref<180x20xf32, #tpu.memory_space<vmem>>, %arg5: memref<1x20xf32, #tpu.memory_space<vmem>>, %arg6: memref<98x20xf32, #tpu.memory_space<vmem>>) attributes {dimension_semantics = [], scalar_prefetch = 0 : i64, scratch_operands = 0 : i64, tpu.core_type = #tpu.core_type<tc>} {
    %c0 = arith.constant 0 : index
    %c0_0 = arith.constant 0 : index
    %0 = vector.load %arg4[%c0, %c0_0] : memref<180x20xf32, #tpu.memory_space<vmem>>, vector<180x20xf32>
    %c0_1 = arith.constant 0 : index
    %c0_2 = arith.constant 0 : index
    %1 = vector.load %arg0[%c0_1, %c0_2] : memref<98x180xf32, #tpu.memory_space<vmem>>, vector<98x180xf32>
    %cst = arith.constant dense<0.000000e+00> : vector<98x20xf32>
    %2 = tpu.matmul %1, %0, %cst {dimension_numbers = #tpu.dot_dimension_numbers<[1], [0], [0], [1], [0, 0, 1, 1], [], []>} : vector<98x180xf32>, vector<180x20xf32>, vector<98x20xf32> -> vector<98x20xf32>
    %c0_3 = arith.constant 0 : index
    %c0_4 = arith.constant 0 : index
    %3 = vector.load %arg1[%c0_3, %c0_4] : memref<98x180xf32, #tpu.memory_space<vmem>>, vector<98x180xf32>
    %cst_5 = arith.constant dense<0.000000e+00> : vector<98x20xf32>
    %4 = tpu.matmul %3, %0, %cst_5 {dimension_numbers = #tpu.dot_dimension_numbers<[1], [0], [0], [1], [0, 0, 1, 1], [], []>} : vector<98x180xf32>, vector<180x20xf32>, vector<98x20xf32> -> vector<98x20xf32>
    %c0_6 = arith.constant 0 : index
    %c0_7 = arith.constant 0 : index
    %5 = vector.load %arg2[%c0_6, %c0_7] : memref<98x180xf32, #tpu.memory_space<vmem>>, vector<98x180xf32>
    %cst_8 = arith.constant dense<0.000000e+00> : vector<98x20xf32>
    %6 = tpu.matmul %5, %0, %cst_8 {dimension_numbers = #tpu.dot_dimension_numbers<[1], [0], [0], [1], [0, 0, 1, 1], [], []>} : vector<98x180xf32>, vector<180x20xf32>, vector<98x20xf32> -> vector<98x20xf32>
    %c0_9 = arith.constant 0 : index
    %c0_10 = arith.constant 0 : index
    %7 = vector.load %arg3[%c0_9, %c0_10] : memref<98x180xf32, #tpu.memory_space<vmem>>, vector<98x180xf32>
    %cst_11 = arith.constant dense<0.000000e+00> : vector<98x20xf32>
    %8 = tpu.matmul %7, %0, %cst_11 {dimension_numbers = #tpu.dot_dimension_numbers<[1], [0], [0], [1], [0, 0, 1, 1], [], []>} : vector<98x180xf32>, vector<180x20xf32>, vector<98x20xf32> -> vector<98x20xf32>
    %9 = arith.maximumf %2, %4 : vector<98x20xf32>
    %10 = arith.maximumf %6, %8 : vector<98x20xf32>
    %11 = arith.maximumf %9, %10 : vector<98x20xf32>
    %c0_12 = arith.constant 0 : index
    %c0_13 = arith.constant 0 : index
    %12 = vector.load %arg5[%c0_12, %c0_13] : memref<1x20xf32, #tpu.memory_space<vmem>>, vector<1x20xf32>
    %13 = vector.broadcast %12 : vector<1x20xf32> to vector<98x20xf32>
    %14 = arith.addf %11, %13 : vector<98x20xf32>
    %cst_14 = arith.constant 0.000000e+00 : f32
    %15 = vector.broadcast %cst_14 : f32 to vector<98x20xf32>
    %16 = arith.maximumf %14, %15 : vector<98x20xf32>
    %c0_15 = arith.constant 0 : index
    %c0_16 = arith.constant 0 : index
    %17 = vector.load %arg6[%c0_15, %c0_16] : memref<98x20xf32, #tpu.memory_space<vmem>>, vector<98x20xf32>
    tpu.vector_store %arg6[%c0_15, %c0_16], %16 {strides = array<i32>} : memref<98x20xf32, #tpu.memory_space<vmem>>, vector<98x20xf32>,
    return
  }
}

module attributes {stable_mosaic.version = 11 : i64} {
  func.func @_latent_kernel(%arg0: memref<40x49xf32, #tpu.memory_space<vmem>>, %arg1: memref<49x10xf32, #tpu.memory_space<vmem>>, %arg2: memref<1x10xf32, #tpu.memory_space<vmem>>, %arg3: memref<10x49xf32, #tpu.memory_space<vmem>>, %arg4: memref<1x49xf32, #tpu.memory_space<vmem>>, %arg5: memref<40x10xf32, #tpu.memory_space<vmem>>, %arg6: memref<40x49xf32, #tpu.memory_space<vmem>>) attributes {dimension_semantics = [], scalar_prefetch = 0 : i64, scratch_operands = 0 : i64, tpu.core_type = #tpu.core_type<tc>} {
    %c0 = arith.constant 0 : index
    %c0_0 = arith.constant 0 : index
    %0 = vector.load %arg0[%c0, %c0_0] : memref<40x49xf32, #tpu.memory_space<vmem>>, vector<40x49xf32>
    %c0_1 = arith.constant 0 : index
    %c0_2 = arith.constant 0 : index
    %1 = vector.load %arg1[%c0_1, %c0_2] : memref<49x10xf32, #tpu.memory_space<vmem>>, vector<49x10xf32>
    %cst = arith.constant dense<0.000000e+00> : vector<40x10xf32>
    %2 = tpu.matmul %0, %1, %cst {dimension_numbers = #tpu.dot_dimension_numbers<[1], [0], [0], [1], [0, 0, 1, 1], [], []>} : vector<40x49xf32>, vector<49x10xf32>, vector<40x10xf32> -> vector<40x10xf32>
    %c0_3 = arith.constant 0 : index
    %c0_4 = arith.constant 0 : index
    %3 = vector.load %arg2[%c0_3, %c0_4] : memref<1x10xf32, #tpu.memory_space<vmem>>, vector<1x10xf32>
    %4 = vector.broadcast %3 : vector<1x10xf32> to vector<40x10xf32>
    %5 = arith.addf %2, %4 : vector<40x10xf32>
    %cst_5 = arith.constant dense<0xFF800000> : vector<40xf32>
    %6 = vector.multi_reduction <maximumf>, %5, %cst_5 [1] : vector<40x10xf32> to vector<40xf32>
    %7 = vector.shape_cast %6 : vector<40xf32> to vector<40x1xf32>
    %8 = vector.broadcast %7 : vector<40x1xf32> to vector<40x10xf32>
    %9 = arith.subf %5, %8 : vector<40x10xf32>
    %10 = math.exp %9 : vector<40x10xf32>
    %cst_6 = arith.constant dense<0.000000e+00> : vector<40xf32>
    %11 = vector.multi_reduction <add>, %10, %cst_6 [1] : vector<40x10xf32> to vector<40xf32>
    %12 = vector.shape_cast %11 : vector<40xf32> to vector<40x1xf32>
    %13 = vector.broadcast %12 : vector<40x1xf32> to vector<40x10xf32>
    %14 = arith.divf %10, %13 : vector<40x10xf32>
    %c0_7 = arith.constant 0 : index
    %c0_8 = arith.constant 0 : index
    %15 = vector.load %arg5[%c0_7, %c0_8] : memref<40x10xf32, #tpu.memory_space<vmem>>, vector<40x10xf32>
    tpu.vector_store %arg5[%c0_7, %c0_8], %14 {strides = array<i32>} : memref<40x10xf32, #tpu.memory_space<vmem>>, vector<40x10xf32>,
    %c0_9 = arith.constant 0 : index
    %c0_10 = arith.constant 0 : index
    %16 = vector.load %arg3[%c0_9, %c0_10] : memref<10x49xf32, #tpu.memory_space<vmem>>, vector<10x49xf32>
    %cst_11 = arith.constant dense<0.000000e+00> : vector<40x49xf32>
    %17 = tpu.matmul %14, %16, %cst_11 {dimension_numbers = #tpu.dot_dimension_numbers<[1], [0], [0], [1], [0, 0, 1, 1], [], []>} : vector<40x10xf32>, vector<10x49xf32>, vector<40x49xf32> -> vector<40x49xf32>
    %c0_12 = arith.constant 0 : index
    %c0_13 = arith.constant 0 : index
    %18 = vector.load %arg4[%c0_12, %c0_13] : memref<1x49xf32, #tpu.memory_space<vmem>>, vector<1x49xf32>
    %19 = vector.broadcast %18 : vector<1x49xf32> to vector<40x49xf32>
    %20 = arith.addf %17, %19 : vector<40x49xf32>
    %c0_14 = arith.constant 0 : index
    %c0_15 = arith.constant 0 : index
    %21 = vector.load %arg6[%c0_14, %c0_15] : memref<40x49xf32, #tpu.memory_space<vmem>>, vector<40x49xf32>
    tpu.vector_store %arg6[%c0_14, %c0_15], %20 {strides = array<i32>} : memref<40x49xf32, #tpu.memory_space<vmem>>, vector<40x49xf32>,
    return
  }
}

module attributes {stable_mosaic.version = 11 : i64} {
  func.func @_matmul_bias_act_kernel(%arg0: memref<98x20xf32, #tpu.memory_space<vmem>>, %arg1: memref<20x80xf32, #tpu.memory_space<vmem>>, %arg2: memref<1x80xf32, #tpu.memory_space<vmem>>, %arg3: memref<98x80xf32, #tpu.memory_space<vmem>>) attributes {dimension_semantics = [], scalar_prefetch = 0 : i64, scratch_operands = 0 : i64, tpu.core_type = #tpu.core_type<tc>} {
    %c0 = arith.constant 0 : index
    %c0_0 = arith.constant 0 : index
    %0 = vector.load %arg0[%c0, %c0_0] : memref<98x20xf32, #tpu.memory_space<vmem>>, vector<98x20xf32>
    %c0_1 = arith.constant 0 : index
    %c0_2 = arith.constant 0 : index
    %1 = vector.load %arg1[%c0_1, %c0_2] : memref<20x80xf32, #tpu.memory_space<vmem>>, vector<20x80xf32>
    %cst = arith.constant dense<0.000000e+00> : vector<98x80xf32>
    %2 = tpu.matmul %0, %1, %cst {dimension_numbers = #tpu.dot_dimension_numbers<[1], [0], [0], [1], [0, 0, 1, 1], [], []>} : vector<98x20xf32>, vector<20x80xf32>, vector<98x80xf32> -> vector<98x80xf32>
    %c0_3 = arith.constant 0 : index
    %c0_4 = arith.constant 0 : index
    %3 = vector.load %arg2[%c0_3, %c0_4] : memref<1x80xf32, #tpu.memory_space<vmem>>, vector<1x80xf32>
    %4 = vector.broadcast %3 : vector<1x80xf32> to vector<98x80xf32>
    %5 = arith.addf %2, %4 : vector<98x80xf32>
    %cst_5 = arith.constant 0.000000e+00 : f32
    %6 = vector.broadcast %cst_5 : f32 to vector<98x80xf32>
    %7 = arith.maximumf %5, %6 : vector<98x80xf32>
    %c0_6 = arith.constant 0 : index
    %c0_7 = arith.constant 0 : index
    %8 = vector.load %arg3[%c0_6, %c0_7] : memref<98x80xf32, #tpu.memory_space<vmem>>, vector<98x80xf32>
    tpu.vector_store %arg3[%c0_6, %c0_7], %7 {strides = array<i32>} : memref<98x80xf32, #tpu.memory_space<vmem>>, vector<98x80xf32>,
    return
  }
}

module attributes {stable_mosaic.version = 11 : i64} {
  func.func @_matmul_bias_act_kernel(%arg0: memref<392x180xf32, #tpu.memory_space<vmem>>, %arg1: memref<180x1xf32, #tpu.memory_space<vmem>>, %arg2: memref<1x1xf32, #tpu.memory_space<vmem>>, %arg3: memref<392x1xf32, #tpu.memory_space<vmem>>) attributes {dimension_semantics = [], scalar_prefetch = 0 : i64, scratch_operands = 0 : i64, tpu.core_type = #tpu.core_type<tc>} {
    %c0 = arith.constant 0 : index
    %c0_0 = arith.constant 0 : index
    %0 = vector.load %arg0[%c0, %c0_0] : memref<392x180xf32, #tpu.memory_space<vmem>>, vector<392x180xf32>
    %c0_1 = arith.constant 0 : index
    %c0_2 = arith.constant 0 : index
    %1 = vector.load %arg1[%c0_1, %c0_2] : memref<180x1xf32, #tpu.memory_space<vmem>>, vector<180x1xf32>
    %cst = arith.constant dense<0.000000e+00> : vector<392x1xf32>
    %2 = tpu.matmul %0, %1, %cst {dimension_numbers = #tpu.dot_dimension_numbers<[1], [0], [0], [1], [0, 0, 1, 1], [], []>} : vector<392x180xf32>, vector<180x1xf32>, vector<392x1xf32> -> vector<392x1xf32>
    %c0_3 = arith.constant 0 : index
    %c0_4 = arith.constant 0 : index
    %3 = vector.load %arg2[%c0_3, %c0_4] : memref<1x1xf32, #tpu.memory_space<vmem>>, vector<1x1xf32>
    %4 = vector.broadcast %3 : vector<1x1xf32> to vector<392x1xf32>
    %5 = arith.addf %2, %4 : vector<392x1xf32>
    %cst_5 = arith.constant 0.000000e+00 : f32
    %6 = vector.broadcast %cst_5 : f32 to vector<392x1xf32>
    %7 = arith.maximumf %5, %6 : vector<392x1xf32>
    %c0_6 = arith.constant 0 : index
    %c0_7 = arith.constant 0 : index
    %8 = vector.load %arg3[%c0_6, %c0_7] : memref<392x1xf32, #tpu.memory_space<vmem>>, vector<392x1xf32>
    tpu.vector_store %arg3[%c0_6, %c0_7], %7 {strides = array<i32>} : memref<392x1xf32, #tpu.memory_space<vmem>>, vector<392x1xf32>,
    return
  }
}

module attributes {stable_mosaic.version = 11 : i64} {
  func.func @_matmul_bias_act_kernel(%arg0: memref<392x1xf32, #tpu.memory_space<vmem>>, %arg1: memref<1x4xf32, #tpu.memory_space<vmem>>, %arg2: memref<1x4xf32, #tpu.memory_space<vmem>>, %arg3: memref<392x4xf32, #tpu.memory_space<vmem>>) attributes {dimension_semantics = [], scalar_prefetch = 0 : i64, scratch_operands = 0 : i64, tpu.core_type = #tpu.core_type<tc>} {
    %c0 = arith.constant 0 : index
    %c0_0 = arith.constant 0 : index
    %0 = vector.load %arg0[%c0, %c0_0] : memref<392x1xf32, #tpu.memory_space<vmem>>, vector<392x1xf32>
    %c0_1 = arith.constant 0 : index
    %c0_2 = arith.constant 0 : index
    %1 = vector.load %arg1[%c0_1, %c0_2] : memref<1x4xf32, #tpu.memory_space<vmem>>, vector<1x4xf32>
    %cst = arith.constant dense<0.000000e+00> : vector<392x4xf32>
    %2 = tpu.matmul %0, %1, %cst {dimension_numbers = #tpu.dot_dimension_numbers<[1], [0], [0], [1], [0, 0, 1, 1], [], []>} : vector<392x1xf32>, vector<1x4xf32>, vector<392x4xf32> -> vector<392x4xf32>
    %c0_3 = arith.constant 0 : index
    %c0_4 = arith.constant 0 : index
    %3 = vector.load %arg2[%c0_3, %c0_4] : memref<1x4xf32, #tpu.memory_space<vmem>>, vector<1x4xf32>
    %4 = vector.broadcast %3 : vector<1x4xf32> to vector<392x4xf32>
    %5 = arith.addf %2, %4 : vector<392x4xf32>
    %cst_5 = arith.constant 0.000000e+00 : f32
    %6 = vector.broadcast %cst_5 : f32 to vector<392x4xf32>
    %7 = arith.maximumf %5, %6 : vector<392x4xf32>
    %c0_6 = arith.constant 0 : index
    %c0_7 = arith.constant 0 : index
    %8 = vector.load %arg3[%c0_6, %c0_7] : memref<392x4xf32, #tpu.memory_space<vmem>>, vector<392x4xf32>
    tpu.vector_store %arg3[%c0_6, %c0_7], %7 {strides = array<i32>} : memref<392x4xf32, #tpu.memory_space<vmem>>, vector<392x4xf32>,
    return
  }
}

module attributes {stable_mosaic.version = 11 : i64} {
  func.func @_matmul_bias_act_kernel(%arg0: memref<1568x9xf32, #tpu.memory_space<vmem>>, %arg1: memref<9x1xf32, #tpu.memory_space<vmem>>, %arg2: memref<1x1xf32, #tpu.memory_space<vmem>>, %arg3: memref<1568x1xf32, #tpu.memory_space<vmem>>) attributes {dimension_semantics = [], scalar_prefetch = 0 : i64, scratch_operands = 0 : i64, tpu.core_type = #tpu.core_type<tc>} {
    %c0 = arith.constant 0 : index
    %c0_0 = arith.constant 0 : index
    %0 = vector.load %arg0[%c0, %c0_0] : memref<1568x9xf32, #tpu.memory_space<vmem>>, vector<1568x9xf32>
    %c0_1 = arith.constant 0 : index
    %c0_2 = arith.constant 0 : index
    %1 = vector.load %arg1[%c0_1, %c0_2] : memref<9x1xf32, #tpu.memory_space<vmem>>, vector<9x1xf32>
    %cst = arith.constant dense<0.000000e+00> : vector<1568x1xf32>
    %2 = tpu.matmul %0, %1, %cst {dimension_numbers = #tpu.dot_dimension_numbers<[1], [0], [0], [1], [0, 0, 1, 1], [], []>} : vector<1568x9xf32>, vector<9x1xf32>, vector<1568x1xf32> -> vector<1568x1xf32>
    %c0_3 = arith.constant 0 : index
    %c0_4 = arith.constant 0 : index
    %3 = vector.load %arg2[%c0_3, %c0_4] : memref<1x1xf32, #tpu.memory_space<vmem>>, vector<1x1xf32>
    %4 = vector.broadcast %3 : vector<1x1xf32> to vector<1568x1xf32>
    %5 = arith.addf %2, %4 : vector<1568x1xf32>
    %c0_5 = arith.constant 0 : index
    %c0_6 = arith.constant 0 : index
    %6 = vector.load %arg3[%c0_5, %c0_6] : memref<1568x1xf32, #tpu.memory_space<vmem>>, vector<1568x1xf32>
    tpu.vector_store %arg3[%c0_5, %c0_6], %5 {strides = array<i32>} : memref<1568x1xf32, #tpu.memory_space<vmem>>, vector<1568x1xf32>,
    return
  }
}

</mosaic_0001>

<bundles_post_ra>
// kernel: autoencoder_minist_forward.7
= control target key start
LH: loop header
LB: loop body
LE: loop exit
PB: predicated region body
PF: predicated region fallthrough
CT: control target
= control target key end

     0   :  { %vm222_vm0 = vcmask 1040384   ;;  %v3371_v0 = vmov 0.0   ;;  %vm74_vm1 = vcmask 72704   ;;  %vm3372_vm2 = vmmov 0   ;;  %s5293_s4 = inlined_call_operand.vmem [shape: f32[9,20], index: 4, kind: input, shape index: {}]   ;;  %s5294_s0 = inlined_call_operand.vmem [shape: f32[392,9], index: 0, kind: input, shape index: {}]   ;;  %s5295_s1 = inlined_call_operand.vmem [shape: f32[392,9], index: 1, kind: input, shape index: {}]   ;;  %s5296_s2 = inlined_call_operand.vmem [shape: f32[392,9], index: 2, kind: input, shape index: {}]   ;;  %s5297_s3 = inlined_call_operand.vmem [shape: f32[392,9], index: 3, kind: input, shape index: {}]   ;;  %s5298_s5 = inlined_call_operand.vmem [shape: f32[1,20], index: 5, kind: input, shape index: {}]   ;;  %s5299_s6 = inlined_call_operand.vmem [shape: f32[392,20], index: 6, kind: output, shape index: {}]  }
   0x1   :  { %2765 = vmatprep.subr.mxu0 %v3371_v0  ;;  %2916 = vmatprep.subr.mxu1 %v3371_v0  ;;  %v24_v1 = vld [vmem:[%s5293_s4 + $0x8] sm:$0x1]  ;;  %v23_v2 = vld [vmem:[%s5293_s4] sm:$0xff]  ;;  %v27_v7 = vld [vmem:[%s5294_s0 + $0x10] sm:$0xff]  ;;  %vm2306_vm3 = vcmask 162816  }
   0x2   :  { %2766 = vmatpush3.msk.msra.mxu0 %vm222_vm0, %v24_v1  ;;  %2917 = vmatpush3.msk.msra.mxu1 %vm222_vm0, %v24_v1  ;;  %v25_v3 = vld [vmem:[%s5294_s0] sm:$0xff]  ;;  %v26_v5 = vld [vmem:[%s5294_s0 + $0x8] sm:$0xff]  ;;  %v538_v8 = vld [vmem:[%s5295_s1 + $0x10] sm:$0xff] }
   0x3   :  { %2767 = vmatprep.subr.mxu0 %v3371_v0  ;;  %2918 = vmatprep.subr.mxu1 %v3371_v0  ;;  %v536_v4 = vld [vmem:[%s5295_s1] sm:$0xff]  ;;  %v537_v6 = vld [vmem:[%s5295_s1 + $0x8] sm:$0xff]  ;;  %v28_v9 = vld [vmem:[%s5294_s0 + $0x18] sm:$0xff] }
   0x4   :  { %2768 = vmatpush3.msra.mxu0 %v23_v2  ;;  %2769 = vmatprep.mubr.msk.f32.mxu0 %vm3372_vm2, %v3371_v0  ;;  %v539_v10 = vld [vmem:[%s5295_s1 + $0x18] sm:$0xff]  ;;  %v29_v11 = vld [vmem:[%s5294_s0 + $0x20] sm:$0xff]  ;;  %v30_v13 = vld [vmem:[%s5294_s0 + $0x28] sm:$0xff] }
   0x5   :  { %2919 = vmatpush3.msra.mxu1 %v23_v2  ;;  %2920 = vmatprep.mubr.msk.f32.mxu1 %vm3372_vm2, %v3371_v0  ;;  %v540_v12 = vld [vmem:[%s5295_s1 + $0x20] sm:$0xff]  ;;  %v541_v14 = vld [vmem:[%s5295_s1 + $0x28] sm:$0xff]  ;;  %v31_v15 = vld [vmem:[%s5294_s0 + $0x30] sm:$0xff] }
   0x6   :  { %2770 = vmatmul.mubr.msk.f32.vlgmr.msra.gmra.mxu0 %vm74_vm1, %v25_v3  ;;  %2921 = vmatmul.mubr.msk.f32.vlgmr.msra.gmra.mxu1 %vm74_vm1, %v536_v4  ;;  %v542_v16 = vld [vmem:[%s5295_s1 + $0x30] sm:$0xff]  ;;  %v32_v17 = vld [vmem:[%s5294_s0 + $0x38] sm:$0xff]  ;;  %v33_v19 = vld [vmem:[%s5294_s0 + $0x40] sm:$0xff] }
   0x7   :  { %3067 = vmatprep.subr.mxu0 %v3371_v0  ;;  %3218 = vmatprep.subr.mxu1 %v3371_v0  ;;  %v543_v18 = vld [vmem:[%s5295_s1 + $0x38] sm:$0xff]  ;;  %v544_v20 = vld [vmem:[%s5295_s1 + $0x40] sm:$0xff]  ;;  %v34_v21 = vld [vmem:[%s5294_s0 + $0x48] sm:$0xff] }
   0x8   :  { %3068 = vmatpush3.msk.msra.mxu0 %vm222_vm0, %v24_v1  ;;  %3219 = vmatpush3.msk.msra.mxu1 %vm222_vm0, %v24_v1  ;;  %v545_v22 = vld [vmem:[%s5295_s1 + $0x48] sm:$0xff]  ;;  %v35_v23 = vld [vmem:[%s5294_s0 + $0x50] sm:$0xff]  ;;  %v36_v25 = vld [vmem:[%s5294_s0 + $0x58] sm:$0xff] }
   0x9   :  { %2772 = vmatprep.mubr.msk.f32.mxu0 %vm3372_vm2, %v3371_v0  ;;  %2923 = vmatprep.mubr.msk.f32.mxu1 %vm3372_vm2, %v3371_v0  ;;  %v546_v24 = vld [vmem:[%s5295_s1 + $0x50] sm:$0xff]  ;;  %v547_v26 = vld [vmem:[%s5295_s1 + $0x58] sm:$0xff]  ;;  %v37_v27 = vld [vmem:[%s5294_s0 + $0x60] sm:$0xff] }
   0xa   :  { %2773 = vmatmul.mubr.msk.f32.gmra.mxu0 %vm74_vm1, %v26_v5  ;;  %2924 = vmatmul.mubr.msk.f32.gmra.mxu1 %vm74_vm1, %v537_v6  ;;  %v548_v28 = vld [vmem:[%s5295_s1 + $0x60] sm:$0xff]  ;;  %v38_v29 = vld [vmem:[%s5294_s0 + $0x68] sm:$0xff]  ;;  %v39_v31 = vld [vmem:[%s5294_s0 + $0x70] sm:$0xff] }
   0xb   :  { %2775 = vmatprep.mubr.msk.f32.mxu0 %vm3372_vm2, %v3371_v0  ;;  %2926 = vmatprep.mubr.msk.f32.mxu1 %vm3372_vm2, %v3371_v0  ;;  %v549_v30 = vld [vmem:[%s5295_s1 + $0x68] sm:$0xff]  ;;  %v550_v32 = vld [vmem:[%s5295_s1 + $0x70] sm:$0xff]  ;;  %v40_v33 = vld [vmem:[%s5294_s0 + $0x78] sm:$0xff] }
   0xc   :  { %3069 = vmatprep.subr.mxu0 %v3371_v0  ;;  %3220 = vmatprep.subr.mxu1 %v3371_v0  ;;  %v551_v34 = vld [vmem:[%s5295_s1 + $0x78] sm:$0xff]  ;;  %v41_v35 = vld [vmem:[%s5294_s0 + $0x80] sm:$0xff]  ;;  %v42_v37 = vld [vmem:[%s5294_s0 + $0x88] sm:$0xff] }
   0xd   :  { %3070 = vmatpush3.msra.mxu0 %v23_v2  ;;  %3221 = vmatpush3.msra.mxu1 %v23_v2  ;;  %v552_v36 = vld [vmem:[%s5295_s1 + $0x80] sm:$0xff]  ;;  %v553_v38 = vld [vmem:[%s5295_s1 + $0x88] sm:$0xff]  ;;  %v43_v39 = vld [vmem:[%s5294_s0 + $0x90] sm:$0xff] }
   0xe   :  { %2776 = vmatmul.mubr.msk.f32.gmra.mxu0 %vm74_vm1, %v27_v7  ;;  %2927 = vmatmul.mubr.msk.f32.gmra.mxu1 %vm74_vm1, %v538_v8  ;;  %v554_v40 = vld [vmem:[%s5295_s1 + $0x90] sm:$0xff]  ;;  %v44_v41 = vld [vmem:[%s5294_s0 + $0x98] sm:$0xff]  ;;  %v45_v43 = vld [vmem:[%s5294_s0 + $0xa0] sm:$0xff] }
   0xf   :  { %2778 = vmatprep.mubr.msk.f32.mxu0 %vm3372_vm2, %v3371_v0  ;;  %2929 = vmatprep.mubr.msk.f32.mxu1 %vm3372_vm2, %v3371_v0  ;;  %v555_v42 = vld [vmem:[%s5295_s1 + $0x98] sm:$0xff]  ;;  %v556_v44 = vld [vmem:[%s5295_s1 + $0xa0] sm:$0xff]  ;;  %v46_v45 = vld [vmem:[%s5294_s0 + $0xa8] sm:$0xff] }
  0x10   :  { %v557_v46 = vld [vmem:[%s5295_s1 + $0xa8] sm:$0xff]  ;;  %v47_v47 = vld [vmem:[%s5294_s0 + $0xb0] sm:$0xff]  ;;  %v48_v49 = vld [vmem:[%s5294_s0 + $0xb8] sm:$0xff] }
  0x11   :  { %v558_v48 = vld [vmem:[%s5295_s1 + $0xb0] sm:$0xff]  ;;  %v559_v50 = vld [vmem:[%s5295_s1 + $0xb8] sm:$0xff]  ;;  %v49_v51 = vld [vmem:[%s5294_s0 + $0xc0] sm:$0xff] }
  0x12   :  { %2779 = vmatmul.mubr.msk.f32.gmra.mxu0 %vm74_vm1, %v28_v9  ;;  %2930 = vmatmul.mubr.msk.f32.gmra.mxu1 %vm74_vm1, %v539_v10  ;;  %v560_v52 = vld [vmem:[%s5295_s1 + $0xc0] sm:$0xff]  ;;  %v50_v53 = vld [vmem:[%s5294_s0 + $0xc8] sm:$0xff]  ;;  %v51_v55 = vld [vmem:[%s5294_s0 + $0xd0] sm:$0xff] }
  0x13   :  { %2781 = vmatprep.mubr.msk.f32.mxu0 %vm3372_vm2, %v3371_v0  ;;  %2932 = vmatprep.mubr.msk.f32.mxu1 %vm3372_vm2, %v3371_v0  ;;  %v561_v54 = vld [vmem:[%s5295_s1 + $0xc8] sm:$0xff]  ;;  %v562_v56 = vld [vmem:[%s5295_s1 + $0xd0] sm:$0xff]  ;;  %v52_v57 = vld [vmem:[%s5294_s0 + $0xd8] sm:$0xff] }
  0x14   :  { %v563_v58 = vld [vmem:[%s5295_s1 + $0xd8] sm:$0xff]  ;;  %v53_v59 = vld [vmem:[%s5294_s0 + $0xe0] sm:$0xff]  ;;  %v54_v61 = vld [vmem:[%s5294_s0 + $0xe8] sm:$0xff] }
  0x15   :  { %v564_v60 = vld [vmem:[%s5295_s1 + $0xe0] sm:$0xff]  ;;  %v565_v62 = vld [vmem:[%s5295_s1 + $0xe8] sm:$0xff]  ;;  %v55_v63 = vld [vmem:[%s5294_s0 + $0xf0] sm:$0xff] }
  0x16   :  { %2782 = vmatmul.mubr.msk.f32.gmra.mxu0 %vm74_vm1, %v29_v11  ;;  %2933 = vmatmul.mubr.msk.f32.gmra.mxu1 %vm74_vm1, %v540_v12  ;;  %v566_v1 = vld [vmem:[%s5295_s1 + $0xf0] sm:$0xff]  ;;  %v56_v2 = vld [vmem:[%s5294_s0 + $0xf8] sm:$0xff]  ;;  %v57_v4 = vld [vmem:[%s5294_s0 + $0x100] sm:$0xff] }
  0x17   :  { %2784 = vmatprep.mubr.msk.f32.mxu0 %vm3372_vm2, %v3371_v0  ;;  %2935 = vmatprep.mubr.msk.f32.mxu1 %vm3372_vm2, %v3371_v0  ;;  %v567_v3 = vld [vmem:[%s5295_s1 + $0xf8] sm:$0xff]  ;;  %v568_v5 = vld [vmem:[%s5295_s1 + $0x100] sm:$0xff]  ;;  %v58_v6 = vld [vmem:[%s5294_s0 + $0x108] sm:$0xff] }
  0x18   :  { %v569_v7 = vld [vmem:[%s5295_s1 + $0x108] sm:$0xff]  ;;  %v59_v8 = vld [vmem:[%s5294_s0 + $0x110] sm:$0xff]  ;;  %v60_v10 = vld [vmem:[%s5294_s0 + $0x118] sm:$0xff] }
  0x19   :  { %v570_v9 = vld [vmem:[%s5295_s1 + $0x110] sm:$0xff]  ;;  %v571_v11 = vld [vmem:[%s5295_s1 + $0x118] sm:$0xff]  ;;  %v61_v12 = vld [vmem:[%s5294_s0 + $0x120] sm:$0xff] }
  0x1a   :  { %2785 = vmatmul.mubr.msk.f32.gmra.mxu0 %vm74_vm1, %v30_v13  ;;  %2936 = vmatmul.mubr.msk.f32.gmra.mxu1 %vm74_vm1, %v541_v14  ;;  %v572_v13 = vld [vmem:[%s5295_s1 + $0x120] sm:$0xff]  ;;  %v62_v14 = vld [vmem:[%s5294_s0 + $0x128] sm:$0xff] }
  0x1b   :  { %2787 = vmatprep.mubr.msk.f32.mxu0 %vm3372_vm2, %v3371_v0  ;;  %2938 = vmatprep.mubr.msk.f32.mxu1 %vm3372_vm2, %v3371_v0 }
  0x1e   :  { %2788 = vmatmul.mubr.msk.f32.gmra.mxu0 %vm74_vm1, %v31_v15  ;;  %2939 = vmatmul.mubr.msk.f32.gmra.mxu1 %vm74_vm1, %v542_v16  ;;  %v573_v15 = vld [vmem:[%s5295_s1 + $0x128] sm:$0xff]  ;;  %v63_v16 = vld [vmem:[%s5294_s0 + $0x130] sm:$0xff] }
  0x1f   :  { %2790 = vmatprep.mubr.msk.f32.mxu0 %vm3372_vm2, %v3371_v0  ;;  %2941 = vmatprep.mubr.msk.f32.mxu1 %vm3372_vm2, %v3371_v0 }
  0x22   :  { %2791 = vmatmul.mubr.msk.f32.gmra.mxu0 %vm74_vm1, %v32_v17  ;;  %2942 = vmatmul.mubr.msk.f32.gmra.mxu1 %vm74_vm1, %v543_v18  ;;  %v574_v17 = vld [vmem:[%s5295_s1 + $0x130] sm:$0xff]  ;;  %v64_v18 = vld [vmem:[%s5294_s0 + $0x138] sm:$0xff] }
  0x23   :  { %2793 = vmatprep.mubr.msk.f32.mxu0 %vm3372_vm2, %v3371_v0  ;;  %2944 = vmatprep.mubr.msk.f32.mxu1 %vm3372_vm2, %v3371_v0 }
  0x26   :  { %2794 = vmatmul.mubr.msk.f32.gmra.mxu0 %vm74_vm1, %v33_v19  ;;  %2945 = vmatmul.mubr.msk.f32.gmra.mxu1 %vm74_vm1, %v544_v20  ;;  %v575_v19 = vld [vmem:[%s5295_s1 + $0x138] sm:$0xff]  ;;  %v65_v20 = vld [vmem:[%s5294_s0 + $0x140] sm:$0xff] }
  0x27   :  { %2796 = vmatprep.mubr.msk.f32.mxu0 %vm3372_vm2, %v3371_v0  ;;  %2947 = vmatprep.mubr.msk.f32.mxu1 %vm3372_vm2, %v3371_v0 }
  0x2a   :  { %2797 = vmatmul.mubr.msk.f32.gmra.mxu0 %vm74_vm1, %v34_v21  ;;  %2948 = vmatmul.mubr.msk.f32.gmra.mxu1 %vm74_vm1, %v545_v22  ;;  %v576_v21 = vld [vmem:[%s5295_s1 + $0x140] sm:$0xff]  ;;  %v66_v22 = vld [vmem:[%s5294_s0 + $0x148] sm:$0xff] }
  0x2b   :  { %2799 = vmatprep.mubr.msk.f32.mxu0 %vm3372_vm2, %v3371_v0  ;;  %2950 = vmatprep.mubr.msk.f32.mxu1 %vm3372_vm2, %v3371_v0 }
  0x2e   :  { %2800 = vmatmul.mubr.msk.f32.gmra.mxu0 %vm74_vm1, %v35_v23  ;;  %2951 = vmatmul.mubr.msk.f32.gmra.mxu1 %vm74_vm1, %v546_v24  ;;  %v577_v23 = vld [vmem:[%s5295_s1 + $0x148] sm:$0xff]  ;;  %v67_v24 = vld [vmem:[%s5294_s0 + $0x150] sm:$0xff] }
  0x2f   :  { %2802 = vmatprep.mubr.msk.f32.mxu0 %vm3372_vm2, %v3371_v0  ;;  %2953 = vmatprep.mubr.msk.f32.mxu1 %vm3372_vm2, %v3371_v0 }
  0x32   :  { %2803 = vmatmul.mubr.msk.f32.gmra.mxu0 %vm74_vm1, %v36_v25  ;;  %2954 = vmatmul.mubr.msk.f32.gmra.mxu1 %vm74_vm1, %v547_v26  ;;  %v578_v25 = vld [vmem:[%s5295_s1 + $0x150] sm:$0xff]  ;;  %v68_v26 = vld [vmem:[%s5294_s0 + $0x158] sm:$0xff] }
  0x33   :  { %2805 = vmatprep.mubr.msk.f32.mxu0 %vm3372_vm2, %v3371_v0  ;;  %2956 = vmatprep.mubr.msk.f32.mxu1 %vm3372_vm2, %v3371_v0 }
  0x36   :  { %2806 = vmatmul.mubr.msk.f32.gmra.mxu0 %vm74_vm1, %v37_v27  ;;  %2957 = vmatmul.mubr.msk.f32.gmra.mxu1 %vm74_vm1, %v548_v28  ;;  %v579_v27 = vld [vmem:[%s5295_s1 + $0x158] sm:$0xff]  ;;  %v69_v28 = vld [vmem:[%s5294_s0 + $0x160] sm:$0xff] }
  0x37   :  { %2808 = vmatprep.mubr.msk.f32.mxu0 %vm3372_vm2, %v3371_v0  ;;  %2959 = vmatprep.mubr.msk.f32.mxu1 %vm3372_vm2, %v3371_v0 }
  0x3a   :  { %2809 = vmatmul.mubr.msk.f32.gmra.mxu0 %vm74_vm1, %v38_v29  ;;  %2960 = vmatmul.mubr.msk.f32.gmra.mxu1 %vm74_vm1, %v549_v30  ;;  %v580_v29 = vld [vmem:[%s5295_s1 + $0x160] sm:$0xff]  ;;  %v70_v30 = vld [vmem:[%s5294_s0 + $0x168] sm:$0xff] }
  0x3b   :  { %2811 = vmatprep.mubr.msk.f32.mxu0 %vm3372_vm2, %v3371_v0  ;;  %2962 = vmatprep.mubr.msk.f32.mxu1 %vm3372_vm2, %v3371_v0 }
  0x3e   :  { %2812 = vmatmul.mubr.msk.f32.gmra.mxu0 %vm74_vm1, %v39_v31  ;;  %2963 = vmatmul.mubr.msk.f32.gmra.mxu1 %vm74_vm1, %v550_v32  ;;  %v581_v31 = vld [vmem:[%s5295_s1 + $0x168] sm:$0xff]  ;;  %v71_v32 = vld [vmem:[%s5294_s0 + $0x170] sm:$0xff] }
  0x3f   :  { %2814 = vmatprep.mubr.msk.f32.mxu0 %vm3372_vm2, %v3371_v0  ;;  %2965 = vmatprep.mubr.msk.f32.mxu1 %vm3372_vm2, %v3371_v0 }
  0x42   :  { %2815 = vmatmul.mubr.msk.f32.gmra.mxu0 %vm74_vm1, %v40_v33  ;;  %2966 = vmatmul.mubr.msk.f32.gmra.mxu1 %vm74_vm1, %v551_v34  ;;  %v582_v33 = vld [vmem:[%s5295_s1 + $0x170] sm:$0xff]  ;;  %v72_v34 = vld [vmem:[%s5294_s0 + $0x178] sm:$0xff] }
  0x43   :  { %2817 = vmatprep.mubr.msk.f32.mxu0 %vm3372_vm2, %v3371_v0  ;;  %2968 = vmatprep.mubr.msk.f32.mxu1 %vm3372_vm2, %v3371_v0 }
  0x46   :  { %2818 = vmatmul.mubr.msk.f32.gmra.mxu0 %vm74_vm1, %v41_v35  ;;  %2969 = vmatmul.mubr.msk.f32.gmra.mxu1 %vm74_vm1, %v552_v36  ;;  %v583_v35 = vld [vmem:[%s5295_s1 + $0x178] sm:$0xff]  ;;  %v73_v36 = vld [vmem:[%s5294_s0 + $0x180] sm:$0xff] }
  0x47   :  { %2820 = vmatprep.mubr.msk.f32.mxu0 %vm3372_vm2, %v3371_v0  ;;  %2971 = vmatprep.mubr.msk.f32.mxu1 %vm3372_vm2, %v3371_v0 }
  0x4a   :  { %2821 = vmatmul.mubr.msk.f32.gmra.mxu0 %vm74_vm1, %v42_v37  ;;  %2972 = vmatmul.mubr.msk.f32.gmra.mxu1 %vm74_vm1, %v553_v38  ;;  %v584_v37 = vld [vmem:[%s5295_s1 + $0x180] sm:$0xff] }
  0x4b   :  { %2823 = vmatprep.mubr.msk.f32.mxu0 %vm3372_vm2, %v3371_v0  ;;  %2974 = vmatprep.mubr.msk.f32.mxu1 %vm3372_vm2, %v3371_v0 }
  0x4e   :  { %2824 = vmatmul.mubr.msk.f32.gmra.mxu0 %vm74_vm1, %v43_v39  ;;  %2975 = vmatmul.mubr.msk.f32.gmra.mxu1 %vm74_vm1, %v554_v40 }
  0x4f   :  { %2826 = vmatprep.mubr.msk.f32.mxu0 %vm3372_vm2, %v3371_v0  ;;  %2977 = vmatprep.mubr.msk.f32.mxu1 %vm3372_vm2, %v3371_v0 }
  0x52   :  { %2827 = vmatmul.mubr.msk.f32.gmra.mxu0 %vm74_vm1, %v44_v41  ;;  %2978 = vmatmul.mubr.msk.f32.gmra.mxu1 %vm74_vm1, %v555_v42  ;;  %v1042_v41 = vld [vmem:[%s5296_s2] sm:$0xff] }
  0x53   :  { %2829 = vmatprep.mubr.msk.f32.mxu0 %vm3372_vm2, %v3371_v0  ;;  %2980 = vmatprep.mubr.msk.f32.mxu1 %vm3372_vm2, %v3371_v0  ;;  %v1548_v42 = vld [vmem:[%s5297_s3] sm:$0xff] }
  0x56   :  { %2830 = vmatmul.mubr.msk.f32.gmra.mxu0 %vm74_vm1, %v45_v43  ;;  %2981 = vmatmul.mubr.msk.f32.gmra.mxu1 %vm74_vm1, %v556_v44 }
  0x57   :  { %2832 = vmatprep.mubr.msk.f32.mxu0 %vm3372_vm2, %v3371_v0  ;;  %2983 = vmatprep.mubr.msk.f32.mxu1 %vm3372_vm2, %v3371_v0 }
  0x5a   :  { %2833 = vmatmul.mubr.msk.f32.gmra.mxu0 %vm74_vm1, %v46_v45  ;;  %2984 = vmatmul.mubr.msk.f32.gmra.mxu1 %vm74_vm1, %v557_v46 }
  0x5b   :  { %2835 = vmatprep.mubr.msk.f32.mxu0 %vm3372_vm2, %v3371_v0  ;;  %2986 = vmatprep.mubr.msk.f32.mxu1 %vm3372_vm2, %v3371_v0 }
  0x5e   :  { %2836 = vmatmul.mubr.msk.f32.gmra.mxu0 %vm74_vm1, %v47_v47  ;;  %2987 = vmatmul.mubr.msk.f32.gmra.mxu1 %vm74_vm1, %v558_v48  ;;  %v1043_v48 = vld [vmem:[%s5296_s2 + $0x8] sm:$0xff] }
  0x5f   :  { %2838 = vmatprep.mubr.msk.f32.mxu0 %vm3372_vm2, %v3371_v0  ;;  %2989 = vmatprep.mubr.msk.f32.mxu1 %vm3372_vm2, %v3371_v0 }
  0x62   :  { %2839 = vmatmul.mubr.msk.f32.gmra.mxu0 %vm74_vm1, %v48_v49  ;;  %2990 = vmatmul.mubr.msk.f32.gmra.mxu1 %vm74_vm1, %v559_v50  ;;  %v1549_v49 = vld [vmem:[%s5297_s3 + $0x8] sm:$0xff] }
  0x63   :  { %2841 = vmatprep.mubr.msk.f32.mxu0 %vm3372_vm2, %v3371_v0  ;;  %2992 = vmatprep.mubr.msk.f32.mxu1 %vm3372_vm2, %v3371_v0 }
  0x66   :  { %2842 = vmatmul.mubr.msk.f32.gmra.mxu0 %vm74_vm1, %v49_v51  ;;  %2993 = vmatmul.mubr.msk.f32.gmra.mxu1 %vm74_vm1, %v560_v52 }
  0x67   :  { %2844 = vmatprep.mubr.msk.f32.mxu0 %vm3372_vm2, %v3371_v0  ;;  %2995 = vmatprep.mubr.msk.f32.mxu1 %vm3372_vm2, %v3371_v0 }
  0x6a   :  { %2845 = vmatmul.mubr.msk.f32.gmra.mxu0 %vm74_vm1, %v50_v53  ;;  %2996 = vmatmul.mubr.msk.f32.gmra.mxu1 %vm74_vm1, %v561_v54 }
  0x6b   :  { %2847 = vmatprep.mubr.msk.f32.mxu0 %vm3372_vm2, %v3371_v0  ;;  %2998 = vmatprep.mubr.msk.f32.mxu1 %vm3372_vm2, %v3371_v0 }
  0x6e   :  { %2848 = vmatmul.mubr.msk.f32.gmra.mxu0 %vm74_vm1, %v51_v55  ;;  %2999 = vmatmul.mubr.msk.f32.gmra.mxu1 %vm74_vm1, %v562_v56  ;;  %v1044_v55 = vld [vmem:[%s5296_s2 + $0x10] sm:$0xff] }
  0x6f   :  { %2850 = vmatprep.mubr.msk.f32.mxu0 %vm3372_vm2, %v3371_v0  ;;  %3001 = vmatprep.mubr.msk.f32.mxu1 %vm3372_vm2, %v3371_v0  ;;  %v1550_v56 = vld [vmem:[%s5297_s3 + $0x10] sm:$0xff] }
  0x72   :  { %2851 = vmatmul.mubr.msk.f32.gmra.mxu0 %vm74_vm1, %v52_v57  ;;  %3002 = vmatmul.mubr.msk.f32.gmra.mxu1 %vm74_vm1, %v563_v58 }
  0x73   :  { %2853 = vmatprep.mubr.msk.f32.mxu0 %vm3372_vm2, %v3371_v0  ;;  %3004 = vmatprep.mubr.msk.f32.mxu1 %vm3372_vm2, %v3371_v0 }
  0x76   :  { %2854 = vmatmul.mubr.msk.f32.gmra.mxu0 %vm74_vm1, %v53_v59  ;;  %3005 = vmatmul.mubr.msk.f32.gmra.mxu1 %vm74_vm1, %v564_v60 }
  0x77   :  { %2856 = vmatprep.mubr.msk.f32.mxu0 %vm3372_vm2, %v3371_v0  ;;  %3007 = vmatprep.mubr.msk.f32.mxu1 %vm3372_vm2, %v3371_v0 }
  0x7a   :  { %2857 = vmatmul.mubr.msk.f32.gmra.mxu0 %vm74_vm1, %v54_v61  ;;  %3008 = vmatmul.mubr.msk.f32.gmra.mxu1 %vm74_vm1, %v565_v62  ;;  %v1045_v62 = vld [vmem:[%s5296_s2 + $0x18] sm:$0xff] }
  0x7b   :  { %2859 = vmatprep.mubr.msk.f32.mxu0 %vm3372_vm2, %v3371_v0  ;;  %3010 = vmatprep.mubr.msk.f32.mxu1 %vm3372_vm2, %v3371_v0 }
  0x7e   :  { %2860 = vmatmul.mubr.msk.f32.gmra.mxu0 %vm74_vm1, %v55_v63  ;;  %3011 = vmatmul.mubr.msk.f32.gmra.mxu1 %vm74_vm1, %v566_v1  ;;  %v1551_v63 = vld [vmem:[%s5297_s3 + $0x18] sm:$0xff] }
  0x7f   :  { %2862 = vmatprep.mubr.msk.f32.mxu0 %vm3372_vm2, %v3371_v0  ;;  %3013 = vmatprep.mubr.msk.f32.mxu1 %vm3372_vm2, %v3371_v0 }
  0x82   :  { %2863 = vmatmul.mubr.msk.f32.gmra.mxu0 %vm74_vm1, %v56_v2  ;;  %3014 = vmatmul.mubr.msk.f32.gmra.mxu1 %vm74_vm1, %v567_v3 }
  0x83   :  { %2865 = vmatprep.mubr.msk.f32.mxu0 %vm3372_vm2, %v3371_v0  ;;  %3016 = vmatprep.mubr.msk.f32.mxu1 %vm3372_vm2, %v3371_v0 }
  0x86   :  { %2866 = vmatmul.mubr.msk.f32.gmra.mxu0 %vm74_vm1, %v57_v4  ;;  %3017 = vmatmul.mubr.msk.f32.gmra.mxu1 %vm74_vm1, %v568_v5 }
  0x87   :  { %2868 = vmatprep.mubr.msk.f32.mxu0 %vm3372_vm2, %v3371_v0  ;;  %3019 = vmatprep.mubr.msk.f32.mxu1 %vm3372_vm2, %v3371_v0 }
  0x8a   :  { %2869 = vmatmul.mubr.msk.f32.gmra.mxu0 %vm74_vm1, %v58_v6  ;;  %3020 = vmatmul.mubr.msk.f32.gmra.mxu1 %vm74_vm1, %v569_v7  ;;  %v1046_v6 = vld [vmem:[%s5296_s2 + $0x20] sm:$0xff] }
  0x8b   :  { %2871 = vmatprep.mubr.msk.f32.mxu0 %vm3372_vm2, %v3371_v0  ;;  %3022 = vmatprep.mubr.msk.f32.mxu1 %vm3372_vm2, %v3371_v0  ;;  %v1552_v7 = vld [vmem:[%s5297_s3 + $0x20] sm:$0xff] }
  0x8e   :  { %2872 = vmatmul.mubr.msk.f32.gmra.mxu0 %vm74_vm1, %v59_v8  ;;  %3023 = vmatmul.mubr.msk.f32.gmra.mxu1 %vm74_vm1, %v570_v9 }
  0x8f   :  { %2874 = vmatprep.mubr.msk.f32.mxu0 %vm3372_vm2, %v3371_v0  ;;  %3025 = vmatprep.mubr.msk.f32.mxu1 %vm3372_vm2, %v3371_v0 }
  0x92   :  { %2875 = vmatmul.mubr.msk.f32.gmra.mxu0 %vm74_vm1, %v60_v10  ;;  %3026 = vmatmul.mubr.msk.f32.gmra.mxu1 %vm74_vm1, %v571_v11 }
  0x93   :  { %2877 = vmatprep.mubr.msk.f32.mxu0 %vm3372_vm2, %v3371_v0  ;;  %3028 = vmatprep.mubr.msk.f32.mxu1 %vm3372_vm2, %v3371_v0 }
  0x96   :  { %2878 = vmatmul.mubr.msk.f32.gmra.mxu0 %vm74_vm1, %v61_v12  ;;  %3029 = vmatmul.mubr.msk.f32.gmra.mxu1 %vm74_vm1, %v572_v13  ;;  %v1047_v13 = vld [vmem:[%s5296_s2 + $0x28] sm:$0xff] }
  0x97   :  { %2880 = vmatprep.mubr.msk.f32.mxu0 %vm3372_vm2, %v3371_v0  ;;  %3031 = vmatprep.mubr.msk.f32.mxu1 %vm3372_vm2, %v3371_v0 }
  0x9a   :  { %2881 = vmatmul.mubr.msk.f32.gmra.mxu0 %vm74_vm1, %v62_v14  ;;  %3032 = vmatmul.mubr.msk.f32.gmra.mxu1 %vm74_vm1, %v573_v15  ;;  %v1553_v14 = vld [vmem:[%s5297_s3 + $0x28] sm:$0xff] }
  0x9b   :  { %2883 = vmatprep.mubr.msk.f32.mxu0 %vm3372_vm2, %v3371_v0  ;;  %3034 = vmatprep.mubr.msk.f32.mxu1 %vm3372_vm2, %v3371_v0 }
  0x9e   :  { %2884 = vmatmul.mubr.msk.f32.gmra.mxu0 %vm74_vm1, %v63_v16  ;;  %3035 = vmatmul.mubr.msk.f32.gmra.mxu1 %vm74_vm1, %v574_v17 }
  0x9f   :  { %2886 = vmatprep.mubr.msk.f32.mxu0 %vm3372_vm2, %v3371_v0  ;;  %3037 = vmatprep.mubr.msk.f32.mxu1 %vm3372_vm2, %v3371_v0 }
  0xa2   :  { %2887 = vmatmul.mubr.msk.f32.gmra.mxu0 %vm74_vm1, %v64_v18  ;;  %3038 = vmatmul.mubr.msk.f32.gmra.mxu1 %vm74_vm1, %v575_v19 }
  0xa3   :  { %2889 = vmatprep.mubr.msk.f32.mxu0 %vm3372_vm2, %v3371_v0  ;;  %3040 = vmatprep.mubr.msk.f32.mxu1 %vm3372_vm2, %v3371_v0 }
  0xa6   :  { %2890 = vmatmul.mubr.msk.f32.gmra.mxu0 %vm74_vm1, %v65_v20  ;;  %3041 = vmatmul.mubr.msk.f32.gmra.mxu1 %vm74_vm1, %v576_v21  ;;  %v1048_v20 = vld [vmem:[%s5296_s2 + $0x30] sm:$0xff] }
  0xa7   :  { %2892 = vmatprep.mubr.msk.f32.mxu0 %vm3372_vm2, %v3371_v0  ;;  %3043 = vmatprep.mubr.msk.f32.mxu1 %vm3372_vm2, %v3371_v0  ;;  %v1554_v21 = vld [vmem:[%s5297_s3 + $0x30] sm:$0xff] }
  0xaa   :  { %2893 = vmatmul.mubr.msk.f32.gmra.mxu0 %vm74_vm1, %v66_v22  ;;  %3044 = vmatmul.mubr.msk.f32.gmra.mxu1 %vm74_vm1, %v577_v23 }
  0xab   :  { %2895 = vmatprep.mubr.msk.f32.mxu0 %vm3372_vm2, %v3371_v0  ;;  %3046 = vmatprep.mubr.msk.f32.mxu1 %vm3372_vm2, %v3371_v0 }
  0xae   :  { %2896 = vmatmul.mubr.msk.f32.gmra.mxu0 %vm74_vm1, %v67_v24  ;;  %3047 = vmatmul.mubr.msk.f32.gmra.mxu1 %vm74_vm1, %v578_v25 }
  0xaf   :  { %2898 = vmatprep.mubr.msk.f32.mxu0 %vm3372_vm2, %v3371_v0  ;;  %3049 = vmatprep.mubr.msk.f32.mxu1 %vm3372_vm2, %v3371_v0 }
  0xb2   :  { %2899 = vmatmul.mubr.msk.f32.gmra.mxu0 %vm74_vm1, %v68_v26  ;;  %3050 = vmatmul.mubr.msk.f32.gmra.mxu1 %vm74_vm1, %v579_v27  ;;  %v1049_v27 = vld [vmem:[%s5296_s2 + $0x38] sm:$0xff] }
  0xb3   :  { %2901 = vmatprep.mubr.msk.f32.mxu0 %vm3372_vm2, %v3371_v0  ;;  %3052 = vmatprep.mubr.msk.f32.mxu1 %vm3372_vm2, %v3371_v0 }
  0xb6   :  { %2902 = vmatmul.mubr.msk.f32.gmra.mxu0 %vm74_vm1, %v69_v28  ;;  %3053 = vmatmul.mubr.msk.f32.gmra.mxu1 %vm74_vm1, %v580_v29  ;;  %v1555_v28 = vld [vmem:[%s5297_s3 + $0x38] sm:$0xff] }
  0xb7   :  { %2904 = vmatprep.mubr.msk.f32.mxu0 %vm3372_vm2, %v3371_v0  ;;  %3055 = vmatprep.mubr.msk.f32.mxu1 %vm3372_vm2, %v3371_v0 }
  0xba   :  { %2905 = vmatmul.mubr.msk.f32.gmra.mxu0 %vm74_vm1, %v70_v30  ;;  %3056 = vmatmul.mubr.msk.f32.gmra.mxu1 %vm74_vm1, %v581_v31 }
  0xbb   :  { %2907 = vmatprep.mubr.msk.f32.mxu0 %vm3372_vm2, %v3371_v0  ;;  %3058 = vmatprep.mubr.msk.f32.mxu1 %vm3372_vm2, %v3371_v0 }
  0xbe   :  { %2908 = vmatmul.mubr.msk.f32.gmra.mxu0 %vm74_vm1, %v71_v32  ;;  %3059 = vmatmul.mubr.msk.f32.gmra.mxu1 %vm74_vm1, %v582_v33 }
  0xbf   :  { %2910 = vmatprep.mubr.msk.f32.mxu0 %vm3372_vm2, %v3371_v0  ;;  %3061 = vmatprep.mubr.msk.f32.mxu1 %vm3372_vm2, %v3371_v0 }
  0xc2   :  { %2911 = vmatmul.mubr.msk.f32.gmra.mxu0 %vm74_vm1, %v72_v34  ;;  %3062 = vmatmul.mubr.msk.f32.gmra.mxu1 %vm74_vm1, %v583_v35  ;;  %v1050_v34 = vld [vmem:[%s5296_s2 + $0x40] sm:$0xff] }
  0xc3   :  { %2913 = vmatprep.mubr.msk.f32.mxu0 %vm3372_vm2, %v3371_v0  ;;  %3064 = vmatprep.mubr.msk.f32.mxu1 %vm3372_vm2, %v3371_v0  ;;  %v1556_v35 = vld [vmem:[%s5297_s3 + $0x40] sm:$0xff] }
  0xc6   :  { %v4012_v38 = vpop.f32.mrf.mxu0  ;;  %2914 = vmatmul.mubr.msk.f32.gmra.mxu0 %vm74_vm1, %v73_v36  ;;  %v4015_v39 = vpop.f32.mrf.mxu1  ;;  %3065 = vmatmul.mubr.msk.f32.gmra.mxu1 %vm74_vm1, %v584_v37 }
  0xc7   :  { %3071 = vmatprep.mubr.msk.f32.mxu0 %vm3372_vm2, %v3371_v0  ;;  %3222 = vmatprep.mubr.msk.f32.mxu1 %vm3372_vm2, %v3371_v0 }
  0xc8   :  { %v2771_v43 = vpop.f32.mrf.mxu0  ;;  %v2922_v44 = vpop.f32.mrf.mxu1 }
  0xc9   :  { %v1051_v44 = vld [vmem:[%s5296_s2 + $0x48] sm:$0xff] }
  0xca   :  { %v4030_v45 = vpop.f32.mrf.mxu0  ;;  %v4032_v46 = vpop.f32.mrf.mxu1  ;;  %3072 = vmatmul.mubr.msk.f32.vlgmr.msra.gmra.mxu0 %vm74_vm1, %v1042_v41  ;;  %3223 = vmatmul.mubr.msk.f32.vlgmr.msra.gmra.mxu1 %vm74_vm1, %v1548_v42 }
  0xcb   :  { %3074 = vmatprep.mubr.msk.f32.mxu0 %vm3372_vm2, %v3371_v0  ;;  %3225 = vmatprep.mubr.msk.f32.mxu1 %vm3372_vm2, %v3371_v0 }
  0xcc   :  { %v2774_v50 = vpop.f32.mrf.mxu0  ;;  %v2925_v51 = vpop.f32.mrf.mxu1 }
  0xce   :  { %v4048_v52 = vpop.f32.mrf.mxu0  ;;  %v4050_v53 = vpop.f32.mrf.mxu1  ;;  %3075 = vmatmul.mubr.msk.f32.gmra.mxu0 %vm74_vm1, %v1043_v48  ;;  %3226 = vmatmul.mubr.msk.f32.gmra.mxu1 %vm74_vm1, %v1549_v49  ;;  %v1557_v48 = vld [vmem:[%s5297_s3 + $0x48] sm:$0xff] }
  0xcf   :  { %3077 = vmatprep.mubr.msk.f32.mxu0 %vm3372_vm2, %v3371_v0  ;;  %3228 = vmatprep.mubr.msk.f32.mxu1 %vm3372_vm2, %v3371_v0 }
  0xd0   :  { %v2777_v57 = vpop.f32.mrf.mxu0  ;;  %v2928_v58 = vpop.f32.mrf.mxu1 }
  0xd1   :  { %v1052_v57 = vld [vmem:[%s5296_s2 + $0x50] sm:$0xff] }
  0xd2   :  { %v4066_v59 = vpop.f32.mrf.mxu0  ;;  %v4068_v60 = vpop.f32.mrf.mxu1  ;;  %3078 = vmatmul.mubr.msk.f32.gmra.mxu0 %vm74_vm1, %v1044_v55  ;;  %3229 = vmatmul.mubr.msk.f32.gmra.mxu1 %vm74_vm1, %v1550_v56  ;;  %v1558_v58 = vld [vmem:[%s5297_s3 + $0x50] sm:$0xff] }
  0xd3   :  { %3080 = vmatprep.mubr.msk.f32.mxu0 %vm3372_vm2, %v3371_v0  ;;  %3231 = vmatprep.mubr.msk.f32.mxu1 %vm3372_vm2, %v3371_v0 }
  0xd4   :  { %v2780_v1 = vpop.f32.mrf.mxu0  ;;  %v2931_v2 = vpop.f32.mrf.mxu1 }
  0xd6   :  { %v4084_v3 = vpop.f32.mrf.mxu0  ;;  %v4086_v4 = vpop.f32.mrf.mxu1  ;;  %3081 = vmatmul.mubr.msk.f32.gmra.mxu0 %vm74_vm1, %v1045_v62  ;;  %3232 = vmatmul.mubr.msk.f32.gmra.mxu1 %vm74_vm1, %v1551_v63 }
  0xd7   :  { %3083 = vmatprep.mubr.msk.f32.mxu0 %vm3372_vm2, %v3371_v0  ;;  %3234 = vmatprep.mubr.msk.f32.mxu1 %vm3372_vm2, %v3371_v0 }
  0xd8   :  { %v2783_v8 = vpop.f32.mrf.mxu0  ;;  %v2934_v9 = vpop.f32.mrf.mxu1 }
  0xd9   :  { %v1559_v8 = vld [vmem:[%s5297_s3 + $0x58] sm:$0xff] }
  0xda   :  { %v4102_v10 = vpop.f32.mrf.mxu0  ;;  %v4104_v11 = vpop.f32.mrf.mxu1  ;;  %3084 = vmatmul.mubr.msk.f32.gmra.mxu0 %vm74_vm1, %v1046_v6  ;;  %3235 = vmatmul.mubr.msk.f32.gmra.mxu1 %vm74_vm1, %v1552_v7  ;;  %v1053_v7 = vld [vmem:[%s5296_s2 + $0x58] sm:$0xff] }
  0xdb   :  { %3086 = vmatprep.mubr.msk.f32.mxu0 %vm3372_vm2, %v3371_v0  ;;  %3237 = vmatprep.mubr.msk.f32.mxu1 %vm3372_vm2, %v3371_v0 }
  0xdc   :  { %v2786_v15 = vpop.f32.mrf.mxu0  ;;  %v2937_v16 = vpop.f32.mrf.mxu1 }
  0xde   :  { %v4120_v17 = vpop.f32.mrf.mxu0  ;;  %v4122_v18 = vpop.f32.mrf.mxu1  ;;  %3087 = vmatmul.mubr.msk.f32.gmra.mxu0 %vm74_vm1, %v1047_v13  ;;  %3238 = vmatmul.mubr.msk.f32.gmra.mxu1 %vm74_vm1, %v1553_v14 }
  0xdf   :  { %3089 = vmatprep.mubr.msk.f32.mxu0 %vm3372_vm2, %v3371_v0  ;;  %3240 = vmatprep.mubr.msk.f32.mxu1 %vm3372_vm2, %v3371_v0 }
  0xe0   :  { %v2789_v22 = vpop.f32.mrf.mxu0  ;;  %v2940_v23 = vpop.f32.mrf.mxu1 }
  0xe2   :  { %v4138_v24 = vpop.f32.mrf.mxu0  ;;  %v4140_v25 = vpop.f32.mrf.mxu1  ;;  %3090 = vmatmul.mubr.msk.f32.gmra.mxu0 %vm74_vm1, %v1048_v20  ;;  %3241 = vmatmul.mubr.msk.f32.gmra.mxu1 %vm74_vm1, %v1554_v21  ;;  %v1054_v20 = vld [vmem:[%s5296_s2 + $0x60] sm:$0xff] }
  0xe3   :  { %3092 = vmatprep.mubr.msk.f32.mxu0 %vm3372_vm2, %v3371_v0  ;;  %3243 = vmatprep.mubr.msk.f32.mxu1 %vm3372_vm2, %v3371_v0  ;;  %v1560_v21 = vld [vmem:[%s5297_s3 + $0x60] sm:$0xff] }
  0xe4   :  { %v2792_v29 = vpop.f32.mrf.mxu0  ;;  %v2943_v30 = vpop.f32.mrf.mxu1 }
  0xe5   :  { %v1055_v30 = vld [vmem:[%s5296_s2 + $0x68] sm:$0xff] }
  0xe6   :  { %v4156_v31 = vpop.f32.mrf.mxu0  ;;  %v4158_v32 = vpop.f32.mrf.mxu1  ;;  %3093 = vmatmul.mubr.msk.f32.gmra.mxu0 %vm74_vm1, %v1049_v27  ;;  %3244 = vmatmul.mubr.msk.f32.gmra.mxu1 %vm74_vm1, %v1555_v28 }
  0xe7   :  { %3095 = vmatprep.mubr.msk.f32.mxu0 %vm3372_vm2, %v3371_v0  ;;  %3246 = vmatprep.mubr.msk.f32.mxu1 %vm3372_vm2, %v3371_v0 }
  0xe8   :  { %v2795_v36 = vpop.f32.mrf.mxu0  ;;  %v2946_v37 = vpop.f32.mrf.mxu1 }
  0xea   :  { %v4174_v41 = vpop.f32.mrf.mxu0  ;;  %v4176_v42 = vpop.f32.mrf.mxu1  ;;  %3096 = vmatmul.mubr.msk.f32.gmra.mxu0 %vm74_vm1, %v1050_v34  ;;  %3247 = vmatmul.mubr.msk.f32.gmra.mxu1 %vm74_vm1, %v1556_v35  ;;  %v1561_v34 = vld [vmem:[%s5297_s3 + $0x68] sm:$0xff] }
  0xeb   :  { %3098 = vmatprep.mubr.msk.f32.mxu0 %vm3372_vm2, %v3371_v0  ;;  %3249 = vmatprep.mubr.msk.f32.mxu1 %vm3372_vm2, %v3371_v0 }
  0xec   :  { %v2798_v49 = vpop.f32.mrf.mxu0  ;;  %v2949_v50 = vpop.f32.mrf.mxu1 }
  0xed   :  { %v1056_v49 = vld [vmem:[%s5296_s2 + $0x70] sm:$0xff] }
  0xee   :  { %v4192_v51 = vpop.f32.mrf.mxu0  ;;  %v4194_v55 = vpop.f32.mrf.mxu1  ;;  %3099 = vmatmul.mubr.msk.f32.gmra.mxu0 %vm74_vm1, %v1051_v44  ;;  %3250 = vmatmul.mubr.msk.f32.gmra.mxu1 %vm74_vm1, %v1557_v48  ;;  %v1562_v50 = vld [vmem:[%s5297_s3 + $0x70] sm:$0xff] }
  0xef   :  { %3101 = vmatprep.mubr.msk.f32.mxu0 %vm3372_vm2, %v3371_v0  ;;  %3252 = vmatprep.mubr.msk.f32.mxu1 %vm3372_vm2, %v3371_v0 }
  0xf0   :  { %v2801_v62 = vpop.f32.mrf.mxu0  ;;  %v2952_v63 = vpop.f32.mrf.mxu1 }
  0xf2   :  { %v4210_v1 = vpop.f32.mrf.mxu0  ;;  %v4212_v2 = vpop.f32.mrf.mxu1  ;;  %3102 = vmatmul.mubr.msk.f32.gmra.mxu0 %vm74_vm1, %v1052_v57  ;;  %3253 = vmatmul.mubr.msk.f32.gmra.mxu1 %vm74_vm1, %v1558_v58 }
  0xf3   :  { %3104 = vmatprep.mubr.msk.f32.mxu0 %vm3372_vm2, %v3371_v0  ;;  %3255 = vmatprep.mubr.msk.f32.mxu1 %vm3372_vm2, %v3371_v0 }
  0xf4   :  { %v2804_v9 = vpop.f32.mrf.mxu0  ;;  %v2955_v13 = vpop.f32.mrf.mxu1 }
  0xf5   :  { %v1563_v9 = vld [vmem:[%s5297_s3 + $0x78] sm:$0xff] }
  0xf6   :  { %v4228_v14 = vpop.f32.mrf.mxu0  ;;  %v4230_v15 = vpop.f32.mrf.mxu1  ;;  %3105 = vmatmul.mubr.msk.f32.gmra.mxu0 %vm74_vm1, %v1053_v7  ;;  %3256 = vmatmul.mubr.msk.f32.gmra.mxu1 %vm74_vm1, %v1559_v8  ;;  %v1057_v8 = vld [vmem:[%s5296_s2 + $0x78] sm:$0xff] }
  0xf7   :  { %3107 = vmatprep.mubr.msk.f32.mxu0 %vm3372_vm2, %v3371_v0  ;;  %3258 = vmatprep.mubr.msk.f32.mxu1 %vm3372_vm2, %v3371_v0 }
  0xf8   :  { %v2807_v22 = vpop.f32.mrf.mxu0  ;;  %v2958_v23 = vpop.f32.mrf.mxu1 }
  0xfa   :  { %v4246_v27 = vpop.f32.mrf.mxu0  ;;  %v4248_v28 = vpop.f32.mrf.mxu1  ;;  %3108 = vmatmul.mubr.msk.f32.gmra.mxu0 %vm74_vm1, %v1054_v20  ;;  %3259 = vmatmul.mubr.msk.f32.gmra.mxu1 %vm74_vm1, %v1560_v21 }
  0xfb   :  { %3110 = vmatprep.mubr.msk.f32.mxu0 %vm3372_vm2, %v3371_v0  ;;  %3261 = vmatprep.mubr.msk.f32.mxu1 %vm3372_vm2, %v3371_v0 }
  0xfc   :  { %v2810_v35 = vpop.f32.mrf.mxu0  ;;  %v2961_v36 = vpop.f32.mrf.mxu1 }
  0xfe   :  { %v4264_v37 = vpop.f32.mrf.mxu0  ;;  %v4266_v44 = vpop.f32.mrf.mxu1  ;;  %3111 = vmatmul.mubr.msk.f32.gmra.mxu0 %vm74_vm1, %v1055_v30  ;;  %3262 = vmatmul.mubr.msk.f32.gmra.mxu1 %vm74_vm1, %v1561_v34  ;;  %v1058_v30 = vld [vmem:[%s5296_s2 + $0x80] sm:$0xff] }
  0xff   :  { %3113 = vmatprep.mubr.msk.f32.mxu0 %vm3372_vm2, %v3371_v0  ;;  %3264 = vmatprep.mubr.msk.f32.mxu1 %vm3372_vm2, %v3371_v0  ;;  %v1564_v34 = vld [vmem:[%s5297_s3 + $0x80] sm:$0xff] }
 0x100   :  { %v2813_v57 = vpop.f32.mrf.mxu0  ;;  %v2964_v58 = vpop.f32.mrf.mxu1 }
 0x101   :  { %v1059_v58 = vld [vmem:[%s5296_s2 + $0x88] sm:$0xff] }
 0x102   :  { %v4282_v62 = vpop.f32.mrf.mxu0  ;;  %v4284_v63 = vpop.f32.mrf.mxu1  ;;  %3114 = vmatmul.mubr.msk.f32.gmra.mxu0 %vm74_vm1, %v1056_v49  ;;  %3265 = vmatmul.mubr.msk.f32.gmra.mxu1 %vm74_vm1, %v1562_v50 }
 0x103   :  { %3116 = vmatprep.mubr.msk.f32.mxu0 %vm3372_vm2, %v3371_v0  ;;  %3267 = vmatprep.mubr.msk.f32.mxu1 %vm3372_vm2, %v3371_v0 }
 0x104   :  { %v2816_v13 = vpop.f32.mrf.mxu0  ;;  %v2967_v20 = vpop.f32.mrf.mxu1 }
 0x106   :  { %v4300_v21 = vpop.f32.mrf.mxu0  ;;  %v4302_v22 = vpop.f32.mrf.mxu1  ;;  %3117 = vmatmul.mubr.msk.f32.gmra.mxu0 %vm74_vm1, %v1057_v8  ;;  %3268 = vmatmul.mubr.msk.f32.gmra.mxu1 %vm74_vm1, %v1563_v9  ;;  %v1565_v8 = vld [vmem:[%s5297_s3 + $0x88] sm:$0xff] }
 0x107   :  { %3119 = vmatprep.mubr.msk.f32.mxu0 %vm3372_vm2, %v3371_v0  ;;  %3270 = vmatprep.mubr.msk.f32.mxu1 %vm3372_vm2, %v3371_v0 }
 0x108   :  { %v2819_v35 = vpop.f32.mrf.mxu0  ;;  %v2970_v36 = vpop.f32.mrf.mxu1 }
 0x109   :  { %v1060_v35 = vld [vmem:[%s5296_s2 + $0x90] sm:$0xff] }
 0x10a   :  { %v4318_v49 = vpop.f32.mrf.mxu0  ;;  %v4320_v50 = vpop.f32.mrf.mxu1  ;;  %3120 = vmatmul.mubr.msk.f32.gmra.mxu0 %vm74_vm1, %v1058_v30  ;;  %3271 = vmatmul.mubr.msk.f32.gmra.mxu1 %vm74_vm1, %v1564_v34  ;;  %v1566_v36 = vld [vmem:[%s5297_s3 + $0x90] sm:$0xff] }
 0x10b   :  { %3122 = vmatprep.mubr.msk.f32.mxu0 %vm3372_vm2, %v3371_v0  ;;  %3273 = vmatprep.mubr.msk.f32.mxu1 %vm3372_vm2, %v3371_v0 }
 0x10c   :  { %v2822_v9 = vpop.f32.mrf.mxu0  ;;  %v2973_v13 = vpop.f32.mrf.mxu1 }
 0x10e   :  { %v4336_v20 = vpop.f32.mrf.mxu0  ;;  %v4338_v30 = vpop.f32.mrf.mxu1  ;;  %3123 = vmatmul.mubr.msk.f32.gmra.mxu0 %vm74_vm1, %v1059_v58  ;;  %3274 = vmatmul.mubr.msk.f32.gmra.mxu1 %vm74_vm1, %v1565_v8 }
 0x10f   :  { %3125 = vmatprep.mubr.msk.f32.mxu0 %vm3372_vm2, %v3371_v0  ;;  %3276 = vmatprep.mubr.msk.f32.mxu1 %vm3372_vm2, %v3371_v0 }
 0x110   :  { %v2825_v58 = vpop.f32.mrf.mxu0  ;;  %v2976_v9 = vpop.f32.mrf.mxu1 }
 0x111   :  { %v1061_v58 = vld [vmem:[%s5296_s2 + $0x98] sm:$0xff] }
 0x112   :  { %v4354_v8 = vpop.f32.mrf.mxu0  ;;  %v4356_v13 = vpop.f32.mrf.mxu1  ;;  %3126 = vmatmul.mubr.msk.f32.gmra.mxu0 %vm74_vm1, %v1060_v35  ;;  %3277 = vmatmul.mubr.msk.f32.gmra.mxu1 %vm74_vm1, %v1566_v36  ;;  %v1567_v9 = vld [vmem:[%s5297_s3 + $0x98] sm:$0xff] }
 0x113   :  { %3128 = vmatprep.mubr.msk.f32.mxu0 %vm3372_vm2, %v3371_v0  ;;  %3279 = vmatprep.mubr.msk.f32.mxu1 %vm3372_vm2, %v3371_v0 }
 0x114   :  { %v2828_v35 = vpop.f32.mrf.mxu0  ;;  %v2979_v57 = vpop.f32.mrf.mxu1 }
 0x115   :  { %v1062_v57 = vld [vmem:[%s5296_s2 + $0xa0] sm:$0xff] }
 0x116   :  { %v4372_v36 = vpop.f32.mrf.mxu0  ;;  %v4374_v23 = vpop.f32.mrf.mxu1  ;;  %3129 = vmatmul.mubr.msk.f32.gmra.mxu0 %vm74_vm1, %v1061_v58  ;;  %3280 = vmatmul.mubr.msk.f32.gmra.mxu1 %vm74_vm1, %v1567_v9  ;;  %v1568_v35 = vld [vmem:[%s5297_s3 + $0xa0] sm:$0xff] }
 0x117   :  { %3131 = vmatprep.mubr.msk.f32.mxu0 %vm3372_vm2, %v3371_v0  ;;  %3282 = vmatprep.mubr.msk.f32.mxu1 %vm3372_vm2, %v3371_v0 }
 0x118   :  { %v2831_v58 = vpop.f32.mrf.mxu0  ;;  %v2982_v7 = vpop.f32.mrf.mxu1 }
 0x119   :  { %v1063_v7 = vld [vmem:[%s5296_s2 + $0xa8] sm:$0xff] }
 0x11a   :  { %v4390_v9 = vpop.f32.mrf.mxu0  ;;  %v4392_v48 = vpop.f32.mrf.mxu1  ;;  %3132 = vmatmul.mubr.msk.f32.gmra.mxu0 %vm74_vm1, %v1062_v57  ;;  %3283 = vmatmul.mubr.msk.f32.gmra.mxu1 %vm74_vm1, %v1568_v35  ;;  %v1569_v58 = vld [vmem:[%s5297_s3 + $0xa8] sm:$0xff] }
 0x11b   :  { %3134 = vmatprep.mubr.msk.f32.mxu0 %vm3372_vm2, %v3371_v0  ;;  %3285 = vmatprep.mubr.msk.f32.mxu1 %vm3372_vm2, %v3371_v0 }
 0x11c   :  { %v2834_v57 = vpop.f32.mrf.mxu0  ;;  %v2985_v29 = vpop.f32.mrf.mxu1 }
 0x11d   :  { %v1064_v29 = vld [vmem:[%s5296_s2 + $0xb0] sm:$0xff] }
 0x11e   :  { %v4408_v35 = vpop.f32.mrf.mxu0  ;;  %v4410_v16 = vpop.f32.mrf.mxu1  ;;  %3135 = vmatmul.mubr.msk.f32.gmra.mxu0 %vm74_vm1, %v1063_v7  ;;  %3286 = vmatmul.mubr.msk.f32.gmra.mxu1 %vm74_vm1, %v1569_v58  ;;  %v1570_v57 = vld [vmem:[%s5297_s3 + $0xb0] sm:$0xff] }
 0x11f   :  { %3137 = vmatprep.mubr.msk.f32.mxu0 %vm3372_vm2, %v3371_v0  ;;  %3288 = vmatprep.mubr.msk.f32.mxu1 %vm3372_vm2, %v3371_v0 }
 0x120   :  { %v2837_v7 = vpop.f32.mrf.mxu0  ;;  %v2988_v6 = vpop.f32.mrf.mxu1 }
 0x121   :  { %v1065_v6 = vld [vmem:[%s5296_s2 + $0xb8] sm:$0xff] }
 0x122   :  { %v4426_v58 = vpop.f32.mrf.mxu0  ;;  %v4428_v56 = vpop.f32.mrf.mxu1  ;;  %3138 = vmatmul.mubr.msk.f32.gmra.mxu0 %vm74_vm1, %v1064_v29  ;;  %3289 = vmatmul.mubr.msk.f32.gmra.mxu1 %vm74_vm1, %v1570_v57  ;;  %v1571_v7 = vld [vmem:[%s5297_s3 + $0xb8] sm:$0xff] }
 0x123   :  { %3140 = vmatprep.mubr.msk.f32.mxu0 %vm3372_vm2, %v3371_v0  ;;  %3291 = vmatprep.mubr.msk.f32.mxu1 %vm3372_vm2, %v3371_v0 }
 0x124   :  { %v2840_v29 = vpop.f32.mrf.mxu0  ;;  %v2991_v43 = vpop.f32.mrf.mxu1 }
 0x125   :  { %v1066_v43 = vld [vmem:[%s5296_s2 + $0xc0] sm:$0xff] }
 0x126   :  { %v4444_v57 = vpop.f32.mrf.mxu0  ;;  %v4446_v33 = vpop.f32.mrf.mxu1  ;;  %3141 = vmatmul.mubr.msk.f32.gmra.mxu0 %vm74_vm1, %v1065_v6  ;;  %3292 = vmatmul.mubr.msk.f32.gmra.mxu1 %vm74_vm1, %v1571_v7  ;;  %v1572_v29 = vld [vmem:[%s5297_s3 + $0xc0] sm:$0xff] }
 0x127   :  { %5350 = vst [vmem:[#allocation2_spill] sm:$0xff] %v4444_v57  ;;  %5351 = vst [vmem:[#allocation3_spill] sm:$0xff] %v4446_v33  ;;  %3143 = vmatprep.mubr.msk.f32.mxu0 %vm3372_vm2, %v3371_v0  ;;  %3294 = vmatprep.mubr.msk.f32.mxu1 %vm3372_vm2, %v3371_v0 }
 0x128   :  { %v2843_v6 = vpop.f32.mrf.mxu0  ;;  %v2994_v26 = vpop.f32.mrf.mxu1 }
 0x129   :  { %v1067_v26 = vld [vmem:[%s5296_s2 + $0xc8] sm:$0xff] }
 0x12a   :  { %v4462_v7 = vpop.f32.mrf.mxu0  ;;  %v4464_v19 = vpop.f32.mrf.mxu1  ;;  %3144 = vmatmul.mubr.msk.f32.gmra.mxu0 %vm74_vm1, %v1066_v43  ;;  %3295 = vmatmul.mubr.msk.f32.gmra.mxu1 %vm74_vm1, %v1572_v29  ;;  %v1573_v6 = vld [vmem:[%s5297_s3 + $0xc8] sm:$0xff] }
 0x12b   :  { %5352 = vst [vmem:[#allocation4_spill] sm:$0xff] %v4462_v7  ;;  %5353 = vst [vmem:[#allocation5_spill] sm:$0xff] %v4464_v19  ;;  %3146 = vmatprep.mubr.msk.f32.mxu0 %vm3372_vm2, %v3371_v0  ;;  %3297 = vmatprep.mubr.msk.f32.mxu1 %vm3372_vm2, %v3371_v0 }
 0x12c   :  { %v2846_v43 = vpop.f32.mrf.mxu0  ;;  %v2997_v12 = vpop.f32.mrf.mxu1 }
 0x12d   :  { %v1068_v12 = vld [vmem:[%s5296_s2 + $0xd0] sm:$0xff] }
 0x12e   :  { %v4480_v29 = vpop.f32.mrf.mxu0  ;;  %v4482_v5 = vpop.f32.mrf.mxu1  ;;  %3147 = vmatmul.mubr.msk.f32.gmra.mxu0 %vm74_vm1, %v1067_v26  ;;  %3298 = vmatmul.mubr.msk.f32.gmra.mxu1 %vm74_vm1, %v1573_v6  ;;  %v1574_v43 = vld [vmem:[%s5297_s3 + $0xd0] sm:$0xff] }
 0x12f   :  { %5354 = vst [vmem:[#allocation6_spill] sm:$0xff] %v4480_v29  ;;  %5355 = vst [vmem:[#allocation7_spill] sm:$0xff] %v4482_v5  ;;  %3149 = vmatprep.mubr.msk.f32.mxu0 %vm3372_vm2, %v3371_v0  ;;  %3300 = vmatprep.mubr.msk.f32.mxu1 %vm3372_vm2, %v3371_v0  ;;  %v5400_v5 = vmax.f32 %v4012_v38, %v4015_v39 }
 0x130   :  { %v2849_v26 = vpop.f32.mrf.mxu0  ;;  %v3000_v61 = vpop.f32.mrf.mxu1 }
 0x131   :  { %v1069_v61 = vld [vmem:[%s5296_s2 + $0xd8] sm:$0xff] }
 0x132   :  { %v4498_v6 = vpop.f32.mrf.mxu0  ;;  %v4500_v54 = vpop.f32.mrf.mxu1  ;;  %3150 = vmatmul.mubr.msk.f32.gmra.mxu0 %vm74_vm1, %v1068_v12  ;;  %3301 = vmatmul.mubr.msk.f32.gmra.mxu1 %vm74_vm1, %v1574_v43  ;;  %v1575_v26 = vld [vmem:[%s5297_s3 + $0xd8] sm:$0xff] }
 0x133   :  { %5356 = vst [vmem:[#allocation8_spill] sm:$0xff] %v4498_v6  ;;  %5357 = vst [vmem:[#allocation9_spill] sm:$0xff] %v4500_v54  ;;  %3152 = vmatprep.mubr.msk.f32.mxu0 %vm3372_vm2, %v3371_v0  ;;  %3303 = vmatprep.mubr.msk.f32.mxu1 %vm3372_vm2, %v3371_v0 }
 0x134   :  { %v2852_v12 = vpop.f32.mrf.mxu0  ;;  %v3003_v47 = vpop.f32.mrf.mxu1 }
 0x135   :  { %v1070_v47 = vld [vmem:[%s5296_s2 + $0xe0] sm:$0xff] }
 0x136   :  { %v4516_v43 = vpop.f32.mrf.mxu0  ;;  %v4518_v40 = vpop.f32.mrf.mxu1  ;;  %3153 = vmatmul.mubr.msk.f32.gmra.mxu0 %vm74_vm1, %v1069_v61  ;;  %3304 = vmatmul.mubr.msk.f32.gmra.mxu1 %vm74_vm1, %v1575_v26  ;;  %v1576_v12 = vld [vmem:[%s5297_s3 + $0xe0] sm:$0xff] }
 0x137   :  { %5358 = vst [vmem:[#allocation10_spill] sm:$0xff] %v4516_v43  ;;  %5359 = vst [vmem:[#allocation11_spill] sm:$0xff] %v4518_v40  ;;  %3155 = vmatprep.mubr.msk.f32.mxu0 %vm3372_vm2, %v3371_v0  ;;  %3306 = vmatprep.mubr.msk.f32.mxu1 %vm3372_vm2, %v3371_v0 }
 0x138   :  { %v2855_v61 = vpop.f32.mrf.mxu0  ;;  %v3006_v54 = vpop.f32.mrf.mxu1 }
 0x139   :  { %v1071_v54 = vld [vmem:[%s5296_s2 + $0xe8] sm:$0xff] }
 0x13a   :  { %v4534_v26 = vpop.f32.mrf.mxu0  ;;  %v4536_v6 = vpop.f32.mrf.mxu1  ;;  %3156 = vmatmul.mubr.msk.f32.gmra.mxu0 %vm74_vm1, %v1070_v47  ;;  %3307 = vmatmul.mubr.msk.f32.gmra.mxu1 %vm74_vm1, %v1576_v12  ;;  %v1577_v61 = vld [vmem:[%s5297_s3 + $0xe8] sm:$0xff] }
 0x13b   :  { %5360 = vst [vmem:[#allocation12_spill] sm:$0xff] %v4534_v26  ;;  %5361 = vst [vmem:[#allocation13_spill] sm:$0xff] %v4536_v6  ;;  %3158 = vmatprep.mubr.msk.f32.mxu0 %vm3372_vm2, %v3371_v0  ;;  %3309 = vmatprep.mubr.msk.f32.mxu1 %vm3372_vm2, %v3371_v0 }
 0x13c   :  { %v2858_v47 = vpop.f32.mrf.mxu0  ;;  %v3009_v40 = vpop.f32.mrf.mxu1 }
 0x13d   :  { %v1072_v40 = vld [vmem:[%s5296_s2 + $0xf0] sm:$0xff] }
 0x13e   :  { %v4552_v12 = vpop.f32.mrf.mxu0  ;;  %v4554_v43 = vpop.f32.mrf.mxu1  ;;  %3159 = vmatmul.mubr.msk.f32.gmra.mxu0 %vm74_vm1, %v1071_v54  ;;  %3310 = vmatmul.mubr.msk.f32.gmra.mxu1 %vm74_vm1, %v1577_v61  ;;  %v1578_v47 = vld [vmem:[%s5297_s3 + $0xf0] sm:$0xff] }
 0x13f   :  { %5362 = vst [vmem:[#allocation14_spill] sm:$0xff] %v4552_v12  ;;  %5363 = vst [vmem:[#allocation15_spill] sm:$0xff] %v4554_v43  ;;  %3161 = vmatprep.mubr.msk.f32.mxu0 %vm3372_vm2, %v3371_v0  ;;  %3312 = vmatprep.mubr.msk.f32.mxu1 %vm3372_vm2, %v3371_v0 }
 0x140   :  { %v2861_v54 = vpop.f32.mrf.mxu0  ;;  %v3012_v6 = vpop.f32.mrf.mxu1 }
 0x141   :  { %v1073_v6 = vld [vmem:[%s5296_s2 + $0xf8] sm:$0xff] }
 0x142   :  { %v4570_v61 = vpop.f32.mrf.mxu0  ;;  %v4572_v26 = vpop.f32.mrf.mxu1  ;;  %3162 = vmatmul.mubr.msk.f32.gmra.mxu0 %vm74_vm1, %v1072_v40  ;;  %3313 = vmatmul.mubr.msk.f32.gmra.mxu1 %vm74_vm1, %v1578_v47  ;;  %v1579_v54 = vld [vmem:[%s5297_s3 + $0xf8] sm:$0xff] }
 0x143   :  { %5364 = vst [vmem:[#allocation16_spill] sm:$0xff] %v4570_v61  ;;  %5365 = vst [vmem:[#allocation17_spill] sm:$0xff] %v4572_v26  ;;  %3164 = vmatprep.mubr.msk.f32.mxu0 %vm3372_vm2, %v3371_v0  ;;  %3315 = vmatprep.mubr.msk.f32.mxu1 %vm3372_vm2, %v3371_v0 }
 0x144   :  { %v2864_v40 = vpop.f32.mrf.mxu0  ;;  %v3015_v43 = vpop.f32.mrf.mxu1 }
 0x145   :  { %v1074_v43 = vld [vmem:[%s5296_s2 + $0x100] sm:$0xff] }
 0x146   :  { %v4588_v47 = vpop.f32.mrf.mxu0  ;;  %v4590_v12 = vpop.f32.mrf.mxu1  ;;  %3165 = vmatmul.mubr.msk.f32.gmra.mxu0 %vm74_vm1, %v1073_v6  ;;  %3316 = vmatmul.mubr.msk.f32.gmra.mxu1 %vm74_vm1, %v1579_v54  ;;  %v1580_v40 = vld [vmem:[%s5297_s3 + $0x100] sm:$0xff] }
 0x147   :  { %5366 = vst [vmem:[#allocation18_spill] sm:$0xff] %v4588_v47  ;;  %5367 = vst [vmem:[#allocation19_spill] sm:$0xff] %v4590_v12  ;;  %3167 = vmatprep.mubr.msk.f32.mxu0 %vm3372_vm2, %v3371_v0  ;;  %3318 = vmatprep.mubr.msk.f32.mxu1 %vm3372_vm2, %v3371_v0 }
 0x148   :  { %v2867_v6 = vpop.f32.mrf.mxu0  ;;  %v3018_v26 = vpop.f32.mrf.mxu1 }
 0x149   :  { %v1075_v26 = vld [vmem:[%s5296_s2 + $0x108] sm:$0xff] }
 0x14a   :  { %v4606_v54 = vpop.f32.mrf.mxu0  ;;  %v4608_v61 = vpop.f32.mrf.mxu1  ;;  %3168 = vmatmul.mubr.msk.f32.gmra.mxu0 %vm74_vm1, %v1074_v43  ;;  %3319 = vmatmul.mubr.msk.f32.gmra.mxu1 %vm74_vm1, %v1580_v40  ;;  %v1581_v6 = vld [vmem:[%s5297_s3 + $0x108] sm:$0xff] }
 0x14b   :  { %5368 = vst [vmem:[#allocation20_spill] sm:$0xff] %v4606_v54  ;;  %5369 = vst [vmem:[#allocation21_spill] sm:$0xff] %v4608_v61  ;;  %3170 = vmatprep.mubr.msk.f32.mxu0 %vm3372_vm2, %v3371_v0  ;;  %3321 = vmatprep.mubr.msk.f32.mxu1 %vm3372_vm2, %v3371_v0 }
 0x14c   :  { %v2870_v43 = vpop.f32.mrf.mxu0  ;;  %v3021_v12 = vpop.f32.mrf.mxu1 }
 0x14d   :  { %v1076_v12 = vld [vmem:[%s5296_s2 + $0x110] sm:$0xff] }
 0x14e   :  { %v4624_v40 = vpop.f32.mrf.mxu0  ;;  %v4626_v47 = vpop.f32.mrf.mxu1  ;;  %3171 = vmatmul.mubr.msk.f32.gmra.mxu0 %vm74_vm1, %v1075_v26  ;;  %3322 = vmatmul.mubr.msk.f32.gmra.mxu1 %vm74_vm1, %v1581_v6  ;;  %v1582_v43 = vld [vmem:[%s5297_s3 + $0x110] sm:$0xff] }
 0x14f   :  { %5370 = vst [vmem:[#allocation22_spill] sm:$0xff] %v4624_v40  ;;  %5371 = vst [vmem:[#allocation23_spill] sm:$0xff] %v4626_v47  ;;  %3173 = vmatprep.mubr.msk.f32.mxu0 %vm3372_vm2, %v3371_v0  ;;  %3324 = vmatprep.mubr.msk.f32.mxu1 %vm3372_vm2, %v3371_v0 }
 0x150   :  { %v2873_v26 = vpop.f32.mrf.mxu0  ;;  %v3024_v61 = vpop.f32.mrf.mxu1 }
 0x151   :  { %v1077_v61 = vld [vmem:[%s5296_s2 + $0x118] sm:$0xff] }
 0x152   :  { %v4642_v6 = vpop.f32.mrf.mxu0  ;;  %v4644_v54 = vpop.f32.mrf.mxu1  ;;  %3174 = vmatmul.mubr.msk.f32.gmra.mxu0 %vm74_vm1, %v1076_v12  ;;  %3325 = vmatmul.mubr.msk.f32.gmra.mxu1 %vm74_vm1, %v1582_v43  ;;  %v1583_v26 = vld [vmem:[%s5297_s3 + $0x118] sm:$0xff] }
 0x153   :  { %5372 = vst [vmem:[#allocation24_spill] sm:$0xff] %v4642_v6  ;;  %5373 = vst [vmem:[#allocation25_spill] sm:$0xff] %v4644_v54  ;;  %3176 = vmatprep.mubr.msk.f32.mxu0 %vm3372_vm2, %v3371_v0  ;;  %3327 = vmatprep.mubr.msk.f32.mxu1 %vm3372_vm2, %v3371_v0 }
 0x154   :  { %v2876_v12 = vpop.f32.mrf.mxu0  ;;  %v3027_v47 = vpop.f32.mrf.mxu1 }
 0x155   :  { %v1078_v47 = vld [vmem:[%s5296_s2 + $0x120] sm:$0xff] }
 0x156   :  { %v4660_v43 = vpop.f32.mrf.mxu0  ;;  %v4662_v40 = vpop.f32.mrf.mxu1  ;;  %3177 = vmatmul.mubr.msk.f32.gmra.mxu0 %vm74_vm1, %v1077_v61  ;;  %3328 = vmatmul.mubr.msk.f32.gmra.mxu1 %vm74_vm1, %v1583_v26  ;;  %v1584_v12 = vld [vmem:[%s5297_s3 + $0x120] sm:$0xff] }
 0x157   :  { %5374 = vst [vmem:[#allocation26_spill] sm:$0xff] %v4660_v43  ;;  %5375 = vst [vmem:[#allocation27_spill] sm:$0xff] %v4662_v40  ;;  %3179 = vmatprep.mubr.msk.f32.mxu0 %vm3372_vm2, %v3371_v0  ;;  %3330 = vmatprep.mubr.msk.f32.mxu1 %vm3372_vm2, %v3371_v0 }
 0x158   :  { %v2879_v61 = vpop.f32.mrf.mxu0  ;;  %v3030_v54 = vpop.f32.mrf.mxu1 }
 0x159   :  { %v1079_v54 = vld [vmem:[%s5296_s2 + $0x128] sm:$0xff] }
 0x15a   :  { %v4678_v26 = vpop.f32.mrf.mxu0  ;;  %v4680_v6 = vpop.f32.mrf.mxu1  ;;  %3180 = vmatmul.mubr.msk.f32.gmra.mxu0 %vm74_vm1, %v1078_v47  ;;  %3331 = vmatmul.mubr.msk.f32.gmra.mxu1 %vm74_vm1, %v1584_v12  ;;  %v1585_v61 = vld [vmem:[%s5297_s3 + $0x128] sm:$0xff] }
 0x15b   :  { %5376 = vst [vmem:[#allocation28_spill] sm:$0xff] %v4678_v26  ;;  %5377 = vst [vmem:[#allocation29_spill] sm:$0xff] %v4680_v6  ;;  %3182 = vmatprep.mubr.msk.f32.mxu0 %vm3372_vm2, %v3371_v0  ;;  %3333 = vmatprep.mubr.msk.f32.mxu1 %vm3372_vm2, %v3371_v0 }
 0x15c   :  { %v2882_v47 = vpop.f32.mrf.mxu0  ;;  %v3033_v40 = vpop.f32.mrf.mxu1 }
 0x15d   :  { %v1080_v40 = vld [vmem:[%s5296_s2 + $0x130] sm:$0xff] }
 0x15e   :  { %v4696_v12 = vpop.f32.mrf.mxu0  ;;  %v4698_v43 = vpop.f32.mrf.mxu1  ;;  %3183 = vmatmul.mubr.msk.f32.gmra.mxu0 %vm74_vm1, %v1079_v54  ;;  %3334 = vmatmul.mubr.msk.f32.gmra.mxu1 %vm74_vm1, %v1585_v61  ;;  %v1586_v47 = vld [vmem:[%s5297_s3 + $0x130] sm:$0xff] }
 0x15f   :  { %5378 = vst [vmem:[#allocation30_spill] sm:$0xff] %v4696_v12  ;;  %5379 = vst [vmem:[#allocation31_spill] sm:$0xff] %v4698_v43  ;;  %3185 = vmatprep.mubr.msk.f32.mxu0 %vm3372_vm2, %v3371_v0  ;;  %3336 = vmatprep.mubr.msk.f32.mxu1 %vm3372_vm2, %v3371_v0 }
 0x160   :  { %v2885_v54 = vpop.f32.mrf.mxu0  ;;  %v3036_v6 = vpop.f32.mrf.mxu1 }
 0x161   :  { %v1081_v6 = vld [vmem:[%s5296_s2 + $0x138] sm:$0xff] }
 0x162   :  { %v4714_v61 = vpop.f32.mrf.mxu0  ;;  %v4716_v26 = vpop.f32.mrf.mxu1  ;;  %3186 = vmatmul.mubr.msk.f32.gmra.mxu0 %vm74_vm1, %v1080_v40  ;;  %3337 = vmatmul.mubr.msk.f32.gmra.mxu1 %vm74_vm1, %v1586_v47  ;;  %v1587_v54 = vld [vmem:[%s5297_s3 + $0x138] sm:$0xff] }
 0x163   :  { %5380 = vst [vmem:[#allocation32_spill] sm:$0xff] %v4714_v61  ;;  %5381 = vst [vmem:[#allocation33_spill] sm:$0xff] %v4716_v26  ;;  %3188 = vmatprep.mubr.msk.f32.mxu0 %vm3372_vm2, %v3371_v0  ;;  %3339 = vmatprep.mubr.msk.f32.mxu1 %vm3372_vm2, %v3371_v0 }
 0x164   :  { %v2888_v40 = vpop.f32.mrf.mxu0  ;;  %v3039_v43 = vpop.f32.mrf.mxu1 }
 0x165   :  { %v1082_v43 = vld [vmem:[%s5296_s2 + $0x140] sm:$0xff] }
 0x166   :  { %v4732_v47 = vpop.f32.mrf.mxu0  ;;  %v4734_v12 = vpop.f32.mrf.mxu1  ;;  %3189 = vmatmul.mubr.msk.f32.gmra.mxu0 %vm74_vm1, %v1081_v6  ;;  %3340 = vmatmul.mubr.msk.f32.gmra.mxu1 %vm74_vm1, %v1587_v54  ;;  %v1588_v40 = vld [vmem:[%s5297_s3 + $0x140] sm:$0xff] }
 0x167   :  { %5382 = vst [vmem:[#allocation34_spill] sm:$0xff] %v4732_v47  ;;  %5383 = vst [vmem:[#allocation35_spill] sm:$0xff] %v4734_v12  ;;  %3191 = vmatprep.mubr.msk.f32.mxu0 %vm3372_vm2, %v3371_v0  ;;  %3342 = vmatprep.mubr.msk.f32.mxu1 %vm3372_vm2, %v3371_v0 }
 0x168   :  { %v2891_v6 = vpop.f32.mrf.mxu0  ;;  %v3042_v26 = vpop.f32.mrf.mxu1 }
 0x169   :  { %v1083_v26 = vld [vmem:[%s5296_s2 + $0x148] sm:$0xff] }
 0x16a   :  { %v4750_v54 = vpop.f32.mrf.mxu0  ;;  %v4752_v61 = vpop.f32.mrf.mxu1  ;;  %3192 = vmatmul.mubr.msk.f32.gmra.mxu0 %vm74_vm1, %v1082_v43  ;;  %3343 = vmatmul.mubr.msk.f32.gmra.mxu1 %vm74_vm1, %v1588_v40  ;;  %v1589_v6 = vld [vmem:[%s5297_s3 + $0x148] sm:$0xff] }
 0x16b   :  { %5384 = vst [vmem:[#allocation36_spill] sm:$0xff] %v4750_v54  ;;  %5385 = vst [vmem:[#allocation37_spill] sm:$0xff] %v4752_v61  ;;  %3194 = vmatprep.mubr.msk.f32.mxu0 %vm3372_vm2, %v3371_v0  ;;  %3345 = vmatprep.mubr.msk.f32.mxu1 %vm3372_vm2, %v3371_v0 }
 0x16c   :  { %v2894_v43 = vpop.f32.mrf.mxu0  ;;  %v3045_v12 = vpop.f32.mrf.mxu1 }
 0x16d   :  { %v1084_v12 = vld [vmem:[%s5296_s2 + $0x150] sm:$0xff] }
 0x16e   :  { %v4768_v40 = vpop.f32.mrf.mxu0  ;;  %v4770_v47 = vpop.f32.mrf.mxu1  ;;  %3195 = vmatmul.mubr.msk.f32.gmra.mxu0 %vm74_vm1, %v1083_v26  ;;  %3346 = vmatmul.mubr.msk.f32.gmra.mxu1 %vm74_vm1, %v1589_v6  ;;  %v1590_v43 = vld [vmem:[%s5297_s3 + $0x150] sm:$0xff] }
 0x16f   :  { %5386 = vst [vmem:[#allocation38_spill] sm:$0xff] %v4768_v40  ;;  %5387 = vst [vmem:[#allocation39_spill] sm:$0xff] %v4770_v47  ;;  %3197 = vmatprep.mubr.msk.f32.mxu0 %vm3372_vm2, %v3371_v0  ;;  %3348 = vmatprep.mubr.msk.f32.mxu1 %vm3372_vm2, %v3371_v0 }
 0x170   :  { %v2897_v26 = vpop.f32.mrf.mxu0  ;;  %v3048_v61 = vpop.f32.mrf.mxu1 }
 0x171   :  { %v1085_v61 = vld [vmem:[%s5296_s2 + $0x158] sm:$0xff] }
 0x172   :  { %v4786_v6 = vpop.f32.mrf.mxu0  ;;  %v4788_v54 = vpop.f32.mrf.mxu1  ;;  %3198 = vmatmul.mubr.msk.f32.gmra.mxu0 %vm74_vm1, %v1084_v12  ;;  %3349 = vmatmul.mubr.msk.f32.gmra.mxu1 %vm74_vm1, %v1590_v43  ;;  %v1591_v26 = vld [vmem:[%s5297_s3 + $0x158] sm:$0xff] }
 0x173   :  { %5388 = vst [vmem:[#allocation40_spill] sm:$0xff] %v4786_v6  ;;  %5389 = vst [vmem:[#allocation41_spill] sm:$0xff] %v4788_v54  ;;  %3200 = vmatprep.mubr.msk.f32.mxu0 %vm3372_vm2, %v3371_v0  ;;  %3351 = vmatprep.mubr.msk.f32.mxu1 %vm3372_vm2, %v3371_v0 }
 0x174   :  { %v2900_v12 = vpop.f32.mrf.mxu0  ;;  %v3051_v47 = vpop.f32.mrf.mxu1 }
 0x175   :  { %v1086_v47 = vld [vmem:[%s5296_s2 + $0x160] sm:$0xff] }
 0x176   :  { %v4804_v43 = vpop.f32.mrf.mxu0  ;;  %v4806_v40 = vpop.f32.mrf.mxu1  ;;  %3201 = vmatmul.mubr.msk.f32.gmra.mxu0 %vm74_vm1, %v1085_v61  ;;  %3352 = vmatmul.mubr.msk.f32.gmra.mxu1 %vm74_vm1, %v1591_v26  ;;  %v1592_v12 = vld [vmem:[%s5297_s3 + $0x160] sm:$0xff] }
 0x177   :  { %5390 = vst [vmem:[#allocation42_spill] sm:$0xff] %v4804_v43  ;;  %5391 = vst [vmem:[#allocation43_spill] sm:$0xff] %v4806_v40  ;;  %3203 = vmatprep.mubr.msk.f32.mxu0 %vm3372_vm2, %v3371_v0  ;;  %3354 = vmatprep.mubr.msk.f32.mxu1 %vm3372_vm2, %v3371_v0 }
 0x178   :  { %v2903_v61 = vpop.f32.mrf.mxu0  ;;  %v3054_v54 = vpop.f32.mrf.mxu1 }
 0x179   :  { %v1087_v54 = vld [vmem:[%s5296_s2 + $0x168] sm:$0xff] }
 0x17a   :  { %v4822_v26 = vpop.f32.mrf.mxu0  ;;  %v4824_v6 = vpop.f32.mrf.mxu1  ;;  %3204 = vmatmul.mubr.msk.f32.gmra.mxu0 %vm74_vm1, %v1086_v47  ;;  %3355 = vmatmul.mubr.msk.f32.gmra.mxu1 %vm74_vm1, %v1592_v12  ;;  %v1593_v61 = vld [vmem:[%s5297_s3 + $0x168] sm:$0xff] }
 0x17b   :  { %5392 = vst [vmem:[#allocation44_spill] sm:$0xff] %v4822_v26  ;;  %5393 = vst [vmem:[#allocation45_spill] sm:$0xff] %v4824_v6  ;;  %3206 = vmatprep.mubr.msk.f32.mxu0 %vm3372_vm2, %v3371_v0  ;;  %3357 = vmatprep.mubr.msk.f32.mxu1 %vm3372_vm2, %v3371_v0 }
 0x17c   :  { %v2906_v47 = vpop.f32.mrf.mxu0  ;;  %v3057_v40 = vpop.f32.mrf.mxu1 }
 0x17d   :  { %v1088_v40 = vld [vmem:[%s5296_s2 + $0x170] sm:$0xff] }
 0x17e   :  { %v4840_v12 = vpop.f32.mrf.mxu0  ;;  %v4842_v43 = vpop.f32.mrf.mxu1  ;;  %3207 = vmatmul.mubr.msk.f32.gmra.mxu0 %vm74_vm1, %v1087_v54  ;;  %3358 = vmatmul.mubr.msk.f32.gmra.mxu1 %vm74_vm1, %v1593_v61  ;;  %v1594_v47 = vld [vmem:[%s5297_s3 + $0x170] sm:$0xff] }
 0x17f   :  { %5394 = vst [vmem:[#allocation46_spill] sm:$0xff] %v4840_v12  ;;  %5395 = vst [vmem:[#allocation47_spill] sm:$0xff] %v4842_v43  ;;  %3209 = vmatprep.mubr.msk.f32.mxu0 %vm3372_vm2, %v3371_v0  ;;  %3360 = vmatprep.mubr.msk.f32.mxu1 %vm3372_vm2, %v3371_v0 }
 0x180   :  { %v2909_v54 = vpop.f32.mrf.mxu0  ;;  %v3060_v6 = vpop.f32.mrf.mxu1 }
 0x181   :  { %v1089_v6 = vld [vmem:[%s5296_s2 + $0x178] sm:$0xff] }
 0x182   :  { %v4858_v61 = vpop.f32.mrf.mxu0  ;;  %v4860_v26 = vpop.f32.mrf.mxu1  ;;  %3210 = vmatmul.mubr.msk.f32.gmra.mxu0 %vm74_vm1, %v1088_v40  ;;  %3361 = vmatmul.mubr.msk.f32.gmra.mxu1 %vm74_vm1, %v1594_v47  ;;  %v1595_v54 = vld [vmem:[%s5297_s3 + $0x178] sm:$0xff] }
 0x183   :  { %5396 = vst [vmem:[#allocation48_spill] sm:$0xff] %v4858_v61  ;;  %5397 = vst [vmem:[#allocation49_spill] sm:$0xff] %v4860_v26  ;;  %3212 = vmatprep.mubr.msk.f32.mxu0 %vm3372_vm2, %v3371_v0  ;;  %3363 = vmatprep.mubr.msk.f32.mxu1 %vm3372_vm2, %v3371_v0 }
 0x184   :  { %v2912_v40 = vpop.f32.mrf.mxu0  ;;  %v3063_v43 = vpop.f32.mrf.mxu1 }
 0x185   :  { %v1090_v43 = vld [vmem:[%s5296_s2 + $0x180] sm:$0xff] }
 0x186   :  { %v4876_v47 = vpop.f32.mrf.mxu0  ;;  %v4878_v12 = vpop.f32.mrf.mxu1  ;;  %3213 = vmatmul.mubr.msk.f32.gmra.mxu0 %vm74_vm1, %v1089_v6  ;;  %3364 = vmatmul.mubr.msk.f32.gmra.mxu1 %vm74_vm1, %v1595_v54  ;;  %v1596_v40 = vld [vmem:[%s5297_s3 + $0x180] sm:$0xff] }
 0x187   :  { %5398 = vst [vmem:[#allocation50_spill] sm:$0xff] %v4876_v47  ;;  %5399 = vst [vmem:[#allocation51_spill] sm:$0xff] %v4878_v12  ;;  %3215 = vmatprep.mubr.msk.f32.mxu0 %vm3372_vm2, %v3371_v0  ;;  %3366 = vmatprep.mubr.msk.f32.mxu1 %vm3372_vm2, %v3371_v0  ;;  %v4899_v0 = vld [vmem:[%s5298_s5] ss:$0 sm:$0xff] }
 0x188   :  { %v2915_v6 = vpop.f32.mrf.mxu0  ;;  %v3066_v26 = vpop.f32.mrf.mxu1 }
 0x18a   :  { %v1304_v54 = vpop.f32.mrf.mxu0  ;;  %3216 = vmatmul.mubr.msk.f32.gmra.mxu0 %vm74_vm1, %v1090_v43  ;;  %v1810_v34 = vpop.f32.mrf.mxu1  ;;  %3367 = vmatmul.mubr.msk.f32.gmra.mxu1 %vm74_vm1, %v1596_v40 }
 0x18b   :  { %v2103_v12 = vmax.f32 %v1304_v54, %v1810_v34  ;;  %v5401_v54 = vmax.f32 %v4030_v45, %v4032_v46 }
 0x18c   :  { %v3073_v47 = vpop.f32.mrf.mxu0  ;;  %v3224_v61 = vpop.f32.mrf.mxu1 }
 0x18d   :  { %v2152_v29 = vmax.f32 %v5400_v5, %v2103_v12 }
 0x18e   :  { %v1309_v6 = vpop.f32.mrf.mxu0  ;;  %v1815_v26 = vpop.f32.mrf.mxu1 }
 0x18f   :  { %v2208_v19 = vadd.f32 %v4899_v0, %v2152_v29  ;;  %v2104_v43 = vmax.f32 %v1309_v6, %v1815_v26 }
 0x190   :  { %v3076_v7 = vpop.f32.mrf.mxu0  ;;  %v3227_v40 = vpop.f32.mrf.mxu1 }
 0x191   :  { %v2257_v34 = vmax.f32 %v2208_v19, 0.0  ;;  %v2153_v33 = vmax.f32 %v5401_v54, %v2104_v43  ;;  %v5402_v19 = vmax.f32 %v4048_v52, %v4050_v53  ;;  %v5403_v43 = vmax.f32 %v4066_v59, %v4068_v60 }
 0x192   :  { %v1314_v57 = vpop.f32.mrf.mxu0  ;;  %v1820_v47 = vpop.f32.mrf.mxu1 }
 0x193   :  { %2307 = vst.msk [vmem:[%s5299_s6] sm:$0xff] %vm2306_vm3, %v2257_v34  ;;  %v2209_v38 = vadd.f32 %v4899_v0, %v2153_v33  ;;  %v2105_v39 = vmax.f32 %v1314_v57, %v1820_v47 }
 0x194   :  { %v3079_v5 = vpop.f32.mrf.mxu0  ;;  %v3230_v29 = vpop.f32.mrf.mxu1 }
 0x195   :  { %v2258_v12 = vmax.f32 %v2209_v38, 0.0  ;;  %v2154_v7 = vmax.f32 %v5402_v19, %v2105_v39  ;;  %v5404_v5 = vmax.f32 %v4084_v3, %v4086_v4 }
 0x196   :  { %v1319_v61 = vpop.f32.mrf.mxu0  ;;  %v1825_v45 = vpop.f32.mrf.mxu1 }
 0x197   :  { %2308 = vst.msk [vmem:[%s5299_s6 + $0x8] sm:$0xff] %vm2306_vm3, %v2258_v12  ;;  %v2210_v46 = vadd.f32 %v4899_v0, %v2154_v7  ;;  %v2106_v6 = vmax.f32 %v1319_v61, %v1825_v45 }
 0x198   :  { %v3082_v26 = vpop.f32.mrf.mxu0  ;;  %v3233_v33 = vpop.f32.mrf.mxu1 }
 0x199   :  { %v2259_v57 = vmax.f32 %v2210_v46, 0.0  ;;  %v2155_v40 = vmax.f32 %v5403_v43, %v2106_v6  ;;  %v5405_v46 = vmax.f32 %v4102_v10, %v4104_v11 }
 0x19a   :  { %v1324_v34 = vpop.f32.mrf.mxu0  ;;  %v1830_v52 = vpop.f32.mrf.mxu1 }
 0x19b   :  { %2309 = vst.msk [vmem:[%s5299_s6 + $0x10] sm:$0xff] %vm2306_vm3, %v2259_v57  ;;  %v2211_v53 = vadd.f32 %v4899_v0, %v2155_v40  ;;  %v2107_v54 = vmax.f32 %v1324_v34, %v1830_v52  ;;  %v5406_v34 = vmax.f32 %v4120_v17, %v4122_v18 }
 0x19c   :  { %v3085_v47 = vpop.f32.mrf.mxu0  ;;  %v3236_v38 = vpop.f32.mrf.mxu1 }
 0x19d   :  { %v2260_v39 = vmax.f32 %v2211_v53, 0.0  ;;  %v2156_v29 = vmax.f32 %v5404_v5, %v2107_v54  ;;  %v5407_v5 = vmax.f32 %v4138_v24, %v4140_v25 }
 0x19e   :  { %v1329_v12 = vpop.f32.mrf.mxu0  ;;  %v1835_v59 = vpop.f32.mrf.mxu1 }
 0x19f   :  { %2310 = vst.msk [vmem:[%s5299_s6 + $0x18] sm:$0xff] %vm2306_vm3, %v2260_v39  ;;  %v2212_v60 = vadd.f32 %v4899_v0, %v2156_v29  ;;  %v2108_v19 = vmax.f32 %v1329_v12, %v1835_v59 }
 0x1a0   :  { %v3088_v7 = vpop.f32.mrf.mxu0  ;;  %v3239_v61 = vpop.f32.mrf.mxu1 }
 0x1a1   :  { %v2261_v45 = vmax.f32 %v2212_v60, 0.0  ;;  %v2157_v6 = vmax.f32 %v5405_v46, %v2108_v19  ;;  %v5408_v61 = vmax.f32 %v4156_v31, %v4158_v32 }
 0x1a2   :  { %v1334_v26 = vpop.f32.mrf.mxu0  ;;  %v1840_v3 = vpop.f32.mrf.mxu1 }
 0x1a3   :  { %2311 = vst.msk [vmem:[%s5299_s6 + $0x20] sm:$0xff] %vm2306_vm3, %v2261_v45  ;;  %v2213_v4 = vadd.f32 %v4899_v0, %v2157_v6  ;;  %v2109_v33 = vmax.f32 %v1334_v26, %v1840_v3 }
 0x1a4   :  { %v3091_v57 = vpop.f32.mrf.mxu0  ;;  %v3242_v43 = vpop.f32.mrf.mxu1 }
 0x1a5   :  { %v2262_v40 = vmax.f32 %v2213_v4, 0.0  ;;  %v2158_v52 = vmax.f32 %v5406_v34, %v2109_v33  ;;  %v5409_v33 = vmax.f32 %v4174_v41, %v4176_v42 }
 0x1a6   :  { %v1339_v53 = vpop.f32.mrf.mxu0  ;;  %v1845_v10 = vpop.f32.mrf.mxu1 }
 0x1a7   :  { %2312 = vst.msk [vmem:[%s5299_s6 + $0x28] sm:$0xff] %vm2306_vm3, %v2262_v40  ;;  %v2214_v11 = vadd.f32 %v4899_v0, %v2158_v52  ;;  %v2110_v54 = vmax.f32 %v1339_v53, %v1845_v10  ;;  %v5410_v10 = vmax.f32 %v4192_v51, %v4194_v55 }
 0x1a8   :  { %v3094_v47 = vpop.f32.mrf.mxu0  ;;  %v3245_v38 = vpop.f32.mrf.mxu1 }
 0x1a9   :  { %v2263_v39 = vmax.f32 %v2214_v11, 0.0  ;;  %v2159_v29 = vmax.f32 %v5407_v5, %v2110_v54 }
 0x1aa   :  { %v1344_v12 = vpop.f32.mrf.mxu0  ;;  %v1850_v17 = vpop.f32.mrf.mxu1 }
 0x1ab   :  { %2313 = vst.msk [vmem:[%s5299_s6 + $0x30] sm:$0xff] %vm2306_vm3, %v2263_v39  ;;  %v2215_v18 = vadd.f32 %v4899_v0, %v2159_v29  ;;  %v2111_v59 = vmax.f32 %v1344_v12, %v1850_v17  ;;  %v5411_v29 = vmax.f32 %v4210_v1, %v4212_v2 }
 0x1ac   :  { %v3097_v60 = vpop.f32.mrf.mxu0  ;;  %v3248_v19 = vpop.f32.mrf.mxu1 }
 0x1ad   :  { %v2264_v7 = vmax.f32 %v2215_v18, 0.0  ;;  %v2160_v45 = vmax.f32 %v5408_v61, %v2111_v59 }
 0x1ae   :  { %v1349_v46 = vpop.f32.mrf.mxu0  ;;  %v1855_v24 = vpop.f32.mrf.mxu1 }
 0x1af   :  { %2314 = vst.msk [vmem:[%s5299_s6 + $0x38] sm:$0xff] %vm2306_vm3, %v2264_v7  ;;  %v2216_v25 = vadd.f32 %v4899_v0, %v2160_v45  ;;  %v2112_v6 = vmax.f32 %v1349_v46, %v1855_v24  ;;  %v5412_v7 = vmax.f32 %v4228_v14, %v4230_v15 }
 0x1b0   :  { %v3100_v26 = vpop.f32.mrf.mxu0  ;;  %v3251_v3 = vpop.f32.mrf.mxu1 }
 0x1b1   :  { %v2265_v4 = vmax.f32 %v2216_v25, 0.0  ;;  %v2161_v57 = vmax.f32 %v5409_v33, %v2112_v6  ;;  %v5413_v26 = vmax.f32 %v4246_v27, %v4248_v28 }
 0x1b2   :  { %v1354_v43 = vpop.f32.mrf.mxu0  ;;  %v1860_v31 = vpop.f32.mrf.mxu1 }
 0x1b3   :  { %2315 = vst.msk [vmem:[%s5299_s6 + $0x40] sm:$0xff] %vm2306_vm3, %v2265_v4  ;;  %v2217_v32 = vadd.f32 %v4899_v0, %v2161_v57  ;;  %v2113_v40 = vmax.f32 %v1354_v43, %v1860_v31 }
 0x1b4   :  { %v3103_v34 = vpop.f32.mrf.mxu0  ;;  %v3254_v52 = vpop.f32.mrf.mxu1 }
 0x1b5   :  { %v2266_v53 = vmax.f32 %v2217_v32, 0.0  ;;  %v2162_v11 = vmax.f32 %v5410_v10, %v2113_v40  ;;  %v5414_v32 = vmax.f32 %v4264_v37, %v4266_v44 }
 0x1b6   :  { %v1359_v54 = vpop.f32.mrf.mxu0  ;;  %v1865_v41 = vpop.f32.mrf.mxu1 }
 0x1b7   :  { %2316 = vst.msk [vmem:[%s5299_s6 + $0x48] sm:$0xff] %vm2306_vm3, %v2266_v53  ;;  %v2218_v42 = vadd.f32 %v4899_v0, %v2162_v11  ;;  %v2114_v47 = vmax.f32 %v1359_v54, %v1865_v41  ;;  %v5415_v54 = vmax.f32 %v4282_v62, %v4284_v63 }
 0x1b8   :  { %v3106_v38 = vpop.f32.mrf.mxu0  ;;  %v3257_v39 = vpop.f32.mrf.mxu1 }
 0x1b9   :  { %v2267_v5 = vmax.f32 %v2218_v42, 0.0  ;;  %v2163_v12 = vmax.f32 %v5411_v29, %v2114_v47  ;;  %v5416_v29 = vmax.f32 %v4300_v21, %v4302_v22 }
 0x1ba   :  { %v1364_v17 = vpop.f32.mrf.mxu0  ;;  %v1870_v51 = vpop.f32.mrf.mxu1 }
 0x1bb   :  { %2317 = vst.msk [vmem:[%s5299_s6 + $0x50] sm:$0xff] %vm2306_vm3, %v2267_v5  ;;  %v2219_v55 = vadd.f32 %v4899_v0, %v2163_v12  ;;  %v2115_v18 = vmax.f32 %v1364_v17, %v1870_v51 }
 0x1bc   :  { %v3109_v59 = vpop.f32.mrf.mxu0  ;;  %v3260_v60 = vpop.f32.mrf.mxu1 }
 0x1bd   :  { %v2268_v19 = vmax.f32 %v2219_v55, 0.0  ;;  %v2164_v61 = vmax.f32 %v5412_v7, %v2115_v18  ;;  %v5417_v60 = vmax.f32 %v4318_v49, %v4320_v50 }
 0x1be   :  { %v1369_v45 = vpop.f32.mrf.mxu0  ;;  %v1875_v1 = vpop.f32.mrf.mxu1 }
 0x1bf   :  { %2318 = vst.msk [vmem:[%s5299_s6 + $0x58] sm:$0xff] %vm2306_vm3, %v2268_v19  ;;  %v2220_v2 = vadd.f32 %v4899_v0, %v2164_v61  ;;  %v2116_v46 = vmax.f32 %v1369_v45, %v1875_v1 }
 0x1c0   :  { %v3112_v24 = vpop.f32.mrf.mxu0  ;;  %v3263_v25 = vpop.f32.mrf.mxu1 }
 0x1c1   :  { %v2269_v6 = vmax.f32 %v2220_v2, 0.0  ;;  %v2165_v3 = vmax.f32 %v5413_v26, %v2116_v46  ;;  %v5418_v46 = vmax.f32 %v4336_v20, %v4338_v30 }
 0x1c2   :  { %v1374_v4 = vpop.f32.mrf.mxu0  ;;  %v1880_v14 = vpop.f32.mrf.mxu1 }
 0x1c3   :  { %2319 = vst.msk [vmem:[%s5299_s6 + $0x60] sm:$0xff] %vm2306_vm3, %v2269_v6  ;;  %v2221_v15 = vadd.f32 %v4899_v0, %v2165_v3  ;;  %v2117_v33 = vmax.f32 %v1374_v4, %v1880_v14  ;;  %v5419_v14 = vmax.f32 %v4354_v8, %v4356_v13 }
 0x1c4   :  { %v3115_v57 = vpop.f32.mrf.mxu0  ;;  %v3266_v43 = vpop.f32.mrf.mxu1 }
 0x1c5   :  { %v2270_v31 = vmax.f32 %v2221_v15, 0.0  ;;  %v2166_v40 = vmax.f32 %v5414_v32, %v2117_v33 }
 0x1c6   :  { %v1379_v34 = vpop.f32.mrf.mxu0  ;;  %v1885_v27 = vpop.f32.mrf.mxu1 }
 0x1c7   :  { %2320 = vst.msk [vmem:[%s5299_s6 + $0x68] sm:$0xff] %vm2306_vm3, %v2270_v31  ;;  %v2222_v28 = vadd.f32 %v4899_v0, %v2166_v40  ;;  %v2118_v52 = vmax.f32 %v1379_v34, %v1885_v27  ;;  %v5420_v40 = vmax.f32 %v4372_v36, %v4374_v23 }
 0x1c8   :  { %v3118_v53 = vpop.f32.mrf.mxu0  ;;  %v3269_v10 = vpop.f32.mrf.mxu1 }
 0x1c9   :  { %v2271_v11 = vmax.f32 %v2222_v28, 0.0  ;;  %v2167_v41 = vmax.f32 %v5415_v54, %v2118_v52 }
 0x1ca   :  { %v1384_v42 = vpop.f32.mrf.mxu0  ;;  %v1890_v37 = vpop.f32.mrf.mxu1 }
 0x1cb   :  { %2321 = vst.msk [vmem:[%s5299_s6 + $0x70] sm:$0xff] %vm2306_vm3, %v2271_v11  ;;  %v2223_v44 = vadd.f32 %v4899_v0, %v2167_v41  ;;  %v2119_v47 = vmax.f32 %v1384_v42, %v1890_v37  ;;  %v5421_v11 = vmax.f32 %v4390_v9, %v4392_v48 }
 0x1cc   :  { %v3121_v38 = vpop.f32.mrf.mxu0  ;;  %v3272_v39 = vpop.f32.mrf.mxu1 }
 0x1cd   :  { %v2272_v5 = vmax.f32 %v2223_v44, 0.0  ;;  %v2168_v12 = vmax.f32 %v5416_v29, %v2119_v47  ;;  %v5422_v38 = vmax.f32 %v4408_v35, %v4410_v16 }
 0x1ce   :  { %v1389_v17 = vpop.f32.mrf.mxu0  ;;  %v1895_v62 = vpop.f32.mrf.mxu1 }
 0x1cf   :  { %2322 = vst.msk [vmem:[%s5299_s6 + $0x78] sm:$0xff] %vm2306_vm3, %v2272_v5  ;;  %v2224_v63 = vadd.f32 %v4899_v0, %v2168_v12  ;;  %v2120_v51 = vmax.f32 %v1389_v17, %v1895_v62 }
 0x1d0   :  { %v3124_v55 = vpop.f32.mrf.mxu0  ;;  %v3275_v18 = vpop.f32.mrf.mxu1 }
 0x1d1   :  { %v2273_v59 = vmax.f32 %v2224_v63, 0.0  ;;  %v2169_v19 = vmax.f32 %v5417_v60, %v2120_v51  ;;  %v5423_v63 = vmax.f32 %v4426_v58, %v4428_v56 }
 0x1d2   :  { %v1394_v7 = vpop.f32.mrf.mxu0  ;;  %v1900_v21 = vpop.f32.mrf.mxu1 }
 0x1d3   :  { %2323 = vst.msk [vmem:[%s5299_s6 + $0x80] sm:$0xff] %vm2306_vm3, %v2273_v59  ;;  %v2225_v22 = vadd.f32 %v4899_v0, %v2169_v19  ;;  %v2121_v61 = vmax.f32 %v1394_v7, %v1900_v21  ;;  %v5424_v7 = vld [vmem:[#allocation2_spill] sm:$0xff]  ;;  %v5425_v21 = vld [vmem:[#allocation3_spill] sm:$0xff] }
 0x1d4   :  { %v3127_v45 = vpop.f32.mrf.mxu0  ;;  %v3278_v1 = vpop.f32.mrf.mxu1 }
 0x1d5   :  { %v2274_v2 = vmax.f32 %v2225_v22, 0.0  ;;  %v2170_v24 = vmax.f32 %v5418_v46, %v2121_v61  ;;  %v5426_v22 = vmax.f32 %v5424_v7, %v5425_v21 }
 0x1d6   :  { %v1399_v25 = vpop.f32.mrf.mxu0  ;;  %v1905_v49 = vpop.f32.mrf.mxu1 }
 0x1d7   :  { %2324 = vst.msk [vmem:[%s5299_s6 + $0x88] sm:$0xff] %vm2306_vm3, %v2274_v2  ;;  %v2226_v50 = vadd.f32 %v4899_v0, %v2170_v24  ;;  %v2122_v6 = vmax.f32 %v1399_v25, %v1905_v49  ;;  %v5427_v25 = vld [vmem:[#allocation4_spill] sm:$0xff]  ;;  %v5428_v49 = vld [vmem:[#allocation5_spill] sm:$0xff] }
 0x1d8   :  { %v3130_v26 = vpop.f32.mrf.mxu0  ;;  %v3281_v3 = vpop.f32.mrf.mxu1 }
 0x1d9   :  { %v2275_v4 = vmax.f32 %v2226_v50, 0.0  ;;  %v2171_v15 = vmax.f32 %v5419_v14, %v2122_v6  ;;  %v5429_v50 = vmax.f32 %v5427_v25, %v5428_v49 }
 0x1da   :  { %v1404_v33 = vpop.f32.mrf.mxu0  ;;  %v1910_v20 = vpop.f32.mrf.mxu1 }
 0x1db   :  { %2325 = vst.msk [vmem:[%s5299_s6 + $0x90] sm:$0xff] %vm2306_vm3, %v2275_v4  ;;  %v2227_v30 = vadd.f32 %v4899_v0, %v2171_v15  ;;  %v2123_v57 = vmax.f32 %v1404_v33, %v1910_v20 }
 0x1dc   :  { %v3133_v43 = vpop.f32.mrf.mxu0  ;;  %v3284_v31 = vpop.f32.mrf.mxu1 }
 0x1dd   :  { %v2276_v32 = vmax.f32 %v2227_v30, 0.0  ;;  %v2172_v34 = vmax.f32 %v5420_v40, %v2123_v57  ;;  %v5430_v30 = vld [vmem:[#allocation6_spill] sm:$0xff]  ;;  %v5431_v57 = vld [vmem:[#allocation7_spill] sm:$0xff] }
 0x1de   :  { %v1409_v27 = vpop.f32.mrf.mxu0  ;;  %v1915_v8 = vpop.f32.mrf.mxu1  ;;  %v5432_v43 = vmax.f32 %v5430_v30, %v5431_v57 }
 0x1df   :  { %2326 = vst.msk [vmem:[%s5299_s6 + $0x98] sm:$0xff] %vm2306_vm3, %v2276_v32  ;;  %v2228_v13 = vadd.f32 %v4899_v0, %v2172_v34  ;;  %v2124_v28 = vmax.f32 %v1409_v27, %v1915_v8 }
 0x1e0   :  { %v3136_v52 = vpop.f32.mrf.mxu0  ;;  %v3287_v53 = vpop.f32.mrf.mxu1 }
 0x1e1   :  { %v2277_v10 = vmax.f32 %v2228_v13, 0.0  ;;  %v2173_v54 = vmax.f32 %v5421_v11, %v2124_v28  ;;  %v5433_v52 = vld [vmem:[#allocation8_spill] sm:$0xff]  ;;  %v5434_v53 = vld [vmem:[#allocation9_spill] sm:$0xff] }
 0x1e2   :  { %v1414_v41 = vpop.f32.mrf.mxu0  ;;  %v1920_v23 = vpop.f32.mrf.mxu1 }
 0x1e3   :  { %2327 = vst.msk [vmem:[%s5299_s6 + $0xa0] sm:$0xff] %vm2306_vm3, %v2277_v10  ;;  %v2229_v36 = vadd.f32 %v4899_v0, %v2173_v54  ;;  %v2125_v42 = vmax.f32 %v1414_v41, %v1920_v23  ;;  %v5435_v10 = vmax.f32 %v5433_v52, %v5434_v53 }
 0x1e4   :  { %v3139_v37 = vpop.f32.mrf.mxu0  ;;  %v3290_v44 = vpop.f32.mrf.mxu1 }
 0x1e5   :  { %v2278_v47 = vmax.f32 %v2229_v36, 0.0  ;;  %v2174_v39 = vmax.f32 %v5422_v38, %v2125_v42  ;;  %v5437_v38 = vld [vmem:[#allocation11_spill] sm:$0xff] }
 0x1e6   :  { %v1419_v5 = vpop.f32.mrf.mxu0  ;;  %v1925_v48 = vpop.f32.mrf.mxu1 }
 0x1e7   :  { %2328 = vst.msk [vmem:[%s5299_s6 + $0xa8] sm:$0xff] %vm2306_vm3, %v2278_v47  ;;  %v2230_v9 = vadd.f32 %v4899_v0, %v2174_v39  ;;  %v2126_v29 = vmax.f32 %v1419_v5, %v1925_v48  ;;  %v5436_v47 = vld [vmem:[#allocation10_spill] sm:$0xff] }
 0x1e8   :  { %v3142_v12 = vpop.f32.mrf.mxu0  ;;  %v3293_v17 = vpop.f32.mrf.mxu1  ;;  %v5438_v39 = vmax.f32 %v5436_v47, %v5437_v38 }
 0x1e9   :  { %v2279_v62 = vmax.f32 %v2230_v9, 0.0  ;;  %v2175_v51 = vmax.f32 %v5423_v63, %v2126_v29 }
 0x1ea   :  { %v1424_v55 = vpop.f32.mrf.mxu0  ;;  %v1930_v16 = vpop.f32.mrf.mxu1 }
 0x1eb   :  { %2329 = vst.msk [vmem:[%s5299_s6 + $0xb0] sm:$0xff] %vm2306_vm3, %v2279_v62  ;;  %v2231_v35 = vadd.f32 %v4899_v0, %v2175_v51  ;;  %v2127_v18 = vmax.f32 %v1424_v55, %v1930_v16  ;;  %v5439_v51 = vld [vmem:[#allocation12_spill] sm:$0xff]  ;;  %v5440_v55 = vld [vmem:[#allocation13_spill] sm:$0xff] }
 0x1ec   :  { %v3145_v59 = vpop.f32.mrf.mxu0  ;;  %v3296_v60 = vpop.f32.mrf.mxu1  ;;  %v5441_v16 = vmax.f32 %v5439_v51, %v5440_v55 }
 0x1ed   :  { %v2280_v19 = vmax.f32 %v2231_v35, 0.0  ;;  %v2176_v61 = vmax.f32 %v5426_v22, %v2127_v18 }
 0x1ee   :  { %v1429_v45 = vpop.f32.mrf.mxu0  ;;  %v1935_v56 = vpop.f32.mrf.mxu1 }
 0x1ef   :  { %2330 = vst.msk [vmem:[%s5299_s6 + $0xb8] sm:$0xff] %vm2306_vm3, %v2280_v19  ;;  %v2232_v58 = vadd.f32 %v4899_v0, %v2176_v61  ;;  %v2128_v1 = vmax.f32 %v1429_v45, %v1935_v56  ;;  %v5442_v61 = vld [vmem:[#allocation14_spill] sm:$0xff]  ;;  %v5443_v45 = vld [vmem:[#allocation15_spill] sm:$0xff] }
 0x1f0   :  { %v3148_v2 = vpop.f32.mrf.mxu0  ;;  %v3299_v46 = vpop.f32.mrf.mxu1  ;;  %v5444_v56 = vmax.f32 %v5442_v61, %v5443_v45 }
 0x1f1   :  { %v2281_v24 = vmax.f32 %v2232_v58, 0.0  ;;  %v2177_v6 = vmax.f32 %v5429_v50, %v2128_v1 }
 0x1f2   :  { %v1434_v26 = vpop.f32.mrf.mxu0  ;;  %v1940_v3 = vpop.f32.mrf.mxu1 }
 0x1f3   :  { %2331 = vst.msk [vmem:[%s5299_s6 + $0xc0] sm:$0xff] %vm2306_vm3, %v2281_v24  ;;  %v2233_v4 = vadd.f32 %v4899_v0, %v2177_v6  ;;  %v2129_v14 = vmax.f32 %v1434_v26, %v1940_v3  ;;  %v5445_v6 = vld [vmem:[#allocation16_spill] sm:$0xff]  ;;  %v5446_v26 = vld [vmem:[#allocation17_spill] sm:$0xff] }
 0x1f4   :  { %v3151_v15 = vpop.f32.mrf.mxu0  ;;  %v3302_v33 = vpop.f32.mrf.mxu1  ;;  %v5447_v3 = vmax.f32 %v5445_v6, %v5446_v26 }
 0x1f5   :  { %v2282_v20 = vmax.f32 %v2233_v4, 0.0  ;;  %v2178_v31 = vmax.f32 %v5432_v43, %v2129_v14 }
 0x1f6   :  { %v1439_v32 = vpop.f32.mrf.mxu0  ;;  %v1945_v40 = vpop.f32.mrf.mxu1 }
 0x1f7   :  { %2332 = vst.msk [vmem:[%s5299_s6 + $0xc8] sm:$0xff] %vm2306_vm3, %v2282_v20  ;;  %v2234_v34 = vadd.f32 %v4899_v0, %v2178_v31  ;;  %v2130_v27 = vmax.f32 %v1439_v32, %v1945_v40  ;;  %v5448_v31 = vld [vmem:[#allocation18_spill] sm:$0xff]  ;;  %v5449_v32 = vld [vmem:[#allocation19_spill] sm:$0xff] }
 0x1f8   :  { %v3154_v8 = vpop.f32.mrf.mxu0  ;;  %v3305_v13 = vpop.f32.mrf.mxu1  ;;  %v5450_v40 = vmax.f32 %v5448_v31, %v5449_v32 }
 0x1f9   :  { %v2283_v28 = vmax.f32 %v2234_v34, 0.0  ;;  %v2179_v11 = vmax.f32 %v5435_v10, %v2130_v27 }
 0x1fa   :  { %v1444_v54 = vpop.f32.mrf.mxu0  ;;  %v1950_v41 = vpop.f32.mrf.mxu1 }
 0x1fb   :  { %2333 = vst.msk [vmem:[%s5299_s6 + $0xd0] sm:$0xff] %vm2306_vm3, %v2283_v28  ;;  %v2235_v23 = vadd.f32 %v4899_v0, %v2179_v11  ;;  %v2131_v36 = vmax.f32 %v1444_v54, %v1950_v41  ;;  %v5451_v11 = vld [vmem:[#allocation20_spill] sm:$0xff]  ;;  %v5452_v54 = vld [vmem:[#allocation21_spill] sm:$0xff] }
 0x1fc   :  { %v3157_v42 = vpop.f32.mrf.mxu0  ;;  %v3308_v37 = vpop.f32.mrf.mxu1  ;;  %v5453_v41 = vmax.f32 %v5451_v11, %v5452_v54 }
 0x1fd   :  { %v2284_v44 = vmax.f32 %v2235_v23, 0.0  ;;  %v2180_v5 = vmax.f32 %v5438_v39, %v2131_v36 }
 0x1fe   :  { %v1449_v48 = vpop.f32.mrf.mxu0  ;;  %v1955_v9 = vpop.f32.mrf.mxu1 }
 0x1ff   :  { %2334 = vst.msk [vmem:[%s5299_s6 + $0xd8] sm:$0xff] %vm2306_vm3, %v2284_v44  ;;  %v2236_v29 = vadd.f32 %v4899_v0, %v2180_v5  ;;  %v2132_v12 = vmax.f32 %v1449_v48, %v1955_v9  ;;  %v5454_v5 = vld [vmem:[#allocation22_spill] sm:$0xff]  ;;  %v5455_v48 = vld [vmem:[#allocation23_spill] sm:$0xff] }
 0x200   :  { %v3160_v17 = vpop.f32.mrf.mxu0  ;;  %v3311_v62 = vpop.f32.mrf.mxu1  ;;  %v5456_v9 = vmax.f32 %v5454_v5, %v5455_v48 }
 0x201   :  { %v2285_v63 = vmax.f32 %v2236_v29, 0.0  ;;  %v2181_v35 = vmax.f32 %v5441_v16, %v2132_v12 }
 0x202   :  { %v1454_v18 = vpop.f32.mrf.mxu0  ;;  %v1960_v59 = vpop.f32.mrf.mxu1 }
 0x203   :  { %2335 = vst.msk [vmem:[%s5299_s6 + $0xe0] sm:$0xff] %vm2306_vm3, %v2285_v63  ;;  %v2237_v60 = vadd.f32 %v4899_v0, %v2181_v35  ;;  %v2133_v19 = vmax.f32 %v1454_v18, %v1960_v59  ;;  %v5457_v35 = vld [vmem:[#allocation24_spill] sm:$0xff]  ;;  %v5458_v18 = vld [vmem:[#allocation25_spill] sm:$0xff] }
 0x204   :  { %v3163_v7 = vpop.f32.mrf.mxu0  ;;  %v3314_v21 = vpop.f32.mrf.mxu1  ;;  %v5459_v59 = vmax.f32 %v5457_v35, %v5458_v18 }
 0x205   :  { %v2286_v22 = vmax.f32 %v2237_v60, 0.0  ;;  %v2182_v58 = vmax.f32 %v5444_v56, %v2133_v19 }
 0x206   :  { %v1459_v1 = vpop.f32.mrf.mxu0  ;;  %v1965_v2 = vpop.f32.mrf.mxu1 }
 0x207   :  { %2336 = vst.msk [vmem:[%s5299_s6 + $0xe8] sm:$0xff] %vm2306_vm3, %v2286_v22  ;;  %v2238_v46 = vadd.f32 %v4899_v0, %v2182_v58  ;;  %v2134_v24 = vmax.f32 %v1459_v1, %v1965_v2  ;;  %v5460_v58 = vld [vmem:[#allocation26_spill] sm:$0xff]  ;;  %v5461_v1 = vld [vmem:[#allocation27_spill] sm:$0xff] }
 0x208   :  { %v3166_v25 = vpop.f32.mrf.mxu0  ;;  %v3317_v49 = vpop.f32.mrf.mxu1  ;;  %v5462_v2 = vmax.f32 %v5460_v58, %v5461_v1 }
 0x209   :  { %v2287_v50 = vmax.f32 %v2238_v46, 0.0  ;;  %v2183_v4 = vmax.f32 %v5447_v3, %v2134_v24 }
 0x20a   :  { %v1464_v14 = vpop.f32.mrf.mxu0  ;;  %v1970_v15 = vpop.f32.mrf.mxu1 }
 0x20b   :  { %2337 = vst.msk [vmem:[%s5299_s6 + $0xf0] sm:$0xff] %vm2306_vm3, %v2287_v50  ;;  %v2239_v33 = vadd.f32 %v4899_v0, %v2183_v4  ;;  %v2135_v20 = vmax.f32 %v1464_v14, %v1970_v15  ;;  %v5463_v4 = vld [vmem:[#allocation28_spill] sm:$0xff]  ;;  %v5464_v14 = vld [vmem:[#allocation29_spill] sm:$0xff] }
 0x20c   :  { %v3169_v30 = vpop.f32.mrf.mxu0  ;;  %v3320_v57 = vpop.f32.mrf.mxu1  ;;  %v5465_v15 = vmax.f32 %v5463_v4, %v5464_v14 }
 0x20d   :  { %v2288_v43 = vmax.f32 %v2239_v33, 0.0  ;;  %v2184_v34 = vmax.f32 %v5450_v40, %v2135_v20 }
 0x20e   :  { %v1469_v27 = vpop.f32.mrf.mxu0  ;;  %v1975_v8 = vpop.f32.mrf.mxu1 }
 0x20f   :  { %2338 = vst.msk [vmem:[%s5299_s6 + $0xf8] sm:$0xff] %vm2306_vm3, %v2288_v43  ;;  %v2240_v13 = vadd.f32 %v4899_v0, %v2184_v34  ;;  %v2136_v28 = vmax.f32 %v1469_v27, %v1975_v8  ;;  %v5466_v34 = vld [vmem:[#allocation30_spill] sm:$0xff]  ;;  %v5467_v27 = vld [vmem:[#allocation31_spill] sm:$0xff] }
 0x210   :  { %v3172_v52 = vpop.f32.mrf.mxu0  ;;  %v3323_v53 = vpop.f32.mrf.mxu1  ;;  %v5468_v8 = vmax.f32 %v5466_v34, %v5467_v27 }
 0x211   :  { %v2289_v10 = vmax.f32 %v2240_v13, 0.0  ;;  %v2185_v23 = vmax.f32 %v5453_v41, %v2136_v28 }
 0x212   :  { %v1474_v36 = vpop.f32.mrf.mxu0  ;;  %v1980_v42 = vpop.f32.mrf.mxu1 }
 0x213   :  { %2339 = vst.msk [vmem:[%s5299_s6 + $0x100] sm:$0xff] %vm2306_vm3, %v2289_v10  ;;  %v2241_v37 = vadd.f32 %v4899_v0, %v2185_v23  ;;  %v2137_v44 = vmax.f32 %v1474_v36, %v1980_v42  ;;  %v5469_v23 = vld [vmem:[#allocation32_spill] sm:$0xff]  ;;  %v5470_v36 = vld [vmem:[#allocation33_spill] sm:$0xff] }
 0x214   :  { %v3175_v47 = vpop.f32.mrf.mxu0  ;;  %v3326_v38 = vpop.f32.mrf.mxu1  ;;  %v5471_v42 = vmax.f32 %v5469_v23, %v5470_v36 }
 0x215   :  { %v2290_v39 = vmax.f32 %v2241_v37, 0.0  ;;  %v2186_v29 = vmax.f32 %v5456_v9, %v2137_v44 }
 0x216   :  { %v1479_v12 = vpop.f32.mrf.mxu0  ;;  %v1985_v17 = vpop.f32.mrf.mxu1 }
 0x217   :  { %2340 = vst.msk [vmem:[%s5299_s6 + $0x108] sm:$0xff] %vm2306_vm3, %v2290_v39  ;;  %v2242_v62 = vadd.f32 %v4899_v0, %v2186_v29  ;;  %v2138_v63 = vmax.f32 %v1479_v12, %v1985_v17  ;;  %v5472_v29 = vld [vmem:[#allocation34_spill] sm:$0xff]  ;;  %v5473_v12 = vld [vmem:[#allocation35_spill] sm:$0xff] }
 0x218   :  { %v3178_v51 = vpop.f32.mrf.mxu0  ;;  %v3329_v55 = vpop.f32.mrf.mxu1  ;;  %v5474_v17 = vmax.f32 %v5472_v29, %v5473_v12 }
 0x219   :  { %v2291_v16 = vmax.f32 %v2242_v62, 0.0  ;;  %v2187_v60 = vmax.f32 %v5459_v59, %v2138_v63 }
 0x21a   :  { %v1484_v19 = vpop.f32.mrf.mxu0  ;;  %v1990_v7 = vpop.f32.mrf.mxu1 }
 0x21b   :  { %2341 = vst.msk [vmem:[%s5299_s6 + $0x110] sm:$0xff] %vm2306_vm3, %v2291_v16  ;;  %v2243_v21 = vadd.f32 %v4899_v0, %v2187_v60  ;;  %v2139_v22 = vmax.f32 %v1484_v19, %v1990_v7  ;;  %v5475_v60 = vld [vmem:[#allocation36_spill] sm:$0xff]  ;;  %v5476_v19 = vld [vmem:[#allocation37_spill] sm:$0xff] }
 0x21c   :  { %v3181_v61 = vpop.f32.mrf.mxu0  ;;  %v3332_v45 = vpop.f32.mrf.mxu1  ;;  %v5477_v7 = vmax.f32 %v5475_v60, %v5476_v19 }
 0x21d   :  { %v2292_v56 = vmax.f32 %v2243_v21, 0.0  ;;  %v2188_v46 = vmax.f32 %v5462_v2, %v2139_v22 }
 0x21e   :  { %v1489_v24 = vpop.f32.mrf.mxu0  ;;  %v1995_v25 = vpop.f32.mrf.mxu1 }
 0x21f   :  { %2342 = vst.msk [vmem:[%s5299_s6 + $0x118] sm:$0xff] %vm2306_vm3, %v2292_v56  ;;  %v2244_v49 = vadd.f32 %v4899_v0, %v2188_v46  ;;  %v2140_v50 = vmax.f32 %v1489_v24, %v1995_v25  ;;  %v5478_v46 = vld [vmem:[#allocation38_spill] sm:$0xff]  ;;  %v5479_v24 = vld [vmem:[#allocation39_spill] sm:$0xff] }
 0x220   :  { %v3184_v6 = vpop.f32.mrf.mxu0  ;;  %v3335_v26 = vpop.f32.mrf.mxu1  ;;  %v5480_v25 = vmax.f32 %v5478_v46, %v5479_v24 }
 0x221   :  { %v2293_v3 = vmax.f32 %v2244_v49, 0.0  ;;  %v2189_v33 = vmax.f32 %v5465_v15, %v2140_v50 }
 0x222   :  { %v1494_v20 = vpop.f32.mrf.mxu0  ;;  %v2000_v30 = vpop.f32.mrf.mxu1 }
 0x223   :  { %2343 = vst.msk [vmem:[%s5299_s6 + $0x120] sm:$0xff] %vm2306_vm3, %v2293_v3  ;;  %v2245_v57 = vadd.f32 %v4899_v0, %v2189_v33  ;;  %v2141_v43 = vmax.f32 %v1494_v20, %v2000_v30  ;;  %v5481_v33 = vld [vmem:[#allocation40_spill] sm:$0xff]  ;;  %v5482_v20 = vld [vmem:[#allocation41_spill] sm:$0xff] }
 0x224   :  { %v3187_v31 = vpop.f32.mrf.mxu0  ;;  %v3338_v32 = vpop.f32.mrf.mxu1  ;;  %v5483_v30 = vmax.f32 %v5481_v33, %v5482_v20 }
 0x225   :  { %v2294_v40 = vmax.f32 %v2245_v57, 0.0  ;;  %v2190_v13 = vmax.f32 %v5468_v8, %v2141_v43 }
 0x226   :  { %v1499_v28 = vpop.f32.mrf.mxu0  ;;  %v2005_v52 = vpop.f32.mrf.mxu1 }
 0x227   :  { %2344 = vst.msk [vmem:[%s5299_s6 + $0x128] sm:$0xff] %vm2306_vm3, %v2294_v40  ;;  %v2246_v53 = vadd.f32 %v4899_v0, %v2190_v13  ;;  %v2142_v10 = vmax.f32 %v1499_v28, %v2005_v52  ;;  %v5484_v13 = vld [vmem:[#allocation42_spill] sm:$0xff]  ;;  %v5485_v28 = vld [vmem:[#allocation43_spill] sm:$0xff] }
 0x228   :  { %v3190_v11 = vpop.f32.mrf.mxu0  ;;  %v3341_v54 = vpop.f32.mrf.mxu1  ;;  %v5486_v52 = vmax.f32 %v5484_v13, %v5485_v28 }
 0x229   :  { %v2295_v41 = vmax.f32 %v2246_v53, 0.0  ;;  %v2191_v37 = vmax.f32 %v5471_v42, %v2142_v10 }
 0x22a   :  { %v1504_v44 = vpop.f32.mrf.mxu0  ;;  %v2010_v47 = vpop.f32.mrf.mxu1 }
 0x22b   :  { %2345 = vst.msk [vmem:[%s5299_s6 + $0x130] sm:$0xff] %vm2306_vm3, %v2295_v41  ;;  %v2247_v38 = vadd.f32 %v4899_v0, %v2191_v37  ;;  %v2143_v39 = vmax.f32 %v1504_v44, %v2010_v47  ;;  %v5487_v37 = vld [vmem:[#allocation44_spill] sm:$0xff]  ;;  %v5488_v44 = vld [vmem:[#allocation45_spill] sm:$0xff] }
 0x22c   :  { %v3193_v5 = vpop.f32.mrf.mxu0  ;;  %v3344_v48 = vpop.f32.mrf.mxu1  ;;  %v5489_v47 = vmax.f32 %v5487_v37, %v5488_v44 }
 0x22d   :  { %v2296_v9 = vmax.f32 %v2247_v38, 0.0  ;;  %v2192_v62 = vmax.f32 %v5474_v17, %v2143_v39 }
 0x22e   :  { %v1509_v63 = vpop.f32.mrf.mxu0  ;;  %v2015_v51 = vpop.f32.mrf.mxu1 }
 0x22f   :  { %2346 = vst.msk [vmem:[%s5299_s6 + $0x138] sm:$0xff] %vm2306_vm3, %v2296_v9  ;;  %v2248_v55 = vadd.f32 %v4899_v0, %v2192_v62  ;;  %v2144_v16 = vmax.f32 %v1509_v63, %v2015_v51  ;;  %v5490_v62 = vld [vmem:[#allocation46_spill] sm:$0xff]  ;;  %v5491_v63 = vld [vmem:[#allocation47_spill] sm:$0xff] }
 0x230   :  { %v3196_v35 = vpop.f32.mrf.mxu0  ;;  %v3347_v18 = vpop.f32.mrf.mxu1  ;;  %v5492_v51 = vmax.f32 %v5490_v62, %v5491_v63 }
 0x231   :  { %v2297_v59 = vmax.f32 %v2248_v55, 0.0  ;;  %v2193_v21 = vmax.f32 %v5477_v7, %v2144_v16 }
 0x232   :  { %v1514_v22 = vpop.f32.mrf.mxu0  ;;  %v2020_v61 = vpop.f32.mrf.mxu1 }
 0x233   :  { %2347 = vst.msk [vmem:[%s5299_s6 + $0x140] sm:$0xff] %vm2306_vm3, %v2297_v59  ;;  %v2249_v45 = vadd.f32 %v4899_v0, %v2193_v21  ;;  %v2145_v56 = vmax.f32 %v1514_v22, %v2020_v61  ;;  %v5493_v21 = vld [vmem:[#allocation48_spill] sm:$0xff]  ;;  %v5494_v22 = vld [vmem:[#allocation49_spill] sm:$0xff] }
 0x234   :  { %v3199_v58 = vpop.f32.mrf.mxu0  ;;  %v3350_v1 = vpop.f32.mrf.mxu1  ;;  %v5495_v61 = vmax.f32 %v5493_v21, %v5494_v22 }
 0x235   :  { %v2298_v2 = vmax.f32 %v2249_v45, 0.0  ;;  %v2194_v49 = vmax.f32 %v5480_v25, %v2145_v56 }
 0x236   :  { %v1519_v50 = vpop.f32.mrf.mxu0  ;;  %v2025_v6 = vpop.f32.mrf.mxu1 }
 0x237   :  { %2348 = vst.msk [vmem:[%s5299_s6 + $0x148] sm:$0xff] %vm2306_vm3, %v2298_v2  ;;  %v2250_v26 = vadd.f32 %v4899_v0, %v2194_v49  ;;  %v2146_v3 = vmax.f32 %v1519_v50, %v2025_v6  ;;  %v5496_v49 = vld [vmem:[#allocation50_spill] sm:$0xff]  ;;  %v5497_v50 = vld [vmem:[#allocation51_spill] sm:$0xff] }
 0x238   :  { %v3202_v4 = vpop.f32.mrf.mxu0  ;;  %v3353_v14 = vpop.f32.mrf.mxu1  ;;  %v5498_v6 = vmax.f32 %v5496_v49, %v5497_v50 }
 0x239   :  { %v2299_v15 = vmax.f32 %v2250_v26, 0.0  ;;  %v2195_v57 = vmax.f32 %v5483_v30, %v2146_v3 }
 0x23a   :  { %v1524_v43 = vpop.f32.mrf.mxu0  ;;  %v2030_v31 = vpop.f32.mrf.mxu1 }
 0x23b   :  { %2349 = vst.msk [vmem:[%s5299_s6 + $0x150] sm:$0xff] %vm2306_vm3, %v2299_v15  ;;  %v2251_v32 = vadd.f32 %v4899_v0, %v2195_v57  ;;  %v2147_v40 = vmax.f32 %v1524_v43, %v2030_v31 }
 0x23c   :  { %v3205_v34 = vpop.f32.mrf.mxu0  ;;  %v3356_v27 = vpop.f32.mrf.mxu1 }
 0x23d   :  { %v2300_v8 = vmax.f32 %v2251_v32, 0.0  ;;  %v2196_v53 = vmax.f32 %v5486_v52, %v2147_v40 }
 0x23e   :  { %v1529_v10 = vpop.f32.mrf.mxu0  ;;  %v2035_v11 = vpop.f32.mrf.mxu1 }
 0x23f   :  { %2350 = vst.msk [vmem:[%s5299_s6 + $0x158] sm:$0xff] %vm2306_vm3, %v2300_v8  ;;  %v2252_v54 = vadd.f32 %v4899_v0, %v2196_v53  ;;  %v2148_v41 = vmax.f32 %v1529_v10, %v2035_v11 }
 0x240   :  { %v3208_v23 = vpop.f32.mrf.mxu0  ;;  %v3359_v36 = vpop.f32.mrf.mxu1 }
 0x241   :  { %v2301_v42 = vmax.f32 %v2252_v54, 0.0  ;;  %v2197_v38 = vmax.f32 %v5489_v47, %v2148_v41 }
 0x242   :  { %v1534_v39 = vpop.f32.mrf.mxu0  ;;  %v2040_v5 = vpop.f32.mrf.mxu1 }
 0x243   :  { %2351 = vst.msk [vmem:[%s5299_s6 + $0x160] sm:$0xff] %vm2306_vm3, %v2301_v42  ;;  %v2253_v48 = vadd.f32 %v4899_v0, %v2197_v38  ;;  %v2149_v9 = vmax.f32 %v1534_v39, %v2040_v5 }
 0x244   :  { %v3211_v29 = vpop.f32.mrf.mxu0  ;;  %v3362_v12 = vpop.f32.mrf.mxu1 }
 0x245   :  { %v2302_v17 = vmax.f32 %v2253_v48, 0.0  ;;  %v2198_v55 = vmax.f32 %v5492_v51, %v2149_v9 }
 0x246   :  { %v1539_v16 = vpop.f32.mrf.mxu0  ;;  %v2045_v35 = vpop.f32.mrf.mxu1 }
 0x247   :  { %2352 = vst.msk [vmem:[%s5299_s6 + $0x168] sm:$0xff] %vm2306_vm3, %v2302_v17  ;;  %v2254_v18 = vadd.f32 %v4899_v0, %v2198_v55  ;;  %v2150_v59 = vmax.f32 %v1539_v16, %v2045_v35 }
 0x248   :  { %v3214_v60 = vpop.f32.mrf.mxu0  ;;  %v3365_v19 = vpop.f32.mrf.mxu1 }
 0x249   :  { %v2303_v7 = vmax.f32 %v2254_v18, 0.0  ;;  %v2199_v45 = vmax.f32 %v5495_v61, %v2150_v59 }
 0x24a   :  { %v1544_v56 = vpop.f32.mrf.mxu0  ;;  %v2050_v58 = vpop.f32.mrf.mxu1 }
 0x24b   :  { %2353 = vst.msk [vmem:[%s5299_s6 + $0x170] sm:$0xff] %vm2306_vm3, %v2303_v7  ;;  %v2255_v1 = vadd.f32 %v4899_v0, %v2199_v45  ;;  %v2151_v2 = vmax.f32 %v1544_v56, %v2050_v58 }
 0x24c   :  { %v3217_v46 = vpop.f32.mrf.mxu0  ;;  %v3368_v24 = vpop.f32.mrf.mxu1 }
 0x24d   :  { %v2304_v25 = vmax.f32 %v2255_v1, 0.0  ;;  %v2200_v26 = vmax.f32 %v5498_v6, %v2151_v2 }
 0x24f   :  { %2354 = vst.msk [vmem:[%s5299_s6 + $0x178] sm:$0xff] %vm2306_vm3, %v2304_v25  ;;  %v2256_v3 = vadd.f32 %v4899_v0, %v2200_v26 }
 0x251   :  { %v2305_v4 = vmax.f32 %v2256_v3, 0.0 }
 0x253   :  { %2355 = vst.msk [vmem:[%s5299_s6 + $0x180] sm:$0xff] %vm2306_vm3, %v2305_v4 }

// kernel: autoencoder_minist_forward.8
= control target key start
LH: loop header
LB: loop body
LE: loop exit
PB: predicated region body
PF: predicated region fallthrough
CT: control target
= control target key end

     0   :  { %v980_v0 = vmov 0.0   ;;  %vm112_vm0 = vcmask 1043456   ;;  %vm72_vm1 = vcmask 424960   ;;  %vm903_vm2 = vcmask 162816   ;;  %s1848_s4 = inlined_call_operand.vmem [shape: f32[180,20], index: 4, kind: input, shape index: {}]   ;;  %s1849_s0 = inlined_call_operand.vmem [shape: f32[98,180], index: 0, kind: input, shape index: {}]   ;;  %s1850_s1 = inlined_call_operand.vmem [shape: f32[98,180], index: 1, kind: input, shape index: {}]   ;;  %s1851_s2 = inlined_call_operand.vmem [shape: f32[98,180], index: 2, kind: input, shape index: {}]   ;;  %s1852_s3 = inlined_call_operand.vmem [shape: f32[98,180], index: 3, kind: input, shape index: {}]   ;;  %s1853_s5 = inlined_call_operand.vmem [shape: f32[1,20], index: 5, kind: input, shape index: {}]   ;;  %s1854_s6 = inlined_call_operand.vmem [shape: f32[98,20], index: 6, kind: output, shape index: {}]  }
   0x1   :  { %116 = vmatprep.subr.mxu0 %v980_v0  ;;  %311 = vmatprep.subr.mxu1 %v980_v0  ;;  %v1021_v1 = vld [vmem:[%s1848_s4 + $0x78] sm:$0xff]  ;;  %v1026_v2 = vld [vmem:[%s1848_s4 + $0x70] sm:$0xff]  ;;  %v1035_v3 = vld [vmem:[%s1848_s4 + $0x68] sm:$0xff]  ;;  %vm916_vm3 = vcmask 156672  }
   0x2   :  { %117 = vmatpush1.msra.mxu0 %v1021_v1  ;;  %312 = vmatpush1.msra.mxu1 %v1021_v1  ;;  %v1044_v4 = vld [vmem:[%s1848_s4 + $0x60] sm:$0xff]  ;;  %v1053_v5 = vld [vmem:[%s1848_s4 + $0x58] sm:$0xff]  ;;  %v1062_v6 = vld [vmem:[%s1848_s4 + $0x50] sm:$0xff] }
   0x3   :  { %118 = vmatprep.subr.mxu0 %v980_v0  ;;  %313 = vmatprep.subr.mxu1 %v980_v0  ;;  %v1071_v7 = vld [vmem:[%s1848_s4 + $0x48] sm:$0xff]  ;;  %v1080_v8 = vld [vmem:[%s1848_s4 + $0x40] sm:$0xff]  ;;  %v1089_v9 = vld [vmem:[%s1848_s4 + $0x38] sm:$0xff] }
   0x4   :  { %119 = vmatpush1.msra.mxu0 %v1026_v2  ;;  %314 = vmatpush1.msra.mxu1 %v1026_v2  ;;  %v1098_v10 = vld [vmem:[%s1848_s4 + $0x30] sm:$0xff]  ;;  %v1107_v11 = vld [vmem:[%s1848_s4 + $0x28] sm:$0xff]  ;;  %v1116_v12 = vld [vmem:[%s1848_s4 + $0x20] sm:$0xff] }
   0x5   :  { %120 = vmatprep.subr.mxu0 %v980_v0  ;;  %315 = vmatprep.subr.mxu1 %v980_v0  ;;  %v1125_v13 = vld [vmem:[%s1848_s4 + $0x18] sm:$0xff]  ;;  %v1134_v14 = vld [vmem:[%s1848_s4 + $0x10] sm:$0xff]  ;;  %v1143_v15 = vld [vmem:[%s1848_s4 + $0x8] sm:$0xff] }
   0x6   :  { %121 = vmatpush1.msra.mxu0 %v1035_v3  ;;  %316 = vmatpush1.msra.mxu1 %v1035_v3  ;;  %v1152_v16 = vld [vmem:[%s1848_s4] sm:$0xff]  ;;  %v1161_v17 = vld [vmem:[%s1848_s4 + $0xb0] sm:$0xf]  ;;  %v1170_v18 = vld [vmem:[%s1848_s4 + $0xa8] sm:$0xff] }
   0x7   :  { %122 = vmatprep.subr.mxu0 %v980_v0  ;;  %317 = vmatprep.subr.mxu1 %v980_v0  ;;  %v1181_v19 = vld [vmem:[%s1848_s4 + $0xa0] sm:$0xff]  ;;  %v1190_v20 = vld [vmem:[%s1848_s4 + $0x98] sm:$0xff]  ;;  %v1199_v21 = vld [vmem:[%s1848_s4 + $0x90] sm:$0xff] }
   0x8   :  { %123 = vmatpush1.msra.mxu0 %v1044_v4  ;;  %318 = vmatpush1.msra.mxu1 %v1044_v4  ;;  %v1208_v22 = vld [vmem:[%s1848_s4 + $0x88] sm:$0xff]  ;;  %v1217_v23 = vld [vmem:[%s1848_s4 + $0x80] sm:$0xff]  ;;  %v49_v28 = vld [vmem:[%s1849_s0 + $0x18] sm:$0xff] }
   0x9   :  { %124 = vmatprep.subr.mxu0 %v980_v0  ;;  %319 = vmatprep.subr.mxu1 %v980_v0  ;;  %v47_v24 = vld [vmem:[%s1849_s0 + $0x8] sm:$0xff]  ;;  %v46_v26 = vld [vmem:[%s1849_s0] sm:$0xff]  ;;  %v249_v29 = vld [vmem:[%s1850_s1 + $0x18] sm:$0xff] }
   0xa   :  { %125 = vmatpush1.msra.mxu0 %v1053_v5  ;;  %320 = vmatpush1.msra.mxu1 %v1053_v5  ;;  %v247_v25 = vld [vmem:[%s1850_s1 + $0x8] sm:$0xff]  ;;  %v246_v27 = vld [vmem:[%s1850_s1] sm:$0xff]  ;;  %v48_v30 = vld [vmem:[%s1849_s0 + $0x10] sm:$0xff] }
   0xb   :  { %126 = vmatprep.subr.mxu0 %v980_v0  ;;  %321 = vmatprep.subr.mxu1 %v980_v0  ;;  %v248_v31 = vld [vmem:[%s1850_s1 + $0x10] sm:$0xff]  ;;  %v51_v32 = vld [vmem:[%s1849_s0 + $0x28] sm:$0xff]  ;;  %v50_v34 = vld [vmem:[%s1849_s0 + $0x20] sm:$0xff] }
   0xc   :  { %127 = vmatpush1.msra.mxu0 %v1062_v6  ;;  %322 = vmatpush1.msra.mxu1 %v1062_v6  ;;  %v251_v33 = vld [vmem:[%s1850_s1 + $0x28] sm:$0xff]  ;;  %v250_v35 = vld [vmem:[%s1850_s1 + $0x20] sm:$0xff]  ;;  %v53_v36 = vld [vmem:[%s1849_s0 + $0x38] sm:$0xff] }
   0xd   :  { %128 = vmatprep.subr.mxu0 %v980_v0  ;;  %323 = vmatprep.subr.mxu1 %v980_v0  ;;  %v253_v37 = vld [vmem:[%s1850_s1 + $0x38] sm:$0xff]  ;;  %v52_v38 = vld [vmem:[%s1849_s0 + $0x30] sm:$0xff]  ;;  %v55_v40 = vld [vmem:[%s1849_s0 + $0x48] sm:$0xff] }
   0xe   :  { %129 = vmatpush1.msra.mxu0 %v1071_v7  ;;  %324 = vmatpush1.msra.mxu1 %v1071_v7  ;;  %v252_v39 = vld [vmem:[%s1850_s1 + $0x30] sm:$0xff]  ;;  %v255_v41 = vld [vmem:[%s1850_s1 + $0x48] sm:$0xff]  ;;  %v54_v42 = vld [vmem:[%s1849_s0 + $0x40] sm:$0xff] }
   0xf   :  { %130 = vmatprep.subr.mxu0 %v980_v0  ;;  %325 = vmatprep.subr.mxu1 %v980_v0  ;;  %v254_v43 = vld [vmem:[%s1850_s1 + $0x40] sm:$0xff]  ;;  %v57_v44 = vld [vmem:[%s1849_s0 + $0x58] sm:$0xff]  ;;  %v56_v46 = vld [vmem:[%s1849_s0 + $0x50] sm:$0xff] }
  0x10   :  { %131 = vmatpush1.msra.mxu0 %v1080_v8  ;;  %326 = vmatpush1.msra.mxu1 %v1080_v8  ;;  %v257_v45 = vld [vmem:[%s1850_s1 + $0x58] sm:$0xff]  ;;  %v256_v47 = vld [vmem:[%s1850_s1 + $0x50] sm:$0xff]  ;;  %v59_v48 = vld [vmem:[%s1849_s0 + $0x68] sm:$0xff] }
  0x11   :  { %132 = vmatprep.subr.mxu0 %v980_v0  ;;  %327 = vmatprep.subr.mxu1 %v980_v0  ;;  %v259_v49 = vld [vmem:[%s1850_s1 + $0x68] sm:$0xff]  ;;  %v58_v50 = vld [vmem:[%s1849_s0 + $0x60] sm:$0xff]  ;;  %v61_v52 = vld [vmem:[%s1849_s0 + $0x78] sm:$0xff] }
  0x12   :  { %133 = vmatpush1.msra.mxu0 %v1089_v9  ;;  %328 = vmatpush1.msra.mxu1 %v1089_v9  ;;  %v258_v51 = vld [vmem:[%s1850_s1 + $0x60] sm:$0xff]  ;;  %v261_v53 = vld [vmem:[%s1850_s1 + $0x78] sm:$0xff]  ;;  %v60_v54 = vld [vmem:[%s1849_s0 + $0x70] sm:$0xff] }
  0x13   :  { %134 = vmatprep.subr.mxu0 %v980_v0  ;;  %329 = vmatprep.subr.mxu1 %v980_v0  ;;  %v260_v55 = vld [vmem:[%s1850_s1 + $0x70] sm:$0xff]  ;;  %v63_v56 = vld [vmem:[%s1849_s0 + $0x88] sm:$0xff]  ;;  %v62_v58 = vld [vmem:[%s1849_s0 + $0x80] sm:$0xff] }
  0x14   :  { %135 = vmatpush1.msra.mxu0 %v1098_v10  ;;  %330 = vmatpush1.msra.mxu1 %v1098_v10  ;;  %v263_v57 = vld [vmem:[%s1850_s1 + $0x88] sm:$0xff]  ;;  %v262_v59 = vld [vmem:[%s1850_s1 + $0x80] sm:$0xff]  ;;  %v65_v60 = vld [vmem:[%s1849_s0 + $0x98] sm:$0xff] }
  0x15   :  { %136 = vmatprep.subr.mxu0 %v980_v0  ;;  %331 = vmatprep.subr.mxu1 %v980_v0  ;;  %v265_v61 = vld [vmem:[%s1850_s1 + $0x98] sm:$0xff]  ;;  %v64_v62 = vld [vmem:[%s1849_s0 + $0x90] sm:$0xff] }
  0x16   :  { %137 = vmatpush1.msra.mxu0 %v1107_v11  ;;  %332 = vmatpush1.msra.mxu1 %v1107_v11  ;;  %v264_v63 = vld [vmem:[%s1850_s1 + $0x90] sm:$0xff] }
  0x17   :  { %138 = vmatprep.subr.mxu0 %v980_v0  ;;  %333 = vmatprep.subr.mxu1 %v980_v0 }
  0x18   :  { %139 = vmatpush1.msra.mxu0 %v1116_v12  ;;  %334 = vmatpush1.msra.mxu1 %v1116_v12 }
  0x19   :  { %140 = vmatprep.subr.mxu0 %v980_v0  ;;  %335 = vmatprep.subr.mxu1 %v980_v0 }
  0x1a   :  { %141 = vmatpush1.msra.mxu0 %v1125_v13  ;;  %336 = vmatpush1.msra.mxu1 %v1125_v13 }
  0x1b   :  { %142 = vmatprep.subr.mxu0 %v980_v0  ;;  %337 = vmatprep.subr.mxu1 %v980_v0 }
  0x1c   :  { %143 = vmatpush1.msra.mxu0 %v1134_v14  ;;  %338 = vmatpush1.msra.mxu1 %v1134_v14 }
  0x1d   :  { %144 = vmatprep.subr.mxu0 %v980_v0  ;;  %339 = vmatprep.subr.mxu1 %v980_v0 }
  0x1e   :  { %145 = vmatpush1.msra.mxu0 %v1143_v15  ;;  %340 = vmatpush1.msra.mxu1 %v1143_v15 }
  0x1f   :  { %146 = vmatprep.subr.mxu0 %v980_v0  ;;  %341 = vmatprep.subr.mxu1 %v980_v0 }
  0x20   :  { %147 = vmatpush1.msra.mxu0 %v1152_v16  ;;  %342 = vmatpush1.msra.mxu1 %v1152_v16 }
  0x21   :  { %166 = vmatprep.subr.mxu0 %v980_v0  ;;  %361 = vmatprep.subr.mxu1 %v980_v0 }
  0x22   :  { %922 = vmatpush2.msk.msra.mxu0 %vm112_vm0, %v1161_v17  ;;  %936 = vmatpush2.msk.msra.mxu1 %vm112_vm0, %v1161_v17 }
  0x23   :  { %168 = vmatprep.subr.mxu0 %v980_v0  ;;  %363 = vmatprep.subr.mxu1 %v980_v0 }
  0x24   :  { %169 = vmatpush2.msra.mxu0 %v1170_v18  ;;  %364 = vmatpush2.msra.mxu1 %v1170_v18 }
  0x25   :  { %170 = vmatprep.subr.mxu0 %v980_v0  ;;  %365 = vmatprep.subr.mxu1 %v980_v0 }
  0x26   :  { %171 = vmatpush2.msra.mxu0 %v1181_v19  ;;  %366 = vmatpush2.msra.mxu1 %v1181_v19 }
  0x27   :  { %172 = vmatprep.subr.mxu0 %v980_v0  ;;  %367 = vmatprep.subr.mxu1 %v980_v0 }
  0x28   :  { %173 = vmatpush2.msra.mxu0 %v1190_v20  ;;  %368 = vmatpush2.msra.mxu1 %v1190_v20 }
  0x29   :  { %174 = vmatprep.subr.mxu0 %v980_v0  ;;  %369 = vmatprep.subr.mxu1 %v980_v0 }
  0x2a   :  { %175 = vmatpush2.msra.mxu0 %v1199_v21  ;;  %370 = vmatpush2.msra.mxu1 %v1199_v21 }
  0x2b   :  { %176 = vmatprep.subr.mxu0 %v980_v0  ;;  %371 = vmatprep.subr.mxu1 %v980_v0 }
  0x2c   :  { %177 = vmatpush2.msra.mxu0 %v1208_v22  ;;  %372 = vmatpush2.msra.mxu1 %v1208_v22 }
  0x2d   :  { %178 = vmatprep.subr.mxu0 %v980_v0  ;;  %373 = vmatprep.subr.mxu1 %v980_v0 }
  0x2e   :  { %179 = vmatpush2.msra.mxu0 %v1217_v23  ;;  %923 = vmatprep.mubr.msk.f32.mxu0 %vm72_vm1, %v47_v24  ;;  %v448_v24 = vld [vmem:[%s1851_s2 + $0x38] sm:$0xff] }
  0x2f   :  { %374 = vmatpush2.msra.mxu1 %v1217_v23  ;;  %937 = vmatprep.mubr.msk.f32.mxu1 %vm72_vm1, %v247_v25  ;;  %v643_v25 = vld [vmem:[%s1852_s3 + $0x38] sm:$0xff] }
  0x30   :  { %181 = vmatmul.mubr.f32.vlgmr.msra.gmra.mxu0 %v46_v26  ;;  %376 = vmatmul.mubr.f32.vlgmr.msra.gmra.mxu1 %v246_v27  ;;  %v447_v26 = vld [vmem:[%s1851_s2 + $0x30] sm:$0xff] }
  0x31   :  { %506 = vmatprep.subr.mxu0 %v980_v0  ;;  %701 = vmatprep.subr.mxu1 %v980_v0  ;;  %v642_v27 = vld [vmem:[%s1852_s3 + $0x30] sm:$0xff] }
  0x32   :  { %507 = vmatpush1.msra.mxu0 %v1021_v1  ;;  %702 = vmatpush1.msra.mxu1 %v1021_v1  ;;  %v67_v1 = vld [vmem:[%s1849_s0 + $0xa8] sm:$0xff] }
  0x33   :  { %924 = vmatprep.mubr.msk.f32.mxu0 %vm72_vm1, %v49_v28  ;;  %938 = vmatprep.mubr.msk.f32.mxu1 %vm72_vm1, %v249_v29  ;;  %v450_v28 = vld [vmem:[%s1851_s2 + $0x48] sm:$0xff] }
  0x34   :  { %508 = vmatprep.subr.mxu0 %v980_v0  ;;  %703 = vmatprep.subr.mxu1 %v980_v0  ;;  %v645_v29 = vld [vmem:[%s1852_s3 + $0x48] sm:$0xff] }
  0x35   :  { %186 = vmatmul.mubr.f32.gmra.mxu0 %v48_v30  ;;  %381 = vmatmul.mubr.f32.gmra.mxu1 %v248_v31  ;;  %v449_v30 = vld [vmem:[%s1851_s2 + $0x40] sm:$0xff] }
  0x36   :  { %509 = vmatpush1.msra.mxu0 %v1026_v2  ;;  %704 = vmatpush1.msra.mxu1 %v1026_v2  ;;  %v267_v2 = vld [vmem:[%s1850_s1 + $0xa8] sm:$0xff]  ;;  %v644_v31 = vld [vmem:[%s1852_s3 + $0x40] sm:$0xff] }
  0x37   :  { %510 = vmatprep.subr.mxu0 %v980_v0  ;;  %705 = vmatprep.subr.mxu1 %v980_v0 }
  0x38   :  { %511 = vmatpush1.msra.mxu0 %v1035_v3  ;;  %706 = vmatpush1.msra.mxu1 %v1035_v3  ;;  %v66_v3 = vld [vmem:[%s1849_s0 + $0xa0] sm:$0xff] }
  0x39   :  { %925 = vmatprep.mubr.msk.f32.mxu0 %vm72_vm1, %v51_v32  ;;  %939 = vmatprep.mubr.msk.f32.mxu1 %vm72_vm1, %v251_v33  ;;  %v452_v32 = vld [vmem:[%s1851_s2 + $0x58] sm:$0xff] }
  0x3a   :  { %512 = vmatprep.subr.mxu0 %v980_v0  ;;  %707 = vmatprep.subr.mxu1 %v980_v0  ;;  %v647_v33 = vld [vmem:[%s1852_s3 + $0x58] sm:$0xff] }
  0x3b   :  { %191 = vmatmul.mubr.f32.gmra.mxu0 %v50_v34  ;;  %386 = vmatmul.mubr.f32.gmra.mxu1 %v250_v35  ;;  %v451_v34 = vld [vmem:[%s1851_s2 + $0x50] sm:$0xff] }
  0x3c   :  { %513 = vmatpush1.msra.mxu0 %v1044_v4  ;;  %708 = vmatpush1.msra.mxu1 %v1044_v4  ;;  %v266_v4 = vld [vmem:[%s1850_s1 + $0xa0] sm:$0xff]  ;;  %v646_v35 = vld [vmem:[%s1852_s3 + $0x50] sm:$0xff] }
  0x3d   :  { %514 = vmatprep.subr.mxu0 %v980_v0  ;;  %709 = vmatprep.subr.mxu1 %v980_v0 }
  0x3e   :  { %926 = vmatprep.mubr.msk.f32.mxu0 %vm72_vm1, %v53_v36  ;;  %940 = vmatprep.mubr.msk.f32.mxu1 %vm72_vm1, %v253_v37  ;;  %v454_v36 = vld [vmem:[%s1851_s2 + $0x68] sm:$0xff] }
  0x3f   :  { %515 = vmatpush1.msra.mxu0 %v1053_v5  ;;  %710 = vmatpush1.msra.mxu1 %v1053_v5  ;;  %v69_v5 = vld [vmem:[%s1849_s0 + $0xb8] sm:$0xff]  ;;  %v649_v37 = vld [vmem:[%s1852_s3 + $0x68] sm:$0xff] }
  0x40   :  { %196 = vmatmul.mubr.f32.gmra.mxu0 %v52_v38  ;;  %391 = vmatmul.mubr.f32.gmra.mxu1 %v252_v39  ;;  %v453_v38 = vld [vmem:[%s1851_s2 + $0x60] sm:$0xff] }
  0x41   :  { %516 = vmatprep.subr.mxu0 %v980_v0  ;;  %711 = vmatprep.subr.mxu1 %v980_v0  ;;  %v648_v39 = vld [vmem:[%s1852_s3 + $0x60] sm:$0xff] }
  0x42   :  { %517 = vmatpush1.msra.mxu0 %v1062_v6  ;;  %712 = vmatpush1.msra.mxu1 %v1062_v6  ;;  %v269_v6 = vld [vmem:[%s1850_s1 + $0xb8] sm:$0xff] }
  0x43   :  { %518 = vmatprep.subr.mxu0 %v980_v0  ;;  %713 = vmatprep.subr.mxu1 %v980_v0 }
  0x44   :  { %927 = vmatprep.mubr.msk.f32.mxu0 %vm72_vm1, %v55_v40  ;;  %941 = vmatprep.mubr.msk.f32.mxu1 %vm72_vm1, %v255_v41  ;;  %v456_v40 = vld [vmem:[%s1851_s2 + $0x78] sm:$0xff] }
  0x45   :  { %519 = vmatpush1.msra.mxu0 %v1071_v7  ;;  %714 = vmatpush1.msra.mxu1 %v1071_v7  ;;  %v68_v7 = vld [vmem:[%s1849_s0 + $0xb0] sm:$0xff]  ;;  %v651_v41 = vld [vmem:[%s1852_s3 + $0x78] sm:$0xff] }
  0x46   :  { %201 = vmatmul.mubr.f32.gmra.mxu0 %v54_v42  ;;  %396 = vmatmul.mubr.f32.gmra.mxu1 %v254_v43  ;;  %v455_v42 = vld [vmem:[%s1851_s2 + $0x70] sm:$0xff] }
  0x47   :  { %520 = vmatprep.subr.mxu0 %v980_v0  ;;  %715 = vmatprep.subr.mxu1 %v980_v0  ;;  %v650_v43 = vld [vmem:[%s1852_s3 + $0x70] sm:$0xff] }
  0x48   :  { %521 = vmatpush1.msra.mxu0 %v1080_v8  ;;  %716 = vmatpush1.msra.mxu1 %v1080_v8  ;;  %v268_v8 = vld [vmem:[%s1850_s1 + $0xb0] sm:$0xff] }
  0x49   :  { %928 = vmatprep.mubr.msk.f32.mxu0 %vm72_vm1, %v57_v44  ;;  %942 = vmatprep.mubr.msk.f32.mxu1 %vm72_vm1, %v257_v45  ;;  %v458_v44 = vld [vmem:[%s1851_s2 + $0x88] sm:$0xff] }
  0x4a   :  { %522 = vmatprep.subr.mxu0 %v980_v0  ;;  %717 = vmatprep.subr.mxu1 %v980_v0  ;;  %v653_v45 = vld [vmem:[%s1852_s3 + $0x88] sm:$0xff] }
  0x4b   :  { %206 = vmatmul.mubr.f32.gmra.mxu0 %v56_v46  ;;  %401 = vmatmul.mubr.f32.gmra.mxu1 %v256_v47  ;;  %v457_v46 = vld [vmem:[%s1851_s2 + $0x80] sm:$0xff] }
  0x4c   :  { %523 = vmatpush1.msra.mxu0 %v1089_v9  ;;  %718 = vmatpush1.msra.mxu1 %v1089_v9  ;;  %v71_v9 = vld [vmem:[%s1849_s0 + $0xc8] sm:$0x3]  ;;  %v652_v47 = vld [vmem:[%s1852_s3 + $0x80] sm:$0xff] }
  0x4d   :  { %524 = vmatprep.subr.mxu0 %v980_v0  ;;  %719 = vmatprep.subr.mxu1 %v980_v0 }
  0x4e   :  { %525 = vmatpush1.msra.mxu0 %v1098_v10  ;;  %720 = vmatpush1.msra.mxu1 %v1098_v10  ;;  %v271_v10 = vld [vmem:[%s1850_s1 + $0xc8] sm:$0x3] }
  0x4f   :  { %929 = vmatprep.mubr.msk.f32.mxu0 %vm72_vm1, %v59_v48  ;;  %943 = vmatprep.mubr.msk.f32.mxu1 %vm72_vm1, %v259_v49  ;;  %v460_v48 = vld [vmem:[%s1851_s2 + $0x98] sm:$0xff] }
  0x50   :  { %526 = vmatprep.subr.mxu0 %v980_v0  ;;  %721 = vmatprep.subr.mxu1 %v980_v0  ;;  %v655_v49 = vld [vmem:[%s1852_s3 + $0x98] sm:$0xff] }
  0x51   :  { %211 = vmatmul.mubr.f32.gmra.mxu0 %v58_v50  ;;  %406 = vmatmul.mubr.f32.gmra.mxu1 %v258_v51  ;;  %v459_v50 = vld [vmem:[%s1851_s2 + $0x90] sm:$0xff] }
  0x52   :  { %527 = vmatpush1.msra.mxu0 %v1107_v11  ;;  %722 = vmatpush1.msra.mxu1 %v1107_v11  ;;  %v70_v11 = vld [vmem:[%s1849_s0 + $0xc0] sm:$0x3]  ;;  %v654_v51 = vld [vmem:[%s1852_s3 + $0x90] sm:$0xff] }
  0x53   :  { %528 = vmatprep.subr.mxu0 %v980_v0  ;;  %723 = vmatprep.subr.mxu1 %v980_v0 }
  0x54   :  { %529 = vmatpush1.msra.mxu0 %v1116_v12  ;;  %724 = vmatpush1.msra.mxu1 %v1116_v12  ;;  %v270_v12 = vld [vmem:[%s1850_s1 + $0xc0] sm:$0x3] }
  0x55   :  { %930 = vmatprep.mubr.msk.f32.mxu0 %vm72_vm1, %v61_v52  ;;  %944 = vmatprep.mubr.msk.f32.mxu1 %vm72_vm1, %v261_v53  ;;  %v462_v52 = vld [vmem:[%s1851_s2 + $0xa8] sm:$0xff] }
  0x56   :  { %216 = vmatmul.mubr.f32.gmra.mxu0 %v60_v54  ;;  %411 = vmatmul.mubr.f32.gmra.mxu1 %v260_v55  ;;  %v657_v53 = vld [vmem:[%s1852_s3 + $0xa8] sm:$0xff]  ;;  %v461_v54 = vld [vmem:[%s1851_s2 + $0xa0] sm:$0xff] }
  0x57   :  { %530 = vmatprep.subr.mxu0 %v980_v0  ;;  %725 = vmatprep.subr.mxu1 %v980_v0  ;;  %v656_v55 = vld [vmem:[%s1852_s3 + $0xa0] sm:$0xff] }
  0x58   :  { %531 = vmatpush1.msra.mxu0 %v1125_v13  ;;  %726 = vmatpush1.msra.mxu1 %v1125_v13  ;;  %v442_v13 = vld [vmem:[%s1851_s2 + $0x8] sm:$0xff] }
  0x59   :  { %532 = vmatprep.subr.mxu0 %v980_v0  ;;  %727 = vmatprep.subr.mxu1 %v980_v0 }
  0x5a   :  { %931 = vmatprep.mubr.msk.f32.mxu0 %vm72_vm1, %v63_v56  ;;  %945 = vmatprep.mubr.msk.f32.mxu1 %vm72_vm1, %v263_v57  ;;  %v464_v56 = vld [vmem:[%s1851_s2 + $0xb8] sm:$0xff] }
  0x5b   :  { %533 = vmatpush1.msra.mxu0 %v1134_v14  ;;  %728 = vmatpush1.msra.mxu1 %v1134_v14  ;;  %v637_v14 = vld [vmem:[%s1852_s3 + $0x8] sm:$0xff]  ;;  %v659_v57 = vld [vmem:[%s1852_s3 + $0xb8] sm:$0xff] }
  0x5c   :  { %221 = vmatmul.mubr.f32.gmra.mxu0 %v62_v58  ;;  %416 = vmatmul.mubr.f32.gmra.mxu1 %v262_v59  ;;  %v463_v58 = vld [vmem:[%s1851_s2 + $0xb0] sm:$0xff] }
  0x5d   :  { %534 = vmatprep.subr.mxu0 %v980_v0  ;;  %729 = vmatprep.subr.mxu1 %v980_v0  ;;  %v658_v59 = vld [vmem:[%s1852_s3 + $0xb0] sm:$0xff] }
  0x5e   :  { %535 = vmatpush1.msra.mxu0 %v1143_v15  ;;  %730 = vmatpush1.msra.mxu1 %v1143_v15  ;;  %v441_v15 = vld [vmem:[%s1851_s2] sm:$0xff] }
  0x5f   :  { %536 = vmatprep.subr.mxu0 %v980_v0  ;;  %731 = vmatprep.subr.mxu1 %v980_v0 }
  0x60   :  { %932 = vmatprep.mubr.msk.f32.mxu0 %vm72_vm1, %v65_v60  ;;  %946 = vmatprep.mubr.msk.f32.mxu1 %vm72_vm1, %v265_v61  ;;  %v466_v60 = vld [vmem:[%s1851_s2 + $0xc8] sm:$0x3] }
  0x61   :  { %537 = vmatpush1.msra.mxu0 %v1152_v16  ;;  %732 = vmatpush1.msra.mxu1 %v1152_v16  ;;  %v636_v16 = vld [vmem:[%s1852_s3] sm:$0xff]  ;;  %v661_v61 = vld [vmem:[%s1852_s3 + $0xc8] sm:$0x3] }
  0x62   :  { %226 = vmatmul.mubr.f32.gmra.mxu0 %v64_v62  ;;  %421 = vmatmul.mubr.f32.gmra.mxu1 %v264_v63  ;;  %v465_v62 = vld [vmem:[%s1851_s2 + $0xc0] sm:$0x3] }
  0x63   :  { %556 = vmatprep.subr.mxu0 %v980_v0  ;;  %751 = vmatprep.subr.mxu1 %v980_v0  ;;  %v660_v63 = vld [vmem:[%s1852_s3 + $0xc0] sm:$0x3] }
  0x64   :  { %950 = vmatpush2.msk.msra.mxu0 %vm112_vm0, %v1161_v17  ;;  %964 = vmatpush2.msk.msra.mxu1 %vm112_vm0, %v1161_v17  ;;  %v444_v17 = vld [vmem:[%s1851_s2 + $0x18] sm:$0xff] }
  0x65   :  { %933 = vmatprep.mubr.msk.f32.mxu0 %vm72_vm1, %v67_v1  ;;  %947 = vmatprep.mubr.msk.f32.mxu1 %vm72_vm1, %v267_v2 }
  0x66   :  { %558 = vmatprep.subr.mxu0 %v980_v0  ;;  %753 = vmatprep.subr.mxu1 %v980_v0 }
  0x67   :  { %231 = vmatmul.mubr.f32.gmra.mxu0 %v66_v3  ;;  %426 = vmatmul.mubr.f32.gmra.mxu1 %v266_v4 }
  0x68   :  { %559 = vmatpush2.msra.mxu0 %v1170_v18  ;;  %754 = vmatpush2.msra.mxu1 %v1170_v18  ;;  %v443_v18 = vld [vmem:[%s1851_s2 + $0x10] sm:$0xff] }
  0x69   :  { %560 = vmatprep.subr.mxu0 %v980_v0  ;;  %755 = vmatprep.subr.mxu1 %v980_v0 }
  0x6a   :  { %561 = vmatpush2.msra.mxu0 %v1181_v19  ;;  %756 = vmatpush2.msra.mxu1 %v1181_v19  ;;  %v638_v19 = vld [vmem:[%s1852_s3 + $0x10] sm:$0xff] }
  0x6b   :  { %934 = vmatprep.mubr.msk.f32.mxu0 %vm72_vm1, %v69_v5  ;;  %948 = vmatprep.mubr.msk.f32.mxu1 %vm72_vm1, %v269_v6 }
  0x6c   :  { %562 = vmatprep.subr.mxu0 %v980_v0  ;;  %757 = vmatprep.subr.mxu1 %v980_v0 }
  0x6d   :  { %236 = vmatmul.mubr.f32.gmra.mxu0 %v68_v7  ;;  %431 = vmatmul.mubr.f32.gmra.mxu1 %v268_v8 }
  0x6e   :  { %563 = vmatpush2.msra.mxu0 %v1190_v20  ;;  %758 = vmatpush2.msra.mxu1 %v1190_v20  ;;  %v446_v20 = vld [vmem:[%s1851_s2 + $0x28] sm:$0xff] }
  0x6f   :  { %564 = vmatprep.subr.mxu0 %v980_v0  ;;  %759 = vmatprep.subr.mxu1 %v980_v0 }
  0x70   :  { %935 = vmatprep.mubr.msk.f32.mxu0 %vm72_vm1, %v71_v9  ;;  %949 = vmatprep.mubr.msk.f32.mxu1 %vm72_vm1, %v271_v10 }
  0x71   :  { %565 = vmatpush2.msra.mxu0 %v1199_v21  ;;  %760 = vmatpush2.msra.mxu1 %v1199_v21  ;;  %v641_v21 = vld [vmem:[%s1852_s3 + $0x28] sm:$0xff] }
  0x72   :  { %241 = vmatmul.mubr.f32.gmra.mxu0 %v70_v11  ;;  %436 = vmatmul.mubr.f32.gmra.mxu1 %v270_v12 }
  0x73   :  { %566 = vmatprep.subr.mxu0 %v980_v0  ;;  %761 = vmatprep.subr.mxu1 %v980_v0 }
  0x74   :  { %567 = vmatpush2.msra.mxu0 %v1208_v22  ;;  %762 = vmatpush2.msra.mxu1 %v1208_v22  ;;  %v445_v22 = vld [vmem:[%s1851_s2 + $0x20] sm:$0xff] }
  0x75   :  { %568 = vmatprep.subr.mxu0 %v980_v0  ;;  %763 = vmatprep.subr.mxu1 %v980_v0  ;;  %v639_v0 = vld [vmem:[%s1852_s3 + $0x18] sm:$0xff] }
  0x76   :  { %569 = vmatpush2.msra.mxu0 %v1217_v23  ;;  %951 = vmatprep.mubr.msk.f32.mxu0 %vm72_vm1, %v442_v13 }
  0x77   :  { %764 = vmatpush2.msra.mxu1 %v1217_v23  ;;  %965 = vmatprep.mubr.msk.f32.mxu1 %vm72_vm1, %v637_v14  ;;  %v640_v23 = vld [vmem:[%s1852_s3 + $0x20] sm:$0xff] }
  0x78   :  { %571 = vmatmul.mubr.f32.vlgmr.msra.gmra.mxu0 %v441_v15  ;;  %766 = vmatmul.mubr.f32.vlgmr.msra.gmra.mxu1 %v636_v16 }
  0x79   :  { %952 = vmatprep.mubr.msk.f32.mxu0 %vm72_vm1, %v444_v17  ;;  %966 = vmatprep.mubr.msk.f32.mxu1 %vm72_vm1, %v639_v0 }
  0x7c   :  { %576 = vmatmul.mubr.f32.gmra.mxu0 %v443_v18  ;;  %771 = vmatmul.mubr.f32.gmra.mxu1 %v638_v19 }
  0x7d   :  { %953 = vmatprep.mubr.msk.f32.mxu0 %vm72_vm1, %v446_v20  ;;  %967 = vmatprep.mubr.msk.f32.mxu1 %vm72_vm1, %v641_v21 }
  0x80   :  { %581 = vmatmul.mubr.f32.gmra.mxu0 %v445_v22  ;;  %776 = vmatmul.mubr.f32.gmra.mxu1 %v640_v23 }
  0x81   :  { %954 = vmatprep.mubr.msk.f32.mxu0 %vm72_vm1, %v448_v24  ;;  %968 = vmatprep.mubr.msk.f32.mxu1 %vm72_vm1, %v643_v25 }
  0x84   :  { %586 = vmatmul.mubr.f32.gmra.mxu0 %v447_v26  ;;  %781 = vmatmul.mubr.f32.gmra.mxu1 %v642_v27 }
  0x85   :  { %955 = vmatprep.mubr.msk.f32.mxu0 %vm72_vm1, %v450_v28  ;;  %969 = vmatprep.mubr.msk.f32.mxu1 %vm72_vm1, %v645_v29 }
  0x88   :  { %591 = vmatmul.mubr.f32.gmra.mxu0 %v449_v30  ;;  %786 = vmatmul.mubr.f32.gmra.mxu1 %v644_v31 }
  0x89   :  { %956 = vmatprep.mubr.msk.f32.mxu0 %vm72_vm1, %v452_v32  ;;  %970 = vmatprep.mubr.msk.f32.mxu1 %vm72_vm1, %v647_v33 }
  0x8c   :  { %596 = vmatmul.mubr.f32.gmra.mxu0 %v451_v34  ;;  %791 = vmatmul.mubr.f32.gmra.mxu1 %v646_v35 }
  0x8d   :  { %957 = vmatprep.mubr.msk.f32.mxu0 %vm72_vm1, %v454_v36  ;;  %971 = vmatprep.mubr.msk.f32.mxu1 %vm72_vm1, %v649_v37 }
  0x90   :  { %601 = vmatmul.mubr.f32.gmra.mxu0 %v453_v38  ;;  %796 = vmatmul.mubr.f32.gmra.mxu1 %v648_v39 }
  0x91   :  { %958 = vmatprep.mubr.msk.f32.mxu0 %vm72_vm1, %v456_v40  ;;  %972 = vmatprep.mubr.msk.f32.mxu1 %vm72_vm1, %v651_v41 }
  0x94   :  { %606 = vmatmul.mubr.f32.gmra.mxu0 %v455_v42  ;;  %801 = vmatmul.mubr.f32.gmra.mxu1 %v650_v43 }
  0x95   :  { %959 = vmatprep.mubr.msk.f32.mxu0 %vm72_vm1, %v458_v44  ;;  %973 = vmatprep.mubr.msk.f32.mxu1 %vm72_vm1, %v653_v45 }
  0x98   :  { %611 = vmatmul.mubr.f32.gmra.mxu0 %v457_v46  ;;  %806 = vmatmul.mubr.f32.gmra.mxu1 %v652_v47 }
  0x99   :  { %960 = vmatprep.mubr.msk.f32.mxu0 %vm72_vm1, %v460_v48  ;;  %974 = vmatprep.mubr.msk.f32.mxu1 %vm72_vm1, %v655_v49 }
  0x9c   :  { %616 = vmatmul.mubr.f32.gmra.mxu0 %v459_v50  ;;  %811 = vmatmul.mubr.f32.gmra.mxu1 %v654_v51 }
  0x9d   :  { %961 = vmatprep.mubr.msk.f32.mxu0 %vm72_vm1, %v462_v52  ;;  %975 = vmatprep.mubr.msk.f32.mxu1 %vm72_vm1, %v657_v53 }
  0xa0   :  { %621 = vmatmul.mubr.f32.gmra.mxu0 %v461_v54  ;;  %816 = vmatmul.mubr.f32.gmra.mxu1 %v656_v55 }
  0xa1   :  { %962 = vmatprep.mubr.msk.f32.mxu0 %vm72_vm1, %v464_v56  ;;  %976 = vmatprep.mubr.msk.f32.mxu1 %vm72_vm1, %v659_v57 }
  0xa4   :  { %626 = vmatmul.mubr.f32.gmra.mxu0 %v463_v58  ;;  %821 = vmatmul.mubr.f32.gmra.mxu1 %v658_v59 }
  0xa5   :  { %963 = vmatprep.mubr.msk.f32.mxu0 %vm72_vm1, %v466_v60  ;;  %977 = vmatprep.mubr.msk.f32.mxu1 %vm72_vm1, %v661_v61  ;;  %v1750_v61 = vld [vmem:[%s1853_s5] ss:$0 sm:$0xff] }
  0xa8   :  { %631 = vmatmul.mubr.f32.gmra.mxu0 %v465_v62  ;;  %826 = vmatmul.mubr.f32.gmra.mxu1 %v660_v63 }
  0xf0   :  { %v1683_v1 = vpop.f32.mrf.mxu0  ;;  %v1685_v2 = vpop.f32.mrf.mxu1 }
  0xf1   :  { %v831_v3 = vmax.f32 %v1683_v1, %v1685_v2 }
  0xf2   :  { %v184_v4 = vpop.f32.mrf.mxu0  ;;  %v379_v5 = vpop.f32.mrf.mxu1 }
  0xf5   :  { %v1689_v6 = vpop.f32.mrf.mxu0  ;;  %v1691_v7 = vpop.f32.mrf.mxu1 }
  0xf6   :  { %v832_v8 = vmax.f32 %v1689_v6, %v1691_v7 }
  0xf7   :  { %v189_v9 = vpop.f32.mrf.mxu0  ;;  %v384_v10 = vpop.f32.mrf.mxu1 }
  0xfb   :  { %v1695_v11 = vpop.f32.mrf.mxu0  ;;  %v1697_v12 = vpop.f32.mrf.mxu1 }
  0xfc   :  { %v833_v13 = vmax.f32 %v1695_v11, %v1697_v12 }
  0xfd   :  { %v194_v14 = vpop.f32.mrf.mxu0  ;;  %v389_v15 = vpop.f32.mrf.mxu1 }
 0x100   :  { %v1701_v16 = vpop.f32.mrf.mxu0  ;;  %v1703_v17 = vpop.f32.mrf.mxu1 }
 0x101   :  { %v834_v0 = vmax.f32 %v1701_v16, %v1703_v17 }
 0x102   :  { %v199_v18 = vpop.f32.mrf.mxu0  ;;  %v394_v19 = vpop.f32.mrf.mxu1 }
 0x106   :  { %v1707_v20 = vpop.f32.mrf.mxu0  ;;  %v1709_v21 = vpop.f32.mrf.mxu1 }
 0x107   :  { %v835_v22 = vmax.f32 %v1707_v20, %v1709_v21 }
 0x108   :  { %v204_v23 = vpop.f32.mrf.mxu0  ;;  %v399_v24 = vpop.f32.mrf.mxu1 }
 0x10b   :  { %v1713_v25 = vpop.f32.mrf.mxu0  ;;  %v1715_v26 = vpop.f32.mrf.mxu1 }
 0x10c   :  { %v836_v27 = vmax.f32 %v1713_v25, %v1715_v26 }
 0x10d   :  { %v209_v28 = vpop.f32.mrf.mxu0  ;;  %v404_v29 = vpop.f32.mrf.mxu1 }
 0x111   :  { %v1719_v30 = vpop.f32.mrf.mxu0  ;;  %v1721_v31 = vpop.f32.mrf.mxu1 }
 0x112   :  { %v837_v21 = vmax.f32 %v1719_v30, %v1721_v31 }
 0x113   :  { %v214_v32 = vpop.f32.mrf.mxu0  ;;  %v409_v33 = vpop.f32.mrf.mxu1 }
 0x116   :  { %v1723_v34 = vpop.f32.mrf.mxu0  ;;  %v1725_v35 = vpop.f32.mrf.mxu1 }
 0x117   :  { %v838_v26 = vmax.f32 %v1723_v34, %v1725_v35 }
 0x118   :  { %v219_v36 = vpop.f32.mrf.mxu0  ;;  %v414_v37 = vpop.f32.mrf.mxu1 }
 0x11c   :  { %v1727_v38 = vpop.f32.mrf.mxu0  ;;  %v1729_v39 = vpop.f32.mrf.mxu1 }
 0x11e   :  { %v224_v40 = vpop.f32.mrf.mxu0  ;;  %v419_v41 = vpop.f32.mrf.mxu1 }
 0x122   :  { %v1731_v42 = vpop.f32.mrf.mxu0  ;;  %v1733_v43 = vpop.f32.mrf.mxu1 }
 0x124   :  { %v229_v44 = vpop.f32.mrf.mxu0  ;;  %v424_v45 = vpop.f32.mrf.mxu1 }
 0x127   :  { %v1735_v46 = vpop.f32.mrf.mxu0  ;;  %v1737_v47 = vpop.f32.mrf.mxu1 }
 0x129   :  { %v234_v48 = vpop.f32.mrf.mxu0  ;;  %v429_v49 = vpop.f32.mrf.mxu1 }
 0x12d   :  { %v1739_v50 = vpop.f32.mrf.mxu0  ;;  %v1741_v51 = vpop.f32.mrf.mxu1 }
 0x12f   :  { %v239_v52 = vpop.f32.mrf.mxu0  ;;  %v434_v53 = vpop.f32.mrf.mxu1 }
 0x132   :  { %v1743_v54 = vpop.f32.mrf.mxu0  ;;  %v1745_v55 = vpop.f32.mrf.mxu1 }
 0x134   :  { %v244_v56 = vpop.f32.mrf.mxu0  ;;  %v439_v57 = vpop.f32.mrf.mxu1 }
 0x138   :  { %v572_v58 = vpop.f32.mrf.mxu0  ;;  %v767_v59 = vpop.f32.mrf.mxu1 }
 0x139   :  { %v844_v60 = vmax.f32 %v572_v58, %v767_v59 }
 0x13a   :  { %v574_v62 = vpop.f32.mrf.mxu0  ;;  %v769_v63 = vpop.f32.mrf.mxu1 }
 0x13b   :  { %v857_v4 = vmax.f32 %v831_v3, %v844_v60 }
 0x13c   :  { %v577_v5 = vpop.f32.mrf.mxu0  ;;  %v772_v9 = vpop.f32.mrf.mxu1 }
 0x13d   :  { %v877_v10 = vadd.f32 %v1750_v61, %v857_v4  ;;  %v845_v14 = vmax.f32 %v577_v5, %v772_v9 }
 0x13e   :  { %v579_v15 = vpop.f32.mrf.mxu0  ;;  %v774_v18 = vpop.f32.mrf.mxu1 }
 0x13f   :  { %v890_v19 = vmax.f32 %v877_v10, 0.0  ;;  %v858_v23 = vmax.f32 %v832_v8, %v845_v14 }
 0x140   :  { %v582_v24 = vpop.f32.mrf.mxu0  ;;  %v777_v28 = vpop.f32.mrf.mxu1 }
 0x141   :  { %904 = vst.msk [vmem:[%s1854_s6] sm:$0xff] %vm903_vm2, %v890_v19  ;;  %v878_v1 = vadd.f32 %v1750_v61, %v858_v23  ;;  %v846_v2 = vmax.f32 %v582_v24, %v777_v28  ;;  %v839_v28 = vmax.f32 %v1727_v38, %v1729_v39 }
 0x142   :  { %v584_v3 = vpop.f32.mrf.mxu0  ;;  %v779_v29 = vpop.f32.mrf.mxu1 }
 0x143   :  { %v891_v32 = vmax.f32 %v878_v1, 0.0  ;;  %v859_v33 = vmax.f32 %v833_v13, %v846_v2 }
 0x144   :  { %v587_v36 = vpop.f32.mrf.mxu0  ;;  %v782_v6 = vpop.f32.mrf.mxu1 }
 0x145   :  { %905 = vst.msk [vmem:[%s1854_s6 + $0x8] sm:$0xff] %vm903_vm2, %v891_v32  ;;  %v879_v7 = vadd.f32 %v1750_v61, %v859_v33  ;;  %v847_v8 = vmax.f32 %v587_v36, %v782_v6  ;;  %v840_v36 = vmax.f32 %v1731_v42, %v1733_v43 }
 0x146   :  { %v589_v37 = vpop.f32.mrf.mxu0  ;;  %v784_v40 = vpop.f32.mrf.mxu1 }
 0x147   :  { %v892_v41 = vmax.f32 %v879_v7, 0.0  ;;  %v860_v44 = vmax.f32 %v834_v0, %v847_v8 }
 0x148   :  { %v592_v45 = vpop.f32.mrf.mxu0  ;;  %v787_v11 = vpop.f32.mrf.mxu1 }
 0x149   :  { %906 = vst.msk [vmem:[%s1854_s6 + $0x10] sm:$0xff] %vm903_vm2, %v892_v41  ;;  %v880_v12 = vadd.f32 %v1750_v61, %v860_v44  ;;  %v848_v13 = vmax.f32 %v592_v45, %v787_v11  ;;  %v841_v44 = vmax.f32 %v1735_v46, %v1737_v47 }
 0x14a   :  { %v594_v48 = vpop.f32.mrf.mxu0  ;;  %v789_v49 = vpop.f32.mrf.mxu1 }
 0x14b   :  { %v893_v52 = vmax.f32 %v880_v12, 0.0  ;;  %v861_v53 = vmax.f32 %v835_v22, %v848_v13 }
 0x14c   :  { %v597_v56 = vpop.f32.mrf.mxu0  ;;  %v792_v16 = vpop.f32.mrf.mxu1 }
 0x14d   :  { %907 = vst.msk [vmem:[%s1854_s6 + $0x18] sm:$0xff] %vm903_vm2, %v893_v52  ;;  %v881_v17 = vadd.f32 %v1750_v61, %v861_v53  ;;  %v849_v0 = vmax.f32 %v597_v56, %v792_v16  ;;  %v842_v52 = vmax.f32 %v1739_v50, %v1741_v51 }
 0x14e   :  { %v599_v57 = vpop.f32.mrf.mxu0  ;;  %v794_v58 = vpop.f32.mrf.mxu1 }
 0x14f   :  { %v894_v59 = vmax.f32 %v881_v17, 0.0  ;;  %v862_v60 = vmax.f32 %v836_v27, %v849_v0  ;;  %v843_v58 = vmax.f32 %v1743_v54, %v1745_v55 }
 0x150   :  { %v602_v62 = vpop.f32.mrf.mxu0  ;;  %v797_v20 = vpop.f32.mrf.mxu1 }
 0x151   :  { %908 = vst.msk [vmem:[%s1854_s6 + $0x20] sm:$0xff] %vm903_vm2, %v894_v59  ;;  %v882_v22 = vadd.f32 %v1750_v61, %v862_v60  ;;  %v850_v63 = vmax.f32 %v602_v62, %v797_v20 }
 0x152   :  { %v604_v4 = vpop.f32.mrf.mxu0  ;;  %v799_v5 = vpop.f32.mrf.mxu1 }
 0x153   :  { %v895_v9 = vmax.f32 %v882_v22, 0.0  ;;  %v863_v10 = vmax.f32 %v837_v21, %v850_v63 }
 0x154   :  { %v607_v14 = vpop.f32.mrf.mxu0  ;;  %v802_v25 = vpop.f32.mrf.mxu1 }
 0x155   :  { %909 = vst.msk [vmem:[%s1854_s6 + $0x28] sm:$0xff] %vm903_vm2, %v895_v9  ;;  %v883_v27 = vadd.f32 %v1750_v61, %v863_v10  ;;  %v851_v30 = vmax.f32 %v607_v14, %v802_v25 }
 0x156   :  { %v609_v31 = vpop.f32.mrf.mxu0  ;;  %v804_v15 = vpop.f32.mrf.mxu1 }
 0x157   :  { %v896_v18 = vmax.f32 %v883_v27, 0.0  ;;  %v864_v19 = vmax.f32 %v838_v26, %v851_v30 }
 0x158   :  { %v612_v23 = vpop.f32.mrf.mxu0  ;;  %v807_v24 = vpop.f32.mrf.mxu1 }
 0x159   :  { %910 = vst.msk [vmem:[%s1854_s6 + $0x30] sm:$0xff] %vm903_vm2, %v896_v18  ;;  %v884_v34 = vadd.f32 %v1750_v61, %v864_v19  ;;  %v852_v35 = vmax.f32 %v612_v23, %v807_v24 }
 0x15a   :  { %v614_v1 = vpop.f32.mrf.mxu0  ;;  %v809_v2 = vpop.f32.mrf.mxu1 }
 0x15b   :  { %v897_v3 = vmax.f32 %v884_v34, 0.0  ;;  %v865_v29 = vmax.f32 %v839_v28, %v852_v35 }
 0x15c   :  { %v617_v32 = vpop.f32.mrf.mxu0  ;;  %v812_v33 = vpop.f32.mrf.mxu1 }
 0x15d   :  { %911 = vst.msk [vmem:[%s1854_s6 + $0x38] sm:$0xff] %vm903_vm2, %v897_v3  ;;  %v885_v38 = vadd.f32 %v1750_v61, %v865_v29  ;;  %v853_v39 = vmax.f32 %v617_v32, %v812_v33 }
 0x15e   :  { %v619_v6 = vpop.f32.mrf.mxu0  ;;  %v814_v7 = vpop.f32.mrf.mxu1 }
 0x15f   :  { %v898_v8 = vmax.f32 %v885_v38, 0.0  ;;  %v866_v37 = vmax.f32 %v840_v36, %v853_v39 }
 0x160   :  { %v622_v40 = vpop.f32.mrf.mxu0  ;;  %v817_v41 = vpop.f32.mrf.mxu1 }
 0x161   :  { %912 = vst.msk [vmem:[%s1854_s6 + $0x40] sm:$0xff] %vm903_vm2, %v898_v8  ;;  %v886_v42 = vadd.f32 %v1750_v61, %v866_v37  ;;  %v854_v43 = vmax.f32 %v622_v40, %v817_v41 }
 0x162   :  { %v624_v45 = vpop.f32.mrf.mxu0  ;;  %v819_v11 = vpop.f32.mrf.mxu1 }
 0x163   :  { %v899_v12 = vmax.f32 %v886_v42, 0.0  ;;  %v867_v13 = vmax.f32 %v841_v44, %v854_v43 }
 0x164   :  { %v627_v48 = vpop.f32.mrf.mxu0  ;;  %v822_v49 = vpop.f32.mrf.mxu1 }
 0x165   :  { %913 = vst.msk [vmem:[%s1854_s6 + $0x48] sm:$0xff] %vm903_vm2, %v899_v12  ;;  %v887_v46 = vadd.f32 %v1750_v61, %v867_v13  ;;  %v855_v47 = vmax.f32 %v627_v48, %v822_v49 }
 0x166   :  { %v629_v53 = vpop.f32.mrf.mxu0  ;;  %v824_v56 = vpop.f32.mrf.mxu1 }
 0x167   :  { %v900_v16 = vmax.f32 %v887_v46, 0.0  ;;  %v868_v17 = vmax.f32 %v842_v52, %v855_v47 }
 0x168   :  { %v632_v0 = vpop.f32.mrf.mxu0  ;;  %v827_v57 = vpop.f32.mrf.mxu1 }
 0x169   :  { %914 = vst.msk [vmem:[%s1854_s6 + $0x50] sm:$0xff] %vm903_vm2, %v900_v16  ;;  %v888_v50 = vadd.f32 %v1750_v61, %v868_v17  ;;  %v856_v51 = vmax.f32 %v632_v0, %v827_v57 }
 0x16a   :  { %v634_v59 = vpop.f32.mrf.mxu0  ;;  %v829_v60 = vpop.f32.mrf.mxu1 }
 0x16b   :  { %v901_v62 = vmax.f32 %v888_v50, 0.0  ;;  %v869_v20 = vmax.f32 %v843_v58, %v856_v51 }
 0x16d   :  { %915 = vst.msk [vmem:[%s1854_s6 + $0x58] sm:$0xff] %vm903_vm2, %v901_v62  ;;  %v889_v21 = vadd.f32 %v1750_v61, %v869_v20 }
 0x16f   :  { %v902_v54 = vmax.f32 %v889_v21, 0.0 }
 0x171   :  { %917 = vst.msk [vmem:[%s1854_s6 + $0x60] sm:$0x3] %vm916_vm3, %v902_v54 }

// kernel: autoencoder_minist_forward.9
= control target key start
LH: loop header
LB: loop body
LE: loop exit
PB: predicated region body
PF: predicated region fallthrough
CT: control target
= control target key end

     0   :  { %vm57_vm0 = vcmask 1040384   ;;  %v446_v0 = vmov 0.0   ;;  %vm447_vm1 = vmmov 0   ;;  %vm41_vm2 = vcmask 400384   ;;  %s620_s1 = inlined_call_operand.vmem [shape: f32[49,10], index: 1, kind: input, shape index: {}]   ;;  %s621_s0 = inlined_call_operand.vmem [shape: f32[40,49], index: 0, kind: input, shape index: {}]   ;;  %s622_s2 = inlined_call_operand.vmem [shape: f32[1,10], index: 2, kind: input, shape index: {}]   ;;  %s623_s3 = inlined_call_operand.vmem [shape: f32[10,49], index: 3, kind: input, shape index: {}]   ;;  %s624_s5 = inlined_call_operand.vmem [shape: f32[40,10], index: 5, kind: output, shape index: {0}]   ;;  %s625_s4 = inlined_call_operand.vmem [shape: f32[1,49], index: 4, kind: input, shape index: {}]   ;;  %s626_s6 = inlined_call_operand.vmem [shape: f32[40,49], index: 6, kind: output, shape index: {1}]  }
   0x1   :  { %376 = vmatprep.subr.mxu0 %v446_v0  ;;  %v33_v1 = vld [vmem:[%s620_s1 + $0x30] sm:$0x1]  ;;  %v32_v2 = vld [vmem:[%s620_s1 + $0x28] sm:$0xff]  ;;  %390 = vmatprep.mubr.msk.f32.mxu0 %vm447_vm1, %v446_v0  ;;  %v31_v3 = vld [vmem:[%s620_s1 + $0x20] sm:$0xff]  ;;  %vm151_vm3 = vcmask 80896   ;;  %vm236_vm4 = vcmask 1041408  }
   0x2   :  { %377 = vmatpush3.msk.msra.mxu0 %vm57_vm0, %v33_v1  ;;  %405 = vmatprep.subr.mxu1 %v446_v0  ;;  %v30_v4 = vld [vmem:[%s620_s1 + $0x18] sm:$0xff]  ;;  %v29_v5 = vld [vmem:[%s620_s1 + $0x10] sm:$0xff]  ;;  %v28_v6 = vld [vmem:[%s620_s1 + $0x8] sm:$0xff] }
   0x3   :  { %378 = vmatprep.subr.mxu0 %v446_v0  ;;  %409 = vmatprep.mubr.msk.f32.mxu1 %vm447_vm1, %v446_v0  ;;  %v27_v7 = vld [vmem:[%s620_s1] sm:$0xff]  ;;  %v23_v9 = vld [vmem:[%s621_s0 + $0x8] sm:$0xff]  ;;  %v24_v10 = vld [vmem:[%s621_s0 + $0x10] sm:$0xff] }
   0x4   :  { %379 = vmatpush3.msra.mxu0 %v32_v2  ;;  %v22_v8 = vld [vmem:[%s621_s0] sm:$0xff]  ;;  %v25_v11 = vld [vmem:[%s621_s0 + $0x18] sm:$0xff]  ;;  %v213_v59 = vld [vmem:[%s623_s3 + $0x8] sm:$0x3] }
   0x5   :  { %380 = vmatprep.subr.mxu0 %v446_v0  ;;  %v26_v12 = vld [vmem:[%s621_s0 + $0x20] sm:$0xff]  ;;  %406 = vmatpush3.msk.msra.mxu1 %vm236_vm4, %v213_v59 }
   0x6   :  { %381 = vmatpush3.msra.mxu0 %v31_v3  ;;  %v343_v13 = vld [vmem:[%s622_s2] ss:$0 sm:$0xff]  ;;  %407 = vmatprep.subr.mxu1 %v446_v0 }
   0x7   :  { %382 = vmatprep.subr.mxu0 %v446_v0  ;;  %v212_v60 = vld [vmem:[%s623_s3] sm:$0xff] }
   0x8   :  { %383 = vmatpush3.msra.mxu0 %v30_v4  ;;  %408 = vmatpush3.msra.mxu1 %v212_v60 }
   0x9   :  { %384 = vmatprep.subr.mxu0 %v446_v0 }
   0xa   :  { %385 = vmatpush3.msra.mxu0 %v29_v5 }
   0xb   :  { %386 = vmatprep.subr.mxu0 %v446_v0 }
   0xc   :  { %387 = vmatpush3.msra.mxu0 %v28_v6 }
   0xd   :  { %388 = vmatprep.subr.mxu0 %v446_v0 }
   0xe   :  { %389 = vmatpush3.msra.mxu0 %v27_v7 }
   0xf   :  { %391 = vmatmul.mubr.msk.f32.vlgmr.msra.gmra.mxu0 %vm41_vm2, %v22_v8 }
  0x10   :  { %393 = vmatprep.mubr.msk.f32.mxu0 %vm447_vm1, %v446_v0 }
  0x13   :  { %394 = vmatmul.mubr.msk.f32.gmra.mxu0 %vm41_vm2, %v23_v9 }
  0x14   :  { %396 = vmatprep.mubr.msk.f32.mxu0 %vm447_vm1, %v446_v0 }
  0x17   :  { %397 = vmatmul.mubr.msk.f32.gmra.mxu0 %vm41_vm2, %v24_v10 }
  0x18   :  { %399 = vmatprep.mubr.msk.f32.mxu0 %vm447_vm1, %v446_v0 }
  0x1b   :  { %400 = vmatmul.mubr.msk.f32.gmra.mxu0 %vm41_vm2, %v25_v11 }
  0x1c   :  { %402 = vmatprep.mubr.msk.f32.mxu0 %vm447_vm1, %v446_v0 }
  0x1f   :  { %403 = vmatmul.mubr.msk.f32.gmra.mxu0 %vm41_vm2, %v26_v12 }
  0xcf   :  { %v127_v14 = vpop.f32.mrf.mxu0 }
  0xd0   :  { %v128_v15 = vadd.f32 %v343_v13, %v127_v14 }
  0xd1   :  { %v392_v16 = vpop.f32.mrf.mxu0 }
  0xd2   :  { %v152_v17 = vsel %vm151_vm3, %v128_v15, -inf }
  0xd3   :  { %153 = vmax.xlane.f32.xlu0 %v152_v17  ;;  %v132_v18 = vpop.f32.mrf.mxu0 }
  0xd4   :  { %v133_v19 = vadd.f32 %v343_v13, %v132_v18 }
  0xd5   :  { %v395_v20 = vpop.f32.mrf.mxu0 }
  0xd6   :  { %v155_v21 = vsel %vm151_vm3, %v133_v19, -inf }
  0xd7   :  { %156 = vmax.xlane.f32.xlu0 %v155_v21  ;;  %v137_v22 = vpop.f32.mrf.mxu0 }
  0xd8   :  { %v138_v23 = vadd.f32 %v343_v13, %v137_v22 }
  0xd9   :  { %v398_v24 = vpop.f32.mrf.mxu0 }
  0xda   :  { %v158_v25 = vsel %vm151_vm3, %v138_v23, -inf }
  0xdb   :  { %159 = vmax.xlane.f32.xlu1 %v158_v25  ;;  %v142_v26 = vpop.f32.mrf.mxu0 }
  0xdc   :  { %v143_v27 = vadd.f32 %v343_v13, %v142_v26 }
  0xdd   :  { %v401_v28 = vpop.f32.mrf.mxu0 }
  0xde   :  { %v161_v29 = vsel %vm151_vm3, %v143_v27, -inf }
  0xdf   :  { %162 = vmax.xlane.f32.xlu1 %v161_v29  ;;  %v147_v30 = vpop.f32.mrf.mxu0 }
  0xe0   :  { %v148_v31 = vadd.f32 %v343_v13, %v147_v30  ;;  %v350_v13 = vld [vmem:[%s625_s4] ss:$0 sm:$0xff] }
  0xe1   :  { %v404_v32 = vpop.f32.mrf.mxu0 }
  0xe2   :  { %v164_v33 = vsel %vm151_vm3, %v148_v31, -inf }
  0xe3   :  { %165 = vmax.xlane.f32.xlu0 %v164_v33 }
 0x15c   :  { %v154_v34 = vpop.xlane.xlu0 %153 }
 0x15d   :  { %v167_v35 = vsub.f32 %v128_v15, %v154_v34 }
 0x15f   :  { %v172_v36 = vmul.f32 1.442695, %v167_v35 }
 0x160   :  { %v157_v37 = vpop.xlane.xlu0 %156 }
 0x161   :  { %426 = vpow2.f32 %v172_v36  ;;  %v168_v38 = vsub.f32 %v133_v19, %v157_v37 }
 0x163   :  { %v174_v39 = vmul.f32 1.442695, %v168_v38 }
 0x164   :  { %v160_v40 = vpop.xlane.xlu1 %159 }
 0x165   :  { %428 = vpow2.f32 %v174_v39  ;;  %v169_v41 = vsub.f32 %v138_v23, %v160_v40 }
 0x167   :  { %v176_v42 = vmul.f32 1.442695, %v169_v41 }
 0x168   :  { %v163_v43 = vpop.xlane.xlu1 %162 }
 0x169   :  { %430 = vpow2.f32 %v176_v42  ;;  %v170_v44 = vsub.f32 %v143_v27, %v163_v43 }
 0x16b   :  { %v178_v45 = vmul.f32 1.442695, %v170_v44 }
 0x16c   :  { %v166_v46 = vpop.xlane.xlu0 %165 }
 0x16d   :  { %432 = vpow2.f32 %v178_v45  ;;  %v171_v47 = vsub.f32 %v148_v31, %v166_v46 }
 0x16e   :  { %v427_v48 = vpop.eup %426 }
 0x16f   :  { %v180_v49 = vmul.f32 1.442695, %v171_v47  ;;  %v182_v50 = vsel %vm151_vm3, %v427_v48, 0.0 }
 0x170   :  { %183 = vadd.xlane.f32.xlu1 %v182_v50 }
 0x171   :  { %434 = vpow2.f32 %v180_v49 }
 0x172   :  { %v429_v51 = vpop.eup %428 }
 0x173   :  { %v185_v52 = vsel %vm151_vm3, %v429_v51, 0.0 }
 0x174   :  { %186 = vadd.xlane.f32.xlu0 %v185_v52 }
 0x176   :  { %v431_v53 = vpop.eup %430 }
 0x177   :  { %v188_v54 = vsel %vm151_vm3, %v431_v53, 0.0 }
 0x178   :  { %189 = vadd.xlane.f32.xlu1 %v188_v54 }
 0x17a   :  { %v433_v55 = vpop.eup %432 }
 0x17b   :  { %v191_v56 = vsel %vm151_vm3, %v433_v55, 0.0 }
 0x17c   :  { %192 = vadd.xlane.f32.xlu0 %v191_v56 }
 0x17e   :  { %v435_v57 = vpop.eup %434 }
 0x17f   :  { %v194_v58 = vsel %vm151_vm3, %v435_v57, 0.0 }
 0x180   :  { %195 = vadd.xlane.f32.xlu1 %v194_v58 }
 0x1f9   :  { %v184_v61 = vpop.xlane.xlu1 %183 }
 0x1fa   :  { %436 = vrcp.f32 %v184_v61 }
 0x1fd   :  { %v187_v62 = vpop.xlane.xlu0 %186 }
 0x1fe   :  { %438 = vrcp.f32 %v187_v62 }
 0x201   :  { %v190_v63 = vpop.xlane.xlu1 %189 }
 0x202   :  { %440 = vrcp.f32 %v190_v63 }
 0x205   :  { %v193_v1 = vpop.xlane.xlu0 %192 }
 0x206   :  { %442 = vrcp.f32 %v193_v1 }
 0x207   :  { %v437_v2 = vpop.eup %436 }
 0x208   :  { %v198_v3 = vmul.f32 %v437_v2, %v427_v48 }
 0x209   :  { %v196_v4 = vpop.xlane.xlu1 %195 }
 0x20a   :  { %444 = vrcp.f32 %v196_v4  ;;  %207 = vst.msk [vmem:[%s624_s5] sm:$0xff] %vm151_vm3, %v198_v3  ;;  %410 = vmatmul.mubr.msk.f32.vlgmr.msra.gmra.mxu1 %vm151_vm3, %v198_v3 }
 0x20b   :  { %v439_v5 = vpop.eup %438  ;;  %412 = vmatprep.mubr.msk.f32.mxu1 %vm447_vm1, %v446_v0 }
 0x20c   :  { %v200_v6 = vmul.f32 %v439_v5, %v429_v51 }
 0x20e   :  { %208 = vst.msk [vmem:[%s624_s5 + $0x8] sm:$0xff] %vm151_vm3, %v200_v6  ;;  %413 = vmatmul.mubr.msk.f32.gmra.mxu1 %vm151_vm3, %v200_v6 }
 0x20f   :  { %v441_v7 = vpop.eup %440  ;;  %415 = vmatprep.mubr.msk.f32.mxu1 %vm447_vm1, %v446_v0 }
 0x210   :  { %v202_v8 = vmul.f32 %v441_v7, %v431_v53 }
 0x212   :  { %209 = vst.msk [vmem:[%s624_s5 + $0x10] sm:$0xff] %vm151_vm3, %v202_v8  ;;  %416 = vmatmul.mubr.msk.f32.gmra.mxu1 %vm151_vm3, %v202_v8 }
 0x213   :  { %v443_v9 = vpop.eup %442  ;;  %418 = vmatprep.mubr.msk.f32.mxu1 %vm447_vm1, %v446_v0 }
 0x214   :  { %v204_v10 = vmul.f32 %v443_v9, %v433_v55 }
 0x216   :  { %210 = vst.msk [vmem:[%s624_s5 + $0x18] sm:$0xff] %vm151_vm3, %v204_v10  ;;  %419 = vmatmul.mubr.msk.f32.gmra.mxu1 %vm151_vm3, %v204_v10 }
 0x217   :  { %v445_v11 = vpop.eup %444  ;;  %421 = vmatprep.mubr.msk.f32.mxu1 %vm447_vm1, %v446_v0 }
 0x218   :  { %v206_v12 = vmul.f32 %v445_v11, %v435_v57 }
 0x21a   :  { %211 = vst.msk [vmem:[%s624_s5 + $0x20] sm:$0xff] %vm151_vm3, %v206_v12  ;;  %422 = vmatmul.mubr.msk.f32.gmra.mxu1 %vm151_vm3, %v206_v12 }
 0x2ca   :  { %v306_v14 = vpop.f32.mrf.mxu1 }
 0x2cb   :  { %v307_v15 = vadd.f32 %v350_v13, %v306_v14 }
 0x2cc   :  { %v411_v16 = vpop.f32.mrf.mxu1 }
 0x2cd   :  { %330 = vst.msk [vmem:[%s626_s6] sm:$0xff] %vm41_vm2, %v307_v15 }
 0x2ce   :  { %v311_v0 = vpop.f32.mrf.mxu1 }
 0x2cf   :  { %v312_v17 = vadd.f32 %v350_v13, %v311_v0 }
 0x2d0   :  { %v414_v18 = vpop.f32.mrf.mxu1 }
 0x2d1   :  { %331 = vst.msk [vmem:[%s626_s6 + $0x8] sm:$0xff] %vm41_vm2, %v312_v17 }
 0x2d2   :  { %v316_v19 = vpop.f32.mrf.mxu1 }
 0x2d3   :  { %v317_v20 = vadd.f32 %v350_v13, %v316_v19 }
 0x2d4   :  { %v417_v21 = vpop.f32.mrf.mxu1 }
 0x2d5   :  { %332 = vst.msk [vmem:[%s626_s6 + $0x10] sm:$0xff] %vm41_vm2, %v317_v20 }
 0x2d6   :  { %v321_v22 = vpop.f32.mrf.mxu1 }
 0x2d7   :  { %v322_v23 = vadd.f32 %v350_v13, %v321_v22 }
 0x2d8   :  { %v420_v24 = vpop.f32.mrf.mxu1 }
 0x2d9   :  { %333 = vst.msk [vmem:[%s626_s6 + $0x18] sm:$0xff] %vm41_vm2, %v322_v23 }
 0x2da   :  { %v326_v25 = vpop.f32.mrf.mxu1 }
 0x2db   :  { %v327_v26 = vadd.f32 %v350_v13, %v326_v25 }
 0x2dc   :  { %v423_v27 = vpop.f32.mrf.mxu1 }
 0x2dd   :  { %334 = vst.msk [vmem:[%s626_s6 + $0x20] sm:$0xff] %vm41_vm2, %v327_v26 }

// kernel: autoencoder_minist_forward.10
= control target key start
LH: loop header
LB: loop body
LE: loop exit
PB: predicated region body
PF: predicated region fallthrough
CT: control target
= control target key end

     0   :  { %vm77_vm0 = vcmask 1043456   ;;  %v327_v0 = vmov 0.0   ;;  %vm37_vm1 = vcmask 162816   ;;  %vm328_vm2 = vmmov 0   ;;  %s492_s1 = inlined_call_operand.vmem [shape: f32[20,80], index: 1, kind: input, shape index: {}]   ;;  %s493_s0 = inlined_call_operand.vmem [shape: f32[98,20], index: 0, kind: input, shape index: {}]   ;;  %s494_s2 = inlined_call_operand.vmem [shape: f32[1,80], index: 2, kind: input, shape index: {}]   ;;  %s495_s3 = inlined_call_operand.vmem [shape: f32[98,80], index: 3, kind: output, shape index: {}]  }
   0x1   :  { %274 = vmatprep.subr.mxu0 %v327_v0  ;;  %v29_v1 = vld [vmem:[%s492_s1 + $0x10] sm:$0xf]  ;;  %319 = vmatprep.subr.mxu1 %v327_v0  ;;  %v28_v2 = vld [vmem:[%s492_s1 + $0x8] sm:$0xff]  ;;  %v27_v3 = vld [vmem:[%s492_s1] sm:$0xff]  ;;  %vm224_vm3 = vcmask 654336   ;;  %vm237_vm4 = vcmask 648192  }
   0x2   :  { %275 = vmatpush3.msk.msra.mxu0 %vm77_vm0, %v29_v1  ;;  %322 = vmatpush3.msk.msra.mxu1 %vm77_vm0, %v29_v1  ;;  %v14_v4 = vld [vmem:[%s493_s0] sm:$0xff]  ;;  %v21_v5 = vld [vmem:[%s493_s0 + $0x38] sm:$0xff]  ;;  %v15_v6 = vld [vmem:[%s493_s0 + $0x8] sm:$0xff] }
   0x3   :  { %276 = vmatprep.subr.mxu0 %v327_v0  ;;  %320 = vmatprep.subr.mxu1 %v327_v0  ;;  %v22_v7 = vld [vmem:[%s493_s0 + $0x40] sm:$0xff]  ;;  %v16_v8 = vld [vmem:[%s493_s0 + $0x10] sm:$0xff]  ;;  %v23_v9 = vld [vmem:[%s493_s0 + $0x48] sm:$0xff] }
   0x4   :  { %277 = vmatpush3.msra.mxu0 %v28_v2  ;;  %323 = vmatpush3.msra.mxu1 %v28_v2  ;;  %v17_v10 = vld [vmem:[%s493_s0 + $0x18] sm:$0xff]  ;;  %v24_v11 = vld [vmem:[%s493_s0 + $0x50] sm:$0xff]  ;;  %v18_v12 = vld [vmem:[%s493_s0 + $0x20] sm:$0xff] }
   0x5   :  { %278 = vmatprep.subr.mxu0 %v327_v0  ;;  %280 = vmatprep.mubr.msk.f32.mxu0 %vm328_vm2, %v327_v0  ;;  %v25_v13 = vld [vmem:[%s493_s0 + $0x58] sm:$0xff]  ;;  %v19_v14 = vld [vmem:[%s493_s0 + $0x28] sm:$0xff]  ;;  %v26_v15 = vld [vmem:[%s493_s0 + $0x60] sm:$0x3] }
   0x6   :  { %279 = vmatpush3.msra.mxu0 %v27_v3  ;;  %321 = vmatprep.subr.mxu1 %v327_v0  ;;  %v20_v16 = vld [vmem:[%s493_s0 + $0x30] sm:$0xff]  ;;  %v426_v17 = vld [vmem:[%s494_s2] ss:$0 sm:$0xff] }
   0x7   :  { %281 = vmatmul.mubr.msk.f32.vlgmr.msra.gmra.mxu0 %vm37_vm1, %v14_v4  ;;  %324 = vmatpush3.msra.mxu1 %v27_v3 }
   0x8   :  { %301 = vmatprep.mubr.msk.f32.mxu1 %vm328_vm2, %v327_v0  ;;  %283 = vmatprep.mubr.msk.f32.mxu0 %vm328_vm2, %v327_v0 }
   0x9   :  { %302 = vmatmul.mubr.msk.f32.vlgmr.msra.gmra.mxu1 %vm37_vm1, %v21_v5 }
   0xa   :  { %304 = vmatprep.mubr.msk.f32.mxu1 %vm328_vm2, %v327_v0 }
   0xb   :  { %284 = vmatmul.mubr.msk.f32.gmra.mxu0 %vm37_vm1, %v15_v6 }
   0xc   :  { %286 = vmatprep.mubr.msk.f32.mxu0 %vm328_vm2, %v327_v0 }
   0xd   :  { %305 = vmatmul.mubr.msk.f32.gmra.mxu1 %vm37_vm1, %v22_v7 }
   0xe   :  { %307 = vmatprep.mubr.msk.f32.mxu1 %vm328_vm2, %v327_v0 }
   0xf   :  { %287 = vmatmul.mubr.msk.f32.gmra.mxu0 %vm37_vm1, %v16_v8 }
  0x10   :  { %289 = vmatprep.mubr.msk.f32.mxu0 %vm328_vm2, %v327_v0 }
  0x11   :  { %308 = vmatmul.mubr.msk.f32.gmra.mxu1 %vm37_vm1, %v23_v9 }
  0x12   :  { %310 = vmatprep.mubr.msk.f32.mxu1 %vm328_vm2, %v327_v0 }
  0x13   :  { %290 = vmatmul.mubr.msk.f32.gmra.mxu0 %vm37_vm1, %v17_v10 }
  0x14   :  { %292 = vmatprep.mubr.msk.f32.mxu0 %vm328_vm2, %v327_v0 }
  0x15   :  { %311 = vmatmul.mubr.msk.f32.gmra.mxu1 %vm37_vm1, %v24_v11 }
  0x16   :  { %313 = vmatprep.mubr.msk.f32.mxu1 %vm328_vm2, %v327_v0 }
  0x17   :  { %293 = vmatmul.mubr.msk.f32.gmra.mxu0 %vm37_vm1, %v18_v12 }
  0x18   :  { %295 = vmatprep.mubr.msk.f32.mxu0 %vm328_vm2, %v327_v0 }
  0x19   :  { %314 = vmatmul.mubr.msk.f32.gmra.mxu1 %vm37_vm1, %v25_v13 }
  0x1a   :  { %316 = vmatprep.mubr.msk.f32.mxu1 %vm328_vm2, %v327_v0 }
  0x1b   :  { %296 = vmatmul.mubr.msk.f32.gmra.mxu0 %vm37_vm1, %v19_v14 }
  0x1c   :  { %298 = vmatprep.mubr.msk.f32.mxu0 %vm328_vm2, %v327_v0 }
  0x1d   :  { %317 = vmatmul.mubr.msk.f32.gmra.mxu1 %vm37_vm1, %v26_v15 }
  0x1f   :  { %299 = vmatmul.mubr.msk.f32.gmra.mxu0 %vm37_vm1, %v20_v16 }
  0xc7   :  { %v147_v18 = vpop.f32.mrf.mxu0 }
  0xc8   :  { %v148_v19 = vadd.f32 %v426_v17, %v147_v18 }
  0xc9   :  { %v282_v20 = vpop.f32.mrf.mxu0  ;;  %v182_v21 = vpop.f32.mrf.mxu1 }
  0xca   :  { %v211_v22 = vmax.f32 %v148_v19, 0.0  ;;  %v183_v23 = vadd.f32 %v426_v17, %v182_v21 }
  0xcb   :  { %v152_v24 = vpop.f32.mrf.mxu0  ;;  %v303_v25 = vpop.f32.mrf.mxu1 }
  0xcc   :  { %225 = vst.msk [vmem:[%s495_s3] sm:$0xff] %vm224_vm3, %v211_v22  ;;  %v218_v26 = vmax.f32 %v183_v23, 0.0  ;;  %v153_v27 = vadd.f32 %v426_v17, %v152_v24 }
  0xcd   :  { %v285_v28 = vpop.f32.mrf.mxu0  ;;  %v187_v29 = vpop.f32.mrf.mxu1 }
  0xce   :  { %232 = vst.msk [vmem:[%s495_s3 + $0x38] sm:$0xff] %vm224_vm3, %v218_v26  ;;  %v212_v30 = vmax.f32 %v153_v27, 0.0  ;;  %v188_v31 = vadd.f32 %v426_v17, %v187_v29 }
  0xcf   :  { %v157_v32 = vpop.f32.mrf.mxu0  ;;  %v306_v33 = vpop.f32.mrf.mxu1 }
  0xd0   :  { %226 = vst.msk [vmem:[%s495_s3 + $0x8] sm:$0xff] %vm224_vm3, %v212_v30  ;;  %v219_v34 = vmax.f32 %v188_v31, 0.0  ;;  %v158_v35 = vadd.f32 %v426_v17, %v157_v32 }
  0xd1   :  { %v288_v36 = vpop.f32.mrf.mxu0  ;;  %v192_v37 = vpop.f32.mrf.mxu1 }
  0xd2   :  { %233 = vst.msk [vmem:[%s495_s3 + $0x40] sm:$0xff] %vm224_vm3, %v219_v34  ;;  %v213_v38 = vmax.f32 %v158_v35, 0.0  ;;  %v193_v39 = vadd.f32 %v426_v17, %v192_v37 }
  0xd3   :  { %v162_v40 = vpop.f32.mrf.mxu0  ;;  %v309_v41 = vpop.f32.mrf.mxu1 }
  0xd4   :  { %227 = vst.msk [vmem:[%s495_s3 + $0x10] sm:$0xff] %vm224_vm3, %v213_v38  ;;  %v220_v42 = vmax.f32 %v193_v39, 0.0  ;;  %v163_v43 = vadd.f32 %v426_v17, %v162_v40 }
  0xd5   :  { %v291_v44 = vpop.f32.mrf.mxu0  ;;  %v197_v45 = vpop.f32.mrf.mxu1 }
  0xd6   :  { %234 = vst.msk [vmem:[%s495_s3 + $0x48] sm:$0xff] %vm224_vm3, %v220_v42  ;;  %v214_v46 = vmax.f32 %v163_v43, 0.0  ;;  %v198_v47 = vadd.f32 %v426_v17, %v197_v45 }
  0xd7   :  { %v167_v48 = vpop.f32.mrf.mxu0  ;;  %v312_v49 = vpop.f32.mrf.mxu1 }
  0xd8   :  { %228 = vst.msk [vmem:[%s495_s3 + $0x18] sm:$0xff] %vm224_vm3, %v214_v46  ;;  %v221_v50 = vmax.f32 %v198_v47, 0.0  ;;  %v168_v51 = vadd.f32 %v426_v17, %v167_v48 }
  0xd9   :  { %v294_v52 = vpop.f32.mrf.mxu0  ;;  %v202_v53 = vpop.f32.mrf.mxu1 }
  0xda   :  { %235 = vst.msk [vmem:[%s495_s3 + $0x50] sm:$0xff] %vm224_vm3, %v221_v50  ;;  %v215_v54 = vmax.f32 %v168_v51, 0.0  ;;  %v203_v55 = vadd.f32 %v426_v17, %v202_v53 }
  0xdb   :  { %v172_v56 = vpop.f32.mrf.mxu0  ;;  %v315_v57 = vpop.f32.mrf.mxu1 }
  0xdc   :  { %229 = vst.msk [vmem:[%s495_s3 + $0x20] sm:$0xff] %vm224_vm3, %v215_v54  ;;  %v222_v58 = vmax.f32 %v203_v55, 0.0  ;;  %v173_v59 = vadd.f32 %v426_v17, %v172_v56 }
  0xdd   :  { %v297_v60 = vpop.f32.mrf.mxu0  ;;  %v207_v61 = vpop.f32.mrf.mxu1 }
  0xde   :  { %236 = vst.msk [vmem:[%s495_s3 + $0x58] sm:$0xff] %vm224_vm3, %v222_v58  ;;  %v216_v62 = vmax.f32 %v173_v59, 0.0  ;;  %v208_v63 = vadd.f32 %v426_v17, %v207_v61 }
  0xdf   :  { %v177_v0 = vpop.f32.mrf.mxu0  ;;  %v318_v1 = vpop.f32.mrf.mxu1 }
  0xe0   :  { %230 = vst.msk [vmem:[%s495_s3 + $0x28] sm:$0xff] %vm224_vm3, %v216_v62  ;;  %v223_v2 = vmax.f32 %v208_v63, 0.0  ;;  %v178_v3 = vadd.f32 %v426_v17, %v177_v0 }
  0xe1   :  { %v300_v4 = vpop.f32.mrf.mxu0 }
  0xe2   :  { %238 = vst.msk [vmem:[%s495_s3 + $0x60] sm:$0x3] %vm237_vm4, %v223_v2  ;;  %v217_v5 = vmax.f32 %v178_v3, 0.0 }
  0xe4   :  { %231 = vst.msk [vmem:[%s495_s3 + $0x30] sm:$0xff] %vm224_vm3, %v217_v5 }

// kernel: autoencoder_minist_forward.11
= control target key start
LH: loop header
LB: loop body
LE: loop exit
PB: predicated region body
PF: predicated region fallthrough
CT: control target
= control target key end

     0   :  { %v807_v0 = vmov 0.0   ;;  %vm292_vm0 = vcmask 1043456   ;;  %vm144_vm1 = vcmask 424960   ;;  %vm655_vm2 = vcmask 7168   ;;  %s1536_s1 = inlined_call_operand.vmem [shape: f32[180,1], index: 1, kind: input, shape index: {}]   ;;  %s1537_s2 = inlined_call_operand.<no memory space> [shape: f32[1,1], index: 2, kind: input, shape index: {}]   ;;  %s1538_s0 = inlined_call_operand.vmem [shape: f32[392,180], index: 0, kind: input, shape index: {}]   ;;  %s1539_s3 = inlined_call_operand.vmem [shape: f32[392,1], index: 3, kind: output, shape index: {}]  }
   0x1   :  { %296 = vmatprep.subr.mxu0 %v807_v0  ;;  %v129_v1 = vld [vmem:[%s1536_s1 + $0x78] sm:$0xff]  ;;  %760 = vmatprep.subr.mxu1 %v807_v0  ;;  %v128_v2 = vld [vmem:[%s1536_s1 + $0x70] sm:$0xff]  ;;  %v127_v3 = vld [vmem:[%s1536_s1 + $0x68] sm:$0xff]  ;;  %v8_v10 = vstv %s1537_s2 }
   0x2   :  { %297 = vmatpush1.msra.mxu0 %v129_v1  ;;  %783 = vmatpush1.msra.mxu1 %v129_v1  ;;  %v126_v4 = vld [vmem:[%s1536_s1 + $0x60] sm:$0xff]  ;;  %v125_v5 = vld [vmem:[%s1536_s1 + $0x58] sm:$0xff]  ;;  %v124_v6 = vld [vmem:[%s1536_s1 + $0x50] sm:$0xff]  ;;  %9 = vst [vmem:[#allocation2] sm:$0x1] %v8_v10 }
   0x3   :  { %298 = vmatprep.subr.mxu0 %v807_v0  ;;  %761 = vmatprep.subr.mxu1 %v807_v0  ;;  %v123_v7 = vld [vmem:[%s1536_s1 + $0x48] sm:$0xff]  ;;  %v122_v8 = vld [vmem:[%s1536_s1 + $0x40] sm:$0xff]  ;;  %v121_v9 = vld [vmem:[%s1536_s1 + $0x38] sm:$0xff] }
   0x4   :  { %299 = vmatpush1.msra.mxu0 %v128_v2  ;;  %784 = vmatpush1.msra.mxu1 %v128_v2  ;;  %v120_v11 = vld [vmem:[%s1536_s1 + $0x30] sm:$0xff]  ;;  %v119_v12 = vld [vmem:[%s1536_s1 + $0x28] sm:$0xff]  ;;  %v118_v13 = vld [vmem:[%s1536_s1 + $0x20] sm:$0xff] }
   0x5   :  { %300 = vmatprep.subr.mxu0 %v807_v0  ;;  %762 = vmatprep.subr.mxu1 %v807_v0  ;;  %v117_v14 = vld [vmem:[%s1536_s1 + $0x18] sm:$0xff]  ;;  %v116_v15 = vld [vmem:[%s1536_s1 + $0x10] sm:$0xff]  ;;  %v115_v16 = vld [vmem:[%s1536_s1 + $0x8] sm:$0xff] }
   0x6   :  { %301 = vmatpush1.msra.mxu0 %v127_v3  ;;  %785 = vmatpush1.msra.mxu1 %v127_v3  ;;  %v114_v17 = vld [vmem:[%s1536_s1] sm:$0xff]  ;;  %v136_v18 = vld [vmem:[%s1536_s1 + $0xb0] sm:$0xf]  ;;  %v135_v19 = vld [vmem:[%s1536_s1 + $0xa8] sm:$0xff] }
   0x7   :  { %302 = vmatprep.subr.mxu0 %v807_v0  ;;  %763 = vmatprep.subr.mxu1 %v807_v0  ;;  %v134_v20 = vld [vmem:[%s1536_s1 + $0xa0] sm:$0xff]  ;;  %v133_v21 = vld [vmem:[%s1536_s1 + $0x98] sm:$0xff]  ;;  %v132_v22 = vld [vmem:[%s1536_s1 + $0x90] sm:$0xff] }
   0x8   :  { %303 = vmatpush1.msra.mxu0 %v126_v4  ;;  %786 = vmatpush1.msra.mxu1 %v126_v4  ;;  %v131_v23 = vld [vmem:[%s1536_s1 + $0x88] sm:$0xff]  ;;  %v130_v25 = vld [vmem:[%s1536_s1 + $0x80] sm:$0xff]  ;;  %v67_v27 = vld [vmem:[%s1538_s0 + $0x198] sm:$0xff] }
   0x9   :  { %304 = vmatprep.subr.mxu0 %v807_v0  ;;  %764 = vmatprep.subr.mxu1 %v807_v0  ;;  %v17_v24 = vld [vmem:[%s1538_s0 + $0x8] sm:$0xff]  ;;  %v16_v26 = vld [vmem:[%s1538_s0] sm:$0xff]  ;;  %v19_v28 = vld [vmem:[%s1538_s0 + $0x18] sm:$0xff] }
   0xa   :  { %305 = vmatpush1.msra.mxu0 %v125_v5  ;;  %787 = vmatpush1.msra.mxu1 %v125_v5  ;;  %v66_v29 = vld [vmem:[%s1538_s0 + $0x190] sm:$0xff]  ;;  %v69_v30 = vld [vmem:[%s1538_s0 + $0x1a8] sm:$0xff]  ;;  %v68_v33 = vld [vmem:[%s1538_s0 + $0x1a0] sm:$0xff] }
   0xb   :  { %306 = vmatprep.subr.mxu0 %v807_v0  ;;  %765 = vmatprep.subr.mxu1 %v807_v0  ;;  %v18_v31 = vld [vmem:[%s1538_s0 + $0x10] sm:$0xff]  ;;  %v21_v32 = vld [vmem:[%s1538_s0 + $0x28] sm:$0xff]  ;;  %v71_v34 = vld [vmem:[%s1538_s0 + $0x1b8] sm:$0xff] }
   0xc   :  { %307 = vmatpush1.msra.mxu0 %v124_v6  ;;  %788 = vmatpush1.msra.mxu1 %v124_v6  ;;  %v20_v35 = vld [vmem:[%s1538_s0 + $0x20] sm:$0xff]  ;;  %v23_v36 = vld [vmem:[%s1538_s0 + $0x38] sm:$0xff]  ;;  %v70_v37 = vld [vmem:[%s1538_s0 + $0x1b0] sm:$0xff] }
   0xd   :  { %308 = vmatprep.subr.mxu0 %v807_v0  ;;  %766 = vmatprep.subr.mxu1 %v807_v0  ;;  %v73_v38 = vld [vmem:[%s1538_s0 + $0x1c8] sm:$0xff]  ;;  %v22_v39 = vld [vmem:[%s1538_s0 + $0x30] sm:$0xff]  ;;  %v72_v41 = vld [vmem:[%s1538_s0 + $0x1c0] sm:$0xff] }
   0xe   :  { %309 = vmatpush1.msra.mxu0 %v123_v7  ;;  %789 = vmatpush1.msra.mxu1 %v123_v7  ;;  %v25_v40 = vld [vmem:[%s1538_s0 + $0x48] sm:$0xff]  ;;  %v75_v42 = vld [vmem:[%s1538_s0 + $0x1d8] sm:$0xff]  ;;  %v24_v43 = vld [vmem:[%s1538_s0 + $0x40] sm:$0xff] }
   0xf   :  { %310 = vmatprep.subr.mxu0 %v807_v0  ;;  %767 = vmatprep.subr.mxu1 %v807_v0  ;;  %v27_v44 = vld [vmem:[%s1538_s0 + $0x58] sm:$0xff]  ;;  %v74_v45 = vld [vmem:[%s1538_s0 + $0x1d0] sm:$0xff]  ;;  %v77_v46 = vld [vmem:[%s1538_s0 + $0x1e8] sm:$0xff] }
  0x10   :  { %311 = vmatpush1.msra.mxu0 %v122_v8  ;;  %790 = vmatpush1.msra.mxu1 %v122_v8  ;;  %v26_v47 = vld [vmem:[%s1538_s0 + $0x50] sm:$0xff]  ;;  %v29_v48 = vld [vmem:[%s1538_s0 + $0x68] sm:$0xff]  ;;  %v76_v49 = vld [vmem:[%s1538_s0 + $0x1e0] sm:$0xff] }
  0x11   :  { %312 = vmatprep.subr.mxu0 %v807_v0  ;;  %768 = vmatprep.subr.mxu1 %v807_v0  ;;  %v79_v50 = vld [vmem:[%s1538_s0 + $0x1f8] sm:$0xff]  ;;  %v28_v51 = vld [vmem:[%s1538_s0 + $0x60] sm:$0xff]  ;;  %v78_v53 = vld [vmem:[%s1538_s0 + $0x1f0] sm:$0xff] }
  0x12   :  { %313 = vmatpush1.msra.mxu0 %v121_v9  ;;  %791 = vmatpush1.msra.mxu1 %v121_v9  ;;  %v31_v52 = vld [vmem:[%s1538_s0 + $0x78] sm:$0xff]  ;;  %v81_v54 = vld [vmem:[%s1538_s0 + $0x208] sm:$0xff]  ;;  %v30_v55 = vld [vmem:[%s1538_s0 + $0x70] sm:$0xff] }
  0x13   :  { %314 = vmatprep.subr.mxu0 %v807_v0  ;;  %769 = vmatprep.subr.mxu1 %v807_v0  ;;  %v33_v56 = vld [vmem:[%s1538_s0 + $0x88] sm:$0xff]  ;;  %v80_v57 = vld [vmem:[%s1538_s0 + $0x200] sm:$0xff]  ;;  %v83_v58 = vld [vmem:[%s1538_s0 + $0x218] sm:$0xff] }
  0x14   :  { %315 = vmatpush1.msra.mxu0 %v120_v11  ;;  %792 = vmatpush1.msra.mxu1 %v120_v11  ;;  %v32_v59 = vld [vmem:[%s1538_s0 + $0x80] sm:$0xff]  ;;  %v35_v60 = vld [vmem:[%s1538_s0 + $0x98] sm:$0xff]  ;;  %v82_v61 = vld [vmem:[%s1538_s0 + $0x210] sm:$0xff] }
  0x15   :  { %316 = vmatprep.subr.mxu0 %v807_v0  ;;  %770 = vmatprep.subr.mxu1 %v807_v0  ;;  %v85_v62 = vld [vmem:[%s1538_s0 + $0x228] sm:$0xff]  ;;  %v34_v63 = vld [vmem:[%s1538_s0 + $0x90] sm:$0xff]  ;;  %v84_v1 = vld [vmem:[%s1538_s0 + $0x220] sm:$0xff] }
  0x16   :  { %317 = vmatpush1.msra.mxu0 %v119_v12  ;;  %793 = vmatpush1.msra.mxu1 %v119_v12  ;;  %v87_v2 = vld [vmem:[%s1538_s0 + $0x238] sm:$0xff]  ;;  %v36_v3 = vld [vmem:[%s1538_s0 + $0xa0] sm:$0xff]  ;;  %v86_v5 = vld [vmem:[%s1538_s0 + $0x230] sm:$0xff] }
  0x17   :  { %318 = vmatprep.subr.mxu0 %v807_v0  ;;  %771 = vmatprep.subr.mxu1 %v807_v0  ;;  %v39_v4 = vld [vmem:[%s1538_s0 + $0xb8] sm:$0xff]  ;;  %v89_v6 = vld [vmem:[%s1538_s0 + $0x248] sm:$0xff]  ;;  %v38_v7 = vld [vmem:[%s1538_s0 + $0xb0] sm:$0xff] }
  0x18   :  { %319 = vmatpush1.msra.mxu0 %v118_v13  ;;  %794 = vmatpush1.msra.mxu1 %v118_v13  ;;  %v41_v8 = vld [vmem:[%s1538_s0 + $0xc8] sm:$0xff]  ;;  %v88_v9 = vld [vmem:[%s1538_s0 + $0x240] sm:$0xff]  ;;  %v91_v10 = vld [vmem:[%s1538_s0 + $0x258] sm:$0xff] }
  0x19   :  { %320 = vmatprep.subr.mxu0 %v807_v0  ;;  %772 = vmatprep.subr.mxu1 %v807_v0  ;;  %v40_v11 = vld [vmem:[%s1538_s0 + $0xc0] sm:$0xff]  ;;  %v43_v12 = vld [vmem:[%s1538_s0 + $0xd8] sm:$0xff]  ;;  %v90_v13 = vld [vmem:[%s1538_s0 + $0x250] sm:$0xff] }
  0x1a   :  { %321 = vmatpush1.msra.mxu0 %v117_v14  ;;  %795 = vmatpush1.msra.mxu1 %v117_v14  ;;  %v93_v14 = vld [vmem:[%s1538_s0 + $0x268] sm:$0xff] }
  0x1b   :  { %322 = vmatprep.subr.mxu0 %v807_v0  ;;  %773 = vmatprep.subr.mxu1 %v807_v0 }
  0x1c   :  { %323 = vmatpush1.msra.mxu0 %v116_v15  ;;  %796 = vmatpush1.msra.mxu1 %v116_v15  ;;  %v42_v15 = vld [vmem:[%s1538_s0 + $0xd0] sm:$0xff] }
  0x1d   :  { %324 = vmatprep.subr.mxu0 %v807_v0  ;;  %774 = vmatprep.subr.mxu1 %v807_v0 }
  0x1e   :  { %325 = vmatpush1.msra.mxu0 %v115_v16  ;;  %797 = vmatpush1.msra.mxu1 %v115_v16  ;;  %v45_v16 = vld [vmem:[%s1538_s0 + $0xe8] sm:$0xff] }
  0x1f   :  { %326 = vmatprep.subr.mxu0 %v807_v0  ;;  %775 = vmatprep.subr.mxu1 %v807_v0 }
  0x20   :  { %327 = vmatpush1.msra.mxu0 %v114_v17  ;;  %798 = vmatpush1.msra.mxu1 %v114_v17  ;;  %v92_v17 = vld [vmem:[%s1538_s0 + $0x260] sm:$0xff] }
  0x21   :  { %346 = vmatprep.subr.mxu0 %v807_v0  ;;  %776 = vmatprep.subr.mxu1 %v807_v0 }
  0x22   :  { %710 = vmatpush2.msk.msra.mxu0 %vm292_vm0, %v136_v18  ;;  %799 = vmatpush2.msk.msra.mxu1 %vm292_vm0, %v136_v18  ;;  %v95_v18 = vld [vmem:[%s1538_s0 + $0x278] sm:$0xff] }
  0x23   :  { %348 = vmatprep.subr.mxu0 %v807_v0  ;;  %777 = vmatprep.subr.mxu1 %v807_v0 }
  0x24   :  { %349 = vmatpush2.msra.mxu0 %v135_v19  ;;  %800 = vmatpush2.msra.mxu1 %v135_v19  ;;  %v44_v19 = vld [vmem:[%s1538_s0 + $0xe0] sm:$0xff] }
  0x25   :  { %350 = vmatprep.subr.mxu0 %v807_v0  ;;  %778 = vmatprep.subr.mxu1 %v807_v0 }
  0x26   :  { %351 = vmatpush2.msra.mxu0 %v134_v20  ;;  %801 = vmatpush2.msra.mxu1 %v134_v20  ;;  %v47_v20 = vld [vmem:[%s1538_s0 + $0xf8] sm:$0xff] }
  0x27   :  { %352 = vmatprep.subr.mxu0 %v807_v0  ;;  %779 = vmatprep.subr.mxu1 %v807_v0 }
  0x28   :  { %353 = vmatpush2.msra.mxu0 %v133_v21  ;;  %802 = vmatpush2.msra.mxu1 %v133_v21  ;;  %v94_v21 = vld [vmem:[%s1538_s0 + $0x270] sm:$0xff] }
  0x29   :  { %354 = vmatprep.subr.mxu0 %v807_v0  ;;  %780 = vmatprep.subr.mxu1 %v807_v0 }
  0x2a   :  { %355 = vmatpush2.msra.mxu0 %v132_v22  ;;  %803 = vmatpush2.msra.mxu1 %v132_v22  ;;  %v97_v22 = vld [vmem:[%s1538_s0 + $0x288] sm:$0xff] }
  0x2b   :  { %356 = vmatprep.subr.mxu0 %v807_v0  ;;  %781 = vmatprep.subr.mxu1 %v807_v0 }
  0x2c   :  { %357 = vmatpush2.msra.mxu0 %v131_v23  ;;  %804 = vmatpush2.msra.mxu1 %v131_v23  ;;  %v46_v23 = vld [vmem:[%s1538_s0 + $0xf0] sm:$0xff] }
  0x2d   :  { %358 = vmatprep.subr.mxu0 %v807_v0  ;;  %711 = vmatprep.mubr.msk.f32.mxu0 %vm144_vm1, %v17_v24  ;;  %v49_v24 = vld [vmem:[%s1538_s0 + $0x108] sm:$0xff] }
  0x2e   :  { %359 = vmatpush2.msra.mxu0 %v130_v25  ;;  %782 = vmatprep.subr.mxu1 %v807_v0  ;;  %v37_v0 = vld [vmem:[%s1538_s0 + $0xa8] sm:$0xff] }
  0x2f   :  { %361 = vmatmul.mubr.f32.vlgmr.msra.gmra.mxu0 %v16_v26  ;;  %805 = vmatpush2.msra.mxu1 %v130_v25  ;;  %v96_v25 = vld [vmem:[%s1538_s0 + $0x280] sm:$0xff]  ;;  %v99_v26 = vld [vmem:[%s1538_s0 + $0x298] sm:$0xff] }
  0x30   :  { %736 = vmatprep.mubr.msk.f32.mxu1 %vm144_vm1, %v67_v27  ;;  %712 = vmatprep.mubr.msk.f32.mxu0 %vm144_vm1, %v19_v28  ;;  %v48_v27 = vld [vmem:[%s1538_s0 + $0x100] sm:$0xff]  ;;  %v51_v28 = vld [vmem:[%s1538_s0 + $0x118] sm:$0xff] }
  0x31   :  { %486 = vmatmul.mubr.f32.vlgmr.msra.gmra.mxu1 %v66_v29  ;;  %v98_v29 = vld [vmem:[%s1538_s0 + $0x290] sm:$0xff] }
  0x32   :  { %737 = vmatprep.mubr.msk.f32.mxu1 %vm144_vm1, %v69_v30  ;;  %v101_v30 = vld [vmem:[%s1538_s0 + $0x2a8] sm:$0xff] }
  0x33   :  { %366 = vmatmul.mubr.f32.gmra.mxu0 %v18_v31  ;;  %v50_v31 = vld [vmem:[%s1538_s0 + $0x110] sm:$0xff] }
  0x34   :  { %713 = vmatprep.mubr.msk.f32.mxu0 %vm144_vm1, %v21_v32  ;;  %v53_v32 = vld [vmem:[%s1538_s0 + $0x128] sm:$0xff] }
  0x35   :  { %491 = vmatmul.mubr.f32.gmra.mxu1 %v68_v33  ;;  %v100_v33 = vld [vmem:[%s1538_s0 + $0x2a0] sm:$0xff] }
  0x36   :  { %738 = vmatprep.mubr.msk.f32.mxu1 %vm144_vm1, %v71_v34  ;;  %v103_v34 = vld [vmem:[%s1538_s0 + $0x2b8] sm:$0xff] }
  0x37   :  { %371 = vmatmul.mubr.f32.gmra.mxu0 %v20_v35  ;;  %v52_v35 = vld [vmem:[%s1538_s0 + $0x120] sm:$0xff] }
  0x38   :  { %714 = vmatprep.mubr.msk.f32.mxu0 %vm144_vm1, %v23_v36  ;;  %v55_v36 = vld [vmem:[%s1538_s0 + $0x138] sm:$0xff] }
  0x39   :  { %496 = vmatmul.mubr.f32.gmra.mxu1 %v70_v37  ;;  %v102_v37 = vld [vmem:[%s1538_s0 + $0x2b0] sm:$0xff] }
  0x3a   :  { %739 = vmatprep.mubr.msk.f32.mxu1 %vm144_vm1, %v73_v38  ;;  %v105_v38 = vld [vmem:[%s1538_s0 + $0x2c8] sm:$0xff] }
  0x3b   :  { %376 = vmatmul.mubr.f32.gmra.mxu0 %v22_v39  ;;  %v54_v39 = vld [vmem:[%s1538_s0 + $0x130] sm:$0xff] }
  0x3c   :  { %715 = vmatprep.mubr.msk.f32.mxu0 %vm144_vm1, %v25_v40  ;;  %v57_v40 = vld [vmem:[%s1538_s0 + $0x148] sm:$0xff] }
  0x3d   :  { %501 = vmatmul.mubr.f32.gmra.mxu1 %v72_v41  ;;  %v104_v41 = vld [vmem:[%s1538_s0 + $0x2c0] sm:$0xff] }
  0x3e   :  { %740 = vmatprep.mubr.msk.f32.mxu1 %vm144_vm1, %v75_v42  ;;  %v107_v42 = vld [vmem:[%s1538_s0 + $0x2d8] sm:$0xff] }
  0x3f   :  { %381 = vmatmul.mubr.f32.gmra.mxu0 %v24_v43  ;;  %v56_v43 = vld [vmem:[%s1538_s0 + $0x140] sm:$0xff] }
  0x40   :  { %716 = vmatprep.mubr.msk.f32.mxu0 %vm144_vm1, %v27_v44  ;;  %v59_v44 = vld [vmem:[%s1538_s0 + $0x158] sm:$0xff] }
  0x41   :  { %506 = vmatmul.mubr.f32.gmra.mxu1 %v74_v45  ;;  %v106_v45 = vld [vmem:[%s1538_s0 + $0x2d0] sm:$0xff] }
  0x42   :  { %741 = vmatprep.mubr.msk.f32.mxu1 %vm144_vm1, %v77_v46  ;;  %v109_v46 = vld [vmem:[%s1538_s0 + $0x2e8] sm:$0xff] }
  0x43   :  { %386 = vmatmul.mubr.f32.gmra.mxu0 %v26_v47  ;;  %v58_v47 = vld [vmem:[%s1538_s0 + $0x150] sm:$0xff] }
  0x44   :  { %717 = vmatprep.mubr.msk.f32.mxu0 %vm144_vm1, %v29_v48  ;;  %v61_v48 = vld [vmem:[%s1538_s0 + $0x168] sm:$0xff] }
  0x45   :  { %511 = vmatmul.mubr.f32.gmra.mxu1 %v76_v49  ;;  %v108_v49 = vld [vmem:[%s1538_s0 + $0x2e0] sm:$0xff] }
  0x46   :  { %742 = vmatprep.mubr.msk.f32.mxu1 %vm144_vm1, %v79_v50  ;;  %v111_v50 = vld [vmem:[%s1538_s0 + $0x2f8] sm:$0xff] }
  0x47   :  { %391 = vmatmul.mubr.f32.gmra.mxu0 %v28_v51  ;;  %v60_v51 = vld [vmem:[%s1538_s0 + $0x160] sm:$0xff] }
  0x48   :  { %718 = vmatprep.mubr.msk.f32.mxu0 %vm144_vm1, %v31_v52  ;;  %v63_v52 = vld [vmem:[%s1538_s0 + $0x178] sm:$0xff] }
  0x49   :  { %516 = vmatmul.mubr.f32.gmra.mxu1 %v78_v53  ;;  %v110_v53 = vld [vmem:[%s1538_s0 + $0x2f0] sm:$0xff] }
  0x4a   :  { %743 = vmatprep.mubr.msk.f32.mxu1 %vm144_vm1, %v81_v54  ;;  %v113_v54 = vld [vmem:[%s1538_s0 + $0x308] sm:$0xff] }
  0x4b   :  { %396 = vmatmul.mubr.f32.gmra.mxu0 %v30_v55  ;;  %v62_v55 = vld [vmem:[%s1538_s0 + $0x170] sm:$0xff] }
  0x4c   :  { %719 = vmatprep.mubr.msk.f32.mxu0 %vm144_vm1, %v33_v56  ;;  %v65_v56 = vld [vmem:[%s1538_s0 + $0x188] sm:$0xff] }
  0x4d   :  { %521 = vmatmul.mubr.f32.gmra.mxu1 %v80_v57  ;;  %v112_v57 = vld [vmem:[%s1538_s0 + $0x300] sm:$0xff] }
  0x4e   :  { %744 = vmatprep.mubr.msk.f32.mxu1 %vm144_vm1, %v83_v58  ;;  %v64_v58 = vld [vmem:[%s1538_s0 + $0x180] sm:$0xff] }
  0x4f   :  { %401 = vmatmul.mubr.f32.gmra.mxu0 %v32_v59  ;;  %v1289_v59 = vld [vmem:[#allocation2] ss:$0 sm:$0xff] }
  0x50   :  { %720 = vmatprep.mubr.msk.f32.mxu0 %vm144_vm1, %v35_v60 }
  0x51   :  { %526 = vmatmul.mubr.f32.gmra.mxu1 %v82_v61 }
  0x52   :  { %745 = vmatprep.mubr.msk.f32.mxu1 %vm144_vm1, %v85_v62 }
  0x53   :  { %406 = vmatmul.mubr.f32.gmra.mxu0 %v34_v63 }
  0x54   :  { %721 = vmatprep.mubr.msk.f32.mxu0 %vm144_vm1, %v37_v0 }
  0x55   :  { %531 = vmatmul.mubr.f32.gmra.mxu1 %v84_v1 }
  0x56   :  { %746 = vmatprep.mubr.msk.f32.mxu1 %vm144_vm1, %v87_v2 }
  0x57   :  { %411 = vmatmul.mubr.f32.gmra.mxu0 %v36_v3 }
  0x58   :  { %722 = vmatprep.mubr.msk.f32.mxu0 %vm144_vm1, %v39_v4 }
  0x59   :  { %536 = vmatmul.mubr.f32.gmra.mxu1 %v86_v5 }
  0x5a   :  { %747 = vmatprep.mubr.msk.f32.mxu1 %vm144_vm1, %v89_v6 }
  0x5b   :  { %416 = vmatmul.mubr.f32.gmra.mxu0 %v38_v7 }
  0x5c   :  { %723 = vmatprep.mubr.msk.f32.mxu0 %vm144_vm1, %v41_v8 }
  0x5d   :  { %541 = vmatmul.mubr.f32.gmra.mxu1 %v88_v9 }
  0x5e   :  { %748 = vmatprep.mubr.msk.f32.mxu1 %vm144_vm1, %v91_v10 }
  0x5f   :  { %421 = vmatmul.mubr.f32.gmra.mxu0 %v40_v11 }
  0x60   :  { %724 = vmatprep.mubr.msk.f32.mxu0 %vm144_vm1, %v43_v12 }
  0x61   :  { %546 = vmatmul.mubr.f32.gmra.mxu1 %v90_v13 }
  0x62   :  { %749 = vmatprep.mubr.msk.f32.mxu1 %vm144_vm1, %v93_v14 }
  0x63   :  { %426 = vmatmul.mubr.f32.gmra.mxu0 %v42_v15 }
  0x64   :  { %725 = vmatprep.mubr.msk.f32.mxu0 %vm144_vm1, %v45_v16 }
  0x65   :  { %551 = vmatmul.mubr.f32.gmra.mxu1 %v92_v17 }
  0x66   :  { %750 = vmatprep.mubr.msk.f32.mxu1 %vm144_vm1, %v95_v18 }
  0x67   :  { %431 = vmatmul.mubr.f32.gmra.mxu0 %v44_v19 }
  0x68   :  { %726 = vmatprep.mubr.msk.f32.mxu0 %vm144_vm1, %v47_v20 }
  0x69   :  { %556 = vmatmul.mubr.f32.gmra.mxu1 %v94_v21 }
  0x6a   :  { %751 = vmatprep.mubr.msk.f32.mxu1 %vm144_vm1, %v97_v22 }
  0x6b   :  { %436 = vmatmul.mubr.f32.gmra.mxu0 %v46_v23 }
  0x6c   :  { %727 = vmatprep.mubr.msk.f32.mxu0 %vm144_vm1, %v49_v24 }
  0x6d   :  { %561 = vmatmul.mubr.f32.gmra.mxu1 %v96_v25 }
  0x6e   :  { %752 = vmatprep.mubr.msk.f32.mxu1 %vm144_vm1, %v99_v26 }
  0x6f   :  { %441 = vmatmul.mubr.f32.gmra.mxu0 %v48_v27 }
  0x70   :  { %728 = vmatprep.mubr.msk.f32.mxu0 %vm144_vm1, %v51_v28 }
  0x71   :  { %566 = vmatmul.mubr.f32.gmra.mxu1 %v98_v29 }
  0x72   :  { %753 = vmatprep.mubr.msk.f32.mxu1 %vm144_vm1, %v101_v30 }
  0x73   :  { %446 = vmatmul.mubr.f32.gmra.mxu0 %v50_v31 }
  0x74   :  { %729 = vmatprep.mubr.msk.f32.mxu0 %vm144_vm1, %v53_v32 }
  0x75   :  { %571 = vmatmul.mubr.f32.gmra.mxu1 %v100_v33 }
  0x76   :  { %754 = vmatprep.mubr.msk.f32.mxu1 %vm144_vm1, %v103_v34 }
  0x77   :  { %451 = vmatmul.mubr.f32.gmra.mxu0 %v52_v35 }
  0x78   :  { %730 = vmatprep.mubr.msk.f32.mxu0 %vm144_vm1, %v55_v36 }
  0x79   :  { %576 = vmatmul.mubr.f32.gmra.mxu1 %v102_v37 }
  0x7a   :  { %755 = vmatprep.mubr.msk.f32.mxu1 %vm144_vm1, %v105_v38 }
  0x7b   :  { %456 = vmatmul.mubr.f32.gmra.mxu0 %v54_v39 }
  0x7c   :  { %731 = vmatprep.mubr.msk.f32.mxu0 %vm144_vm1, %v57_v40 }
  0x7d   :  { %581 = vmatmul.mubr.f32.gmra.mxu1 %v104_v41 }
  0x7e   :  { %756 = vmatprep.mubr.msk.f32.mxu1 %vm144_vm1, %v107_v42 }
  0x7f   :  { %461 = vmatmul.mubr.f32.gmra.mxu0 %v56_v43 }
  0x80   :  { %732 = vmatprep.mubr.msk.f32.mxu0 %vm144_vm1, %v59_v44 }
  0x81   :  { %586 = vmatmul.mubr.f32.gmra.mxu1 %v106_v45 }
  0x82   :  { %757 = vmatprep.mubr.msk.f32.mxu1 %vm144_vm1, %v109_v46 }
  0x83   :  { %466 = vmatmul.mubr.f32.gmra.mxu0 %v58_v47 }
  0x84   :  { %733 = vmatprep.mubr.msk.f32.mxu0 %vm144_vm1, %v61_v48 }
  0x85   :  { %591 = vmatmul.mubr.f32.gmra.mxu1 %v108_v49 }
  0x86   :  { %758 = vmatprep.mubr.msk.f32.mxu1 %vm144_vm1, %v111_v50 }
  0x87   :  { %471 = vmatmul.mubr.f32.gmra.mxu0 %v60_v51 }
  0x88   :  { %734 = vmatprep.mubr.msk.f32.mxu0 %vm144_vm1, %v63_v52 }
  0x89   :  { %596 = vmatmul.mubr.f32.gmra.mxu1 %v110_v53 }
  0x8a   :  { %759 = vmatprep.mubr.msk.f32.mxu1 %vm144_vm1, %v113_v54 }
  0x8b   :  { %476 = vmatmul.mubr.f32.gmra.mxu0 %v62_v55 }
  0x8c   :  { %735 = vmatprep.mubr.msk.f32.mxu0 %vm144_vm1, %v65_v56 }
  0x8d   :  { %601 = vmatmul.mubr.f32.gmra.mxu1 %v112_v57 }
  0x8f   :  { %481 = vmatmul.mubr.f32.gmra.mxu0 %v64_v58 }
  0xef   :  { %v362_v60 = vpop.f32.mrf.mxu0 }
  0xf0   :  { %v363_v61 = vadd.f32 %v1289_v59, %v362_v60 }
  0xf1   :  { %v364_v62 = vpop.f32.mrf.mxu0  ;;  %v487_v63 = vpop.f32.mrf.mxu1 }
  0xf2   :  { %v606_v0 = vmax.f32 %v363_v61, 0.0  ;;  %v488_v1 = vadd.f32 %v1289_v59, %v487_v63 }
  0xf3   :  { %v367_v2 = vpop.f32.mrf.mxu0  ;;  %v489_v3 = vpop.f32.mrf.mxu1 }
  0xf4   :  { %656 = vst.msk [vmem:[%s1539_s3] sm:$0xff] %vm655_vm2, %v606_v0  ;;  %v631_v4 = vmax.f32 %v488_v1, 0.0  ;;  %v368_v5 = vadd.f32 %v1289_v59, %v367_v2 }
  0xf5   :  { %v369_v6 = vpop.f32.mrf.mxu0  ;;  %v492_v7 = vpop.f32.mrf.mxu1 }
  0xf6   :  { %681 = vst.msk [vmem:[%s1539_s3 + $0xc8] sm:$0xff] %vm655_vm2, %v631_v4  ;;  %v607_v8 = vmax.f32 %v368_v5, 0.0  ;;  %v493_v9 = vadd.f32 %v1289_v59, %v492_v7 }
  0xf7   :  { %v372_v10 = vpop.f32.mrf.mxu0  ;;  %v494_v11 = vpop.f32.mrf.mxu1 }
  0xf8   :  { %657 = vst.msk [vmem:[%s1539_s3 + $0x8] sm:$0xff] %vm655_vm2, %v607_v8  ;;  %v632_v12 = vmax.f32 %v493_v9, 0.0  ;;  %v373_v13 = vadd.f32 %v1289_v59, %v372_v10 }
  0xf9   :  { %v374_v14 = vpop.f32.mrf.mxu0  ;;  %v497_v15 = vpop.f32.mrf.mxu1 }
  0xfa   :  { %682 = vst.msk [vmem:[%s1539_s3 + $0xd0] sm:$0xff] %vm655_vm2, %v632_v12  ;;  %v608_v16 = vmax.f32 %v373_v13, 0.0  ;;  %v498_v17 = vadd.f32 %v1289_v59, %v497_v15 }
  0xfb   :  { %v377_v18 = vpop.f32.mrf.mxu0  ;;  %v499_v19 = vpop.f32.mrf.mxu1 }
  0xfc   :  { %658 = vst.msk [vmem:[%s1539_s3 + $0x10] sm:$0xff] %vm655_vm2, %v608_v16  ;;  %v633_v20 = vmax.f32 %v498_v17, 0.0  ;;  %v378_v21 = vadd.f32 %v1289_v59, %v377_v18 }
  0xfd   :  { %v379_v22 = vpop.f32.mrf.mxu0  ;;  %v502_v23 = vpop.f32.mrf.mxu1 }
  0xfe   :  { %683 = vst.msk [vmem:[%s1539_s3 + $0xd8] sm:$0xff] %vm655_vm2, %v633_v20  ;;  %v609_v24 = vmax.f32 %v378_v21, 0.0  ;;  %v503_v25 = vadd.f32 %v1289_v59, %v502_v23 }
  0xff   :  { %v382_v26 = vpop.f32.mrf.mxu0  ;;  %v504_v27 = vpop.f32.mrf.mxu1 }
 0x100   :  { %659 = vst.msk [vmem:[%s1539_s3 + $0x18] sm:$0xff] %vm655_vm2, %v609_v24  ;;  %v634_v28 = vmax.f32 %v503_v25, 0.0  ;;  %v383_v29 = vadd.f32 %v1289_v59, %v382_v26 }
 0x101   :  { %v384_v30 = vpop.f32.mrf.mxu0  ;;  %v507_v31 = vpop.f32.mrf.mxu1 }
 0x102   :  { %684 = vst.msk [vmem:[%s1539_s3 + $0xe0] sm:$0xff] %vm655_vm2, %v634_v28  ;;  %v610_v32 = vmax.f32 %v383_v29, 0.0  ;;  %v508_v33 = vadd.f32 %v1289_v59, %v507_v31 }
 0x103   :  { %v387_v34 = vpop.f32.mrf.mxu0  ;;  %v509_v35 = vpop.f32.mrf.mxu1 }
 0x104   :  { %660 = vst.msk [vmem:[%s1539_s3 + $0x20] sm:$0xff] %vm655_vm2, %v610_v32  ;;  %v635_v36 = vmax.f32 %v508_v33, 0.0  ;;  %v388_v37 = vadd.f32 %v1289_v59, %v387_v34 }
 0x105   :  { %v389_v38 = vpop.f32.mrf.mxu0  ;;  %v512_v39 = vpop.f32.mrf.mxu1 }
 0x106   :  { %685 = vst.msk [vmem:[%s1539_s3 + $0xe8] sm:$0xff] %vm655_vm2, %v635_v36  ;;  %v611_v40 = vmax.f32 %v388_v37, 0.0  ;;  %v513_v41 = vadd.f32 %v1289_v59, %v512_v39 }
 0x107   :  { %v392_v42 = vpop.f32.mrf.mxu0  ;;  %v514_v43 = vpop.f32.mrf.mxu1 }
 0x108   :  { %661 = vst.msk [vmem:[%s1539_s3 + $0x28] sm:$0xff] %vm655_vm2, %v611_v40  ;;  %v636_v44 = vmax.f32 %v513_v41, 0.0  ;;  %v393_v45 = vadd.f32 %v1289_v59, %v392_v42 }
 0x109   :  { %v394_v46 = vpop.f32.mrf.mxu0  ;;  %v517_v47 = vpop.f32.mrf.mxu1 }
 0x10a   :  { %686 = vst.msk [vmem:[%s1539_s3 + $0xf0] sm:$0xff] %vm655_vm2, %v636_v44  ;;  %v612_v48 = vmax.f32 %v393_v45, 0.0  ;;  %v518_v49 = vadd.f32 %v1289_v59, %v517_v47 }
 0x10b   :  { %v397_v50 = vpop.f32.mrf.mxu0  ;;  %v519_v51 = vpop.f32.mrf.mxu1 }
 0x10c   :  { %662 = vst.msk [vmem:[%s1539_s3 + $0x30] sm:$0xff] %vm655_vm2, %v612_v48  ;;  %v637_v52 = vmax.f32 %v518_v49, 0.0  ;;  %v398_v53 = vadd.f32 %v1289_v59, %v397_v50 }
 0x10d   :  { %v399_v54 = vpop.f32.mrf.mxu0  ;;  %v522_v55 = vpop.f32.mrf.mxu1 }
 0x10e   :  { %687 = vst.msk [vmem:[%s1539_s3 + $0xf8] sm:$0xff] %vm655_vm2, %v637_v52  ;;  %v613_v56 = vmax.f32 %v398_v53, 0.0  ;;  %v523_v57 = vadd.f32 %v1289_v59, %v522_v55 }
 0x10f   :  { %v402_v58 = vpop.f32.mrf.mxu0  ;;  %v524_v60 = vpop.f32.mrf.mxu1 }
 0x110   :  { %663 = vst.msk [vmem:[%s1539_s3 + $0x38] sm:$0xff] %vm655_vm2, %v613_v56  ;;  %v638_v61 = vmax.f32 %v523_v57, 0.0  ;;  %v403_v62 = vadd.f32 %v1289_v59, %v402_v58 }
 0x111   :  { %v404_v63 = vpop.f32.mrf.mxu0  ;;  %v527_v0 = vpop.f32.mrf.mxu1 }
 0x112   :  { %688 = vst.msk [vmem:[%s1539_s3 + $0x100] sm:$0xff] %vm655_vm2, %v638_v61  ;;  %v614_v1 = vmax.f32 %v403_v62, 0.0  ;;  %v528_v2 = vadd.f32 %v1289_v59, %v527_v0 }
 0x113   :  { %v407_v3 = vpop.f32.mrf.mxu0  ;;  %v529_v4 = vpop.f32.mrf.mxu1 }
 0x114   :  { %664 = vst.msk [vmem:[%s1539_s3 + $0x40] sm:$0xff] %vm655_vm2, %v614_v1  ;;  %v639_v5 = vmax.f32 %v528_v2, 0.0  ;;  %v408_v6 = vadd.f32 %v1289_v59, %v407_v3 }
 0x115   :  { %v409_v7 = vpop.f32.mrf.mxu0  ;;  %v532_v8 = vpop.f32.mrf.mxu1 }
 0x116   :  { %689 = vst.msk [vmem:[%s1539_s3 + $0x108] sm:$0xff] %vm655_vm2, %v639_v5  ;;  %v615_v9 = vmax.f32 %v408_v6, 0.0  ;;  %v533_v10 = vadd.f32 %v1289_v59, %v532_v8 }
 0x117   :  { %v412_v11 = vpop.f32.mrf.mxu0  ;;  %v534_v12 = vpop.f32.mrf.mxu1 }
 0x118   :  { %665 = vst.msk [vmem:[%s1539_s3 + $0x48] sm:$0xff] %vm655_vm2, %v615_v9  ;;  %v640_v13 = vmax.f32 %v533_v10, 0.0  ;;  %v413_v14 = vadd.f32 %v1289_v59, %v412_v11 }
 0x119   :  { %v414_v15 = vpop.f32.mrf.mxu0  ;;  %v537_v16 = vpop.f32.mrf.mxu1 }
 0x11a   :  { %690 = vst.msk [vmem:[%s1539_s3 + $0x110] sm:$0xff] %vm655_vm2, %v640_v13  ;;  %v616_v17 = vmax.f32 %v413_v14, 0.0  ;;  %v538_v18 = vadd.f32 %v1289_v59, %v537_v16 }
 0x11b   :  { %v417_v19 = vpop.f32.mrf.mxu0  ;;  %v539_v20 = vpop.f32.mrf.mxu1 }
 0x11c   :  { %666 = vst.msk [vmem:[%s1539_s3 + $0x50] sm:$0xff] %vm655_vm2, %v616_v17  ;;  %v641_v21 = vmax.f32 %v538_v18, 0.0  ;;  %v418_v22 = vadd.f32 %v1289_v59, %v417_v19 }
 0x11d   :  { %v419_v23 = vpop.f32.mrf.mxu0  ;;  %v542_v24 = vpop.f32.mrf.mxu1 }
 0x11e   :  { %691 = vst.msk [vmem:[%s1539_s3 + $0x118] sm:$0xff] %vm655_vm2, %v641_v21  ;;  %v617_v25 = vmax.f32 %v418_v22, 0.0  ;;  %v543_v26 = vadd.f32 %v1289_v59, %v542_v24 }
 0x11f   :  { %v422_v27 = vpop.f32.mrf.mxu0  ;;  %v544_v28 = vpop.f32.mrf.mxu1 }
 0x120   :  { %667 = vst.msk [vmem:[%s1539_s3 + $0x58] sm:$0xff] %vm655_vm2, %v617_v25  ;;  %v642_v29 = vmax.f32 %v543_v26, 0.0  ;;  %v423_v30 = vadd.f32 %v1289_v59, %v422_v27 }
 0x121   :  { %v424_v31 = vpop.f32.mrf.mxu0  ;;  %v547_v32 = vpop.f32.mrf.mxu1 }
 0x122   :  { %692 = vst.msk [vmem:[%s1539_s3 + $0x120] sm:$0xff] %vm655_vm2, %v642_v29  ;;  %v618_v33 = vmax.f32 %v423_v30, 0.0  ;;  %v548_v34 = vadd.f32 %v1289_v59, %v547_v32 }
 0x123   :  { %v427_v35 = vpop.f32.mrf.mxu0  ;;  %v549_v36 = vpop.f32.mrf.mxu1 }
 0x124   :  { %668 = vst.msk [vmem:[%s1539_s3 + $0x60] sm:$0xff] %vm655_vm2, %v618_v33  ;;  %v643_v37 = vmax.f32 %v548_v34, 0.0  ;;  %v428_v38 = vadd.f32 %v1289_v59, %v427_v35 }
 0x125   :  { %v429_v39 = vpop.f32.mrf.mxu0  ;;  %v552_v40 = vpop.f32.mrf.mxu1 }
 0x126   :  { %693 = vst.msk [vmem:[%s1539_s3 + $0x128] sm:$0xff] %vm655_vm2, %v643_v37  ;;  %v619_v41 = vmax.f32 %v428_v38, 0.0  ;;  %v553_v42 = vadd.f32 %v1289_v59, %v552_v40 }
 0x127   :  { %v432_v43 = vpop.f32.mrf.mxu0  ;;  %v554_v44 = vpop.f32.mrf.mxu1 }
 0x128   :  { %669 = vst.msk [vmem:[%s1539_s3 + $0x68] sm:$0xff] %vm655_vm2, %v619_v41  ;;  %v644_v45 = vmax.f32 %v553_v42, 0.0  ;;  %v433_v46 = vadd.f32 %v1289_v59, %v432_v43 }
 0x129   :  { %v434_v47 = vpop.f32.mrf.mxu0  ;;  %v557_v48 = vpop.f32.mrf.mxu1 }
 0x12a   :  { %694 = vst.msk [vmem:[%s1539_s3 + $0x130] sm:$0xff] %vm655_vm2, %v644_v45  ;;  %v620_v49 = vmax.f32 %v433_v46, 0.0  ;;  %v558_v50 = vadd.f32 %v1289_v59, %v557_v48 }
 0x12b   :  { %v437_v51 = vpop.f32.mrf.mxu0  ;;  %v559_v52 = vpop.f32.mrf.mxu1 }
 0x12c   :  { %670 = vst.msk [vmem:[%s1539_s3 + $0x70] sm:$0xff] %vm655_vm2, %v620_v49  ;;  %v645_v53 = vmax.f32 %v558_v50, 0.0  ;;  %v438_v54 = vadd.f32 %v1289_v59, %v437_v51 }
 0x12d   :  { %v439_v55 = vpop.f32.mrf.mxu0  ;;  %v562_v56 = vpop.f32.mrf.mxu1 }
 0x12e   :  { %695 = vst.msk [vmem:[%s1539_s3 + $0x138] sm:$0xff] %vm655_vm2, %v645_v53  ;;  %v621_v57 = vmax.f32 %v438_v54, 0.0  ;;  %v563_v58 = vadd.f32 %v1289_v59, %v562_v56 }
 0x12f   :  { %v442_v60 = vpop.f32.mrf.mxu0  ;;  %v564_v61 = vpop.f32.mrf.mxu1 }
 0x130   :  { %671 = vst.msk [vmem:[%s1539_s3 + $0x78] sm:$0xff] %vm655_vm2, %v621_v57  ;;  %v646_v62 = vmax.f32 %v563_v58, 0.0  ;;  %v443_v63 = vadd.f32 %v1289_v59, %v442_v60 }
 0x131   :  { %v444_v0 = vpop.f32.mrf.mxu0  ;;  %v567_v1 = vpop.f32.mrf.mxu1 }
 0x132   :  { %696 = vst.msk [vmem:[%s1539_s3 + $0x140] sm:$0xff] %vm655_vm2, %v646_v62  ;;  %v622_v2 = vmax.f32 %v443_v63, 0.0  ;;  %v568_v3 = vadd.f32 %v1289_v59, %v567_v1 }
 0x133   :  { %v447_v4 = vpop.f32.mrf.mxu0  ;;  %v569_v5 = vpop.f32.mrf.mxu1 }
 0x134   :  { %672 = vst.msk [vmem:[%s1539_s3 + $0x80] sm:$0xff] %vm655_vm2, %v622_v2  ;;  %v647_v6 = vmax.f32 %v568_v3, 0.0  ;;  %v448_v7 = vadd.f32 %v1289_v59, %v447_v4 }
 0x135   :  { %v449_v8 = vpop.f32.mrf.mxu0  ;;  %v572_v9 = vpop.f32.mrf.mxu1 }
 0x136   :  { %697 = vst.msk [vmem:[%s1539_s3 + $0x148] sm:$0xff] %vm655_vm2, %v647_v6  ;;  %v623_v10 = vmax.f32 %v448_v7, 0.0  ;;  %v573_v11 = vadd.f32 %v1289_v59, %v572_v9 }
 0x137   :  { %v452_v12 = vpop.f32.mrf.mxu0  ;;  %v574_v13 = vpop.f32.mrf.mxu1 }
 0x138   :  { %673 = vst.msk [vmem:[%s1539_s3 + $0x88] sm:$0xff] %vm655_vm2, %v623_v10  ;;  %v648_v14 = vmax.f32 %v573_v11, 0.0  ;;  %v453_v15 = vadd.f32 %v1289_v59, %v452_v12 }
 0x139   :  { %v454_v16 = vpop.f32.mrf.mxu0  ;;  %v577_v17 = vpop.f32.mrf.mxu1 }
 0x13a   :  { %698 = vst.msk [vmem:[%s1539_s3 + $0x150] sm:$0xff] %vm655_vm2, %v648_v14  ;;  %v624_v18 = vmax.f32 %v453_v15, 0.0  ;;  %v578_v19 = vadd.f32 %v1289_v59, %v577_v17 }
 0x13b   :  { %v457_v20 = vpop.f32.mrf.mxu0  ;;  %v579_v21 = vpop.f32.mrf.mxu1 }
 0x13c   :  { %674 = vst.msk [vmem:[%s1539_s3 + $0x90] sm:$0xff] %vm655_vm2, %v624_v18  ;;  %v649_v22 = vmax.f32 %v578_v19, 0.0  ;;  %v458_v23 = vadd.f32 %v1289_v59, %v457_v20 }
 0x13d   :  { %v459_v24 = vpop.f32.mrf.mxu0  ;;  %v582_v25 = vpop.f32.mrf.mxu1 }
 0x13e   :  { %699 = vst.msk [vmem:[%s1539_s3 + $0x158] sm:$0xff] %vm655_vm2, %v649_v22  ;;  %v625_v26 = vmax.f32 %v458_v23, 0.0  ;;  %v583_v27 = vadd.f32 %v1289_v59, %v582_v25 }
 0x13f   :  { %v462_v28 = vpop.f32.mrf.mxu0  ;;  %v584_v29 = vpop.f32.mrf.mxu1 }
 0x140   :  { %675 = vst.msk [vmem:[%s1539_s3 + $0x98] sm:$0xff] %vm655_vm2, %v625_v26  ;;  %v650_v30 = vmax.f32 %v583_v27, 0.0  ;;  %v463_v31 = vadd.f32 %v1289_v59, %v462_v28 }
 0x141   :  { %v464_v32 = vpop.f32.mrf.mxu0  ;;  %v587_v33 = vpop.f32.mrf.mxu1 }
 0x142   :  { %700 = vst.msk [vmem:[%s1539_s3 + $0x160] sm:$0xff] %vm655_vm2, %v650_v30  ;;  %v626_v34 = vmax.f32 %v463_v31, 0.0  ;;  %v588_v35 = vadd.f32 %v1289_v59, %v587_v33 }
 0x143   :  { %v467_v36 = vpop.f32.mrf.mxu0  ;;  %v589_v37 = vpop.f32.mrf.mxu1 }
 0x144   :  { %676 = vst.msk [vmem:[%s1539_s3 + $0xa0] sm:$0xff] %vm655_vm2, %v626_v34  ;;  %v651_v38 = vmax.f32 %v588_v35, 0.0  ;;  %v468_v39 = vadd.f32 %v1289_v59, %v467_v36 }
 0x145   :  { %v469_v40 = vpop.f32.mrf.mxu0  ;;  %v592_v41 = vpop.f32.mrf.mxu1 }
 0x146   :  { %701 = vst.msk [vmem:[%s1539_s3 + $0x168] sm:$0xff] %vm655_vm2, %v651_v38  ;;  %v627_v42 = vmax.f32 %v468_v39, 0.0  ;;  %v593_v43 = vadd.f32 %v1289_v59, %v592_v41 }
 0x147   :  { %v472_v44 = vpop.f32.mrf.mxu0  ;;  %v594_v45 = vpop.f32.mrf.mxu1 }
 0x148   :  { %677 = vst.msk [vmem:[%s1539_s3 + $0xa8] sm:$0xff] %vm655_vm2, %v627_v42  ;;  %v652_v46 = vmax.f32 %v593_v43, 0.0  ;;  %v473_v47 = vadd.f32 %v1289_v59, %v472_v44 }
 0x149   :  { %v474_v48 = vpop.f32.mrf.mxu0  ;;  %v597_v49 = vpop.f32.mrf.mxu1 }
 0x14a   :  { %702 = vst.msk [vmem:[%s1539_s3 + $0x170] sm:$0xff] %vm655_vm2, %v652_v46  ;;  %v628_v50 = vmax.f32 %v473_v47, 0.0  ;;  %v598_v51 = vadd.f32 %v1289_v59, %v597_v49 }
 0x14b   :  { %v477_v52 = vpop.f32.mrf.mxu0  ;;  %v599_v53 = vpop.f32.mrf.mxu1 }
 0x14c   :  { %678 = vst.msk [vmem:[%s1539_s3 + $0xb0] sm:$0xff] %vm655_vm2, %v628_v50  ;;  %v653_v54 = vmax.f32 %v598_v51, 0.0  ;;  %v478_v55 = vadd.f32 %v1289_v59, %v477_v52 }
 0x14d   :  { %v479_v56 = vpop.f32.mrf.mxu0  ;;  %v602_v57 = vpop.f32.mrf.mxu1 }
 0x14e   :  { %703 = vst.msk [vmem:[%s1539_s3 + $0x178] sm:$0xff] %vm655_vm2, %v653_v54  ;;  %v629_v58 = vmax.f32 %v478_v55, 0.0  ;;  %v603_v60 = vadd.f32 %v1289_v59, %v602_v57 }
 0x14f   :  { %v482_v61 = vpop.f32.mrf.mxu0  ;;  %v604_v62 = vpop.f32.mrf.mxu1 }
 0x150   :  { %679 = vst.msk [vmem:[%s1539_s3 + $0xb8] sm:$0xff] %vm655_vm2, %v629_v58  ;;  %v654_v63 = vmax.f32 %v603_v60, 0.0  ;;  %v483_v0 = vadd.f32 %v1289_v59, %v482_v61 }
 0x151   :  { %v484_v1 = vpop.f32.mrf.mxu0 }
 0x152   :  { %704 = vst.msk [vmem:[%s1539_s3 + $0x180] sm:$0xff] %vm655_vm2, %v654_v63  ;;  %v630_v2 = vmax.f32 %v483_v0, 0.0 }
 0x154   :  { %680 = vst.msk [vmem:[%s1539_s3 + $0xc0] sm:$0xff] %vm655_vm2, %v630_v2 }

// kernel: autoencoder_minist_forward.12
= control target key start
LH: loop header
LB: loop body
LE: loop exit
PB: predicated region body
PF: predicated region fallthrough
CT: control target
= control target key end

     0   :  { %vm219_vm0 = vcmask 1040384   ;;  %vm71_vm1 = vcmask 7168   ;;  %v890_v0 = vmov 0.0   ;;  %vm891_vm2 = vmmov 0   ;;  %s1461_s1 = inlined_call_operand.vmem [shape: f32[1,4], index: 1, kind: input, shape index: {}]   ;;  %s1462_s0 = inlined_call_operand.vmem [shape: f32[392,1], index: 0, kind: input, shape index: {}]   ;;  %s1463_s2 = inlined_call_operand.vmem [shape: f32[1,4], index: 2, kind: input, shape index: {}]   ;;  %s1464_s3 = inlined_call_operand.vmem [shape: f32[392,4], index: 3, kind: output, shape index: {}]  }
   0x1   :  { %737 = vmatprep.subr.mxu0 %v890_v0  ;;  %v63_v1 = vld [vmem:[%s1461_s1] sm:$0x1]  ;;  %739 = vmatprep.mubr.msk.f32.mxu0 %vm891_vm2, %v890_v0  ;;  %v39_v3 = vld [vmem:[%s1462_s0 + $0xc8] sm:$0xff]  ;;  %v40_v5 = vld [vmem:[%s1462_s0 + $0xd0] sm:$0xff]  ;;  %vm582_vm3 = vcmask 31744  }
   0x2   :  { %v14_v2 = vld [vmem:[%s1462_s0] sm:$0xff]  ;;  %738 = vmatpush3.msk.msra.mxu0 %vm219_vm0, %v63_v1  ;;  %886 = vmatprep.subr.mxu1 %v890_v0  ;;  %v15_v4 = vld [vmem:[%s1462_s0 + $0x8] sm:$0xff]  ;;  %v16_v6 = vld [vmem:[%s1462_s0 + $0x10] sm:$0xff] }
   0x3   :  { %740 = vmatmul.mubr.msk.f32.vlgmr.msra.gmra.mxu0 %vm71_vm1, %v14_v2  ;;  %887 = vmatpush3.msk.msra.mxu1 %vm219_vm0, %v63_v1  ;;  %v41_v7 = vld [vmem:[%s1462_s0 + $0xd8] sm:$0xff]  ;;  %v42_v9 = vld [vmem:[%s1462_s0 + $0xe0] sm:$0xff]  ;;  %v43_v11 = vld [vmem:[%s1462_s0 + $0xe8] sm:$0xff] }
   0x4   :  { %814 = vmatprep.mubr.msk.f32.mxu1 %vm891_vm2, %v890_v0  ;;  %742 = vmatprep.mubr.msk.f32.mxu0 %vm891_vm2, %v890_v0  ;;  %v17_v8 = vld [vmem:[%s1462_s0 + $0x18] sm:$0xff]  ;;  %v18_v10 = vld [vmem:[%s1462_s0 + $0x20] sm:$0xff]  ;;  %v19_v12 = vld [vmem:[%s1462_s0 + $0x28] sm:$0xff] }
   0x5   :  { %815 = vmatmul.mubr.msk.f32.vlgmr.msra.gmra.mxu1 %vm71_vm1, %v39_v3  ;;  %v44_v13 = vld [vmem:[%s1462_s0 + $0xf0] sm:$0xff]  ;;  %v45_v15 = vld [vmem:[%s1462_s0 + $0xf8] sm:$0xff]  ;;  %v46_v17 = vld [vmem:[%s1462_s0 + $0x100] sm:$0xff] }
   0x6   :  { %817 = vmatprep.mubr.msk.f32.mxu1 %vm891_vm2, %v890_v0  ;;  %v20_v14 = vld [vmem:[%s1462_s0 + $0x30] sm:$0xff]  ;;  %v21_v16 = vld [vmem:[%s1462_s0 + $0x38] sm:$0xff]  ;;  %v22_v18 = vld [vmem:[%s1462_s0 + $0x40] sm:$0xff] }
   0x7   :  { %743 = vmatmul.mubr.msk.f32.gmra.mxu0 %vm71_vm1, %v15_v4  ;;  %v47_v19 = vld [vmem:[%s1462_s0 + $0x108] sm:$0xff]  ;;  %v48_v21 = vld [vmem:[%s1462_s0 + $0x110] sm:$0xff]  ;;  %v49_v23 = vld [vmem:[%s1462_s0 + $0x118] sm:$0xff] }
   0x8   :  { %745 = vmatprep.mubr.msk.f32.mxu0 %vm891_vm2, %v890_v0  ;;  %v23_v20 = vld [vmem:[%s1462_s0 + $0x48] sm:$0xff]  ;;  %v24_v22 = vld [vmem:[%s1462_s0 + $0x50] sm:$0xff]  ;;  %v25_v24 = vld [vmem:[%s1462_s0 + $0x58] sm:$0xff] }
   0x9   :  { %818 = vmatmul.mubr.msk.f32.gmra.mxu1 %vm71_vm1, %v40_v5  ;;  %v50_v25 = vld [vmem:[%s1462_s0 + $0x120] sm:$0xff]  ;;  %v51_v27 = vld [vmem:[%s1462_s0 + $0x128] sm:$0xff]  ;;  %v52_v29 = vld [vmem:[%s1462_s0 + $0x130] sm:$0xff] }
   0xa   :  { %820 = vmatprep.mubr.msk.f32.mxu1 %vm891_vm2, %v890_v0  ;;  %v26_v26 = vld [vmem:[%s1462_s0 + $0x60] sm:$0xff]  ;;  %v27_v28 = vld [vmem:[%s1462_s0 + $0x68] sm:$0xff]  ;;  %v28_v30 = vld [vmem:[%s1462_s0 + $0x70] sm:$0xff] }
   0xb   :  { %746 = vmatmul.mubr.msk.f32.gmra.mxu0 %vm71_vm1, %v16_v6  ;;  %v53_v31 = vld [vmem:[%s1462_s0 + $0x138] sm:$0xff]  ;;  %v54_v33 = vld [vmem:[%s1462_s0 + $0x140] sm:$0xff]  ;;  %v55_v35 = vld [vmem:[%s1462_s0 + $0x148] sm:$0xff] }
   0xc   :  { %748 = vmatprep.mubr.msk.f32.mxu0 %vm891_vm2, %v890_v0  ;;  %v29_v32 = vld [vmem:[%s1462_s0 + $0x78] sm:$0xff]  ;;  %v30_v34 = vld [vmem:[%s1462_s0 + $0x80] sm:$0xff]  ;;  %v31_v36 = vld [vmem:[%s1462_s0 + $0x88] sm:$0xff] }
   0xd   :  { %821 = vmatmul.mubr.msk.f32.gmra.mxu1 %vm71_vm1, %v41_v7  ;;  %v56_v37 = vld [vmem:[%s1462_s0 + $0x150] sm:$0xff]  ;;  %v57_v39 = vld [vmem:[%s1462_s0 + $0x158] sm:$0xff]  ;;  %v58_v41 = vld [vmem:[%s1462_s0 + $0x160] sm:$0xff] }
   0xe   :  { %823 = vmatprep.mubr.msk.f32.mxu1 %vm891_vm2, %v890_v0  ;;  %v32_v38 = vld [vmem:[%s1462_s0 + $0x90] sm:$0xff]  ;;  %v33_v40 = vld [vmem:[%s1462_s0 + $0x98] sm:$0xff]  ;;  %v34_v42 = vld [vmem:[%s1462_s0 + $0xa0] sm:$0xff] }
   0xf   :  { %749 = vmatmul.mubr.msk.f32.gmra.mxu0 %vm71_vm1, %v17_v8  ;;  %v59_v43 = vld [vmem:[%s1462_s0 + $0x168] sm:$0xff]  ;;  %v60_v45 = vld [vmem:[%s1462_s0 + $0x170] sm:$0xff]  ;;  %v61_v47 = vld [vmem:[%s1462_s0 + $0x178] sm:$0xff] }
  0x10   :  { %751 = vmatprep.mubr.msk.f32.mxu0 %vm891_vm2, %v890_v0  ;;  %v35_v44 = vld [vmem:[%s1462_s0 + $0xa8] sm:$0xff]  ;;  %v36_v46 = vld [vmem:[%s1462_s0 + $0xb0] sm:$0xff]  ;;  %v37_v48 = vld [vmem:[%s1462_s0 + $0xb8] sm:$0xff] }
  0x11   :  { %824 = vmatmul.mubr.msk.f32.gmra.mxu1 %vm71_vm1, %v42_v9  ;;  %v62_v49 = vld [vmem:[%s1462_s0 + $0x180] sm:$0xff] }
  0x12   :  { %826 = vmatprep.mubr.msk.f32.mxu1 %vm891_vm2, %v890_v0  ;;  %v38_v50 = vld [vmem:[%s1462_s0 + $0xc0] sm:$0xff] }
  0x13   :  { %752 = vmatmul.mubr.msk.f32.gmra.mxu0 %vm71_vm1, %v18_v10  ;;  %v1214_v51 = vld [vmem:[%s1463_s2] ss:$0 sm:$0xff] }
  0x14   :  { %754 = vmatprep.mubr.msk.f32.mxu0 %vm891_vm2, %v890_v0 }
  0x15   :  { %827 = vmatmul.mubr.msk.f32.gmra.mxu1 %vm71_vm1, %v43_v11 }
  0x16   :  { %829 = vmatprep.mubr.msk.f32.mxu1 %vm891_vm2, %v890_v0 }
  0x17   :  { %755 = vmatmul.mubr.msk.f32.gmra.mxu0 %vm71_vm1, %v19_v12 }
  0x18   :  { %757 = vmatprep.mubr.msk.f32.mxu0 %vm891_vm2, %v890_v0 }
  0x19   :  { %830 = vmatmul.mubr.msk.f32.gmra.mxu1 %vm71_vm1, %v44_v13 }
  0x1a   :  { %832 = vmatprep.mubr.msk.f32.mxu1 %vm891_vm2, %v890_v0 }
  0x1b   :  { %758 = vmatmul.mubr.msk.f32.gmra.mxu0 %vm71_vm1, %v20_v14 }
  0x1c   :  { %760 = vmatprep.mubr.msk.f32.mxu0 %vm891_vm2, %v890_v0 }
  0x1d   :  { %833 = vmatmul.mubr.msk.f32.gmra.mxu1 %vm71_vm1, %v45_v15 }
  0x1e   :  { %835 = vmatprep.mubr.msk.f32.mxu1 %vm891_vm2, %v890_v0 }
  0x1f   :  { %761 = vmatmul.mubr.msk.f32.gmra.mxu0 %vm71_vm1, %v21_v16 }
  0x20   :  { %763 = vmatprep.mubr.msk.f32.mxu0 %vm891_vm2, %v890_v0 }
  0x21   :  { %836 = vmatmul.mubr.msk.f32.gmra.mxu1 %vm71_vm1, %v46_v17 }
  0x22   :  { %838 = vmatprep.mubr.msk.f32.mxu1 %vm891_vm2, %v890_v0 }
  0x23   :  { %764 = vmatmul.mubr.msk.f32.gmra.mxu0 %vm71_vm1, %v22_v18 }
  0x24   :  { %766 = vmatprep.mubr.msk.f32.mxu0 %vm891_vm2, %v890_v0 }
  0x25   :  { %839 = vmatmul.mubr.msk.f32.gmra.mxu1 %vm71_vm1, %v47_v19 }
  0x26   :  { %841 = vmatprep.mubr.msk.f32.mxu1 %vm891_vm2, %v890_v0 }
  0x27   :  { %767 = vmatmul.mubr.msk.f32.gmra.mxu0 %vm71_vm1, %v23_v20 }
  0x28   :  { %769 = vmatprep.mubr.msk.f32.mxu0 %vm891_vm2, %v890_v0 }
  0x29   :  { %842 = vmatmul.mubr.msk.f32.gmra.mxu1 %vm71_vm1, %v48_v21 }
  0x2a   :  { %844 = vmatprep.mubr.msk.f32.mxu1 %vm891_vm2, %v890_v0 }
  0x2b   :  { %770 = vmatmul.mubr.msk.f32.gmra.mxu0 %vm71_vm1, %v24_v22 }
  0x2c   :  { %772 = vmatprep.mubr.msk.f32.mxu0 %vm891_vm2, %v890_v0 }
  0x2d   :  { %845 = vmatmul.mubr.msk.f32.gmra.mxu1 %vm71_vm1, %v49_v23 }
  0x2e   :  { %847 = vmatprep.mubr.msk.f32.mxu1 %vm891_vm2, %v890_v0 }
  0x2f   :  { %773 = vmatmul.mubr.msk.f32.gmra.mxu0 %vm71_vm1, %v25_v24 }
  0x30   :  { %775 = vmatprep.mubr.msk.f32.mxu0 %vm891_vm2, %v890_v0 }
  0x31   :  { %848 = vmatmul.mubr.msk.f32.gmra.mxu1 %vm71_vm1, %v50_v25 }
  0x32   :  { %850 = vmatprep.mubr.msk.f32.mxu1 %vm891_vm2, %v890_v0 }
  0x33   :  { %776 = vmatmul.mubr.msk.f32.gmra.mxu0 %vm71_vm1, %v26_v26 }
  0x34   :  { %778 = vmatprep.mubr.msk.f32.mxu0 %vm891_vm2, %v890_v0 }
  0x35   :  { %851 = vmatmul.mubr.msk.f32.gmra.mxu1 %vm71_vm1, %v51_v27 }
  0x36   :  { %853 = vmatprep.mubr.msk.f32.mxu1 %vm891_vm2, %v890_v0 }
  0x37   :  { %779 = vmatmul.mubr.msk.f32.gmra.mxu0 %vm71_vm1, %v27_v28 }
  0x38   :  { %781 = vmatprep.mubr.msk.f32.mxu0 %vm891_vm2, %v890_v0 }
  0x39   :  { %854 = vmatmul.mubr.msk.f32.gmra.mxu1 %vm71_vm1, %v52_v29 }
  0x3a   :  { %856 = vmatprep.mubr.msk.f32.mxu1 %vm891_vm2, %v890_v0 }
  0x3b   :  { %782 = vmatmul.mubr.msk.f32.gmra.mxu0 %vm71_vm1, %v28_v30 }
  0x3c   :  { %784 = vmatprep.mubr.msk.f32.mxu0 %vm891_vm2, %v890_v0 }
  0x3d   :  { %857 = vmatmul.mubr.msk.f32.gmra.mxu1 %vm71_vm1, %v53_v31 }
  0x3e   :  { %859 = vmatprep.mubr.msk.f32.mxu1 %vm891_vm2, %v890_v0 }
  0x3f   :  { %785 = vmatmul.mubr.msk.f32.gmra.mxu0 %vm71_vm1, %v29_v32 }
  0x40   :  { %787 = vmatprep.mubr.msk.f32.mxu0 %vm891_vm2, %v890_v0 }
  0x41   :  { %860 = vmatmul.mubr.msk.f32.gmra.mxu1 %vm71_vm1, %v54_v33 }
  0x42   :  { %862 = vmatprep.mubr.msk.f32.mxu1 %vm891_vm2, %v890_v0 }
  0x43   :  { %788 = vmatmul.mubr.msk.f32.gmra.mxu0 %vm71_vm1, %v30_v34 }
  0x44   :  { %790 = vmatprep.mubr.msk.f32.mxu0 %vm891_vm2, %v890_v0 }
  0x45   :  { %863 = vmatmul.mubr.msk.f32.gmra.mxu1 %vm71_vm1, %v55_v35 }
  0x46   :  { %865 = vmatprep.mubr.msk.f32.mxu1 %vm891_vm2, %v890_v0 }
  0x47   :  { %791 = vmatmul.mubr.msk.f32.gmra.mxu0 %vm71_vm1, %v31_v36 }
  0x48   :  { %793 = vmatprep.mubr.msk.f32.mxu0 %vm891_vm2, %v890_v0 }
  0x49   :  { %866 = vmatmul.mubr.msk.f32.gmra.mxu1 %vm71_vm1, %v56_v37 }
  0x4a   :  { %868 = vmatprep.mubr.msk.f32.mxu1 %vm891_vm2, %v890_v0 }
  0x4b   :  { %794 = vmatmul.mubr.msk.f32.gmra.mxu0 %vm71_vm1, %v32_v38 }
  0x4c   :  { %796 = vmatprep.mubr.msk.f32.mxu0 %vm891_vm2, %v890_v0 }
  0x4d   :  { %869 = vmatmul.mubr.msk.f32.gmra.mxu1 %vm71_vm1, %v57_v39 }
  0x4e   :  { %871 = vmatprep.mubr.msk.f32.mxu1 %vm891_vm2, %v890_v0 }
  0x4f   :  { %797 = vmatmul.mubr.msk.f32.gmra.mxu0 %vm71_vm1, %v33_v40 }
  0x50   :  { %799 = vmatprep.mubr.msk.f32.mxu0 %vm891_vm2, %v890_v0 }
  0x51   :  { %872 = vmatmul.mubr.msk.f32.gmra.mxu1 %vm71_vm1, %v58_v41 }
  0x52   :  { %874 = vmatprep.mubr.msk.f32.mxu1 %vm891_vm2, %v890_v0 }
  0x53   :  { %800 = vmatmul.mubr.msk.f32.gmra.mxu0 %vm71_vm1, %v34_v42 }
  0x54   :  { %802 = vmatprep.mubr.msk.f32.mxu0 %vm891_vm2, %v890_v0 }
  0x55   :  { %875 = vmatmul.mubr.msk.f32.gmra.mxu1 %vm71_vm1, %v59_v43 }
  0x56   :  { %877 = vmatprep.mubr.msk.f32.mxu1 %vm891_vm2, %v890_v0 }
  0x57   :  { %803 = vmatmul.mubr.msk.f32.gmra.mxu0 %vm71_vm1, %v35_v44 }
  0x58   :  { %805 = vmatprep.mubr.msk.f32.mxu0 %vm891_vm2, %v890_v0 }
  0x59   :  { %878 = vmatmul.mubr.msk.f32.gmra.mxu1 %vm71_vm1, %v60_v45 }
  0x5a   :  { %880 = vmatprep.mubr.msk.f32.mxu1 %vm891_vm2, %v890_v0 }
  0x5b   :  { %806 = vmatmul.mubr.msk.f32.gmra.mxu0 %vm71_vm1, %v36_v46 }
  0x5c   :  { %808 = vmatprep.mubr.msk.f32.mxu0 %vm891_vm2, %v890_v0 }
  0x5d   :  { %881 = vmatmul.mubr.msk.f32.gmra.mxu1 %vm71_vm1, %v61_v47 }
  0x5e   :  { %883 = vmatprep.mubr.msk.f32.mxu1 %vm891_vm2, %v890_v0 }
  0x5f   :  { %809 = vmatmul.mubr.msk.f32.gmra.mxu0 %vm71_vm1, %v37_v48 }
  0x60   :  { %811 = vmatprep.mubr.msk.f32.mxu0 %vm891_vm2, %v890_v0 }
  0x61   :  { %884 = vmatmul.mubr.msk.f32.gmra.mxu1 %vm71_vm1, %v62_v49 }
  0x63   :  { %812 = vmatmul.mubr.msk.f32.gmra.mxu0 %vm71_vm1, %v38_v50 }
  0xc3   :  { %v289_v52 = vpop.f32.mrf.mxu0 }
  0xc4   :  { %v290_v53 = vadd.f32 %v1214_v51, %v289_v52 }
  0xc5   :  { %v741_v54 = vpop.f32.mrf.mxu0  ;;  %v414_v55 = vpop.f32.mrf.mxu1 }
  0xc6   :  { %v533_v56 = vmax.f32 %v290_v53, 0.0  ;;  %v415_v57 = vadd.f32 %v1214_v51, %v414_v55 }
  0xc7   :  { %v294_v58 = vpop.f32.mrf.mxu0  ;;  %v816_v59 = vpop.f32.mrf.mxu1 }
  0xc8   :  { %583 = vst.msk [vmem:[%s1464_s3] sm:$0xff] %vm582_vm3, %v533_v56  ;;  %v558_v60 = vmax.f32 %v415_v57, 0.0  ;;  %v295_v61 = vadd.f32 %v1214_v51, %v294_v58 }
  0xc9   :  { %v744_v62 = vpop.f32.mrf.mxu0  ;;  %v419_v63 = vpop.f32.mrf.mxu1 }
  0xca   :  { %608 = vst.msk [vmem:[%s1464_s3 + $0xc8] sm:$0xff] %vm582_vm3, %v558_v60  ;;  %v534_v0 = vmax.f32 %v295_v61, 0.0  ;;  %v420_v1 = vadd.f32 %v1214_v51, %v419_v63 }
  0xcb   :  { %v299_v2 = vpop.f32.mrf.mxu0  ;;  %v819_v3 = vpop.f32.mrf.mxu1 }
  0xcc   :  { %584 = vst.msk [vmem:[%s1464_s3 + $0x8] sm:$0xff] %vm582_vm3, %v534_v0  ;;  %v559_v4 = vmax.f32 %v420_v1, 0.0  ;;  %v300_v5 = vadd.f32 %v1214_v51, %v299_v2 }
  0xcd   :  { %v747_v6 = vpop.f32.mrf.mxu0  ;;  %v424_v7 = vpop.f32.mrf.mxu1 }
  0xce   :  { %609 = vst.msk [vmem:[%s1464_s3 + $0xd0] sm:$0xff] %vm582_vm3, %v559_v4  ;;  %v535_v8 = vmax.f32 %v300_v5, 0.0  ;;  %v425_v9 = vadd.f32 %v1214_v51, %v424_v7 }
  0xcf   :  { %v304_v10 = vpop.f32.mrf.mxu0  ;;  %v822_v11 = vpop.f32.mrf.mxu1 }
  0xd0   :  { %585 = vst.msk [vmem:[%s1464_s3 + $0x10] sm:$0xff] %vm582_vm3, %v535_v8  ;;  %v560_v12 = vmax.f32 %v425_v9, 0.0  ;;  %v305_v13 = vadd.f32 %v1214_v51, %v304_v10 }
  0xd1   :  { %v750_v14 = vpop.f32.mrf.mxu0  ;;  %v429_v15 = vpop.f32.mrf.mxu1 }
  0xd2   :  { %610 = vst.msk [vmem:[%s1464_s3 + $0xd8] sm:$0xff] %vm582_vm3, %v560_v12  ;;  %v536_v16 = vmax.f32 %v305_v13, 0.0  ;;  %v430_v17 = vadd.f32 %v1214_v51, %v429_v15 }
  0xd3   :  { %v309_v18 = vpop.f32.mrf.mxu0  ;;  %v825_v19 = vpop.f32.mrf.mxu1 }
  0xd4   :  { %586 = vst.msk [vmem:[%s1464_s3 + $0x18] sm:$0xff] %vm582_vm3, %v536_v16  ;;  %v561_v20 = vmax.f32 %v430_v17, 0.0  ;;  %v310_v21 = vadd.f32 %v1214_v51, %v309_v18 }
  0xd5   :  { %v753_v22 = vpop.f32.mrf.mxu0  ;;  %v434_v23 = vpop.f32.mrf.mxu1 }
  0xd6   :  { %611 = vst.msk [vmem:[%s1464_s3 + $0xe0] sm:$0xff] %vm582_vm3, %v561_v20  ;;  %v537_v24 = vmax.f32 %v310_v21, 0.0  ;;  %v435_v25 = vadd.f32 %v1214_v51, %v434_v23 }
  0xd7   :  { %v314_v26 = vpop.f32.mrf.mxu0  ;;  %v828_v27 = vpop.f32.mrf.mxu1 }
  0xd8   :  { %587 = vst.msk [vmem:[%s1464_s3 + $0x20] sm:$0xff] %vm582_vm3, %v537_v24  ;;  %v562_v28 = vmax.f32 %v435_v25, 0.0  ;;  %v315_v29 = vadd.f32 %v1214_v51, %v314_v26 }
  0xd9   :  { %v756_v30 = vpop.f32.mrf.mxu0  ;;  %v439_v31 = vpop.f32.mrf.mxu1 }
  0xda   :  { %612 = vst.msk [vmem:[%s1464_s3 + $0xe8] sm:$0xff] %vm582_vm3, %v562_v28  ;;  %v538_v32 = vmax.f32 %v315_v29, 0.0  ;;  %v440_v33 = vadd.f32 %v1214_v51, %v439_v31 }
  0xdb   :  { %v319_v34 = vpop.f32.mrf.mxu0  ;;  %v831_v35 = vpop.f32.mrf.mxu1 }
  0xdc   :  { %588 = vst.msk [vmem:[%s1464_s3 + $0x28] sm:$0xff] %vm582_vm3, %v538_v32  ;;  %v563_v36 = vmax.f32 %v440_v33, 0.0  ;;  %v320_v37 = vadd.f32 %v1214_v51, %v319_v34 }
  0xdd   :  { %v759_v38 = vpop.f32.mrf.mxu0  ;;  %v444_v39 = vpop.f32.mrf.mxu1 }
  0xde   :  { %613 = vst.msk [vmem:[%s1464_s3 + $0xf0] sm:$0xff] %vm582_vm3, %v563_v36  ;;  %v539_v40 = vmax.f32 %v320_v37, 0.0  ;;  %v445_v41 = vadd.f32 %v1214_v51, %v444_v39 }
  0xdf   :  { %v324_v42 = vpop.f32.mrf.mxu0  ;;  %v834_v43 = vpop.f32.mrf.mxu1 }
  0xe0   :  { %589 = vst.msk [vmem:[%s1464_s3 + $0x30] sm:$0xff] %vm582_vm3, %v539_v40  ;;  %v564_v44 = vmax.f32 %v445_v41, 0.0  ;;  %v325_v45 = vadd.f32 %v1214_v51, %v324_v42 }
  0xe1   :  { %v762_v46 = vpop.f32.mrf.mxu0  ;;  %v449_v47 = vpop.f32.mrf.mxu1 }
  0xe2   :  { %614 = vst.msk [vmem:[%s1464_s3 + $0xf8] sm:$0xff] %vm582_vm3, %v564_v44  ;;  %v540_v48 = vmax.f32 %v325_v45, 0.0  ;;  %v450_v49 = vadd.f32 %v1214_v51, %v449_v47 }
  0xe3   :  { %v329_v50 = vpop.f32.mrf.mxu0  ;;  %v837_v52 = vpop.f32.mrf.mxu1 }
  0xe4   :  { %590 = vst.msk [vmem:[%s1464_s3 + $0x38] sm:$0xff] %vm582_vm3, %v540_v48  ;;  %v565_v53 = vmax.f32 %v450_v49, 0.0  ;;  %v330_v54 = vadd.f32 %v1214_v51, %v329_v50 }
  0xe5   :  { %v765_v55 = vpop.f32.mrf.mxu0  ;;  %v454_v56 = vpop.f32.mrf.mxu1 }
  0xe6   :  { %615 = vst.msk [vmem:[%s1464_s3 + $0x100] sm:$0xff] %vm582_vm3, %v565_v53  ;;  %v541_v57 = vmax.f32 %v330_v54, 0.0  ;;  %v455_v58 = vadd.f32 %v1214_v51, %v454_v56 }
  0xe7   :  { %v334_v59 = vpop.f32.mrf.mxu0  ;;  %v840_v60 = vpop.f32.mrf.mxu1 }
  0xe8   :  { %591 = vst.msk [vmem:[%s1464_s3 + $0x40] sm:$0xff] %vm582_vm3, %v541_v57  ;;  %v566_v61 = vmax.f32 %v455_v58, 0.0  ;;  %v335_v62 = vadd.f32 %v1214_v51, %v334_v59 }
  0xe9   :  { %v768_v63 = vpop.f32.mrf.mxu0  ;;  %v459_v0 = vpop.f32.mrf.mxu1 }
  0xea   :  { %616 = vst.msk [vmem:[%s1464_s3 + $0x108] sm:$0xff] %vm582_vm3, %v566_v61  ;;  %v542_v1 = vmax.f32 %v335_v62, 0.0  ;;  %v460_v2 = vadd.f32 %v1214_v51, %v459_v0 }
  0xeb   :  { %v339_v3 = vpop.f32.mrf.mxu0  ;;  %v843_v4 = vpop.f32.mrf.mxu1 }
  0xec   :  { %592 = vst.msk [vmem:[%s1464_s3 + $0x48] sm:$0xff] %vm582_vm3, %v542_v1  ;;  %v567_v5 = vmax.f32 %v460_v2, 0.0  ;;  %v340_v6 = vadd.f32 %v1214_v51, %v339_v3 }
  0xed   :  { %v771_v7 = vpop.f32.mrf.mxu0  ;;  %v464_v8 = vpop.f32.mrf.mxu1 }
  0xee   :  { %617 = vst.msk [vmem:[%s1464_s3 + $0x110] sm:$0xff] %vm582_vm3, %v567_v5  ;;  %v543_v9 = vmax.f32 %v340_v6, 0.0  ;;  %v465_v10 = vadd.f32 %v1214_v51, %v464_v8 }
  0xef   :  { %v344_v11 = vpop.f32.mrf.mxu0  ;;  %v846_v12 = vpop.f32.mrf.mxu1 }
  0xf0   :  { %593 = vst.msk [vmem:[%s1464_s3 + $0x50] sm:$0xff] %vm582_vm3, %v543_v9  ;;  %v568_v13 = vmax.f32 %v465_v10, 0.0  ;;  %v345_v14 = vadd.f32 %v1214_v51, %v344_v11 }
  0xf1   :  { %v774_v15 = vpop.f32.mrf.mxu0  ;;  %v469_v16 = vpop.f32.mrf.mxu1 }
  0xf2   :  { %618 = vst.msk [vmem:[%s1464_s3 + $0x118] sm:$0xff] %vm582_vm3, %v568_v13  ;;  %v544_v17 = vmax.f32 %v345_v14, 0.0  ;;  %v470_v18 = vadd.f32 %v1214_v51, %v469_v16 }
  0xf3   :  { %v349_v19 = vpop.f32.mrf.mxu0  ;;  %v849_v20 = vpop.f32.mrf.mxu1 }
  0xf4   :  { %594 = vst.msk [vmem:[%s1464_s3 + $0x58] sm:$0xff] %vm582_vm3, %v544_v17  ;;  %v569_v21 = vmax.f32 %v470_v18, 0.0  ;;  %v350_v22 = vadd.f32 %v1214_v51, %v349_v19 }
  0xf5   :  { %v777_v23 = vpop.f32.mrf.mxu0  ;;  %v474_v24 = vpop.f32.mrf.mxu1 }
  0xf6   :  { %619 = vst.msk [vmem:[%s1464_s3 + $0x120] sm:$0xff] %vm582_vm3, %v569_v21  ;;  %v545_v25 = vmax.f32 %v350_v22, 0.0  ;;  %v475_v26 = vadd.f32 %v1214_v51, %v474_v24 }
  0xf7   :  { %v354_v27 = vpop.f32.mrf.mxu0  ;;  %v852_v28 = vpop.f32.mrf.mxu1 }
  0xf8   :  { %595 = vst.msk [vmem:[%s1464_s3 + $0x60] sm:$0xff] %vm582_vm3, %v545_v25  ;;  %v570_v29 = vmax.f32 %v475_v26, 0.0  ;;  %v355_v30 = vadd.f32 %v1214_v51, %v354_v27 }
  0xf9   :  { %v780_v31 = vpop.f32.mrf.mxu0  ;;  %v479_v32 = vpop.f32.mrf.mxu1 }
  0xfa   :  { %620 = vst.msk [vmem:[%s1464_s3 + $0x128] sm:$0xff] %vm582_vm3, %v570_v29  ;;  %v546_v33 = vmax.f32 %v355_v30, 0.0  ;;  %v480_v34 = vadd.f32 %v1214_v51, %v479_v32 }
  0xfb   :  { %v359_v35 = vpop.f32.mrf.mxu0  ;;  %v855_v36 = vpop.f32.mrf.mxu1 }
  0xfc   :  { %596 = vst.msk [vmem:[%s1464_s3 + $0x68] sm:$0xff] %vm582_vm3, %v546_v33  ;;  %v571_v37 = vmax.f32 %v480_v34, 0.0  ;;  %v360_v38 = vadd.f32 %v1214_v51, %v359_v35 }
  0xfd   :  { %v783_v39 = vpop.f32.mrf.mxu0  ;;  %v484_v40 = vpop.f32.mrf.mxu1 }
  0xfe   :  { %621 = vst.msk [vmem:[%s1464_s3 + $0x130] sm:$0xff] %vm582_vm3, %v571_v37  ;;  %v547_v41 = vmax.f32 %v360_v38, 0.0  ;;  %v485_v42 = vadd.f32 %v1214_v51, %v484_v40 }
  0xff   :  { %v364_v43 = vpop.f32.mrf.mxu0  ;;  %v858_v44 = vpop.f32.mrf.mxu1 }
 0x100   :  { %597 = vst.msk [vmem:[%s1464_s3 + $0x70] sm:$0xff] %vm582_vm3, %v547_v41  ;;  %v572_v45 = vmax.f32 %v485_v42, 0.0  ;;  %v365_v46 = vadd.f32 %v1214_v51, %v364_v43 }
 0x101   :  { %v786_v47 = vpop.f32.mrf.mxu0  ;;  %v489_v48 = vpop.f32.mrf.mxu1 }
 0x102   :  { %622 = vst.msk [vmem:[%s1464_s3 + $0x138] sm:$0xff] %vm582_vm3, %v572_v45  ;;  %v548_v49 = vmax.f32 %v365_v46, 0.0  ;;  %v490_v50 = vadd.f32 %v1214_v51, %v489_v48 }
 0x103   :  { %v369_v52 = vpop.f32.mrf.mxu0  ;;  %v861_v53 = vpop.f32.mrf.mxu1 }
 0x104   :  { %598 = vst.msk [vmem:[%s1464_s3 + $0x78] sm:$0xff] %vm582_vm3, %v548_v49  ;;  %v573_v54 = vmax.f32 %v490_v50, 0.0  ;;  %v370_v55 = vadd.f32 %v1214_v51, %v369_v52 }
 0x105   :  { %v789_v56 = vpop.f32.mrf.mxu0  ;;  %v494_v57 = vpop.f32.mrf.mxu1 }
 0x106   :  { %623 = vst.msk [vmem:[%s1464_s3 + $0x140] sm:$0xff] %vm582_vm3, %v573_v54  ;;  %v549_v58 = vmax.f32 %v370_v55, 0.0  ;;  %v495_v59 = vadd.f32 %v1214_v51, %v494_v57 }
 0x107   :  { %v374_v60 = vpop.f32.mrf.mxu0  ;;  %v864_v61 = vpop.f32.mrf.mxu1 }
 0x108   :  { %599 = vst.msk [vmem:[%s1464_s3 + $0x80] sm:$0xff] %vm582_vm3, %v549_v58  ;;  %v574_v62 = vmax.f32 %v495_v59, 0.0  ;;  %v375_v63 = vadd.f32 %v1214_v51, %v374_v60 }
 0x109   :  { %v792_v0 = vpop.f32.mrf.mxu0  ;;  %v499_v1 = vpop.f32.mrf.mxu1 }
 0x10a   :  { %624 = vst.msk [vmem:[%s1464_s3 + $0x148] sm:$0xff] %vm582_vm3, %v574_v62  ;;  %v550_v2 = vmax.f32 %v375_v63, 0.0  ;;  %v500_v3 = vadd.f32 %v1214_v51, %v499_v1 }
 0x10b   :  { %v379_v4 = vpop.f32.mrf.mxu0  ;;  %v867_v5 = vpop.f32.mrf.mxu1 }
 0x10c   :  { %600 = vst.msk [vmem:[%s1464_s3 + $0x88] sm:$0xff] %vm582_vm3, %v550_v2  ;;  %v575_v6 = vmax.f32 %v500_v3, 0.0  ;;  %v380_v7 = vadd.f32 %v1214_v51, %v379_v4 }
 0x10d   :  { %v795_v8 = vpop.f32.mrf.mxu0  ;;  %v504_v9 = vpop.f32.mrf.mxu1 }
 0x10e   :  { %625 = vst.msk [vmem:[%s1464_s3 + $0x150] sm:$0xff] %vm582_vm3, %v575_v6  ;;  %v551_v10 = vmax.f32 %v380_v7, 0.0  ;;  %v505_v11 = vadd.f32 %v1214_v51, %v504_v9 }
 0x10f   :  { %v384_v12 = vpop.f32.mrf.mxu0  ;;  %v870_v13 = vpop.f32.mrf.mxu1 }
 0x110   :  { %601 = vst.msk [vmem:[%s1464_s3 + $0x90] sm:$0xff] %vm582_vm3, %v551_v10  ;;  %v576_v14 = vmax.f32 %v505_v11, 0.0  ;;  %v385_v15 = vadd.f32 %v1214_v51, %v384_v12 }
 0x111   :  { %v798_v16 = vpop.f32.mrf.mxu0  ;;  %v509_v17 = vpop.f32.mrf.mxu1 }
 0x112   :  { %626 = vst.msk [vmem:[%s1464_s3 + $0x158] sm:$0xff] %vm582_vm3, %v576_v14  ;;  %v552_v18 = vmax.f32 %v385_v15, 0.0  ;;  %v510_v19 = vadd.f32 %v1214_v51, %v509_v17 }
 0x113   :  { %v389_v20 = vpop.f32.mrf.mxu0  ;;  %v873_v21 = vpop.f32.mrf.mxu1 }
 0x114   :  { %602 = vst.msk [vmem:[%s1464_s3 + $0x98] sm:$0xff] %vm582_vm3, %v552_v18  ;;  %v577_v22 = vmax.f32 %v510_v19, 0.0  ;;  %v390_v23 = vadd.f32 %v1214_v51, %v389_v20 }
 0x115   :  { %v801_v24 = vpop.f32.mrf.mxu0  ;;  %v514_v25 = vpop.f32.mrf.mxu1 }
 0x116   :  { %627 = vst.msk [vmem:[%s1464_s3 + $0x160] sm:$0xff] %vm582_vm3, %v577_v22  ;;  %v553_v26 = vmax.f32 %v390_v23, 0.0  ;;  %v515_v27 = vadd.f32 %v1214_v51, %v514_v25 }
 0x117   :  { %v394_v28 = vpop.f32.mrf.mxu0  ;;  %v876_v29 = vpop.f32.mrf.mxu1 }
 0x118   :  { %603 = vst.msk [vmem:[%s1464_s3 + $0xa0] sm:$0xff] %vm582_vm3, %v553_v26  ;;  %v578_v30 = vmax.f32 %v515_v27, 0.0  ;;  %v395_v31 = vadd.f32 %v1214_v51, %v394_v28 }
 0x119   :  { %v804_v32 = vpop.f32.mrf.mxu0  ;;  %v519_v33 = vpop.f32.mrf.mxu1 }
 0x11a   :  { %628 = vst.msk [vmem:[%s1464_s3 + $0x168] sm:$0xff] %vm582_vm3, %v578_v30  ;;  %v554_v34 = vmax.f32 %v395_v31, 0.0  ;;  %v520_v35 = vadd.f32 %v1214_v51, %v519_v33 }
 0x11b   :  { %v399_v36 = vpop.f32.mrf.mxu0  ;;  %v879_v37 = vpop.f32.mrf.mxu1 }
 0x11c   :  { %604 = vst.msk [vmem:[%s1464_s3 + $0xa8] sm:$0xff] %vm582_vm3, %v554_v34  ;;  %v579_v38 = vmax.f32 %v520_v35, 0.0  ;;  %v400_v39 = vadd.f32 %v1214_v51, %v399_v36 }
 0x11d   :  { %v807_v40 = vpop.f32.mrf.mxu0  ;;  %v524_v41 = vpop.f32.mrf.mxu1 }
 0x11e   :  { %629 = vst.msk [vmem:[%s1464_s3 + $0x170] sm:$0xff] %vm582_vm3, %v579_v38  ;;  %v555_v42 = vmax.f32 %v400_v39, 0.0  ;;  %v525_v43 = vadd.f32 %v1214_v51, %v524_v41 }
 0x11f   :  { %v404_v44 = vpop.f32.mrf.mxu0  ;;  %v882_v45 = vpop.f32.mrf.mxu1 }
 0x120   :  { %605 = vst.msk [vmem:[%s1464_s3 + $0xb0] sm:$0xff] %vm582_vm3, %v555_v42  ;;  %v580_v46 = vmax.f32 %v525_v43, 0.0  ;;  %v405_v47 = vadd.f32 %v1214_v51, %v404_v44 }
 0x121   :  { %v810_v48 = vpop.f32.mrf.mxu0  ;;  %v529_v49 = vpop.f32.mrf.mxu1 }
 0x122   :  { %630 = vst.msk [vmem:[%s1464_s3 + $0x178] sm:$0xff] %vm582_vm3, %v580_v46  ;;  %v556_v50 = vmax.f32 %v405_v47, 0.0  ;;  %v530_v52 = vadd.f32 %v1214_v51, %v529_v49 }
 0x123   :  { %v409_v53 = vpop.f32.mrf.mxu0  ;;  %v885_v54 = vpop.f32.mrf.mxu1 }
 0x124   :  { %606 = vst.msk [vmem:[%s1464_s3 + $0xb8] sm:$0xff] %vm582_vm3, %v556_v50  ;;  %v581_v55 = vmax.f32 %v530_v52, 0.0  ;;  %v410_v56 = vadd.f32 %v1214_v51, %v409_v53 }
 0x125   :  { %v813_v57 = vpop.f32.mrf.mxu0 }
 0x126   :  { %631 = vst.msk [vmem:[%s1464_s3 + $0x180] sm:$0xff] %vm582_vm3, %v581_v55  ;;  %v557_v58 = vmax.f32 %v410_v56, 0.0 }
 0x128   :  { %607 = vst.msk [vmem:[%s1464_s3 + $0xc0] sm:$0xff] %vm582_vm3, %v557_v58 }

// kernel: autoencoder_minist_forward.13
= control target key start
LH: loop header
LB: loop body
LE: loop exit
PB: predicated region body
PF: predicated region fallthrough
CT: control target
= control target key end

     0   :  { %vm810_vm0 = vcmask 1040384   ;;  %vm221_vm1 = vcmask 72704   ;;  %vm1859_vm2 = vcmask 7168   ;;  %s4556_s1 = inlined_call_operand.vmem [shape: f32[9,1], index: 1, kind: input, shape index: {}]   ;;  %s4557_s0 = inlined_call_operand.vmem [shape: f32[1568,9], index: 0, kind: input, shape index: {}]   ;;  %s4558_s2 = inlined_call_operand.<no memory space> [shape: f32[1,1], index: 2, kind: input, shape index: {}]   ;;  %s4559_s3 = inlined_call_operand.vmem [shape: f32[1568,1], index: 3, kind: output, shape index: {}]  }
   0x1   :  { %v213_v0 = vld [vmem:[%s4556_s1 + $0x8] sm:$0x1]  ;;  %v212_v1 = vld [vmem:[%s4556_s1] sm:$0xff]  ;;  %v114_v3 = vld [vmem:[%s4557_s0 + $0x310] sm:$0xff] }
   0x2   :  { %2456 = vmatprep.subr.msk.mxu0 %vm810_vm0, %v213_v0  ;;  %2754 = vmatprep.subr.msk.mxu1 %vm810_vm0, %v213_v0  ;;  %v16_v2 = vld [vmem:[%s4557_s0] sm:$0xff]  ;;  %v17_v4 = vld [vmem:[%s4557_s0 + $0x8] sm:$0xff]  ;;  %v115_v5 = vld [vmem:[%s4557_s0 + $0x318] sm:$0xff] }
   0x3   :  { %2457 = vmatpush3.msk.msra.mxu0 %vm810_vm0, %v213_v0  ;;  %2756 = vmatpush3.msk.msra.mxu1 %vm810_vm0, %v213_v0  ;;  %v18_v6 = vld [vmem:[%s4557_s0 + $0x10] sm:$0xff]  ;;  %v116_v7 = vld [vmem:[%s4557_s0 + $0x320] sm:$0xff]  ;;  %v19_v8 = vld [vmem:[%s4557_s0 + $0x18] sm:$0xff]  ;;  %v8_v0 = vstv %s4558_s2 }
   0x4   :  { %2458 = vmatprep.subr.mxu0 %v212_v1  ;;  %2755 = vmatprep.subr.mxu1 %v212_v1  ;;  %v117_v9 = vld [vmem:[%s4557_s0 + $0x328] sm:$0xff]  ;;  %v20_v10 = vld [vmem:[%s4557_s0 + $0x20] sm:$0xff]  ;;  %v118_v11 = vld [vmem:[%s4557_s0 + $0x330] sm:$0xff]  ;;  %9 = vst [vmem:[#allocation2] sm:$0x1] %v8_v0 }
   0x5   :  { %2459 = vmatpush3.msra.mxu0 %v212_v1  ;;  %2757 = vmatpush3.msra.mxu1 %v212_v1  ;;  %v21_v12 = vld [vmem:[%s4557_s0 + $0x28] sm:$0xff]  ;;  %v119_v13 = vld [vmem:[%s4557_s0 + $0x338] sm:$0xff]  ;;  %v22_v14 = vld [vmem:[%s4557_s0 + $0x30] sm:$0xff] }
   0x6   :  { %2460 = vmatprep.mubr.msk.f32.mxu0 %vm221_vm1, %v16_v2  ;;  %2607 = vmatprep.mubr.msk.f32.mxu1 %vm221_vm1, %v114_v3  ;;  %v120_v15 = vld [vmem:[%s4557_s0 + $0x340] sm:$0xff]  ;;  %v23_v16 = vld [vmem:[%s4557_s0 + $0x38] sm:$0xff]  ;;  %v121_v17 = vld [vmem:[%s4557_s0 + $0x348] sm:$0xff] }
   0x7   :  { %2461 = vmatmul.mubr.msk.f32.vlgmr.msra.gmra.mxu0 %vm221_vm1, %v17_v4  ;;  %2608 = vmatmul.mubr.msk.f32.vlgmr.msra.gmra.mxu1 %vm221_vm1, %v115_v5  ;;  %v24_v18 = vld [vmem:[%s4557_s0 + $0x40] sm:$0xff]  ;;  %v122_v19 = vld [vmem:[%s4557_s0 + $0x350] sm:$0xff]  ;;  %v25_v20 = vld [vmem:[%s4557_s0 + $0x48] sm:$0xff] }
   0x8   :  { %2463 = vmatprep.mubr.msk.f32.mxu0 %vm221_vm1, %v18_v6  ;;  %2610 = vmatprep.mubr.msk.f32.mxu1 %vm221_vm1, %v116_v7  ;;  %v123_v21 = vld [vmem:[%s4557_s0 + $0x358] sm:$0xff]  ;;  %v26_v22 = vld [vmem:[%s4557_s0 + $0x50] sm:$0xff]  ;;  %v124_v23 = vld [vmem:[%s4557_s0 + $0x360] sm:$0xff] }
   0x9   :  { %v27_v24 = vld [vmem:[%s4557_s0 + $0x58] sm:$0xff]  ;;  %v125_v25 = vld [vmem:[%s4557_s0 + $0x368] sm:$0xff]  ;;  %v28_v26 = vld [vmem:[%s4557_s0 + $0x60] sm:$0xff] }
   0xa   :  { %v126_v27 = vld [vmem:[%s4557_s0 + $0x370] sm:$0xff]  ;;  %v29_v28 = vld [vmem:[%s4557_s0 + $0x68] sm:$0xff]  ;;  %v127_v29 = vld [vmem:[%s4557_s0 + $0x378] sm:$0xff] }
   0xb   :  { %2464 = vmatmul.mubr.msk.f32.gmra.mxu0 %vm221_vm1, %v19_v8  ;;  %2611 = vmatmul.mubr.msk.f32.gmra.mxu1 %vm221_vm1, %v117_v9  ;;  %v30_v30 = vld [vmem:[%s4557_s0 + $0x70] sm:$0xff]  ;;  %v128_v31 = vld [vmem:[%s4557_s0 + $0x380] sm:$0xff]  ;;  %v31_v32 = vld [vmem:[%s4557_s0 + $0x78] sm:$0xff] }
   0xc   :  { %2466 = vmatprep.mubr.msk.f32.mxu0 %vm221_vm1, %v20_v10  ;;  %2613 = vmatprep.mubr.msk.f32.mxu1 %vm221_vm1, %v118_v11  ;;  %v129_v33 = vld [vmem:[%s4557_s0 + $0x388] sm:$0xff]  ;;  %v32_v34 = vld [vmem:[%s4557_s0 + $0x80] sm:$0xff]  ;;  %v130_v35 = vld [vmem:[%s4557_s0 + $0x390] sm:$0xff] }
   0xd   :  { %v33_v36 = vld [vmem:[%s4557_s0 + $0x88] sm:$0xff]  ;;  %v131_v37 = vld [vmem:[%s4557_s0 + $0x398] sm:$0xff]  ;;  %v34_v38 = vld [vmem:[%s4557_s0 + $0x90] sm:$0xff] }
   0xe   :  { %v132_v39 = vld [vmem:[%s4557_s0 + $0x3a0] sm:$0xff]  ;;  %v35_v40 = vld [vmem:[%s4557_s0 + $0x98] sm:$0xff]  ;;  %v133_v41 = vld [vmem:[%s4557_s0 + $0x3a8] sm:$0xff] }
   0xf   :  { %2467 = vmatmul.mubr.msk.f32.gmra.mxu0 %vm221_vm1, %v21_v12  ;;  %2614 = vmatmul.mubr.msk.f32.gmra.mxu1 %vm221_vm1, %v119_v13  ;;  %v36_v42 = vld [vmem:[%s4557_s0 + $0xa0] sm:$0xff]  ;;  %v134_v43 = vld [vmem:[%s4557_s0 + $0x3b0] sm:$0xff]  ;;  %v37_v44 = vld [vmem:[%s4557_s0 + $0xa8] sm:$0xff] }
  0x10   :  { %2469 = vmatprep.mubr.msk.f32.mxu0 %vm221_vm1, %v22_v14  ;;  %2616 = vmatprep.mubr.msk.f32.mxu1 %vm221_vm1, %v120_v15  ;;  %v135_v45 = vld [vmem:[%s4557_s0 + $0x3b8] sm:$0xff]  ;;  %v38_v46 = vld [vmem:[%s4557_s0 + $0xb0] sm:$0xff]  ;;  %v136_v47 = vld [vmem:[%s4557_s0 + $0x3c0] sm:$0xff] }
  0x11   :  { %v39_v48 = vld [vmem:[%s4557_s0 + $0xb8] sm:$0xff]  ;;  %v137_v49 = vld [vmem:[%s4557_s0 + $0x3c8] sm:$0xff]  ;;  %v40_v50 = vld [vmem:[%s4557_s0 + $0xc0] sm:$0xff] }
  0x12   :  { %v138_v51 = vld [vmem:[%s4557_s0 + $0x3d0] sm:$0xff]  ;;  %v41_v52 = vld [vmem:[%s4557_s0 + $0xc8] sm:$0xff]  ;;  %v139_v53 = vld [vmem:[%s4557_s0 + $0x3d8] sm:$0xff] }
  0x13   :  { %2470 = vmatmul.mubr.msk.f32.gmra.mxu0 %vm221_vm1, %v23_v16  ;;  %2617 = vmatmul.mubr.msk.f32.gmra.mxu1 %vm221_vm1, %v121_v17  ;;  %v42_v54 = vld [vmem:[%s4557_s0 + $0xd0] sm:$0xff]  ;;  %v140_v55 = vld [vmem:[%s4557_s0 + $0x3e0] sm:$0xff]  ;;  %v43_v56 = vld [vmem:[%s4557_s0 + $0xd8] sm:$0xff] }
  0x14   :  { %2472 = vmatprep.mubr.msk.f32.mxu0 %vm221_vm1, %v24_v18  ;;  %2619 = vmatprep.mubr.msk.f32.mxu1 %vm221_vm1, %v122_v19  ;;  %v141_v57 = vld [vmem:[%s4557_s0 + $0x3e8] sm:$0xff]  ;;  %v44_v58 = vld [vmem:[%s4557_s0 + $0xe0] sm:$0xff]  ;;  %v142_v59 = vld [vmem:[%s4557_s0 + $0x3f0] sm:$0xff] }
  0x15   :  { %v45_v60 = vld [vmem:[%s4557_s0 + $0xe8] sm:$0xff]  ;;  %v143_v61 = vld [vmem:[%s4557_s0 + $0x3f8] sm:$0xff]  ;;  %v46_v62 = vld [vmem:[%s4557_s0 + $0xf0] sm:$0xff] }
  0x16   :  { %v144_v63 = vld [vmem:[%s4557_s0 + $0x400] sm:$0xff]  ;;  %v47_v1 = vld [vmem:[%s4557_s0 + $0xf8] sm:$0xff]  ;;  %v145_v2 = vld [vmem:[%s4557_s0 + $0x408] sm:$0xff] }
  0x17   :  { %2473 = vmatmul.mubr.msk.f32.gmra.mxu0 %vm221_vm1, %v25_v20  ;;  %2620 = vmatmul.mubr.msk.f32.gmra.mxu1 %vm221_vm1, %v123_v21  ;;  %v48_v3 = vld [vmem:[%s4557_s0 + $0x100] sm:$0xff]  ;;  %v146_v4 = vld [vmem:[%s4557_s0 + $0x410] sm:$0xff]  ;;  %v49_v5 = vld [vmem:[%s4557_s0 + $0x108] sm:$0xff] }
  0x18   :  { %2475 = vmatprep.mubr.msk.f32.mxu0 %vm221_vm1, %v26_v22  ;;  %2622 = vmatprep.mubr.msk.f32.mxu1 %vm221_vm1, %v124_v23  ;;  %v147_v6 = vld [vmem:[%s4557_s0 + $0x418] sm:$0xff]  ;;  %v50_v7 = vld [vmem:[%s4557_s0 + $0x110] sm:$0xff]  ;;  %v148_v8 = vld [vmem:[%s4557_s0 + $0x420] sm:$0xff] }
  0x19   :  { %v51_v9 = vld [vmem:[%s4557_s0 + $0x118] sm:$0xff]  ;;  %v149_v10 = vld [vmem:[%s4557_s0 + $0x428] sm:$0xff]  ;;  %v52_v11 = vld [vmem:[%s4557_s0 + $0x120] sm:$0xff] }
  0x1a   :  { %v150_v12 = vld [vmem:[%s4557_s0 + $0x430] sm:$0xff]  ;;  %v53_v13 = vld [vmem:[%s4557_s0 + $0x128] sm:$0xff]  ;;  %v151_v14 = vld [vmem:[%s4557_s0 + $0x438] sm:$0xff] }
  0x1b   :  { %2476 = vmatmul.mubr.msk.f32.gmra.mxu0 %vm221_vm1, %v27_v24  ;;  %2623 = vmatmul.mubr.msk.f32.gmra.mxu1 %vm221_vm1, %v125_v25  ;;  %v54_v15 = vld [vmem:[%s4557_s0 + $0x130] sm:$0xff]  ;;  %v152_v16 = vld [vmem:[%s4557_s0 + $0x440] sm:$0xff]  ;;  %v55_v17 = vld [vmem:[%s4557_s0 + $0x138] sm:$0xff] }
  0x1c   :  { %2478 = vmatprep.mubr.msk.f32.mxu0 %vm221_vm1, %v28_v26  ;;  %2625 = vmatprep.mubr.msk.f32.mxu1 %vm221_vm1, %v126_v27  ;;  %v153_v18 = vld [vmem:[%s4557_s0 + $0x448] sm:$0xff]  ;;  %v56_v19 = vld [vmem:[%s4557_s0 + $0x140] sm:$0xff]  ;;  %v154_v20 = vld [vmem:[%s4557_s0 + $0x450] sm:$0xff] }
  0x1d   :  { %v57_v21 = vld [vmem:[%s4557_s0 + $0x148] sm:$0xff]  ;;  %v155_v22 = vld [vmem:[%s4557_s0 + $0x458] sm:$0xff]  ;;  %v58_v23 = vld [vmem:[%s4557_s0 + $0x150] sm:$0xff] }
  0x1e   :  { %v156_v24 = vld [vmem:[%s4557_s0 + $0x460] sm:$0xff]  ;;  %v59_v25 = vld [vmem:[%s4557_s0 + $0x158] sm:$0xff]  ;;  %v157_v26 = vld [vmem:[%s4557_s0 + $0x468] sm:$0xff] }
  0x1f   :  { %2479 = vmatmul.mubr.msk.f32.gmra.mxu0 %vm221_vm1, %v29_v28  ;;  %2626 = vmatmul.mubr.msk.f32.gmra.mxu1 %vm221_vm1, %v127_v29  ;;  %v60_v27 = vld [vmem:[%s4557_s0 + $0x160] sm:$0xff]  ;;  %v158_v28 = vld [vmem:[%s4557_s0 + $0x470] sm:$0xff]  ;;  %v61_v29 = vld [vmem:[%s4557_s0 + $0x168] sm:$0xff] }
  0x20   :  { %2481 = vmatprep.mubr.msk.f32.mxu0 %vm221_vm1, %v30_v30  ;;  %2628 = vmatprep.mubr.msk.f32.mxu1 %vm221_vm1, %v128_v31  ;;  %v159_v30 = vld [vmem:[%s4557_s0 + $0x478] sm:$0xff]  ;;  %v62_v31 = vld [vmem:[%s4557_s0 + $0x170] sm:$0xff]  ;;  %v176_v0 = vld [vmem:[%s4557_s0 + $0x500] sm:$0xff] }
  0x23   :  { %2482 = vmatmul.mubr.msk.f32.gmra.mxu0 %vm221_vm1, %v31_v32  ;;  %2629 = vmatmul.mubr.msk.f32.gmra.mxu1 %vm221_vm1, %v129_v33  ;;  %v160_v32 = vld [vmem:[%s4557_s0 + $0x480] sm:$0xff]  ;;  %v63_v33 = vld [vmem:[%s4557_s0 + $0x178] sm:$0xff] }
  0x24   :  { %2484 = vmatprep.mubr.msk.f32.mxu0 %vm221_vm1, %v32_v34  ;;  %2631 = vmatprep.mubr.msk.f32.mxu1 %vm221_vm1, %v130_v35  ;;  %v161_v34 = vld [vmem:[%s4557_s0 + $0x488] sm:$0xff]  ;;  %v64_v35 = vld [vmem:[%s4557_s0 + $0x180] sm:$0xff] }
  0x27   :  { %2485 = vmatmul.mubr.msk.f32.gmra.mxu0 %vm221_vm1, %v33_v36  ;;  %2632 = vmatmul.mubr.msk.f32.gmra.mxu1 %vm221_vm1, %v131_v37  ;;  %v162_v36 = vld [vmem:[%s4557_s0 + $0x490] sm:$0xff]  ;;  %v65_v37 = vld [vmem:[%s4557_s0 + $0x188] sm:$0xff] }
  0x28   :  { %2487 = vmatprep.mubr.msk.f32.mxu0 %vm221_vm1, %v34_v38  ;;  %2634 = vmatprep.mubr.msk.f32.mxu1 %vm221_vm1, %v132_v39  ;;  %v163_v38 = vld [vmem:[%s4557_s0 + $0x498] sm:$0xff]  ;;  %v66_v39 = vld [vmem:[%s4557_s0 + $0x190] sm:$0xff] }
  0x2b   :  { %2488 = vmatmul.mubr.msk.f32.gmra.mxu0 %vm221_vm1, %v35_v40  ;;  %2635 = vmatmul.mubr.msk.f32.gmra.mxu1 %vm221_vm1, %v133_v41  ;;  %v164_v40 = vld [vmem:[%s4557_s0 + $0x4a0] sm:$0xff]  ;;  %v67_v41 = vld [vmem:[%s4557_s0 + $0x198] sm:$0xff] }
  0x2c   :  { %2490 = vmatprep.mubr.msk.f32.mxu0 %vm221_vm1, %v36_v42  ;;  %2637 = vmatprep.mubr.msk.f32.mxu1 %vm221_vm1, %v134_v43  ;;  %v165_v42 = vld [vmem:[%s4557_s0 + $0x4a8] sm:$0xff]  ;;  %v68_v43 = vld [vmem:[%s4557_s0 + $0x1a0] sm:$0xff] }
  0x2f   :  { %2491 = vmatmul.mubr.msk.f32.gmra.mxu0 %vm221_vm1, %v37_v44  ;;  %2638 = vmatmul.mubr.msk.f32.gmra.mxu1 %vm221_vm1, %v135_v45  ;;  %v166_v44 = vld [vmem:[%s4557_s0 + $0x4b0] sm:$0xff]  ;;  %v69_v45 = vld [vmem:[%s4557_s0 + $0x1a8] sm:$0xff] }
  0x30   :  { %2493 = vmatprep.mubr.msk.f32.mxu0 %vm221_vm1, %v38_v46  ;;  %2640 = vmatprep.mubr.msk.f32.mxu1 %vm221_vm1, %v136_v47  ;;  %v167_v46 = vld [vmem:[%s4557_s0 + $0x4b8] sm:$0xff]  ;;  %v70_v47 = vld [vmem:[%s4557_s0 + $0x1b0] sm:$0xff] }
  0x33   :  { %2494 = vmatmul.mubr.msk.f32.gmra.mxu0 %vm221_vm1, %v39_v48  ;;  %2641 = vmatmul.mubr.msk.f32.gmra.mxu1 %vm221_vm1, %v137_v49  ;;  %v168_v48 = vld [vmem:[%s4557_s0 + $0x4c0] sm:$0xff]  ;;  %v71_v49 = vld [vmem:[%s4557_s0 + $0x1b8] sm:$0xff] }
  0x34   :  { %2496 = vmatprep.mubr.msk.f32.mxu0 %vm221_vm1, %v40_v50  ;;  %2643 = vmatprep.mubr.msk.f32.mxu1 %vm221_vm1, %v138_v51  ;;  %v169_v50 = vld [vmem:[%s4557_s0 + $0x4c8] sm:$0xff]  ;;  %v72_v51 = vld [vmem:[%s4557_s0 + $0x1c0] sm:$0xff] }
  0x37   :  { %2497 = vmatmul.mubr.msk.f32.gmra.mxu0 %vm221_vm1, %v41_v52  ;;  %2644 = vmatmul.mubr.msk.f32.gmra.mxu1 %vm221_vm1, %v139_v53  ;;  %v170_v52 = vld [vmem:[%s4557_s0 + $0x4d0] sm:$0xff]  ;;  %v73_v53 = vld [vmem:[%s4557_s0 + $0x1c8] sm:$0xff] }
  0x38   :  { %2499 = vmatprep.mubr.msk.f32.mxu0 %vm221_vm1, %v42_v54  ;;  %2646 = vmatprep.mubr.msk.f32.mxu1 %vm221_vm1, %v140_v55  ;;  %v171_v54 = vld [vmem:[%s4557_s0 + $0x4d8] sm:$0xff]  ;;  %v74_v55 = vld [vmem:[%s4557_s0 + $0x1d0] sm:$0xff] }
  0x3b   :  { %2500 = vmatmul.mubr.msk.f32.gmra.mxu0 %vm221_vm1, %v43_v56  ;;  %2647 = vmatmul.mubr.msk.f32.gmra.mxu1 %vm221_vm1, %v141_v57  ;;  %v172_v56 = vld [vmem:[%s4557_s0 + $0x4e0] sm:$0xff]  ;;  %v75_v57 = vld [vmem:[%s4557_s0 + $0x1d8] sm:$0xff] }
  0x3c   :  { %2502 = vmatprep.mubr.msk.f32.mxu0 %vm221_vm1, %v44_v58  ;;  %2649 = vmatprep.mubr.msk.f32.mxu1 %vm221_vm1, %v142_v59  ;;  %v173_v58 = vld [vmem:[%s4557_s0 + $0x4e8] sm:$0xff]  ;;  %v76_v59 = vld [vmem:[%s4557_s0 + $0x1e0] sm:$0xff] }
  0x3f   :  { %2503 = vmatmul.mubr.msk.f32.gmra.mxu0 %vm221_vm1, %v45_v60  ;;  %2650 = vmatmul.mubr.msk.f32.gmra.mxu1 %vm221_vm1, %v143_v61  ;;  %v174_v60 = vld [vmem:[%s4557_s0 + $0x4f0] sm:$0xff]  ;;  %v77_v61 = vld [vmem:[%s4557_s0 + $0x1e8] sm:$0xff] }
  0x40   :  { %2505 = vmatprep.mubr.msk.f32.mxu0 %vm221_vm1, %v46_v62  ;;  %2652 = vmatprep.mubr.msk.f32.mxu1 %vm221_vm1, %v144_v63  ;;  %v175_v62 = vld [vmem:[%s4557_s0 + $0x4f8] sm:$0xff]  ;;  %v78_v63 = vld [vmem:[%s4557_s0 + $0x1f0] sm:$0xff] }
  0x43   :  { %2506 = vmatmul.mubr.msk.f32.gmra.mxu0 %vm221_vm1, %v47_v1  ;;  %2653 = vmatmul.mubr.msk.f32.gmra.mxu1 %vm221_vm1, %v145_v2  ;;  %v79_v1 = vld [vmem:[%s4557_s0 + $0x1f8] sm:$0xff]  ;;  %v177_v2 = vld [vmem:[%s4557_s0 + $0x508] sm:$0xff] }
  0x44   :  { %2508 = vmatprep.mubr.msk.f32.mxu0 %vm221_vm1, %v48_v3  ;;  %2655 = vmatprep.mubr.msk.f32.mxu1 %vm221_vm1, %v146_v4  ;;  %v80_v3 = vld [vmem:[%s4557_s0 + $0x200] sm:$0xff]  ;;  %v178_v4 = vld [vmem:[%s4557_s0 + $0x510] sm:$0xff] }
  0x47   :  { %2509 = vmatmul.mubr.msk.f32.gmra.mxu0 %vm221_vm1, %v49_v5  ;;  %2656 = vmatmul.mubr.msk.f32.gmra.mxu1 %vm221_vm1, %v147_v6  ;;  %v81_v5 = vld [vmem:[%s4557_s0 + $0x208] sm:$0xff]  ;;  %v179_v6 = vld [vmem:[%s4557_s0 + $0x518] sm:$0xff] }
  0x48   :  { %2511 = vmatprep.mubr.msk.f32.mxu0 %vm221_vm1, %v50_v7  ;;  %2658 = vmatprep.mubr.msk.f32.mxu1 %vm221_vm1, %v148_v8  ;;  %v82_v7 = vld [vmem:[%s4557_s0 + $0x210] sm:$0xff]  ;;  %v180_v8 = vld [vmem:[%s4557_s0 + $0x520] sm:$0xff] }
  0x4b   :  { %2512 = vmatmul.mubr.msk.f32.gmra.mxu0 %vm221_vm1, %v51_v9  ;;  %2659 = vmatmul.mubr.msk.f32.gmra.mxu1 %vm221_vm1, %v149_v10  ;;  %v83_v9 = vld [vmem:[%s4557_s0 + $0x218] sm:$0xff]  ;;  %v181_v10 = vld [vmem:[%s4557_s0 + $0x528] sm:$0xff] }
  0x4c   :  { %2514 = vmatprep.mubr.msk.f32.mxu0 %vm221_vm1, %v52_v11  ;;  %2661 = vmatprep.mubr.msk.f32.mxu1 %vm221_vm1, %v150_v12  ;;  %v84_v11 = vld [vmem:[%s4557_s0 + $0x220] sm:$0xff]  ;;  %v182_v12 = vld [vmem:[%s4557_s0 + $0x530] sm:$0xff] }
  0x4f   :  { %2515 = vmatmul.mubr.msk.f32.gmra.mxu0 %vm221_vm1, %v53_v13  ;;  %2662 = vmatmul.mubr.msk.f32.gmra.mxu1 %vm221_vm1, %v151_v14  ;;  %v85_v13 = vld [vmem:[%s4557_s0 + $0x228] sm:$0xff]  ;;  %v183_v14 = vld [vmem:[%s4557_s0 + $0x538] sm:$0xff] }
  0x50   :  { %2517 = vmatprep.mubr.msk.f32.mxu0 %vm221_vm1, %v54_v15  ;;  %2664 = vmatprep.mubr.msk.f32.mxu1 %vm221_vm1, %v152_v16  ;;  %v86_v15 = vld [vmem:[%s4557_s0 + $0x230] sm:$0xff]  ;;  %v184_v16 = vld [vmem:[%s4557_s0 + $0x540] sm:$0xff] }
  0x53   :  { %2518 = vmatmul.mubr.msk.f32.gmra.mxu0 %vm221_vm1, %v55_v17  ;;  %2665 = vmatmul.mubr.msk.f32.gmra.mxu1 %vm221_vm1, %v153_v18  ;;  %v87_v17 = vld [vmem:[%s4557_s0 + $0x238] sm:$0xff]  ;;  %v185_v18 = vld [vmem:[%s4557_s0 + $0x548] sm:$0xff] }
  0x54   :  { %2520 = vmatprep.mubr.msk.f32.mxu0 %vm221_vm1, %v56_v19  ;;  %2667 = vmatprep.mubr.msk.f32.mxu1 %vm221_vm1, %v154_v20  ;;  %v88_v19 = vld [vmem:[%s4557_s0 + $0x240] sm:$0xff]  ;;  %v186_v20 = vld [vmem:[%s4557_s0 + $0x550] sm:$0xff] }
  0x57   :  { %2521 = vmatmul.mubr.msk.f32.gmra.mxu0 %vm221_vm1, %v57_v21  ;;  %2668 = vmatmul.mubr.msk.f32.gmra.mxu1 %vm221_vm1, %v155_v22  ;;  %v89_v21 = vld [vmem:[%s4557_s0 + $0x248] sm:$0xff]  ;;  %v187_v22 = vld [vmem:[%s4557_s0 + $0x558] sm:$0xff] }
  0x58   :  { %2523 = vmatprep.mubr.msk.f32.mxu0 %vm221_vm1, %v58_v23  ;;  %2670 = vmatprep.mubr.msk.f32.mxu1 %vm221_vm1, %v156_v24  ;;  %v90_v23 = vld [vmem:[%s4557_s0 + $0x250] sm:$0xff]  ;;  %v188_v24 = vld [vmem:[%s4557_s0 + $0x560] sm:$0xff] }
  0x5b   :  { %2524 = vmatmul.mubr.msk.f32.gmra.mxu0 %vm221_vm1, %v59_v25  ;;  %2671 = vmatmul.mubr.msk.f32.gmra.mxu1 %vm221_vm1, %v157_v26  ;;  %v91_v25 = vld [vmem:[%s4557_s0 + $0x258] sm:$0xff]  ;;  %v189_v26 = vld [vmem:[%s4557_s0 + $0x568] sm:$0xff] }
  0x5c   :  { %2526 = vmatprep.mubr.msk.f32.mxu0 %vm221_vm1, %v60_v27  ;;  %2673 = vmatprep.mubr.msk.f32.mxu1 %vm221_vm1, %v158_v28  ;;  %v92_v27 = vld [vmem:[%s4557_s0 + $0x260] sm:$0xff]  ;;  %v190_v28 = vld [vmem:[%s4557_s0 + $0x570] sm:$0xff] }
  0x5f   :  { %2527 = vmatmul.mubr.msk.f32.gmra.mxu0 %vm221_vm1, %v61_v29  ;;  %2674 = vmatmul.mubr.msk.f32.gmra.mxu1 %vm221_vm1, %v159_v30  ;;  %v93_v29 = vld [vmem:[%s4557_s0 + $0x268] sm:$0xff]  ;;  %v191_v30 = vld [vmem:[%s4557_s0 + $0x578] sm:$0xff] }
  0x60   :  { %2529 = vmatprep.mubr.msk.f32.mxu0 %vm221_vm1, %v62_v31  ;;  %2676 = vmatprep.mubr.msk.f32.mxu1 %vm221_vm1, %v160_v32  ;;  %v94_v31 = vld [vmem:[%s4557_s0 + $0x270] sm:$0xff]  ;;  %v192_v32 = vld [vmem:[%s4557_s0 + $0x580] sm:$0xff] }
  0x63   :  { %2530 = vmatmul.mubr.msk.f32.gmra.mxu0 %vm221_vm1, %v63_v33  ;;  %2677 = vmatmul.mubr.msk.f32.gmra.mxu1 %vm221_vm1, %v161_v34  ;;  %v95_v33 = vld [vmem:[%s4557_s0 + $0x278] sm:$0xff]  ;;  %v193_v34 = vld [vmem:[%s4557_s0 + $0x588] sm:$0xff] }
  0x64   :  { %2532 = vmatprep.mubr.msk.f32.mxu0 %vm221_vm1, %v64_v35  ;;  %2679 = vmatprep.mubr.msk.f32.mxu1 %vm221_vm1, %v162_v36  ;;  %v96_v35 = vld [vmem:[%s4557_s0 + $0x280] sm:$0xff]  ;;  %v194_v36 = vld [vmem:[%s4557_s0 + $0x590] sm:$0xff] }
  0x67   :  { %2533 = vmatmul.mubr.msk.f32.gmra.mxu0 %vm221_vm1, %v65_v37  ;;  %2680 = vmatmul.mubr.msk.f32.gmra.mxu1 %vm221_vm1, %v163_v38  ;;  %v97_v37 = vld [vmem:[%s4557_s0 + $0x288] sm:$0xff]  ;;  %v195_v38 = vld [vmem:[%s4557_s0 + $0x598] sm:$0xff] }
  0x68   :  { %2535 = vmatprep.mubr.msk.f32.mxu0 %vm221_vm1, %v66_v39  ;;  %2682 = vmatprep.mubr.msk.f32.mxu1 %vm221_vm1, %v164_v40  ;;  %v98_v39 = vld [vmem:[%s4557_s0 + $0x290] sm:$0xff]  ;;  %v196_v40 = vld [vmem:[%s4557_s0 + $0x5a0] sm:$0xff] }
  0x6b   :  { %2536 = vmatmul.mubr.msk.f32.gmra.mxu0 %vm221_vm1, %v67_v41  ;;  %2683 = vmatmul.mubr.msk.f32.gmra.mxu1 %vm221_vm1, %v165_v42  ;;  %v99_v41 = vld [vmem:[%s4557_s0 + $0x298] sm:$0xff]  ;;  %v197_v42 = vld [vmem:[%s4557_s0 + $0x5a8] sm:$0xff] }
  0x6c   :  { %2538 = vmatprep.mubr.msk.f32.mxu0 %vm221_vm1, %v68_v43  ;;  %2685 = vmatprep.mubr.msk.f32.mxu1 %vm221_vm1, %v166_v44  ;;  %v100_v43 = vld [vmem:[%s4557_s0 + $0x2a0] sm:$0xff]  ;;  %v198_v44 = vld [vmem:[%s4557_s0 + $0x5b0] sm:$0xff] }
  0x6f   :  { %2539 = vmatmul.mubr.msk.f32.gmra.mxu0 %vm221_vm1, %v69_v45  ;;  %2686 = vmatmul.mubr.msk.f32.gmra.mxu1 %vm221_vm1, %v167_v46  ;;  %v101_v45 = vld [vmem:[%s4557_s0 + $0x2a8] sm:$0xff]  ;;  %v199_v46 = vld [vmem:[%s4557_s0 + $0x5b8] sm:$0xff] }
  0x70   :  { %2541 = vmatprep.mubr.msk.f32.mxu0 %vm221_vm1, %v70_v47  ;;  %2688 = vmatprep.mubr.msk.f32.mxu1 %vm221_vm1, %v168_v48  ;;  %v102_v47 = vld [vmem:[%s4557_s0 + $0x2b0] sm:$0xff]  ;;  %v200_v48 = vld [vmem:[%s4557_s0 + $0x5c0] sm:$0xff] }
  0x73   :  { %2542 = vmatmul.mubr.msk.f32.gmra.mxu0 %vm221_vm1, %v71_v49  ;;  %2689 = vmatmul.mubr.msk.f32.gmra.mxu1 %vm221_vm1, %v169_v50  ;;  %v103_v49 = vld [vmem:[%s4557_s0 + $0x2b8] sm:$0xff]  ;;  %v201_v50 = vld [vmem:[%s4557_s0 + $0x5c8] sm:$0xff] }
  0x74   :  { %2544 = vmatprep.mubr.msk.f32.mxu0 %vm221_vm1, %v72_v51  ;;  %2691 = vmatprep.mubr.msk.f32.mxu1 %vm221_vm1, %v170_v52  ;;  %v104_v51 = vld [vmem:[%s4557_s0 + $0x2c0] sm:$0xff]  ;;  %v202_v52 = vld [vmem:[%s4557_s0 + $0x5d0] sm:$0xff] }
  0x77   :  { %2545 = vmatmul.mubr.msk.f32.gmra.mxu0 %vm221_vm1, %v73_v53  ;;  %2692 = vmatmul.mubr.msk.f32.gmra.mxu1 %vm221_vm1, %v171_v54  ;;  %v105_v53 = vld [vmem:[%s4557_s0 + $0x2c8] sm:$0xff]  ;;  %v203_v54 = vld [vmem:[%s4557_s0 + $0x5d8] sm:$0xff] }
  0x78   :  { %2547 = vmatprep.mubr.msk.f32.mxu0 %vm221_vm1, %v74_v55  ;;  %2694 = vmatprep.mubr.msk.f32.mxu1 %vm221_vm1, %v172_v56  ;;  %v106_v55 = vld [vmem:[%s4557_s0 + $0x2d0] sm:$0xff]  ;;  %v204_v56 = vld [vmem:[%s4557_s0 + $0x5e0] sm:$0xff] }
  0x7b   :  { %2548 = vmatmul.mubr.msk.f32.gmra.mxu0 %vm221_vm1, %v75_v57  ;;  %2695 = vmatmul.mubr.msk.f32.gmra.mxu1 %vm221_vm1, %v173_v58  ;;  %v107_v57 = vld [vmem:[%s4557_s0 + $0x2d8] sm:$0xff]  ;;  %v205_v58 = vld [vmem:[%s4557_s0 + $0x5e8] sm:$0xff] }
  0x7c   :  { %2550 = vmatprep.mubr.msk.f32.mxu0 %vm221_vm1, %v76_v59  ;;  %2697 = vmatprep.mubr.msk.f32.mxu1 %vm221_vm1, %v174_v60  ;;  %v108_v59 = vld [vmem:[%s4557_s0 + $0x2e0] sm:$0xff]  ;;  %v206_v60 = vld [vmem:[%s4557_s0 + $0x5f0] sm:$0xff] }
  0x7f   :  { %2551 = vmatmul.mubr.msk.f32.gmra.mxu0 %vm221_vm1, %v77_v61  ;;  %2698 = vmatmul.mubr.msk.f32.gmra.mxu1 %vm221_vm1, %v175_v62  ;;  %v109_v61 = vld [vmem:[%s4557_s0 + $0x2e8] sm:$0xff]  ;;  %v207_v62 = vld [vmem:[%s4557_s0 + $0x5f8] sm:$0xff] }
  0x80   :  { %2553 = vmatprep.mubr.msk.f32.mxu0 %vm221_vm1, %v78_v63  ;;  %2700 = vmatprep.mubr.msk.f32.mxu1 %vm221_vm1, %v176_v0  ;;  %v110_v63 = vld [vmem:[%s4557_s0 + $0x2f0] sm:$0xff]  ;;  %v208_v0 = vld [vmem:[%s4557_s0 + $0x600] sm:$0xff] }
  0x83   :  { %2554 = vmatmul.mubr.msk.f32.gmra.mxu0 %vm221_vm1, %v79_v1  ;;  %2701 = vmatmul.mubr.msk.f32.gmra.mxu1 %vm221_vm1, %v177_v2  ;;  %v111_v1 = vld [vmem:[%s4557_s0 + $0x2f8] sm:$0xff]  ;;  %v209_v2 = vld [vmem:[%s4557_s0 + $0x608] sm:$0xff] }
  0x84   :  { %2556 = vmatprep.mubr.msk.f32.mxu0 %vm221_vm1, %v80_v3  ;;  %2703 = vmatprep.mubr.msk.f32.mxu1 %vm221_vm1, %v178_v4  ;;  %v112_v3 = vld [vmem:[%s4557_s0 + $0x300] sm:$0xff]  ;;  %v210_v4 = vld [vmem:[%s4557_s0 + $0x610] sm:$0xff] }
  0x87   :  { %2557 = vmatmul.mubr.msk.f32.gmra.mxu0 %vm221_vm1, %v81_v5  ;;  %2704 = vmatmul.mubr.msk.f32.gmra.mxu1 %vm221_vm1, %v179_v6  ;;  %v113_v5 = vld [vmem:[%s4557_s0 + $0x308] sm:$0xff]  ;;  %v211_v6 = vld [vmem:[%s4557_s0 + $0x618] sm:$0xff] }
  0x88   :  { %2559 = vmatprep.mubr.msk.f32.mxu0 %vm221_vm1, %v82_v7  ;;  %2706 = vmatprep.mubr.msk.f32.mxu1 %vm221_vm1, %v180_v8  ;;  %v3570_v7 = vld [vmem:[#allocation2] ss:$0 sm:$0xff] }
  0x8b   :  { %2560 = vmatmul.mubr.msk.f32.gmra.mxu0 %vm221_vm1, %v83_v9  ;;  %2707 = vmatmul.mubr.msk.f32.gmra.mxu1 %vm221_vm1, %v181_v10 }
  0x8c   :  { %2562 = vmatprep.mubr.msk.f32.mxu0 %vm221_vm1, %v84_v11  ;;  %2709 = vmatprep.mubr.msk.f32.mxu1 %vm221_vm1, %v182_v12 }
  0x8f   :  { %2563 = vmatmul.mubr.msk.f32.gmra.mxu0 %vm221_vm1, %v85_v13  ;;  %2710 = vmatmul.mubr.msk.f32.gmra.mxu1 %vm221_vm1, %v183_v14 }
  0x90   :  { %2565 = vmatprep.mubr.msk.f32.mxu0 %vm221_vm1, %v86_v15  ;;  %2712 = vmatprep.mubr.msk.f32.mxu1 %vm221_vm1, %v184_v16 }
  0x93   :  { %2566 = vmatmul.mubr.msk.f32.gmra.mxu0 %vm221_vm1, %v87_v17  ;;  %2713 = vmatmul.mubr.msk.f32.gmra.mxu1 %vm221_vm1, %v185_v18 }
  0x94   :  { %2568 = vmatprep.mubr.msk.f32.mxu0 %vm221_vm1, %v88_v19  ;;  %2715 = vmatprep.mubr.msk.f32.mxu1 %vm221_vm1, %v186_v20 }
  0x97   :  { %2569 = vmatmul.mubr.msk.f32.gmra.mxu0 %vm221_vm1, %v89_v21  ;;  %2716 = vmatmul.mubr.msk.f32.gmra.mxu1 %vm221_vm1, %v187_v22 }
  0x98   :  { %2571 = vmatprep.mubr.msk.f32.mxu0 %vm221_vm1, %v90_v23  ;;  %2718 = vmatprep.mubr.msk.f32.mxu1 %vm221_vm1, %v188_v24 }
  0x9b   :  { %2572 = vmatmul.mubr.msk.f32.gmra.mxu0 %vm221_vm1, %v91_v25  ;;  %2719 = vmatmul.mubr.msk.f32.gmra.mxu1 %vm221_vm1, %v189_v26 }
  0x9c   :  { %2574 = vmatprep.mubr.msk.f32.mxu0 %vm221_vm1, %v92_v27  ;;  %2721 = vmatprep.mubr.msk.f32.mxu1 %vm221_vm1, %v190_v28 }
  0x9f   :  { %2575 = vmatmul.mubr.msk.f32.gmra.mxu0 %vm221_vm1, %v93_v29  ;;  %2722 = vmatmul.mubr.msk.f32.gmra.mxu1 %vm221_vm1, %v191_v30 }
  0xa0   :  { %2577 = vmatprep.mubr.msk.f32.mxu0 %vm221_vm1, %v94_v31  ;;  %2724 = vmatprep.mubr.msk.f32.mxu1 %vm221_vm1, %v192_v32 }
  0xa3   :  { %2578 = vmatmul.mubr.msk.f32.gmra.mxu0 %vm221_vm1, %v95_v33  ;;  %2725 = vmatmul.mubr.msk.f32.gmra.mxu1 %vm221_vm1, %v193_v34 }
  0xa4   :  { %2580 = vmatprep.mubr.msk.f32.mxu0 %vm221_vm1, %v96_v35  ;;  %2727 = vmatprep.mubr.msk.f32.mxu1 %vm221_vm1, %v194_v36 }
  0xa7   :  { %2581 = vmatmul.mubr.msk.f32.gmra.mxu0 %vm221_vm1, %v97_v37  ;;  %2728 = vmatmul.mubr.msk.f32.gmra.mxu1 %vm221_vm1, %v195_v38 }
  0xa8   :  { %2583 = vmatprep.mubr.msk.f32.mxu0 %vm221_vm1, %v98_v39  ;;  %2730 = vmatprep.mubr.msk.f32.mxu1 %vm221_vm1, %v196_v40 }
  0xab   :  { %2584 = vmatmul.mubr.msk.f32.gmra.mxu0 %vm221_vm1, %v99_v41  ;;  %2731 = vmatmul.mubr.msk.f32.gmra.mxu1 %vm221_vm1, %v197_v42 }
  0xac   :  { %2586 = vmatprep.mubr.msk.f32.mxu0 %vm221_vm1, %v100_v43  ;;  %2733 = vmatprep.mubr.msk.f32.mxu1 %vm221_vm1, %v198_v44 }
  0xaf   :  { %2587 = vmatmul.mubr.msk.f32.gmra.mxu0 %vm221_vm1, %v101_v45  ;;  %2734 = vmatmul.mubr.msk.f32.gmra.mxu1 %vm221_vm1, %v199_v46 }
  0xb0   :  { %2589 = vmatprep.mubr.msk.f32.mxu0 %vm221_vm1, %v102_v47  ;;  %2736 = vmatprep.mubr.msk.f32.mxu1 %vm221_vm1, %v200_v48 }
  0xb3   :  { %2590 = vmatmul.mubr.msk.f32.gmra.mxu0 %vm221_vm1, %v103_v49  ;;  %2737 = vmatmul.mubr.msk.f32.gmra.mxu1 %vm221_vm1, %v201_v50 }
  0xb4   :  { %2592 = vmatprep.mubr.msk.f32.mxu0 %vm221_vm1, %v104_v51  ;;  %2739 = vmatprep.mubr.msk.f32.mxu1 %vm221_vm1, %v202_v52 }
  0xb7   :  { %2593 = vmatmul.mubr.msk.f32.gmra.mxu0 %vm221_vm1, %v105_v53  ;;  %2740 = vmatmul.mubr.msk.f32.gmra.mxu1 %vm221_vm1, %v203_v54 }
  0xb8   :  { %2595 = vmatprep.mubr.msk.f32.mxu0 %vm221_vm1, %v106_v55  ;;  %2742 = vmatprep.mubr.msk.f32.mxu1 %vm221_vm1, %v204_v56 }
  0xbb   :  { %2596 = vmatmul.mubr.msk.f32.gmra.mxu0 %vm221_vm1, %v107_v57  ;;  %2743 = vmatmul.mubr.msk.f32.gmra.mxu1 %vm221_vm1, %v205_v58 }
  0xbc   :  { %2598 = vmatprep.mubr.msk.f32.mxu0 %vm221_vm1, %v108_v59  ;;  %2745 = vmatprep.mubr.msk.f32.mxu1 %vm221_vm1, %v206_v60 }
  0xbf   :  { %2599 = vmatmul.mubr.msk.f32.gmra.mxu0 %vm221_vm1, %v109_v61  ;;  %2746 = vmatmul.mubr.msk.f32.gmra.mxu1 %vm221_vm1, %v207_v62 }
  0xc0   :  { %2601 = vmatprep.mubr.msk.f32.mxu0 %vm221_vm1, %v110_v63  ;;  %2748 = vmatprep.mubr.msk.f32.mxu1 %vm221_vm1, %v208_v0 }
  0xc3   :  { %2602 = vmatmul.mubr.msk.f32.gmra.mxu0 %vm221_vm1, %v111_v1  ;;  %2749 = vmatmul.mubr.msk.f32.gmra.mxu1 %vm221_vm1, %v209_v2 }
  0xc4   :  { %2604 = vmatprep.mubr.msk.f32.mxu0 %vm221_vm1, %v112_v3  ;;  %2751 = vmatprep.mubr.msk.f32.mxu1 %vm221_vm1, %v210_v4 }
  0xc7   :  { %v2462_v8 = vpop.f32.mrf.mxu0  ;;  %2605 = vmatmul.mubr.msk.f32.gmra.mxu0 %vm221_vm1, %v113_v5  ;;  %v2609_v9 = vpop.f32.mrf.mxu1  ;;  %2752 = vmatmul.mubr.msk.f32.gmra.mxu1 %vm221_vm1, %v211_v6 }
  0xc8   :  { %v886_v10 = vadd.f32 %v2462_v8, %v3570_v7  ;;  %v1376_v11 = vadd.f32 %v2609_v9, %v3570_v7 }
  0xc9   :  { %v880_v12 = vpop.f32.mrf.mxu0  ;;  %v1370_v13 = vpop.f32.mrf.mxu1 }
  0xca   :  { %1861 = vst.msk [vmem:[%s4559_s3 + $0x8] sm:$0xff] %vm1859_vm2, %v886_v10  ;;  %1959 = vst.msk [vmem:[%s4559_s3 + $0x318] sm:$0xff] %vm1859_vm2, %v1376_v11  ;;  %v881_v14 = vadd.f32 %v3570_v7, %v880_v12  ;;  %v1371_v15 = vadd.f32 %v3570_v7, %v1370_v13 }
  0xcb   :  { %v2465_v16 = vpop.f32.mrf.mxu0  ;;  %v2612_v17 = vpop.f32.mrf.mxu1 }
  0xcc   :  { %1860 = vst.msk [vmem:[%s4559_s3] sm:$0xff] %vm1859_vm2, %v881_v14  ;;  %1958 = vst.msk [vmem:[%s4559_s3 + $0x310] sm:$0xff] %vm1859_vm2, %v1371_v15  ;;  %v896_v18 = vadd.f32 %v2465_v16, %v3570_v7  ;;  %v1386_v19 = vadd.f32 %v2612_v17, %v3570_v7 }
  0xcd   :  { %v890_v20 = vpop.f32.mrf.mxu0  ;;  %v1380_v21 = vpop.f32.mrf.mxu1 }
  0xce   :  { %1863 = vst.msk [vmem:[%s4559_s3 + $0x18] sm:$0xff] %vm1859_vm2, %v896_v18  ;;  %1961 = vst.msk [vmem:[%s4559_s3 + $0x328] sm:$0xff] %vm1859_vm2, %v1386_v19  ;;  %v891_v22 = vadd.f32 %v3570_v7, %v890_v20  ;;  %v1381_v23 = vadd.f32 %v3570_v7, %v1380_v21 }
  0xcf   :  { %v2468_v24 = vpop.f32.mrf.mxu0  ;;  %v2615_v25 = vpop.f32.mrf.mxu1 }
  0xd0   :  { %1862 = vst.msk [vmem:[%s4559_s3 + $0x10] sm:$0xff] %vm1859_vm2, %v891_v22  ;;  %1960 = vst.msk [vmem:[%s4559_s3 + $0x320] sm:$0xff] %vm1859_vm2, %v1381_v23  ;;  %v906_v26 = vadd.f32 %v2468_v24, %v3570_v7  ;;  %v1396_v27 = vadd.f32 %v2615_v25, %v3570_v7 }
  0xd1   :  { %v900_v28 = vpop.f32.mrf.mxu0  ;;  %v1390_v29 = vpop.f32.mrf.mxu1 }
  0xd2   :  { %1865 = vst.msk [vmem:[%s4559_s3 + $0x28] sm:$0xff] %vm1859_vm2, %v906_v26  ;;  %1963 = vst.msk [vmem:[%s4559_s3 + $0x338] sm:$0xff] %vm1859_vm2, %v1396_v27  ;;  %v901_v30 = vadd.f32 %v3570_v7, %v900_v28  ;;  %v1391_v31 = vadd.f32 %v3570_v7, %v1390_v29 }
  0xd3   :  { %v2471_v32 = vpop.f32.mrf.mxu0  ;;  %v2618_v33 = vpop.f32.mrf.mxu1 }
  0xd4   :  { %1864 = vst.msk [vmem:[%s4559_s3 + $0x20] sm:$0xff] %vm1859_vm2, %v901_v30  ;;  %1962 = vst.msk [vmem:[%s4559_s3 + $0x330] sm:$0xff] %vm1859_vm2, %v1391_v31  ;;  %v916_v34 = vadd.f32 %v2471_v32, %v3570_v7  ;;  %v1406_v35 = vadd.f32 %v2618_v33, %v3570_v7 }
  0xd5   :  { %v910_v36 = vpop.f32.mrf.mxu0  ;;  %v1400_v37 = vpop.f32.mrf.mxu1 }
  0xd6   :  { %1867 = vst.msk [vmem:[%s4559_s3 + $0x38] sm:$0xff] %vm1859_vm2, %v916_v34  ;;  %1965 = vst.msk [vmem:[%s4559_s3 + $0x348] sm:$0xff] %vm1859_vm2, %v1406_v35  ;;  %v911_v38 = vadd.f32 %v3570_v7, %v910_v36  ;;  %v1401_v39 = vadd.f32 %v3570_v7, %v1400_v37 }
  0xd7   :  { %v2474_v40 = vpop.f32.mrf.mxu0  ;;  %v2621_v41 = vpop.f32.mrf.mxu1 }
  0xd8   :  { %1866 = vst.msk [vmem:[%s4559_s3 + $0x30] sm:$0xff] %vm1859_vm2, %v911_v38  ;;  %1964 = vst.msk [vmem:[%s4559_s3 + $0x340] sm:$0xff] %vm1859_vm2, %v1401_v39  ;;  %v926_v42 = vadd.f32 %v2474_v40, %v3570_v7  ;;  %v1416_v43 = vadd.f32 %v2621_v41, %v3570_v7 }
  0xd9   :  { %v920_v44 = vpop.f32.mrf.mxu0  ;;  %v1410_v45 = vpop.f32.mrf.mxu1 }
  0xda   :  { %1869 = vst.msk [vmem:[%s4559_s3 + $0x48] sm:$0xff] %vm1859_vm2, %v926_v42  ;;  %1967 = vst.msk [vmem:[%s4559_s3 + $0x358] sm:$0xff] %vm1859_vm2, %v1416_v43  ;;  %v921_v46 = vadd.f32 %v3570_v7, %v920_v44  ;;  %v1411_v47 = vadd.f32 %v3570_v7, %v1410_v45 }
  0xdb   :  { %v2477_v48 = vpop.f32.mrf.mxu0  ;;  %v2624_v49 = vpop.f32.mrf.mxu1 }
  0xdc   :  { %1868 = vst.msk [vmem:[%s4559_s3 + $0x40] sm:$0xff] %vm1859_vm2, %v921_v46  ;;  %1966 = vst.msk [vmem:[%s4559_s3 + $0x350] sm:$0xff] %vm1859_vm2, %v1411_v47  ;;  %v936_v50 = vadd.f32 %v2477_v48, %v3570_v7  ;;  %v1426_v51 = vadd.f32 %v2624_v49, %v3570_v7 }
  0xdd   :  { %v930_v52 = vpop.f32.mrf.mxu0  ;;  %v1420_v53 = vpop.f32.mrf.mxu1 }
  0xde   :  { %1871 = vst.msk [vmem:[%s4559_s3 + $0x58] sm:$0xff] %vm1859_vm2, %v936_v50  ;;  %1969 = vst.msk [vmem:[%s4559_s3 + $0x368] sm:$0xff] %vm1859_vm2, %v1426_v51  ;;  %v931_v54 = vadd.f32 %v3570_v7, %v930_v52  ;;  %v1421_v55 = vadd.f32 %v3570_v7, %v1420_v53 }
  0xdf   :  { %v2480_v56 = vpop.f32.mrf.mxu0  ;;  %v2627_v57 = vpop.f32.mrf.mxu1 }
  0xe0   :  { %1870 = vst.msk [vmem:[%s4559_s3 + $0x50] sm:$0xff] %vm1859_vm2, %v931_v54  ;;  %1968 = vst.msk [vmem:[%s4559_s3 + $0x360] sm:$0xff] %vm1859_vm2, %v1421_v55  ;;  %v946_v58 = vadd.f32 %v2480_v56, %v3570_v7  ;;  %v1436_v59 = vadd.f32 %v2627_v57, %v3570_v7 }
  0xe1   :  { %v940_v60 = vpop.f32.mrf.mxu0  ;;  %v1430_v61 = vpop.f32.mrf.mxu1 }
  0xe2   :  { %1873 = vst.msk [vmem:[%s4559_s3 + $0x68] sm:$0xff] %vm1859_vm2, %v946_v58  ;;  %1971 = vst.msk [vmem:[%s4559_s3 + $0x378] sm:$0xff] %vm1859_vm2, %v1436_v59  ;;  %v941_v62 = vadd.f32 %v3570_v7, %v940_v60  ;;  %v1431_v63 = vadd.f32 %v3570_v7, %v1430_v61 }
  0xe3   :  { %v2483_v0 = vpop.f32.mrf.mxu0  ;;  %v2630_v1 = vpop.f32.mrf.mxu1 }
  0xe4   :  { %1872 = vst.msk [vmem:[%s4559_s3 + $0x60] sm:$0xff] %vm1859_vm2, %v941_v62  ;;  %1970 = vst.msk [vmem:[%s4559_s3 + $0x370] sm:$0xff] %vm1859_vm2, %v1431_v63  ;;  %v956_v2 = vadd.f32 %v2483_v0, %v3570_v7  ;;  %v1446_v3 = vadd.f32 %v2630_v1, %v3570_v7 }
  0xe5   :  { %v950_v4 = vpop.f32.mrf.mxu0  ;;  %v1440_v5 = vpop.f32.mrf.mxu1 }
  0xe6   :  { %1875 = vst.msk [vmem:[%s4559_s3 + $0x78] sm:$0xff] %vm1859_vm2, %v956_v2  ;;  %1973 = vst.msk [vmem:[%s4559_s3 + $0x388] sm:$0xff] %vm1859_vm2, %v1446_v3  ;;  %v951_v6 = vadd.f32 %v3570_v7, %v950_v4  ;;  %v1441_v8 = vadd.f32 %v3570_v7, %v1440_v5 }
  0xe7   :  { %v2486_v9 = vpop.f32.mrf.mxu0  ;;  %v2633_v10 = vpop.f32.mrf.mxu1 }
  0xe8   :  { %1874 = vst.msk [vmem:[%s4559_s3 + $0x70] sm:$0xff] %vm1859_vm2, %v951_v6  ;;  %1972 = vst.msk [vmem:[%s4559_s3 + $0x380] sm:$0xff] %vm1859_vm2, %v1441_v8  ;;  %v966_v11 = vadd.f32 %v2486_v9, %v3570_v7  ;;  %v1456_v12 = vadd.f32 %v2633_v10, %v3570_v7 }
  0xe9   :  { %v960_v13 = vpop.f32.mrf.mxu0  ;;  %v1450_v14 = vpop.f32.mrf.mxu1 }
  0xea   :  { %1877 = vst.msk [vmem:[%s4559_s3 + $0x88] sm:$0xff] %vm1859_vm2, %v966_v11  ;;  %1975 = vst.msk [vmem:[%s4559_s3 + $0x398] sm:$0xff] %vm1859_vm2, %v1456_v12  ;;  %v961_v15 = vadd.f32 %v3570_v7, %v960_v13  ;;  %v1451_v16 = vadd.f32 %v3570_v7, %v1450_v14 }
  0xeb   :  { %v2489_v17 = vpop.f32.mrf.mxu0  ;;  %v2636_v18 = vpop.f32.mrf.mxu1 }
  0xec   :  { %1876 = vst.msk [vmem:[%s4559_s3 + $0x80] sm:$0xff] %vm1859_vm2, %v961_v15  ;;  %1974 = vst.msk [vmem:[%s4559_s3 + $0x390] sm:$0xff] %vm1859_vm2, %v1451_v16  ;;  %v976_v19 = vadd.f32 %v2489_v17, %v3570_v7  ;;  %v1466_v20 = vadd.f32 %v2636_v18, %v3570_v7 }
  0xed   :  { %v970_v21 = vpop.f32.mrf.mxu0  ;;  %v1460_v22 = vpop.f32.mrf.mxu1 }
  0xee   :  { %1879 = vst.msk [vmem:[%s4559_s3 + $0x98] sm:$0xff] %vm1859_vm2, %v976_v19  ;;  %1977 = vst.msk [vmem:[%s4559_s3 + $0x3a8] sm:$0xff] %vm1859_vm2, %v1466_v20  ;;  %v971_v23 = vadd.f32 %v3570_v7, %v970_v21  ;;  %v1461_v24 = vadd.f32 %v3570_v7, %v1460_v22 }
  0xef   :  { %v2492_v25 = vpop.f32.mrf.mxu0  ;;  %v2639_v26 = vpop.f32.mrf.mxu1 }
  0xf0   :  { %1878 = vst.msk [vmem:[%s4559_s3 + $0x90] sm:$0xff] %vm1859_vm2, %v971_v23  ;;  %1976 = vst.msk [vmem:[%s4559_s3 + $0x3a0] sm:$0xff] %vm1859_vm2, %v1461_v24  ;;  %v986_v27 = vadd.f32 %v2492_v25, %v3570_v7  ;;  %v1476_v28 = vadd.f32 %v2639_v26, %v3570_v7 }
  0xf1   :  { %v980_v29 = vpop.f32.mrf.mxu0  ;;  %v1470_v30 = vpop.f32.mrf.mxu1 }
  0xf2   :  { %1881 = vst.msk [vmem:[%s4559_s3 + $0xa8] sm:$0xff] %vm1859_vm2, %v986_v27  ;;  %1979 = vst.msk [vmem:[%s4559_s3 + $0x3b8] sm:$0xff] %vm1859_vm2, %v1476_v28  ;;  %v981_v31 = vadd.f32 %v3570_v7, %v980_v29  ;;  %v1471_v32 = vadd.f32 %v3570_v7, %v1470_v30 }
  0xf3   :  { %v2495_v33 = vpop.f32.mrf.mxu0  ;;  %v2642_v34 = vpop.f32.mrf.mxu1 }
  0xf4   :  { %1880 = vst.msk [vmem:[%s4559_s3 + $0xa0] sm:$0xff] %vm1859_vm2, %v981_v31  ;;  %1978 = vst.msk [vmem:[%s4559_s3 + $0x3b0] sm:$0xff] %vm1859_vm2, %v1471_v32  ;;  %v996_v35 = vadd.f32 %v2495_v33, %v3570_v7  ;;  %v1486_v36 = vadd.f32 %v2642_v34, %v3570_v7 }
  0xf5   :  { %v990_v37 = vpop.f32.mrf.mxu0  ;;  %v1480_v38 = vpop.f32.mrf.mxu1 }
  0xf6   :  { %1883 = vst.msk [vmem:[%s4559_s3 + $0xb8] sm:$0xff] %vm1859_vm2, %v996_v35  ;;  %1981 = vst.msk [vmem:[%s4559_s3 + $0x3c8] sm:$0xff] %vm1859_vm2, %v1486_v36  ;;  %v991_v39 = vadd.f32 %v3570_v7, %v990_v37  ;;  %v1481_v40 = vadd.f32 %v3570_v7, %v1480_v38 }
  0xf7   :  { %v2498_v41 = vpop.f32.mrf.mxu0  ;;  %v2645_v42 = vpop.f32.mrf.mxu1 }
  0xf8   :  { %1882 = vst.msk [vmem:[%s4559_s3 + $0xb0] sm:$0xff] %vm1859_vm2, %v991_v39  ;;  %1980 = vst.msk [vmem:[%s4559_s3 + $0x3c0] sm:$0xff] %vm1859_vm2, %v1481_v40  ;;  %v1006_v43 = vadd.f32 %v2498_v41, %v3570_v7  ;;  %v1496_v44 = vadd.f32 %v2645_v42, %v3570_v7 }
  0xf9   :  { %v1000_v45 = vpop.f32.mrf.mxu0  ;;  %v1490_v46 = vpop.f32.mrf.mxu1 }
  0xfa   :  { %1885 = vst.msk [vmem:[%s4559_s3 + $0xc8] sm:$0xff] %vm1859_vm2, %v1006_v43  ;;  %1983 = vst.msk [vmem:[%s4559_s3 + $0x3d8] sm:$0xff] %vm1859_vm2, %v1496_v44  ;;  %v1001_v47 = vadd.f32 %v3570_v7, %v1000_v45  ;;  %v1491_v48 = vadd.f32 %v3570_v7, %v1490_v46 }
  0xfb   :  { %v2501_v49 = vpop.f32.mrf.mxu0  ;;  %v2648_v50 = vpop.f32.mrf.mxu1 }
  0xfc   :  { %1884 = vst.msk [vmem:[%s4559_s3 + $0xc0] sm:$0xff] %vm1859_vm2, %v1001_v47  ;;  %1982 = vst.msk [vmem:[%s4559_s3 + $0x3d0] sm:$0xff] %vm1859_vm2, %v1491_v48  ;;  %v1016_v51 = vadd.f32 %v2501_v49, %v3570_v7  ;;  %v1506_v52 = vadd.f32 %v2648_v50, %v3570_v7 }
  0xfd   :  { %v1010_v53 = vpop.f32.mrf.mxu0  ;;  %v1500_v54 = vpop.f32.mrf.mxu1 }
  0xfe   :  { %1887 = vst.msk [vmem:[%s4559_s3 + $0xd8] sm:$0xff] %vm1859_vm2, %v1016_v51  ;;  %1985 = vst.msk [vmem:[%s4559_s3 + $0x3e8] sm:$0xff] %vm1859_vm2, %v1506_v52  ;;  %v1011_v55 = vadd.f32 %v3570_v7, %v1010_v53  ;;  %v1501_v56 = vadd.f32 %v3570_v7, %v1500_v54 }
  0xff   :  { %v2504_v57 = vpop.f32.mrf.mxu0  ;;  %v2651_v58 = vpop.f32.mrf.mxu1 }
 0x100   :  { %1886 = vst.msk [vmem:[%s4559_s3 + $0xd0] sm:$0xff] %vm1859_vm2, %v1011_v55  ;;  %1984 = vst.msk [vmem:[%s4559_s3 + $0x3e0] sm:$0xff] %vm1859_vm2, %v1501_v56  ;;  %v1026_v59 = vadd.f32 %v2504_v57, %v3570_v7  ;;  %v1516_v60 = vadd.f32 %v2651_v58, %v3570_v7 }
 0x101   :  { %v1020_v61 = vpop.f32.mrf.mxu0  ;;  %v1510_v62 = vpop.f32.mrf.mxu1 }
 0x102   :  { %1889 = vst.msk [vmem:[%s4559_s3 + $0xe8] sm:$0xff] %vm1859_vm2, %v1026_v59  ;;  %1987 = vst.msk [vmem:[%s4559_s3 + $0x3f8] sm:$0xff] %vm1859_vm2, %v1516_v60  ;;  %v1021_v63 = vadd.f32 %v3570_v7, %v1020_v61  ;;  %v1511_v0 = vadd.f32 %v3570_v7, %v1510_v62 }
 0x103   :  { %v2507_v1 = vpop.f32.mrf.mxu0  ;;  %v2654_v2 = vpop.f32.mrf.mxu1 }
 0x104   :  { %1888 = vst.msk [vmem:[%s4559_s3 + $0xe0] sm:$0xff] %vm1859_vm2, %v1021_v63  ;;  %1986 = vst.msk [vmem:[%s4559_s3 + $0x3f0] sm:$0xff] %vm1859_vm2, %v1511_v0  ;;  %v1036_v3 = vadd.f32 %v2507_v1, %v3570_v7  ;;  %v1526_v4 = vadd.f32 %v2654_v2, %v3570_v7 }
 0x105   :  { %v1030_v5 = vpop.f32.mrf.mxu0  ;;  %v1520_v6 = vpop.f32.mrf.mxu1 }
 0x106   :  { %1891 = vst.msk [vmem:[%s4559_s3 + $0xf8] sm:$0xff] %vm1859_vm2, %v1036_v3  ;;  %1989 = vst.msk [vmem:[%s4559_s3 + $0x408] sm:$0xff] %vm1859_vm2, %v1526_v4  ;;  %v1031_v8 = vadd.f32 %v3570_v7, %v1030_v5  ;;  %v1521_v9 = vadd.f32 %v3570_v7, %v1520_v6 }
 0x107   :  { %v2510_v10 = vpop.f32.mrf.mxu0  ;;  %v2657_v11 = vpop.f32.mrf.mxu1 }
 0x108   :  { %1890 = vst.msk [vmem:[%s4559_s3 + $0xf0] sm:$0xff] %vm1859_vm2, %v1031_v8  ;;  %1988 = vst.msk [vmem:[%s4559_s3 + $0x400] sm:$0xff] %vm1859_vm2, %v1521_v9  ;;  %v1046_v12 = vadd.f32 %v2510_v10, %v3570_v7  ;;  %v1536_v13 = vadd.f32 %v2657_v11, %v3570_v7 }
 0x109   :  { %v1040_v14 = vpop.f32.mrf.mxu0  ;;  %v1530_v15 = vpop.f32.mrf.mxu1 }
 0x10a   :  { %1893 = vst.msk [vmem:[%s4559_s3 + $0x108] sm:$0xff] %vm1859_vm2, %v1046_v12  ;;  %1991 = vst.msk [vmem:[%s4559_s3 + $0x418] sm:$0xff] %vm1859_vm2, %v1536_v13  ;;  %v1041_v16 = vadd.f32 %v3570_v7, %v1040_v14  ;;  %v1531_v17 = vadd.f32 %v3570_v7, %v1530_v15 }
 0x10b   :  { %v2513_v18 = vpop.f32.mrf.mxu0  ;;  %v2660_v19 = vpop.f32.mrf.mxu1 }
 0x10c   :  { %1892 = vst.msk [vmem:[%s4559_s3 + $0x100] sm:$0xff] %vm1859_vm2, %v1041_v16  ;;  %1990 = vst.msk [vmem:[%s4559_s3 + $0x410] sm:$0xff] %vm1859_vm2, %v1531_v17  ;;  %v1056_v20 = vadd.f32 %v2513_v18, %v3570_v7  ;;  %v1546_v21 = vadd.f32 %v2660_v19, %v3570_v7 }
 0x10d   :  { %v1050_v22 = vpop.f32.mrf.mxu0  ;;  %v1540_v23 = vpop.f32.mrf.mxu1 }
 0x10e   :  { %1895 = vst.msk [vmem:[%s4559_s3 + $0x118] sm:$0xff] %vm1859_vm2, %v1056_v20  ;;  %1993 = vst.msk [vmem:[%s4559_s3 + $0x428] sm:$0xff] %vm1859_vm2, %v1546_v21  ;;  %v1051_v24 = vadd.f32 %v3570_v7, %v1050_v22  ;;  %v1541_v25 = vadd.f32 %v3570_v7, %v1540_v23 }
 0x10f   :  { %v2516_v26 = vpop.f32.mrf.mxu0  ;;  %v2663_v27 = vpop.f32.mrf.mxu1 }
 0x110   :  { %1894 = vst.msk [vmem:[%s4559_s3 + $0x110] sm:$0xff] %vm1859_vm2, %v1051_v24  ;;  %1992 = vst.msk [vmem:[%s4559_s3 + $0x420] sm:$0xff] %vm1859_vm2, %v1541_v25  ;;  %v1066_v28 = vadd.f32 %v2516_v26, %v3570_v7  ;;  %v1556_v29 = vadd.f32 %v2663_v27, %v3570_v7 }
 0x111   :  { %v1060_v30 = vpop.f32.mrf.mxu0  ;;  %v1550_v31 = vpop.f32.mrf.mxu1 }
 0x112   :  { %1897 = vst.msk [vmem:[%s4559_s3 + $0x128] sm:$0xff] %vm1859_vm2, %v1066_v28  ;;  %1995 = vst.msk [vmem:[%s4559_s3 + $0x438] sm:$0xff] %vm1859_vm2, %v1556_v29  ;;  %v1061_v32 = vadd.f32 %v3570_v7, %v1060_v30  ;;  %v1551_v33 = vadd.f32 %v3570_v7, %v1550_v31 }
 0x113   :  { %v2519_v34 = vpop.f32.mrf.mxu0  ;;  %v2666_v35 = vpop.f32.mrf.mxu1 }
 0x114   :  { %1896 = vst.msk [vmem:[%s4559_s3 + $0x120] sm:$0xff] %vm1859_vm2, %v1061_v32  ;;  %1994 = vst.msk [vmem:[%s4559_s3 + $0x430] sm:$0xff] %vm1859_vm2, %v1551_v33  ;;  %v1076_v36 = vadd.f32 %v2519_v34, %v3570_v7  ;;  %v1566_v37 = vadd.f32 %v2666_v35, %v3570_v7 }
 0x115   :  { %v1070_v38 = vpop.f32.mrf.mxu0  ;;  %v1560_v39 = vpop.f32.mrf.mxu1 }
 0x116   :  { %1899 = vst.msk [vmem:[%s4559_s3 + $0x138] sm:$0xff] %vm1859_vm2, %v1076_v36  ;;  %1997 = vst.msk [vmem:[%s4559_s3 + $0x448] sm:$0xff] %vm1859_vm2, %v1566_v37  ;;  %v1071_v40 = vadd.f32 %v3570_v7, %v1070_v38  ;;  %v1561_v41 = vadd.f32 %v3570_v7, %v1560_v39 }
 0x117   :  { %v2522_v42 = vpop.f32.mrf.mxu0  ;;  %v2669_v43 = vpop.f32.mrf.mxu1 }
 0x118   :  { %1898 = vst.msk [vmem:[%s4559_s3 + $0x130] sm:$0xff] %vm1859_vm2, %v1071_v40  ;;  %1996 = vst.msk [vmem:[%s4559_s3 + $0x440] sm:$0xff] %vm1859_vm2, %v1561_v41  ;;  %v1086_v44 = vadd.f32 %v2522_v42, %v3570_v7  ;;  %v1576_v45 = vadd.f32 %v2669_v43, %v3570_v7 }
 0x119   :  { %v1080_v46 = vpop.f32.mrf.mxu0  ;;  %v1570_v47 = vpop.f32.mrf.mxu1 }
 0x11a   :  { %1901 = vst.msk [vmem:[%s4559_s3 + $0x148] sm:$0xff] %vm1859_vm2, %v1086_v44  ;;  %1999 = vst.msk [vmem:[%s4559_s3 + $0x458] sm:$0xff] %vm1859_vm2, %v1576_v45  ;;  %v1081_v48 = vadd.f32 %v3570_v7, %v1080_v46  ;;  %v1571_v49 = vadd.f32 %v3570_v7, %v1570_v47 }
 0x11b   :  { %v2525_v50 = vpop.f32.mrf.mxu0  ;;  %v2672_v51 = vpop.f32.mrf.mxu1 }
 0x11c   :  { %1900 = vst.msk [vmem:[%s4559_s3 + $0x140] sm:$0xff] %vm1859_vm2, %v1081_v48  ;;  %1998 = vst.msk [vmem:[%s4559_s3 + $0x450] sm:$0xff] %vm1859_vm2, %v1571_v49  ;;  %v1096_v52 = vadd.f32 %v2525_v50, %v3570_v7  ;;  %v1586_v53 = vadd.f32 %v2672_v51, %v3570_v7 }
 0x11d   :  { %v1090_v54 = vpop.f32.mrf.mxu0  ;;  %v1580_v55 = vpop.f32.mrf.mxu1 }
 0x11e   :  { %1903 = vst.msk [vmem:[%s4559_s3 + $0x158] sm:$0xff] %vm1859_vm2, %v1096_v52  ;;  %2001 = vst.msk [vmem:[%s4559_s3 + $0x468] sm:$0xff] %vm1859_vm2, %v1586_v53  ;;  %v1091_v56 = vadd.f32 %v3570_v7, %v1090_v54  ;;  %v1581_v57 = vadd.f32 %v3570_v7, %v1580_v55 }
 0x11f   :  { %v2528_v58 = vpop.f32.mrf.mxu0  ;;  %v2675_v59 = vpop.f32.mrf.mxu1 }
 0x120   :  { %1902 = vst.msk [vmem:[%s4559_s3 + $0x150] sm:$0xff] %vm1859_vm2, %v1091_v56  ;;  %2000 = vst.msk [vmem:[%s4559_s3 + $0x460] sm:$0xff] %vm1859_vm2, %v1581_v57  ;;  %v1106_v60 = vadd.f32 %v2528_v58, %v3570_v7  ;;  %v1596_v61 = vadd.f32 %v2675_v59, %v3570_v7 }
 0x121   :  { %v1100_v62 = vpop.f32.mrf.mxu0  ;;  %v1590_v63 = vpop.f32.mrf.mxu1 }
 0x122   :  { %1905 = vst.msk [vmem:[%s4559_s3 + $0x168] sm:$0xff] %vm1859_vm2, %v1106_v60  ;;  %2003 = vst.msk [vmem:[%s4559_s3 + $0x478] sm:$0xff] %vm1859_vm2, %v1596_v61  ;;  %v1101_v0 = vadd.f32 %v3570_v7, %v1100_v62  ;;  %v1591_v1 = vadd.f32 %v3570_v7, %v1590_v63 }
 0x123   :  { %v2531_v2 = vpop.f32.mrf.mxu0  ;;  %v2678_v3 = vpop.f32.mrf.mxu1 }
 0x124   :  { %1904 = vst.msk [vmem:[%s4559_s3 + $0x160] sm:$0xff] %vm1859_vm2, %v1101_v0  ;;  %2002 = vst.msk [vmem:[%s4559_s3 + $0x470] sm:$0xff] %vm1859_vm2, %v1591_v1  ;;  %v1116_v4 = vadd.f32 %v2531_v2, %v3570_v7  ;;  %v1606_v5 = vadd.f32 %v2678_v3, %v3570_v7 }
 0x125   :  { %v1110_v6 = vpop.f32.mrf.mxu0  ;;  %v1600_v8 = vpop.f32.mrf.mxu1 }
 0x126   :  { %1907 = vst.msk [vmem:[%s4559_s3 + $0x178] sm:$0xff] %vm1859_vm2, %v1116_v4  ;;  %2005 = vst.msk [vmem:[%s4559_s3 + $0x488] sm:$0xff] %vm1859_vm2, %v1606_v5  ;;  %v1111_v9 = vadd.f32 %v3570_v7, %v1110_v6  ;;  %v1601_v10 = vadd.f32 %v3570_v7, %v1600_v8 }
 0x127   :  { %v2534_v11 = vpop.f32.mrf.mxu0  ;;  %v2681_v12 = vpop.f32.mrf.mxu1 }
 0x128   :  { %1906 = vst.msk [vmem:[%s4559_s3 + $0x170] sm:$0xff] %vm1859_vm2, %v1111_v9  ;;  %2004 = vst.msk [vmem:[%s4559_s3 + $0x480] sm:$0xff] %vm1859_vm2, %v1601_v10  ;;  %v1126_v13 = vadd.f32 %v2534_v11, %v3570_v7  ;;  %v1616_v14 = vadd.f32 %v2681_v12, %v3570_v7 }
 0x129   :  { %v1120_v15 = vpop.f32.mrf.mxu0  ;;  %v1610_v16 = vpop.f32.mrf.mxu1 }
 0x12a   :  { %1909 = vst.msk [vmem:[%s4559_s3 + $0x188] sm:$0xff] %vm1859_vm2, %v1126_v13  ;;  %2007 = vst.msk [vmem:[%s4559_s3 + $0x498] sm:$0xff] %vm1859_vm2, %v1616_v14  ;;  %v1121_v17 = vadd.f32 %v3570_v7, %v1120_v15  ;;  %v1611_v18 = vadd.f32 %v3570_v7, %v1610_v16 }
 0x12b   :  { %v2537_v19 = vpop.f32.mrf.mxu0  ;;  %v2684_v20 = vpop.f32.mrf.mxu1 }
 0x12c   :  { %1908 = vst.msk [vmem:[%s4559_s3 + $0x180] sm:$0xff] %vm1859_vm2, %v1121_v17  ;;  %2006 = vst.msk [vmem:[%s4559_s3 + $0x490] sm:$0xff] %vm1859_vm2, %v1611_v18  ;;  %v1136_v21 = vadd.f32 %v2537_v19, %v3570_v7  ;;  %v1626_v22 = vadd.f32 %v2684_v20, %v3570_v7 }
 0x12d   :  { %v1130_v23 = vpop.f32.mrf.mxu0  ;;  %v1620_v24 = vpop.f32.mrf.mxu1 }
 0x12e   :  { %1911 = vst.msk [vmem:[%s4559_s3 + $0x198] sm:$0xff] %vm1859_vm2, %v1136_v21  ;;  %2009 = vst.msk [vmem:[%s4559_s3 + $0x4a8] sm:$0xff] %vm1859_vm2, %v1626_v22  ;;  %v1131_v25 = vadd.f32 %v3570_v7, %v1130_v23  ;;  %v1621_v26 = vadd.f32 %v3570_v7, %v1620_v24 }
 0x12f   :  { %v2540_v27 = vpop.f32.mrf.mxu0  ;;  %v2687_v28 = vpop.f32.mrf.mxu1 }
 0x130   :  { %1910 = vst.msk [vmem:[%s4559_s3 + $0x190] sm:$0xff] %vm1859_vm2, %v1131_v25  ;;  %2008 = vst.msk [vmem:[%s4559_s3 + $0x4a0] sm:$0xff] %vm1859_vm2, %v1621_v26  ;;  %v1146_v29 = vadd.f32 %v2540_v27, %v3570_v7  ;;  %v1636_v30 = vadd.f32 %v2687_v28, %v3570_v7 }
 0x131   :  { %v1140_v31 = vpop.f32.mrf.mxu0  ;;  %v1630_v32 = vpop.f32.mrf.mxu1 }
 0x132   :  { %1913 = vst.msk [vmem:[%s4559_s3 + $0x1a8] sm:$0xff] %vm1859_vm2, %v1146_v29  ;;  %2011 = vst.msk [vmem:[%s4559_s3 + $0x4b8] sm:$0xff] %vm1859_vm2, %v1636_v30  ;;  %v1141_v33 = vadd.f32 %v3570_v7, %v1140_v31  ;;  %v1631_v34 = vadd.f32 %v3570_v7, %v1630_v32 }
 0x133   :  { %v2543_v35 = vpop.f32.mrf.mxu0  ;;  %v2690_v36 = vpop.f32.mrf.mxu1 }
 0x134   :  { %1912 = vst.msk [vmem:[%s4559_s3 + $0x1a0] sm:$0xff] %vm1859_vm2, %v1141_v33  ;;  %2010 = vst.msk [vmem:[%s4559_s3 + $0x4b0] sm:$0xff] %vm1859_vm2, %v1631_v34  ;;  %v1156_v37 = vadd.f32 %v2543_v35, %v3570_v7  ;;  %v1646_v38 = vadd.f32 %v2690_v36, %v3570_v7 }
 0x135   :  { %v1150_v39 = vpop.f32.mrf.mxu0  ;;  %v1640_v40 = vpop.f32.mrf.mxu1 }
 0x136   :  { %1915 = vst.msk [vmem:[%s4559_s3 + $0x1b8] sm:$0xff] %vm1859_vm2, %v1156_v37  ;;  %2013 = vst.msk [vmem:[%s4559_s3 + $0x4c8] sm:$0xff] %vm1859_vm2, %v1646_v38  ;;  %v1151_v41 = vadd.f32 %v3570_v7, %v1150_v39  ;;  %v1641_v42 = vadd.f32 %v3570_v7, %v1640_v40 }
 0x137   :  { %v2546_v43 = vpop.f32.mrf.mxu0  ;;  %v2693_v44 = vpop.f32.mrf.mxu1 }
 0x138   :  { %1914 = vst.msk [vmem:[%s4559_s3 + $0x1b0] sm:$0xff] %vm1859_vm2, %v1151_v41  ;;  %2012 = vst.msk [vmem:[%s4559_s3 + $0x4c0] sm:$0xff] %vm1859_vm2, %v1641_v42  ;;  %v1166_v45 = vadd.f32 %v2546_v43, %v3570_v7  ;;  %v1656_v46 = vadd.f32 %v2693_v44, %v3570_v7 }
 0x139   :  { %v1160_v47 = vpop.f32.mrf.mxu0  ;;  %v1650_v48 = vpop.f32.mrf.mxu1 }
 0x13a   :  { %1917 = vst.msk [vmem:[%s4559_s3 + $0x1c8] sm:$0xff] %vm1859_vm2, %v1166_v45  ;;  %2015 = vst.msk [vmem:[%s4559_s3 + $0x4d8] sm:$0xff] %vm1859_vm2, %v1656_v46  ;;  %v1161_v49 = vadd.f32 %v3570_v7, %v1160_v47  ;;  %v1651_v50 = vadd.f32 %v3570_v7, %v1650_v48 }
 0x13b   :  { %v2549_v51 = vpop.f32.mrf.mxu0  ;;  %v2696_v52 = vpop.f32.mrf.mxu1 }
 0x13c   :  { %1916 = vst.msk [vmem:[%s4559_s3 + $0x1c0] sm:$0xff] %vm1859_vm2, %v1161_v49  ;;  %2014 = vst.msk [vmem:[%s4559_s3 + $0x4d0] sm:$0xff] %vm1859_vm2, %v1651_v50  ;;  %v1176_v53 = vadd.f32 %v2549_v51, %v3570_v7  ;;  %v1666_v54 = vadd.f32 %v2696_v52, %v3570_v7 }
 0x13d   :  { %v1170_v55 = vpop.f32.mrf.mxu0  ;;  %v1660_v56 = vpop.f32.mrf.mxu1 }
 0x13e   :  { %1919 = vst.msk [vmem:[%s4559_s3 + $0x1d8] sm:$0xff] %vm1859_vm2, %v1176_v53  ;;  %2017 = vst.msk [vmem:[%s4559_s3 + $0x4e8] sm:$0xff] %vm1859_vm2, %v1666_v54  ;;  %v1171_v57 = vadd.f32 %v3570_v7, %v1170_v55  ;;  %v1661_v58 = vadd.f32 %v3570_v7, %v1660_v56 }
 0x13f   :  { %v2552_v59 = vpop.f32.mrf.mxu0  ;;  %v2699_v60 = vpop.f32.mrf.mxu1 }
 0x140   :  { %1918 = vst.msk [vmem:[%s4559_s3 + $0x1d0] sm:$0xff] %vm1859_vm2, %v1171_v57  ;;  %2016 = vst.msk [vmem:[%s4559_s3 + $0x4e0] sm:$0xff] %vm1859_vm2, %v1661_v58  ;;  %v1186_v61 = vadd.f32 %v2552_v59, %v3570_v7  ;;  %v1676_v62 = vadd.f32 %v2699_v60, %v3570_v7 }
 0x141   :  { %v1180_v63 = vpop.f32.mrf.mxu0  ;;  %v1670_v0 = vpop.f32.mrf.mxu1 }
 0x142   :  { %1921 = vst.msk [vmem:[%s4559_s3 + $0x1e8] sm:$0xff] %vm1859_vm2, %v1186_v61  ;;  %2019 = vst.msk [vmem:[%s4559_s3 + $0x4f8] sm:$0xff] %vm1859_vm2, %v1676_v62  ;;  %v1181_v1 = vadd.f32 %v3570_v7, %v1180_v63  ;;  %v1671_v2 = vadd.f32 %v3570_v7, %v1670_v0 }
 0x143   :  { %v2555_v3 = vpop.f32.mrf.mxu0  ;;  %v2702_v4 = vpop.f32.mrf.mxu1 }
 0x144   :  { %1920 = vst.msk [vmem:[%s4559_s3 + $0x1e0] sm:$0xff] %vm1859_vm2, %v1181_v1  ;;  %2018 = vst.msk [vmem:[%s4559_s3 + $0x4f0] sm:$0xff] %vm1859_vm2, %v1671_v2  ;;  %v1196_v5 = vadd.f32 %v2555_v3, %v3570_v7  ;;  %v1686_v6 = vadd.f32 %v2702_v4, %v3570_v7 }
 0x145   :  { %v1190_v8 = vpop.f32.mrf.mxu0  ;;  %v1680_v9 = vpop.f32.mrf.mxu1 }
 0x146   :  { %1923 = vst.msk [vmem:[%s4559_s3 + $0x1f8] sm:$0xff] %vm1859_vm2, %v1196_v5  ;;  %2021 = vst.msk [vmem:[%s4559_s3 + $0x508] sm:$0xff] %vm1859_vm2, %v1686_v6  ;;  %v1191_v10 = vadd.f32 %v3570_v7, %v1190_v8  ;;  %v1681_v11 = vadd.f32 %v3570_v7, %v1680_v9 }
 0x147   :  { %v2558_v12 = vpop.f32.mrf.mxu0  ;;  %v2705_v13 = vpop.f32.mrf.mxu1 }
 0x148   :  { %1922 = vst.msk [vmem:[%s4559_s3 + $0x1f0] sm:$0xff] %vm1859_vm2, %v1191_v10  ;;  %2020 = vst.msk [vmem:[%s4559_s3 + $0x500] sm:$0xff] %vm1859_vm2, %v1681_v11  ;;  %v1206_v14 = vadd.f32 %v2558_v12, %v3570_v7  ;;  %v1696_v15 = vadd.f32 %v2705_v13, %v3570_v7 }
 0x149   :  { %v1200_v16 = vpop.f32.mrf.mxu0  ;;  %v1690_v17 = vpop.f32.mrf.mxu1 }
 0x14a   :  { %1925 = vst.msk [vmem:[%s4559_s3 + $0x208] sm:$0xff] %vm1859_vm2, %v1206_v14  ;;  %2023 = vst.msk [vmem:[%s4559_s3 + $0x518] sm:$0xff] %vm1859_vm2, %v1696_v15  ;;  %v1201_v18 = vadd.f32 %v3570_v7, %v1200_v16  ;;  %v1691_v19 = vadd.f32 %v3570_v7, %v1690_v17 }
 0x14b   :  { %v2561_v20 = vpop.f32.mrf.mxu0  ;;  %v2708_v21 = vpop.f32.mrf.mxu1 }
 0x14c   :  { %1924 = vst.msk [vmem:[%s4559_s3 + $0x200] sm:$0xff] %vm1859_vm2, %v1201_v18  ;;  %2022 = vst.msk [vmem:[%s4559_s3 + $0x510] sm:$0xff] %vm1859_vm2, %v1691_v19  ;;  %v1216_v22 = vadd.f32 %v2561_v20, %v3570_v7  ;;  %v1706_v23 = vadd.f32 %v2708_v21, %v3570_v7 }
 0x14d   :  { %v1210_v24 = vpop.f32.mrf.mxu0  ;;  %v1700_v25 = vpop.f32.mrf.mxu1 }
 0x14e   :  { %1927 = vst.msk [vmem:[%s4559_s3 + $0x218] sm:$0xff] %vm1859_vm2, %v1216_v22  ;;  %2025 = vst.msk [vmem:[%s4559_s3 + $0x528] sm:$0xff] %vm1859_vm2, %v1706_v23  ;;  %v1211_v26 = vadd.f32 %v3570_v7, %v1210_v24  ;;  %v1701_v27 = vadd.f32 %v3570_v7, %v1700_v25 }
 0x14f   :  { %v2564_v28 = vpop.f32.mrf.mxu0  ;;  %v2711_v29 = vpop.f32.mrf.mxu1 }
 0x150   :  { %1926 = vst.msk [vmem:[%s4559_s3 + $0x210] sm:$0xff] %vm1859_vm2, %v1211_v26  ;;  %2024 = vst.msk [vmem:[%s4559_s3 + $0x520] sm:$0xff] %vm1859_vm2, %v1701_v27  ;;  %v1226_v30 = vadd.f32 %v2564_v28, %v3570_v7  ;;  %v1716_v31 = vadd.f32 %v2711_v29, %v3570_v7 }
 0x151   :  { %v1220_v32 = vpop.f32.mrf.mxu0  ;;  %v1710_v33 = vpop.f32.mrf.mxu1 }
 0x152   :  { %1929 = vst.msk [vmem:[%s4559_s3 + $0x228] sm:$0xff] %vm1859_vm2, %v1226_v30  ;;  %2027 = vst.msk [vmem:[%s4559_s3 + $0x538] sm:$0xff] %vm1859_vm2, %v1716_v31  ;;  %v1221_v34 = vadd.f32 %v3570_v7, %v1220_v32  ;;  %v1711_v35 = vadd.f32 %v3570_v7, %v1710_v33  ;;  %v4415_v32 = vld [vmem:[#allocation2] ss:$0 sm:$0xff] }
 0x153   :  { %v2567_v36 = vpop.f32.mrf.mxu0  ;;  %v2714_v37 = vpop.f32.mrf.mxu1 }
 0x154   :  { %1928 = vst.msk [vmem:[%s4559_s3 + $0x220] sm:$0xff] %vm1859_vm2, %v1221_v34  ;;  %2026 = vst.msk [vmem:[%s4559_s3 + $0x530] sm:$0xff] %vm1859_vm2, %v1711_v35  ;;  %v1236_v38 = vadd.f32 %v2567_v36, %v3570_v7  ;;  %v1726_v39 = vadd.f32 %v2714_v37, %v3570_v7 }
 0x155   :  { %v1230_v40 = vpop.f32.mrf.mxu0  ;;  %v1720_v41 = vpop.f32.mrf.mxu1 }
 0x156   :  { %1931 = vst.msk [vmem:[%s4559_s3 + $0x238] sm:$0xff] %vm1859_vm2, %v1236_v38  ;;  %2029 = vst.msk [vmem:[%s4559_s3 + $0x548] sm:$0xff] %vm1859_vm2, %v1726_v39  ;;  %v1231_v42 = vadd.f32 %v3570_v7, %v1230_v40  ;;  %v1721_v43 = vadd.f32 %v3570_v7, %v1720_v41 }
 0x157   :  { %v2570_v44 = vpop.f32.mrf.mxu0  ;;  %v2717_v45 = vpop.f32.mrf.mxu1 }
 0x158   :  { %1930 = vst.msk [vmem:[%s4559_s3 + $0x230] sm:$0xff] %vm1859_vm2, %v1231_v42  ;;  %2028 = vst.msk [vmem:[%s4559_s3 + $0x540] sm:$0xff] %vm1859_vm2, %v1721_v43  ;;  %v1246_v46 = vadd.f32 %v2570_v44, %v3570_v7  ;;  %v1736_v47 = vadd.f32 %v2717_v45, %v3570_v7 }
 0x159   :  { %v1240_v48 = vpop.f32.mrf.mxu0  ;;  %v1730_v49 = vpop.f32.mrf.mxu1 }
 0x15a   :  { %1933 = vst.msk [vmem:[%s4559_s3 + $0x248] sm:$0xff] %vm1859_vm2, %v1246_v46  ;;  %2031 = vst.msk [vmem:[%s4559_s3 + $0x558] sm:$0xff] %vm1859_vm2, %v1736_v47  ;;  %v1241_v50 = vadd.f32 %v3570_v7, %v1240_v48  ;;  %v1731_v51 = vadd.f32 %v3570_v7, %v1730_v49 }
 0x15b   :  { %v2573_v52 = vpop.f32.mrf.mxu0  ;;  %v2720_v53 = vpop.f32.mrf.mxu1 }
 0x15c   :  { %1932 = vst.msk [vmem:[%s4559_s3 + $0x240] sm:$0xff] %vm1859_vm2, %v1241_v50  ;;  %2030 = vst.msk [vmem:[%s4559_s3 + $0x550] sm:$0xff] %vm1859_vm2, %v1731_v51  ;;  %v1256_v54 = vadd.f32 %v2573_v52, %v3570_v7  ;;  %v1746_v55 = vadd.f32 %v2720_v53, %v3570_v7 }
 0x15d   :  { %v1250_v56 = vpop.f32.mrf.mxu0  ;;  %v1740_v57 = vpop.f32.mrf.mxu1 }
 0x15e   :  { %1935 = vst.msk [vmem:[%s4559_s3 + $0x258] sm:$0xff] %vm1859_vm2, %v1256_v54  ;;  %2033 = vst.msk [vmem:[%s4559_s3 + $0x568] sm:$0xff] %vm1859_vm2, %v1746_v55  ;;  %v1251_v58 = vadd.f32 %v3570_v7, %v1250_v56  ;;  %v1741_v59 = vadd.f32 %v3570_v7, %v1740_v57 }
 0x15f   :  { %v2576_v60 = vpop.f32.mrf.mxu0  ;;  %v2723_v61 = vpop.f32.mrf.mxu1 }
 0x160   :  { %1934 = vst.msk [vmem:[%s4559_s3 + $0x250] sm:$0xff] %vm1859_vm2, %v1251_v58  ;;  %2032 = vst.msk [vmem:[%s4559_s3 + $0x560] sm:$0xff] %vm1859_vm2, %v1741_v59  ;;  %v1266_v62 = vadd.f32 %v2576_v60, %v3570_v7  ;;  %v1756_v63 = vadd.f32 %v2723_v61, %v3570_v7 }
 0x161   :  { %v1260_v0 = vpop.f32.mrf.mxu0  ;;  %v1750_v1 = vpop.f32.mrf.mxu1 }
 0x162   :  { %1937 = vst.msk [vmem:[%s4559_s3 + $0x268] sm:$0xff] %vm1859_vm2, %v1266_v62  ;;  %2035 = vst.msk [vmem:[%s4559_s3 + $0x578] sm:$0xff] %vm1859_vm2, %v1756_v63  ;;  %v1261_v2 = vadd.f32 %v3570_v7, %v1260_v0  ;;  %v1751_v3 = vadd.f32 %v3570_v7, %v1750_v1 }
 0x163   :  { %v2579_v4 = vpop.f32.mrf.mxu0  ;;  %v2726_v5 = vpop.f32.mrf.mxu1 }
 0x164   :  { %1936 = vst.msk [vmem:[%s4559_s3 + $0x260] sm:$0xff] %vm1859_vm2, %v1261_v2  ;;  %2034 = vst.msk [vmem:[%s4559_s3 + $0x570] sm:$0xff] %vm1859_vm2, %v1751_v3  ;;  %v1276_v6 = vadd.f32 %v2579_v4, %v3570_v7  ;;  %v1766_v8 = vadd.f32 %v2726_v5, %v3570_v7 }
 0x165   :  { %v1270_v9 = vpop.f32.mrf.mxu0  ;;  %v1760_v10 = vpop.f32.mrf.mxu1 }
 0x166   :  { %1939 = vst.msk [vmem:[%s4559_s3 + $0x278] sm:$0xff] %vm1859_vm2, %v1276_v6  ;;  %2037 = vst.msk [vmem:[%s4559_s3 + $0x588] sm:$0xff] %vm1859_vm2, %v1766_v8  ;;  %v1271_v11 = vadd.f32 %v3570_v7, %v1270_v9  ;;  %v1761_v12 = vadd.f32 %v3570_v7, %v1760_v10 }
 0x167   :  { %v2582_v13 = vpop.f32.mrf.mxu0  ;;  %v2729_v14 = vpop.f32.mrf.mxu1 }
 0x168   :  { %1938 = vst.msk [vmem:[%s4559_s3 + $0x270] sm:$0xff] %vm1859_vm2, %v1271_v11  ;;  %2036 = vst.msk [vmem:[%s4559_s3 + $0x580] sm:$0xff] %vm1859_vm2, %v1761_v12  ;;  %v1286_v15 = vadd.f32 %v2582_v13, %v3570_v7  ;;  %v1776_v16 = vadd.f32 %v2729_v14, %v3570_v7 }
 0x169   :  { %v1280_v17 = vpop.f32.mrf.mxu0  ;;  %v1770_v18 = vpop.f32.mrf.mxu1 }
 0x16a   :  { %1941 = vst.msk [vmem:[%s4559_s3 + $0x288] sm:$0xff] %vm1859_vm2, %v1286_v15  ;;  %2039 = vst.msk [vmem:[%s4559_s3 + $0x598] sm:$0xff] %vm1859_vm2, %v1776_v16  ;;  %v1281_v19 = vadd.f32 %v3570_v7, %v1280_v17  ;;  %v1771_v20 = vadd.f32 %v3570_v7, %v1770_v18 }
 0x16b   :  { %v2585_v21 = vpop.f32.mrf.mxu0  ;;  %v2732_v22 = vpop.f32.mrf.mxu1 }
 0x16c   :  { %1940 = vst.msk [vmem:[%s4559_s3 + $0x280] sm:$0xff] %vm1859_vm2, %v1281_v19  ;;  %2038 = vst.msk [vmem:[%s4559_s3 + $0x590] sm:$0xff] %vm1859_vm2, %v1771_v20  ;;  %v1296_v23 = vadd.f32 %v2585_v21, %v3570_v7  ;;  %v1786_v24 = vadd.f32 %v2732_v22, %v3570_v7 }
 0x16d   :  { %v1290_v25 = vpop.f32.mrf.mxu0  ;;  %v1780_v26 = vpop.f32.mrf.mxu1 }
 0x16e   :  { %1943 = vst.msk [vmem:[%s4559_s3 + $0x298] sm:$0xff] %vm1859_vm2, %v1296_v23  ;;  %2041 = vst.msk [vmem:[%s4559_s3 + $0x5a8] sm:$0xff] %vm1859_vm2, %v1786_v24  ;;  %v1291_v27 = vadd.f32 %v3570_v7, %v1290_v25  ;;  %v1781_v28 = vadd.f32 %v3570_v7, %v1780_v26 }
 0x16f   :  { %v2588_v29 = vpop.f32.mrf.mxu0  ;;  %v2735_v30 = vpop.f32.mrf.mxu1 }
 0x170   :  { %1942 = vst.msk [vmem:[%s4559_s3 + $0x290] sm:$0xff] %vm1859_vm2, %v1291_v27  ;;  %2040 = vst.msk [vmem:[%s4559_s3 + $0x5a0] sm:$0xff] %vm1859_vm2, %v1781_v28  ;;  %v1306_v31 = vadd.f32 %v2588_v29, %v3570_v7  ;;  %v1796_v33 = vadd.f32 %v4415_v32, %v2735_v30 }
 0x171   :  { %v1300_v34 = vpop.f32.mrf.mxu0  ;;  %v1790_v35 = vpop.f32.mrf.mxu1 }
 0x172   :  { %1945 = vst.msk [vmem:[%s4559_s3 + $0x2a8] sm:$0xff] %vm1859_vm2, %v1306_v31  ;;  %2043 = vst.msk [vmem:[%s4559_s3 + $0x5b8] sm:$0xff] %vm1859_vm2, %v1796_v33  ;;  %v1301_v36 = vadd.f32 %v4415_v32, %v1300_v34  ;;  %v1791_v7 = vadd.f32 %v4415_v32, %v1790_v35 }
 0x173   :  { %v2591_v37 = vpop.f32.mrf.mxu0  ;;  %v2738_v38 = vpop.f32.mrf.mxu1 }
 0x174   :  { %1944 = vst.msk [vmem:[%s4559_s3 + $0x2a0] sm:$0xff] %vm1859_vm2, %v1301_v36  ;;  %2042 = vst.msk [vmem:[%s4559_s3 + $0x5b0] sm:$0xff] %vm1859_vm2, %v1791_v7  ;;  %v1316_v39 = vadd.f32 %v4415_v32, %v2591_v37  ;;  %v1806_v40 = vadd.f32 %v4415_v32, %v2738_v38 }
 0x175   :  { %v1310_v41 = vpop.f32.mrf.mxu0  ;;  %v1800_v42 = vpop.f32.mrf.mxu1 }
 0x176   :  { %1947 = vst.msk [vmem:[%s4559_s3 + $0x2b8] sm:$0xff] %vm1859_vm2, %v1316_v39  ;;  %2045 = vst.msk [vmem:[%s4559_s3 + $0x5c8] sm:$0xff] %vm1859_vm2, %v1806_v40  ;;  %v1311_v43 = vadd.f32 %v4415_v32, %v1310_v41  ;;  %v1801_v44 = vadd.f32 %v4415_v32, %v1800_v42 }
 0x177   :  { %v2594_v45 = vpop.f32.mrf.mxu0  ;;  %v2741_v46 = vpop.f32.mrf.mxu1 }
 0x178   :  { %1946 = vst.msk [vmem:[%s4559_s3 + $0x2b0] sm:$0xff] %vm1859_vm2, %v1311_v43  ;;  %2044 = vst.msk [vmem:[%s4559_s3 + $0x5c0] sm:$0xff] %vm1859_vm2, %v1801_v44  ;;  %v1326_v47 = vadd.f32 %v4415_v32, %v2594_v45  ;;  %v1816_v48 = vadd.f32 %v4415_v32, %v2741_v46 }
 0x179   :  { %v1320_v49 = vpop.f32.mrf.mxu0  ;;  %v1810_v50 = vpop.f32.mrf.mxu1 }
 0x17a   :  { %1949 = vst.msk [vmem:[%s4559_s3 + $0x2c8] sm:$0xff] %vm1859_vm2, %v1326_v47  ;;  %2047 = vst.msk [vmem:[%s4559_s3 + $0x5d8] sm:$0xff] %vm1859_vm2, %v1816_v48  ;;  %v1321_v51 = vadd.f32 %v4415_v32, %v1320_v49  ;;  %v1811_v52 = vadd.f32 %v4415_v32, %v1810_v50 }
 0x17b   :  { %v2597_v53 = vpop.f32.mrf.mxu0  ;;  %v2744_v54 = vpop.f32.mrf.mxu1 }
 0x17c   :  { %1948 = vst.msk [vmem:[%s4559_s3 + $0x2c0] sm:$0xff] %vm1859_vm2, %v1321_v51  ;;  %2046 = vst.msk [vmem:[%s4559_s3 + $0x5d0] sm:$0xff] %vm1859_vm2, %v1811_v52  ;;  %v1336_v55 = vadd.f32 %v4415_v32, %v2597_v53  ;;  %v1826_v56 = vadd.f32 %v4415_v32, %v2744_v54 }
 0x17d   :  { %v1330_v57 = vpop.f32.mrf.mxu0  ;;  %v1820_v58 = vpop.f32.mrf.mxu1 }
 0x17e   :  { %1951 = vst.msk [vmem:[%s4559_s3 + $0x2d8] sm:$0xff] %vm1859_vm2, %v1336_v55  ;;  %2049 = vst.msk [vmem:[%s4559_s3 + $0x5e8] sm:$0xff] %vm1859_vm2, %v1826_v56  ;;  %v1331_v59 = vadd.f32 %v4415_v32, %v1330_v57  ;;  %v1821_v60 = vadd.f32 %v4415_v32, %v1820_v58 }
 0x17f   :  { %v2600_v61 = vpop.f32.mrf.mxu0  ;;  %v2747_v62 = vpop.f32.mrf.mxu1 }
 0x180   :  { %1950 = vst.msk [vmem:[%s4559_s3 + $0x2d0] sm:$0xff] %vm1859_vm2, %v1331_v59  ;;  %2048 = vst.msk [vmem:[%s4559_s3 + $0x5e0] sm:$0xff] %vm1859_vm2, %v1821_v60  ;;  %v1346_v63 = vadd.f32 %v4415_v32, %v2600_v61  ;;  %v1836_v0 = vadd.f32 %v4415_v32, %v2747_v62 }
 0x181   :  { %v1340_v1 = vpop.f32.mrf.mxu0  ;;  %v1830_v2 = vpop.f32.mrf.mxu1 }
 0x182   :  { %1953 = vst.msk [vmem:[%s4559_s3 + $0x2e8] sm:$0xff] %vm1859_vm2, %v1346_v63  ;;  %2051 = vst.msk [vmem:[%s4559_s3 + $0x5f8] sm:$0xff] %vm1859_vm2, %v1836_v0  ;;  %v1341_v3 = vadd.f32 %v4415_v32, %v1340_v1  ;;  %v1831_v4 = vadd.f32 %v4415_v32, %v1830_v2 }
 0x183   :  { %v2603_v5 = vpop.f32.mrf.mxu0  ;;  %v2750_v6 = vpop.f32.mrf.mxu1 }
 0x184   :  { %1952 = vst.msk [vmem:[%s4559_s3 + $0x2e0] sm:$0xff] %vm1859_vm2, %v1341_v3  ;;  %2050 = vst.msk [vmem:[%s4559_s3 + $0x5f0] sm:$0xff] %vm1859_vm2, %v1831_v4  ;;  %v1356_v8 = vadd.f32 %v4415_v32, %v2603_v5  ;;  %v1846_v9 = vadd.f32 %v4415_v32, %v2750_v6 }
 0x185   :  { %v1350_v10 = vpop.f32.mrf.mxu0  ;;  %v1840_v11 = vpop.f32.mrf.mxu1 }
 0x186   :  { %1955 = vst.msk [vmem:[%s4559_s3 + $0x2f8] sm:$0xff] %vm1859_vm2, %v1356_v8  ;;  %2053 = vst.msk [vmem:[%s4559_s3 + $0x608] sm:$0xff] %vm1859_vm2, %v1846_v9  ;;  %v1351_v12 = vadd.f32 %v4415_v32, %v1350_v10  ;;  %v1841_v13 = vadd.f32 %v4415_v32, %v1840_v11 }
 0x187   :  { %v2606_v14 = vpop.f32.mrf.mxu0  ;;  %v2753_v15 = vpop.f32.mrf.mxu1 }
 0x188   :  { %1954 = vst.msk [vmem:[%s4559_s3 + $0x2f0] sm:$0xff] %vm1859_vm2, %v1351_v12  ;;  %2052 = vst.msk [vmem:[%s4559_s3 + $0x600] sm:$0xff] %vm1859_vm2, %v1841_v13  ;;  %v1366_v16 = vadd.f32 %v4415_v32, %v2606_v14  ;;  %v1856_v17 = vadd.f32 %v4415_v32, %v2753_v15 }
 0x189   :  { %v1360_v18 = vpop.f32.mrf.mxu0  ;;  %v1850_v19 = vpop.f32.mrf.mxu1 }
 0x18a   :  { %1957 = vst.msk [vmem:[%s4559_s3 + $0x308] sm:$0xff] %vm1859_vm2, %v1366_v16  ;;  %2055 = vst.msk [vmem:[%s4559_s3 + $0x618] sm:$0xff] %vm1859_vm2, %v1856_v17  ;;  %v1361_v20 = vadd.f32 %v4415_v32, %v1360_v18  ;;  %v1851_v21 = vadd.f32 %v4415_v32, %v1850_v19 }
 0x18c   :  { %1956 = vst.msk [vmem:[%s4559_s3 + $0x300] sm:$0xff] %vm1859_vm2, %v1361_v20  ;;  %2054 = vst.msk [vmem:[%s4559_s3 + $0x610] sm:$0xff] %vm1859_vm2, %v1851_v21 }

</bundles_post_ra>
